<compile_context>
chip_gen: v7x
topology: tpu7x:2x2x1
jax: 0.10.0
libtpu: 0.0.40
codegen_flags: <defaults>
</compile_context>

<pallas_src>
import functools

import jax
import jax.numpy as jnp
from jax import lax
from jax.experimental import pallas as pl
from jax.experimental.pallas import tpu as pltpu


# ----------------------------------------------------------------------------
# helpers
# ----------------------------------------------------------------------------
def _round_up(x, m):
    return ((x + m - 1) // m) * m


def _vmem_capacity_bytes():
    try:
        cap = int(pltpu.get_tpu_info().vmem_capacity_bytes)
        if cap > 0:
            return cap
    except Exception:
        pass
    return 64 * 1024 * 1024   # conservative default (v7x per-core VMEM)


def _choose_band_rows(Ho, Wo, Wp, C4, cout_pad, N, in_bytes, out_bytes, budget):
    """Largest divisor of Ho (output rows per band) that fits the VMEM budget,
    preferring a split that yields >=2 total grid tiles (keeps both v7x
    TensorCores busy; harmless on single-TC v5e/v6e)."""

    def need(tr):
        band = tr * Wp * C4 * in_bytes
        halo = Wp * C4 * in_bytes
        wsz = 4 * C4 * cout_pad * in_bytes
        osz = tr * Wo * cout_pad * out_bytes
        scratch = (tr + 1) * Wp * C4 * in_bytes
        temps = tr * Wo * C4 * in_bytes + 2 * tr * Wo * cout_pad * 4
        return 2 * (band + halo + wsz + osz + cout_pad * 4) + scratch + temps

    divisors = [d for d in range(1, Ho + 1) if Ho % d == 0]
    feasible = [d for d in divisors if d * Wo <= 4096 and need(d) <= budget] or [1]
    multi = [d for d in feasible if N * (Ho // d) >= 2]
    tr = max(multi) if multi else max(feasible)
    return tr, need(tr)


# ----------------------------------------------------------------------------
# Pallas kernel: one (batch image, row band) tile of the 4x4/stride-2 conv,
# expressed as a 2x2/stride-1 conv over the space-to-depth'ed input.
# ----------------------------------------------------------------------------
def _conv4x4s2_kernel(x_ref, h_ref, w_ref, b_ref, o_ref, xs_ref, *,
                      apply_act, negative_slope):
    """
    x_ref : (1, TR, Wp, C4)   s2d input rows [i*TR, (i+1)*TR)
    h_ref : (1, 1,  Wp, C4)   halo row (i+1)*TR
    w_ref : (4, C4, Cout_pad) one (C4, Cout) weight matrix per 2x2 tap
    b_ref : (1, Cout_pad)     f32 bias
    o_ref : (1, TR, Wo, Cout_pad)
    xs_ref: (TR+1, Wp, C4)    VMEM scratch = band rows + halo row
    """
    TR = x_ref.shape[1]
    Wo = o_ref.shape[2]
    cout = o_ref.shape[3]
    c4 = x_ref.shape[3]

    xs_ref[0:TR] = x_ref[0]
    xs_ref[TR:TR + 1] = h_ref[0]

    acc = None
    for sh in range(2):
        for sw in range(2):
            xt = xs_ref[sh:sh + TR, sw:sw + Wo, :].reshape(TR * Wo, c4)
            t = jnp.dot(xt, w_ref[2 * sh + sw],
                        preferred_element_type=jnp.float32)
            acc = t if acc is None else acc + t

    out = acc + b_ref[...]
    if apply_act:
        out = jnp.where(out >= 0.0, out, negative_slope * out)
    o_ref[...] = out.reshape(1, TR, Wo, cout).astype(o_ref.dtype)


def _conv4x4s2_pallas(x_nhwc, w_oihw, b, *, cin_actual, apply_act,
                      negative_slope=0.2, compute_dtype=jnp.float32,
                      out_dtype=None):
    """Conv2d(k=4, s=2, p=1) + optional LeakyReLU with fused in-kernel im2col.

    `x_nhwc` may carry zero-padded channels beyond `cin_actual`; the output
    keeps `Cout` real channels zero-padded up to a multiple of 128 so stores
    stay lane-dense.  Returns (out_padded, Cout)."""
    N, H, W, c_arr = x_nhwc.shape
    Cout = w_oihw.shape[0]
    if H % 2 or W % 2:
        raise ValueError("fused conv4x4/s2 kernel expects even H, W")
    Ho, Wo = H // 2, W // 2
    Hp, Wp = Ho + 1, Wo + 1
    C4 = 4 * c_arr
    cout_pad = max(128, _round_up(Cout, 128))
    out_dtype = compute_dtype if out_dtype is None else out_dtype

    # space-to-depth (pure reshape/transpose glue; ~input-sized, no 16x blowup)
    xp = jnp.pad(x_nhwc.astype(compute_dtype),
                 ((0, 0), (1, 1), (1, 1), (0, 0)))
    x_s2d = (xp.reshape(N, Hp, 2, Wp, 2, c_arr)
               .transpose(0, 1, 3, 2, 4, 5)
               .reshape(N, Hp, Wp, C4))

    # weights: (Cout, Cin, 4, 4) -> (tap=(sh,sw), (dh,dw,ci), Cout_pad)
    w_t = jnp.transpose(w_oihw, (2, 3, 1, 0))              # (kh, kw, ci, co)
    if c_arr > cin_actual:                                  # padded input chans
        w_t = jnp.pad(w_t, ((0, 0), (0, 0), (0, c_arr - cin_actual), (0, 0)))
    w_taps = (w_t.reshape(2, 2, 2, 2, c_arr, Cout)          # (sh,dh,sw,dw,ci,co)
                 .transpose(0, 2, 1, 3, 4, 5)                # (sh,sw,dh,dw,ci,co)
                 .reshape(4, C4, Cout))
    if cout_pad > Cout:
        w_taps = jnp.pad(w_taps, ((0, 0), (0, 0), (0, cout_pad - Cout)))
    w_taps = w_taps.astype(compute_dtype)

    bias = b.astype(jnp.float32).reshape(1, Cout)
    if cout_pad > Cout:
        bias = jnp.pad(bias, ((0, 0), (0, cout_pad - Cout)))

    in_bytes = jnp.dtype(compute_dtype).itemsize
    out_bytes = jnp.dtype(out_dtype).itemsize
    cap = _vmem_capacity_bytes()
    TR, need = _choose_band_rows(Ho, Wo, Wp, C4, cout_pad, N,
                                 in_bytes, out_bytes, budget=cap // 2)
    vmem_limit = int(min(cap * 0.9, max(need * 2, 32 * 1024 * 1024)))

    grid = (N, Ho // TR)
    out = pl.pallas_call(
        functools.partial(_conv4x4s2_kernel, apply_act=apply_act,
                          negative_slope=negative_slope),
        out_shape=jax.ShapeDtypeStruct((N, Ho, Wo, cout_pad), out_dtype),
        grid_spec=pltpu.PrefetchScalarGridSpec(
            num_scalar_prefetch=0,
            grid=grid,
            in_specs=[
                pl.BlockSpec((1, TR, Wp, C4), lambda n, i: (n, i, 0, 0)),
                pl.BlockSpec((1, 1, Wp, C4),
                             lambda n, i: (n, (i + 1) * TR, 0, 0)),
                pl.BlockSpec((4, C4, cout_pad), lambda n, i: (0, 0, 0)),
                pl.BlockSpec((1, cout_pad), lambda n, i: (0, 0)),
            ],
            out_specs=pl.BlockSpec((1, TR, Wo, cout_pad),
                                   lambda n, i: (n, i, 0, 0)),
            scratch_shapes=[pltpu.VMEM((TR + 1, Wp, C4), compute_dtype)],
        ),
        compiler_params=pltpu.CompilerParams(
            dimension_semantics=("parallel", "parallel"),
            vmem_limit_bytes=vmem_limit),
    )(x_s2d, x_s2d, w_taps, bias)
    return out, Cout


# ----------------------------------------------------------------------------
# plain-JAX conv for tiny deep layers / the Cout=1 classifier
# ----------------------------------------------------------------------------
def _conv2d_jax(x_nhwc, w_oihw, b, *, apply_act, negative_slope=0.2):
    x = x_nhwc.astype(w_oihw.dtype)
    w_hwio = jnp.transpose(w_oihw, (2, 3, 1, 0))
    y = lax.conv_general_dilated(
        x, w_hwio, window_strides=(2, 2), padding=((1, 1), (1, 1)),
        dimension_numbers=("NHWC", "HWIO", "NHWC"))
    y = y + b.reshape(1, 1, 1, -1)
    if apply_act:
        y = jnp.where(y >= 0.0, y, negative_slope * y)
    return y


# ----------------------------------------------------------------------------
# FCDiscriminator forward
# ----------------------------------------------------------------------------
def init_fc_discriminator_params(key, num_classes, ndf=64, dtype=jnp.float32):
    chans = [(num_classes, ndf), (ndf, ndf * 2), (ndf * 2, ndf * 4),
             (ndf * 4, ndf * 8), (ndf * 8, 1)]
    params = []
    for cin, cout in chans:
        key, kw, kb = jax.random.split(key, 3)
        w = jax.random.normal(kw, (cout, cin, 4, 4), dtype) * 0.05
        bias = jax.random.normal(kb, (cout,), dtype) * 0.05
        params.append((w, bias))
    return params


def fc_discriminator_forward(x_nchw, params, compute_dtype=jnp.float32):
    """(N, num_classes, H, W) -> (N, 1, H//32, W//32), matching PyTorch."""
    x = jnp.transpose(x_nchw, (0, 2, 3, 1))           # NCHW -> NHWC
    c_actual = x.shape[-1]
    n_layers = len(params)
    for i, (w, b) in enumerate(params):
        apply_act = i < n_layers - 1                   # no act after classifier
        N, H, W, _ = x.shape
        Cout = w.shape[0]
        Ho, Wo = (H + 2 - 4) // 2 + 1, (W + 2 - 4) // 2 + 1
        big = N * Ho * Wo >= 256
        if big and Cout > 1 and H % 2 == 0 and W % 2 == 0:
            x, c_actual = _conv4x4s2_pallas(
                x, w, b, cin_actual=c_actual, apply_act=apply_act,
                negative_slope=0.2, compute_dtype=compute_dtype)
        else:
            # Tiny deep layers / Cout=1 classifier stay on XLA; drop padded
            # channels once at the transition.
            if x.shape[-1] != c_actual:
                x = x[..., :c_actual]
            x = _conv2d_jax(x, w, b, apply_act=apply_act, negative_slope=0.2)
            c_actual = Cout
    if x.shape[-1] != c_actual:
        x = x[..., :c_actual]
    return jnp.transpose(x, (0, 3, 1, 2))              # NHWC -> NCHW


# ----------------------------------------------------------------------------
# pure-JAX reference (correctness check)
# ----------------------------------------------------------------------------
def _reference_forward(x_nchw, params):
    x = x_nchw
    n_layers = len(params)
    for i, (w, b) in enumerate(params):
        x = lax.conv_general_dilated(
            x, w, window_strides=(2, 2), padding=((1, 1), (1, 1)),
            dimension_numbers=("NCHW", "OIHW", "NCHW"))
        x = x + b.reshape(1, -1, 1, 1)
        if i < n_layers - 1:
            x = jnp.where(x >= 0.0, x, 0.2 * x)
    return x


if __name__ == "__main__":
    key = jax.random.PRNGKey(0)
    k_in, k_par, k_ux, k_uw, k_ub = jax.random.split(key, 5)

    num_classes, ndf = 4, 32
    N, H, W = 2, 64, 64            # 5 stride-2 convs: 64 -> 32 -> ... -> 2
    x = jax.random.normal(k_in, (N, num_classes, H, W), jnp.float32)
    params = init_fc_discriminator_params(k_par, num_classes, ndf)

    # ---- f32 path: matches reference conv semantics -------------------------
    fwd_f32 = jax.jit(functools.partial(fc_discriminator_forward,
                                        compute_dtype=jnp.float32))
    out = jax.block_until_ready(fwd_f32(x, params))
    ref = jax.block_until_ready(_reference_forward(x, params))
    assert out.shape == (N, 1, H // 32, W // 32), out.shape
    assert jnp.allclose(out, ref, atol=1e-3, rtol=1e-3), "f32 mismatch vs reference"

    # ---- bf16 MXU path (v5e/v6e/v7x), bf16 intermediates: loose check -------
    fwd_bf16 = jax.jit(functools.partial(fc_discriminator_forward,
                                         compute_dtype=jnp.bfloat16))
    out_bf16 = jax.block_until_ready(fwd_bf16(x, params))
    assert jnp.allclose(out_bf16, ref, atol=1e-1, rtol=1e-1), "bf16 mismatch vs reference"

    # ---- unit test: padded input channels + multi-band (halo) path ----------
    c_act, c_arr, c_out = 40, 48, 96
    xa = jax.random.normal(k_ux, (1, 32, 32, c_act), jnp.float32)
    xpad = jnp.pad(xa, ((0, 0), (0, 0), (0, 0), (0, c_arr - c_act)))
    wu = jax.random.normal(k_uw, (c_out, c_act, 4, 4), jnp.float32) * 0.05
    bu = jax.random.normal(k_ub, (c_out,), jnp.float32) * 0.05
    got, cc = jax.jit(functools.partial(
        _conv4x4s2_pallas, cin_actual=c_act, apply_act=True,
        compute_dtype=jnp.float32))(xpad, wu, bu)
    want = _conv2d_jax(xa, wu, bu, apply_act=True)
    got, want = jax.block_until_ready((got, want))
    assert int(cc) == c_out
    assert jnp.allclose(got[..., :c_out], want, atol=1e-3, rtol=1e-3), \
        "fused conv kernel mismatch"

    print("KERNEL_OK")
</pallas_src>

<mosaic_0001>
module attributes {stable_mosaic.version = 11 : i64} {
  func.func @_conv4x4s2_kernel(%arg0: i32, %arg1: i32, %arg2: memref<1x32x33x16xf32, #tpu.memory_space<vmem>>, %arg3: memref<1x1x33x16xf32, #tpu.memory_space<vmem>>, %arg4: memref<4x16x128xf32, #tpu.memory_space<vmem>>, %arg5: memref<1x128xf32, #tpu.memory_space<vmem>>, %arg6: memref<1x32x32x128xf32, #tpu.memory_space<vmem>>, %arg7: memref<33x33x16xf32, #tpu.memory_space<vmem>>) attributes {dimension_semantics = [#tpu.dimension_semantics<parallel>, #tpu.dimension_semantics<parallel>], iteration_bounds = array<i64: 2, 1>, scalar_prefetch = 0 : i64, scratch_operands = 1 : i64, tpu.core_type = #tpu.core_type<tc>, window_params = [{transform_indices = @transform_0, window_bounds = array<i64: 1, 32, 33, 16>}, {transform_indices = @transform_1, window_bounds = array<i64: 1, 1, 33, 16>}, {pipeline_mode = #tpu.pipeline_mode<synchronous>, transform_indices = @transform_2, window_bounds = array<i64: 4, 16, 128>}, {pipeline_mode = #tpu.pipeline_mode<synchronous>, transform_indices = @transform_3, window_bounds = array<i64: 1, 128>}, {transform_indices = @transform_4, window_bounds = array<i64: 1, 32, 32, 128>}]} {
    %c0 = arith.constant 0 : index
    %c0_0 = arith.constant 0 : index
    %c0_1 = arith.constant 0 : index
    %c0_2 = arith.constant 0 : index
    %0 = vector.load %arg2[%c0, %c0_0, %c0_1, %c0_2] : memref<1x32x33x16xf32, #tpu.memory_space<vmem>>, vector<1x32x33x16xf32>
    %1 = vector.shape_cast %0 : vector<1x32x33x16xf32> to vector<32x33x16xf32>
    %c0_3 = arith.constant 0 : index
    %c0_4 = arith.constant 0 : index
    %c0_5 = arith.constant 0 : index
    %2 = vector.load %arg7[%c0_3, %c0_4, %c0_5] : memref<33x33x16xf32, #tpu.memory_space<vmem>>, vector<32x33x16xf32>
    tpu.vector_store %arg7[%c0_3, %c0_4, %c0_5], %1 {strides = array<i32>} : memref<33x33x16xf32, #tpu.memory_space<vmem>>, vector<32x33x16xf32>,
    %c0_6 = arith.constant 0 : index
    %c0_7 = arith.constant 0 : index
    %c0_8 = arith.constant 0 : index
    %c0_9 = arith.constant 0 : index
    %3 = vector.load %arg3[%c0_6, %c0_7, %c0_8, %c0_9] : memref<1x1x33x16xf32, #tpu.memory_space<vmem>>, vector<1x1x33x16xf32>
    %4 = vector.shape_cast %3 : vector<1x1x33x16xf32> to vector<1x33x16xf32>
    %c32 = arith.constant 32 : index
    %c0_10 = arith.constant 0 : index
    %c0_11 = arith.constant 0 : index
    %5 = vector.load %arg7[%c32, %c0_10, %c0_11] : memref<33x33x16xf32, #tpu.memory_space<vmem>>, vector<1x33x16xf32>
    tpu.vector_store %arg7[%c32, %c0_10, %c0_11], %4 {strides = array<i32>} : memref<33x33x16xf32, #tpu.memory_space<vmem>>, vector<1x33x16xf32>,
    %c0_12 = arith.constant 0 : index
    %c0_13 = arith.constant 0 : index
    %c0_14 = arith.constant 0 : index
    %6 = vector.load %arg7[%c0_12, %c0_13, %c0_14] : memref<33x33x16xf32, #tpu.memory_space<vmem>>, vector<32x32x16xf32>
    %7 = vector.shape_cast %6 : vector<32x32x16xf32> to vector<1024x16xf32>
    %c0_15 = arith.constant 0 : index
    %c0_16 = arith.constant 0 : index
    %c0_17 = arith.constant 0 : index
    %8 = vector.load %arg4[%c0_15, %c0_16, %c0_17] : memref<4x16x128xf32, #tpu.memory_space<vmem>>, vector<1x16x128xf32>
    %9 = vector.shape_cast %8 : vector<1x16x128xf32> to vector<16x128xf32>
    %cst = arith.constant dense<0.000000e+00> : vector<1024x128xf32>
    %10 = tpu.matmul %7, %9, %cst {dimension_numbers = #tpu.dot_dimension_numbers<[1], [0], [0], [1], [0, 0, 1, 1], [], []>} : vector<1024x16xf32>, vector<16x128xf32>, vector<1024x128xf32> -> vector<1024x128xf32>
    %c0_18 = arith.constant 0 : index
    %c1 = arith.constant 1 : index
    %c0_19 = arith.constant 0 : index
    %11 = vector.load %arg7[%c0_18, %c1, %c0_19] : memref<33x33x16xf32, #tpu.memory_space<vmem>>, vector<32x32x16xf32>
    %12 = vector.shape_cast %11 : vector<32x32x16xf32> to vector<1024x16xf32>
    %c1_20 = arith.constant 1 : index
    %c0_21 = arith.constant 0 : index
    %c0_22 = arith.constant 0 : index
    %13 = vector.load %arg4[%c1_20, %c0_21, %c0_22] : memref<4x16x128xf32, #tpu.memory_space<vmem>>, vector<1x16x128xf32>
    %14 = vector.shape_cast %13 : vector<1x16x128xf32> to vector<16x128xf32>
    %cst_23 = arith.constant dense<0.000000e+00> : vector<1024x128xf32>
    %15 = tpu.matmul %12, %14, %cst_23 {dimension_numbers = #tpu.dot_dimension_numbers<[1], [0], [0], [1], [0, 0, 1, 1], [], []>} : vector<1024x16xf32>, vector<16x128xf32>, vector<1024x128xf32> -> vector<1024x128xf32>
    %16 = arith.addf %10, %15 : vector<1024x128xf32>
    %c1_24 = arith.constant 1 : index
    %c0_25 = arith.constant 0 : index
    %c0_26 = arith.constant 0 : index
    %17 = vector.load %arg7[%c1_24, %c0_25, %c0_26] : memref<33x33x16xf32, #tpu.memory_space<vmem>>, vector<32x32x16xf32>
    %18 = vector.shape_cast %17 : vector<32x32x16xf32> to vector<1024x16xf32>
    %c2 = arith.constant 2 : index
    %c0_27 = arith.constant 0 : index
    %c0_28 = arith.constant 0 : index
    %19 = vector.load %arg4[%c2, %c0_27, %c0_28] : memref<4x16x128xf32, #tpu.memory_space<vmem>>, vector<1x16x128xf32>
    %20 = vector.shape_cast %19 : vector<1x16x128xf32> to vector<16x128xf32>
    %cst_29 = arith.constant dense<0.000000e+00> : vector<1024x128xf32>
    %21 = tpu.matmul %18, %20, %cst_29 {dimension_numbers = #tpu.dot_dimension_numbers<[1], [0], [0], [1], [0, 0, 1, 1], [], []>} : vector<1024x16xf32>, vector<16x128xf32>, vector<1024x128xf32> -> vector<1024x128xf32>
    %22 = arith.addf %16, %21 : vector<1024x128xf32>
    %c1_30 = arith.constant 1 : index
    %c1_31 = arith.constant 1 : index
    %c0_32 = arith.constant 0 : index
    %23 = vector.load %arg7[%c1_30, %c1_31, %c0_32] : memref<33x33x16xf32, #tpu.memory_space<vmem>>, vector<32x32x16xf32>
    %24 = vector.shape_cast %23 : vector<32x32x16xf32> to vector<1024x16xf32>
    %c3 = arith.constant 3 : index
    %c0_33 = arith.constant 0 : index
    %c0_34 = arith.constant 0 : index
    %25 = vector.load %arg4[%c3, %c0_33, %c0_34] : memref<4x16x128xf32, #tpu.memory_space<vmem>>, vector<1x16x128xf32>
    %26 = vector.shape_cast %25 : vector<1x16x128xf32> to vector<16x128xf32>
    %cst_35 = arith.constant dense<0.000000e+00> : vector<1024x128xf32>
    %27 = tpu.matmul %24, %26, %cst_35 {dimension_numbers = #tpu.dot_dimension_numbers<[1], [0], [0], [1], [0, 0, 1, 1], [], []>} : vector<1024x16xf32>, vector<16x128xf32>, vector<1024x128xf32> -> vector<1024x128xf32>
    %28 = arith.addf %22, %27 : vector<1024x128xf32>
    %c0_36 = arith.constant 0 : index
    %c0_37 = arith.constant 0 : index
    %29 = vector.load %arg5[%c0_36, %c0_37] : memref<1x128xf32, #tpu.memory_space<vmem>>, vector<1x128xf32>
    %30 = vector.broadcast %29 : vector<1x128xf32> to vector<1024x128xf32>
    %31 = arith.addf %28, %30 : vector<1024x128xf32>
    %cst_38 = arith.constant 0.000000e+00 : f32
    %32 = vector.broadcast %cst_38 : f32 to vector<1024x128xf32>
    %33 = arith.cmpf oge, %31, %32 : vector<1024x128xf32>
    %cst_39 = arith.constant 2.000000e-01 : f32
    %34 = vector.broadcast %cst_39 : f32 to vector<1024x128xf32>
    %35 = arith.mulf %34, %31 : vector<1024x128xf32>
    %36 = arith.select %33, %31, %35 : vector<1024x128xi1>, vector<1024x128xf32>
    %37 = vector.shape_cast %36 : vector<1024x128xf32> to vector<1x32x32x128xf32>
    %c0_40 = arith.constant 0 : index
    %c0_41 = arith.constant 0 : index
    %c0_42 = arith.constant 0 : index
    %c0_43 = arith.constant 0 : index
    %38 = vector.load %arg6[%c0_40, %c0_41, %c0_42, %c0_43] : memref<1x32x32x128xf32, #tpu.memory_space<vmem>>, vector<1x32x32x128xf32>
    tpu.vector_store %arg6[%c0_40, %c0_41, %c0_42, %c0_43], %37 {strides = array<i32>} : memref<1x32x32x128xf32, #tpu.memory_space<vmem>>, vector<1x32x32x128xf32>,
    return
  }
  func.func @transform_0(%arg0: i32, %arg1: i32) -> (i32, i32, i32, i32) {
    %c0_i32 = arith.constant 0 : i32
    %c0_i32_0 = arith.constant 0 : i32
    %c0_i32_1 = arith.constant 0 : i32
    return %arg0, %arg1, %c0_i32, %c0_i32_0 : i32, i32, i32, i32
  }
  func.func @transform_1(%arg0: i32, %arg1: i32) -> (i32, i32, i32, i32) {
    %c1_i32 = arith.constant 1 : i32
    %0 = arith.addi %arg1, %c1_i32 : i32
    %c32_i32 = arith.constant 32 : i32
    %1 = arith.muli %0, %c32_i32 : i32
    %c0_i32 = arith.constant 0 : i32
    %c0_i32_0 = arith.constant 0 : i32
    %c0_i32_1 = arith.constant 0 : i32
    return %arg0, %1, %c0_i32, %c0_i32_0 : i32, i32, i32, i32
  }
  func.func @transform_2(%arg0: i32, %arg1: i32) -> (i32, i32, i32) {
    %c0_i32 = arith.constant 0 : i32
    %c0_i32_0 = arith.constant 0 : i32
    %c0_i32_1 = arith.constant 0 : i32
    %c0_i32_2 = arith.constant 0 : i32
    return %c0_i32, %c0_i32_0, %c0_i32_1 : i32, i32, i32
  }
  func.func @transform_3(%arg0: i32, %arg1: i32) -> (i32, i32) {
    %c0_i32 = arith.constant 0 : i32
    %c0_i32_0 = arith.constant 0 : i32
    %c0_i32_1 = arith.constant 0 : i32
    return %c0_i32, %c0_i32_0 : i32, i32
  }
  func.func @transform_4(%arg0: i32, %arg1: i32) -> (i32, i32, i32, i32) {
    %c0_i32 = arith.constant 0 : i32
    %c0_i32_0 = arith.constant 0 : i32
    %c0_i32_1 = arith.constant 0 : i32
    return %arg0, %arg1, %c0_i32, %c0_i32_0 : i32, i32, i32, i32
  }
}

module attributes {stable_mosaic.version = 11 : i64} {
  func.func @_conv4x4s2_kernel(%arg0: i32, %arg1: i32, %arg2: memref<1x16x17x512xf32, #tpu.memory_space<vmem>>, %arg3: memref<1x1x17x512xf32, #tpu.memory_space<vmem>>, %arg4: memref<4x512x128xf32, #tpu.memory_space<vmem>>, %arg5: memref<1x128xf32, #tpu.memory_space<vmem>>, %arg6: memref<1x16x16x128xf32, #tpu.memory_space<vmem>>, %arg7: memref<17x17x512xf32, #tpu.memory_space<vmem>>) attributes {dimension_semantics = [#tpu.dimension_semantics<parallel>, #tpu.dimension_semantics<parallel>], iteration_bounds = array<i64: 2, 1>, scalar_prefetch = 0 : i64, scratch_operands = 1 : i64, tpu.core_type = #tpu.core_type<tc>, window_params = [{transform_indices = @transform_0, window_bounds = array<i64: 1, 16, 17, 512>}, {transform_indices = @transform_1, window_bounds = array<i64: 1, 1, 17, 512>}, {pipeline_mode = #tpu.pipeline_mode<synchronous>, transform_indices = @transform_2, window_bounds = array<i64: 4, 512, 128>}, {pipeline_mode = #tpu.pipeline_mode<synchronous>, transform_indices = @transform_3, window_bounds = array<i64: 1, 128>}, {transform_indices = @transform_4, window_bounds = array<i64: 1, 16, 16, 128>}]} {
    %c0 = arith.constant 0 : index
    %c0_0 = arith.constant 0 : index
    %c0_1 = arith.constant 0 : index
    %c0_2 = arith.constant 0 : index
    %0 = vector.load %arg2[%c0, %c0_0, %c0_1, %c0_2] : memref<1x16x17x512xf32, #tpu.memory_space<vmem>>, vector<1x16x17x512xf32>
    %1 = vector.shape_cast %0 : vector<1x16x17x512xf32> to vector<16x17x512xf32>
    %c0_3 = arith.constant 0 : index
    %c0_4 = arith.constant 0 : index
    %c0_5 = arith.constant 0 : index
    %2 = vector.load %arg7[%c0_3, %c0_4, %c0_5] : memref<17x17x512xf32, #tpu.memory_space<vmem>>, vector<16x17x512xf32>
    tpu.vector_store %arg7[%c0_3, %c0_4, %c0_5], %1 {strides = array<i32>} : memref<17x17x512xf32, #tpu.memory_space<vmem>>, vector<16x17x512xf32>,
    %c0_6 = arith.constant 0 : index
    %c0_7 = arith.constant 0 : index
    %c0_8 = arith.constant 0 : index
    %c0_9 = arith.constant 0 : index
    %3 = vector.load %arg3[%c0_6, %c0_7, %c0_8, %c0_9] : memref<1x1x17x512xf32, #tpu.memory_space<vmem>>, vector<1x1x17x512xf32>
    %4 = vector.shape_cast %3 : vector<1x1x17x512xf32> to vector<1x17x512xf32>
    %c16 = arith.constant 16 : index
    %c0_10 = arith.constant 0 : index
    %c0_11 = arith.constant 0 : index
    %5 = vector.load %arg7[%c16, %c0_10, %c0_11] : memref<17x17x512xf32, #tpu.memory_space<vmem>>, vector<1x17x512xf32>
    tpu.vector_store %arg7[%c16, %c0_10, %c0_11], %4 {strides = array<i32>} : memref<17x17x512xf32, #tpu.memory_space<vmem>>, vector<1x17x512xf32>,
    %c0_12 = arith.constant 0 : index
    %c0_13 = arith.constant 0 : index
    %c0_14 = arith.constant 0 : index
    %6 = vector.load %arg7[%c0_12, %c0_13, %c0_14] : memref<17x17x512xf32, #tpu.memory_space<vmem>>, vector<16x16x512xf32>
    %7 = vector.shape_cast %6 : vector<16x16x512xf32> to vector<256x512xf32>
    %c0_15 = arith.constant 0 : index
    %c0_16 = arith.constant 0 : index
    %c0_17 = arith.constant 0 : index
    %8 = vector.load %arg4[%c0_15, %c0_16, %c0_17] : memref<4x512x128xf32, #tpu.memory_space<vmem>>, vector<1x512x128xf32>
    %9 = vector.shape_cast %8 : vector<1x512x128xf32> to vector<512x128xf32>
    %cst = arith.constant dense<0.000000e+00> : vector<256x128xf32>
    %10 = tpu.matmul %7, %9, %cst {dimension_numbers = #tpu.dot_dimension_numbers<[1], [0], [0], [1], [0, 0, 1, 1], [], []>} : vector<256x512xf32>, vector<512x128xf32>, vector<256x128xf32> -> vector<256x128xf32>
    %c0_18 = arith.constant 0 : index
    %c1 = arith.constant 1 : index
    %c0_19 = arith.constant 0 : index
    %11 = vector.load %arg7[%c0_18, %c1, %c0_19] : memref<17x17x512xf32, #tpu.memory_space<vmem>>, vector<16x16x512xf32>
    %12 = vector.shape_cast %11 : vector<16x16x512xf32> to vector<256x512xf32>
    %c1_20 = arith.constant 1 : index
    %c0_21 = arith.constant 0 : index
    %c0_22 = arith.constant 0 : index
    %13 = vector.load %arg4[%c1_20, %c0_21, %c0_22] : memref<4x512x128xf32, #tpu.memory_space<vmem>>, vector<1x512x128xf32>
    %14 = vector.shape_cast %13 : vector<1x512x128xf32> to vector<512x128xf32>
    %cst_23 = arith.constant dense<0.000000e+00> : vector<256x128xf32>
    %15 = tpu.matmul %12, %14, %cst_23 {dimension_numbers = #tpu.dot_dimension_numbers<[1], [0], [0], [1], [0, 0, 1, 1], [], []>} : vector<256x512xf32>, vector<512x128xf32>, vector<256x128xf32> -> vector<256x128xf32>
    %16 = arith.addf %10, %15 : vector<256x128xf32>
    %c1_24 = arith.constant 1 : index
    %c0_25 = arith.constant 0 : index
    %c0_26 = arith.constant 0 : index
    %17 = vector.load %arg7[%c1_24, %c0_25, %c0_26] : memref<17x17x512xf32, #tpu.memory_space<vmem>>, vector<16x16x512xf32>
    %18 = vector.shape_cast %17 : vector<16x16x512xf32> to vector<256x512xf32>
    %c2 = arith.constant 2 : index
    %c0_27 = arith.constant 0 : index
    %c0_28 = arith.constant 0 : index
    %19 = vector.load %arg4[%c2, %c0_27, %c0_28] : memref<4x512x128xf32, #tpu.memory_space<vmem>>, vector<1x512x128xf32>
    %20 = vector.shape_cast %19 : vector<1x512x128xf32> to vector<512x128xf32>
    %cst_29 = arith.constant dense<0.000000e+00> : vector<256x128xf32>
    %21 = tpu.matmul %18, %20, %cst_29 {dimension_numbers = #tpu.dot_dimension_numbers<[1], [0], [0], [1], [0, 0, 1, 1], [], []>} : vector<256x512xf32>, vector<512x128xf32>, vector<256x128xf32> -> vector<256x128xf32>
    %22 = arith.addf %16, %21 : vector<256x128xf32>
    %c1_30 = arith.constant 1 : index
    %c1_31 = arith.constant 1 : index
    %c0_32 = arith.constant 0 : index
    %23 = vector.load %arg7[%c1_30, %c1_31, %c0_32] : memref<17x17x512xf32, #tpu.memory_space<vmem>>, vector<16x16x512xf32>
    %24 = vector.shape_cast %23 : vector<16x16x512xf32> to vector<256x512xf32>
    %c3 = arith.constant 3 : index
    %c0_33 = arith.constant 0 : index
    %c0_34 = arith.constant 0 : index
    %25 = vector.load %arg4[%c3, %c0_33, %c0_34] : memref<4x512x128xf32, #tpu.memory_space<vmem>>, vector<1x512x128xf32>
    %26 = vector.shape_cast %25 : vector<1x512x128xf32> to vector<512x128xf32>
    %cst_35 = arith.constant dense<0.000000e+00> : vector<256x128xf32>
    %27 = tpu.matmul %24, %26, %cst_35 {dimension_numbers = #tpu.dot_dimension_numbers<[1], [0], [0], [1], [0, 0, 1, 1], [], []>} : vector<256x512xf32>, vector<512x128xf32>, vector<256x128xf32> -> vector<256x128xf32>
    %28 = arith.addf %22, %27 : vector<256x128xf32>
    %c0_36 = arith.constant 0 : index
    %c0_37 = arith.constant 0 : index
    %29 = vector.load %arg5[%c0_36, %c0_37] : memref<1x128xf32, #tpu.memory_space<vmem>>, vector<1x128xf32>
    %30 = vector.broadcast %29 : vector<1x128xf32> to vector<256x128xf32>
    %31 = arith.addf %28, %30 : vector<256x128xf32>
    %cst_38 = arith.constant 0.000000e+00 : f32
    %32 = vector.broadcast %cst_38 : f32 to vector<256x128xf32>
    %33 = arith.cmpf oge, %31, %32 : vector<256x128xf32>
    %cst_39 = arith.constant 2.000000e-01 : f32
    %34 = vector.broadcast %cst_39 : f32 to vector<256x128xf32>
    %35 = arith.mulf %34, %31 : vector<256x128xf32>
    %36 = arith.select %33, %31, %35 : vector<256x128xi1>, vector<256x128xf32>
    %37 = vector.shape_cast %36 : vector<256x128xf32> to vector<1x16x16x128xf32>
    %c0_40 = arith.constant 0 : index
    %c0_41 = arith.constant 0 : index
    %c0_42 = arith.constant 0 : index
    %c0_43 = arith.constant 0 : index
    %38 = vector.load %arg6[%c0_40, %c0_41, %c0_42, %c0_43] : memref<1x16x16x128xf32, #tpu.memory_space<vmem>>, vector<1x16x16x128xf32>
    tpu.vector_store %arg6[%c0_40, %c0_41, %c0_42, %c0_43], %37 {strides = array<i32>} : memref<1x16x16x128xf32, #tpu.memory_space<vmem>>, vector<1x16x16x128xf32>,
    return
  }
  func.func @transform_0(%arg0: i32, %arg1: i32) -> (i32, i32, i32, i32) {
    %c0_i32 = arith.constant 0 : i32
    %c0_i32_0 = arith.constant 0 : i32
    %c0_i32_1 = arith.constant 0 : i32
    return %arg0, %arg1, %c0_i32, %c0_i32_0 : i32, i32, i32, i32
  }
  func.func @transform_1(%arg0: i32, %arg1: i32) -> (i32, i32, i32, i32) {
    %c1_i32 = arith.constant 1 : i32
    %0 = arith.addi %arg1, %c1_i32 : i32
    %c16_i32 = arith.constant 16 : i32
    %1 = arith.muli %0, %c16_i32 : i32
    %c0_i32 = arith.constant 0 : i32
    %c0_i32_0 = arith.constant 0 : i32
    %c0_i32_1 = arith.constant 0 : i32
    return %arg0, %1, %c0_i32, %c0_i32_0 : i32, i32, i32, i32
  }
  func.func @transform_2(%arg0: i32, %arg1: i32) -> (i32, i32, i32) {
    %c0_i32 = arith.constant 0 : i32
    %c0_i32_0 = arith.constant 0 : i32
    %c0_i32_1 = arith.constant 0 : i32
    %c0_i32_2 = arith.constant 0 : i32
    return %c0_i32, %c0_i32_0, %c0_i32_1 : i32, i32, i32
  }
  func.func @transform_3(%arg0: i32, %arg1: i32) -> (i32, i32) {
    %c0_i32 = arith.constant 0 : i32
    %c0_i32_0 = arith.constant 0 : i32
    %c0_i32_1 = arith.constant 0 : i32
    return %c0_i32, %c0_i32_0 : i32, i32
  }
  func.func @transform_4(%arg0: i32, %arg1: i32) -> (i32, i32, i32, i32) {
    %c0_i32 = arith.constant 0 : i32
    %c0_i32_0 = arith.constant 0 : i32
    %c0_i32_1 = arith.constant 0 : i32
    return %arg0, %arg1, %c0_i32, %c0_i32_0 : i32, i32, i32, i32
  }
}

</mosaic_0001>

<bundles_post_ra>
// kernel: fc_discriminator_forward.2
= control target key start
LH: loop header
LB: loop body
LE: loop exit
PB: predicated region body
PF: predicated region fallthrough
CT: control target
= control target key end

     0   :  { %s8863_s15 = smov 0   ;;  %s8865_s16 = smov 0   ;;  %s10058_s0 = inlined_call_operand.vmem [shape: f32[2,33,33,16], index: 0, kind: input, shape index: {}, may-alias: {0,1}]   ;;  %s10059_s1 = inlined_call_operand.vmem [shape: f32[2,33,33,16], index: 1, kind: input, shape index: {}, may-alias: {0,1}]   ;;  %s10060_s2 = inlined_call_operand.vmem [shape: f32[4,16,128], index: 2, kind: input, shape index: {}]   ;;  %s10061_s3 = inlined_call_operand.vmem [shape: f32[1,128], index: 3, kind: input, shape index: {}]   ;;  %s10062_s4 = inlined_call_operand.vmem [shape: f32[2,32,32,128], index: 4, kind: output, shape index: {}]  }
   0x1   :  { %s8867_s17 = smov 0  }
   0x2 LB: > { %s26_s18 = sadd.s32 1, %s8832_s16  ;;  %p6552_p0 = scmp.ge.s32.totalorder %s8836_s17, 1  ;;  %s8836_s17 = sphi %s8867_s17, %s14_s17   ;;  %s8832_s16 = sphi %s8865_s16, %s10064_s16   ;;  %s8828_s15 = sphi %s8863_s15, %s10063_s15  }
   0x3   : > { %p28_p1 = scmp.ge.s32.totalorder %s26_s18, 2  ;;  %p218_p2 = scmp.lt.s32.totalorder %s8836_s17, 3 }
   0x5   : > { %s10066_s18 = smov (%p28_p1, %s26_s18), 0  ;;  %p219_p3 = pnand %p6552_p0, %p218_p2 }
   0x6   : > { %v6557_v0 = vld [vmem:[%s10060_s2 + $0x10] sm:$0xff] (!%p219_p3)  ;;  %v6558_v1 = vld [vmem:[%s10060_s2 + $0x18] sm:$0xff] (!%p219_p3)  ;;  %v6815_v2 = vld [vmem:[%s10060_s2 + $0x20] sm:$0xff] (!%p219_p3)  ;;  %p276_p4 = scmp.lt.s32.totalorder (!%p219_p3), %s8828_s15, 1  ;;  %vm475_vm0 = vcmask (!%p219_p3), 130048   ;;  %vm480_vm1 = vcmask (!%p219_p3), 122880  }
   0x7   : > { %222 = sbr.rel (%p219_p3) target bundleno = 761 (0x2f9), region = 36  ;;  %v8385_v3 = vpack.c.bf16 (!%p219_p3), %v6558_v1, %v6557_v0  ;;  %v6816_v4 = vld [vmem:[%s10060_s2 + $0x28] sm:$0xff] (!%p219_p3)  ;;  %v776_v5 = vld [vmem:[%s10060_s2] sm:$0xff] (!%p219_p3)  ;;  %v6945_v9 = vld [vmem:[%s10060_s2 + $0x30] sm:$0xff] (!%p219_p3) }
   0x8   : > { %v777_v6 = vld [vmem:[%s10060_s2 + $0x8] sm:$0xff] (!%p219_p3)  ;;  %v8393_v7 = vpack.c.bf16 (!%p219_p3), %v6816_v4, %v6815_v2  ;;  %v6946_v10 = vld [vmem:[%s10060_s2 + $0x38] sm:$0xff] (!%p219_p3) }
   0x9   : > { %v8901_v8 = vpack.c.bf16 (!%p219_p3), %v777_v6, %v776_v5  ;;  %8386 = vmatprep.subr.bf16.mxu1 (!%p219_p3), %v8385_v3  ;;  %v8909_v11 = vpack.c.bf16 (!%p219_p3), %v6946_v10, %v6945_v9 }
   0xa   : > { %8394 = vmatprep.subr.bf16.mxu0 (!%p219_p3), %v8393_v7  ;;  %8388 = vmatpush3.bf16.msra.mxu1 (!%p219_p3), %v8385_v3 }
   0xb   : > { %8396 = vmatpush3.bf16.msra.mxu0 (!%p219_p3), %v8393_v7  ;;  %8390 = vmatprep.subr.bf16.mxu1 (!%p219_p3), %v8901_v8 }
   0xc   : > { %8398 = vmatprep.subr.bf16.mxu0 (!%p219_p3), %v8909_v11 }
   0xe   : > { %s10068_s15 = smov (!%p276_p4, %s8828_s15), 1 }
   0xf   : > { %s8785_s9 = smul.u32 1320, %s10068_s15  ;;  %s7080_s23 = sshll.u32 %s10068_s15, 10 }
  0x10   : > { %s9745_s26 = scalar_lea.vmem %s10062_s4, %s7080_s23 }
  0x11   : > { %s8918_s12 = scalar_lea.vmem %s10058_s0, %s8785_s9  ;;  %s7079_s13 = sadd.s32 1280, %s8785_s9 }
  0x12   : > { %v315_v12 = vld [vmem:[%s8918_s12] sm:$0xff]  ;;  %v316_v13 = vld [vmem:[%s8918_s12 + $0x8] sm:$0xff]  ;;  %v317_v15 = vld [vmem:[%s8918_s12 + $0x10] sm:$0xff]  ;;  %s9349_s20 = scalar_lea.vmem %s10059_s1, %s7079_s13 }
  0x13   : > { %v320_v14 = vld [vmem:[%s8918_s12 + $0x28] sm:$0xff]  ;;  %476 = vst.msk [vmem:[#allocation2] sm:$0xff] %vm475_vm0, %v315_v12  ;;  %477 = vst.msk [vmem:[#allocation2 + $0x8] sm:$0xff] %vm475_vm0, %v316_v13  ;;  %v321_v16 = vld [vmem:[%s8918_s12 + $0x30] sm:$0xff] }
  0x14   : > { %482 = vst.msk [vmem:[#allocation2 + $0x28] sm:$0xff] %vm475_vm0, %v320_v14  ;;  %v318_v17 = vld [vmem:[%s8918_s12 + $0x18] sm:$0xff]  ;;  %478 = vst.msk [vmem:[#allocation2 + $0x10] sm:$0xff] %vm475_vm0, %v317_v15  ;;  %v319_v19 = vld [vmem:[%s8918_s12 + $0x20] sm:$0x1] }
  0x15   : > { %483 = vst.msk [vmem:[#allocation2 + $0x30] sm:$0xff] %vm475_vm0, %v321_v16  ;;  %479 = vst.msk [vmem:[#allocation2 + $0x18] sm:$0xff] %vm475_vm0, %v318_v17  ;;  %v322_v18 = vld [vmem:[%s8918_s12 + $0x38] sm:$0xff]  ;;  %v323_v20 = vld [vmem:[%s8918_s12 + $0x40] sm:$0xff] }
  0x16   : > { %484 = vst.msk [vmem:[#allocation2 + $0x38] sm:$0xff] %vm475_vm0, %v322_v18  ;;  %485 = vst.msk [vmem:[#allocation2 + $0x40] sm:$0xff] %vm475_vm0, %v323_v20  ;;  %v325_v21 = vld [vmem:[%s8918_s12 + $0x50] sm:$0xff]  ;;  %v326_v22 = vld [vmem:[%s8918_s12 + $0x58] sm:$0xff] }
  0x17   : > { %481 = vst.msk [vmem:[#allocation2 + $0x20] sm:$0x1] %vm480_vm1, %v319_v19  ;;  %v327_v23 = vld [vmem:[%s8918_s12 + $0x60] sm:$0xff]  ;;  %v324_v24 = vld [vmem:[%s8918_s12 + $0x48] sm:$0x1]  ;;  %v330_v26 = vld [vmem:[%s8918_s12 + $0x78] sm:$0xff] }
  0x18   : > { %487 = vst.msk [vmem:[#allocation2 + $0x50] sm:$0xff] %vm475_vm0, %v325_v21  ;;  %488 = vst.msk [vmem:[#allocation2 + $0x58] sm:$0xff] %vm475_vm0, %v326_v22  ;;  %v328_v25 = vld [vmem:[%s8918_s12 + $0x68] sm:$0xff]  ;;  %v331_v27 = vld [vmem:[%s8918_s12 + $0x80] sm:$0xff] }
  0x19   : > { %489 = vst.msk [vmem:[#allocation2 + $0x60] sm:$0xff] %vm475_vm0, %v327_v23  ;;  %490 = vst.msk [vmem:[#allocation2 + $0x68] sm:$0xff] %vm475_vm0, %v328_v25  ;;  %v332_v28 = vld [vmem:[%s8918_s12 + $0x88] sm:$0xff]  ;;  %v329_v29 = vld [vmem:[%s8918_s12 + $0x70] sm:$0x1] }
  0x1a   : > { %486 = vst.msk [vmem:[#allocation2 + $0x48] sm:$0x1] %vm480_vm1, %v324_v24  ;;  %491 = vst.msk [vmem:[#allocation2 + $0x70] sm:$0x1] %vm480_vm1, %v329_v29  ;;  %v333_v30 = vld [vmem:[%s8918_s12 + $0x90] sm:$0xff]  ;;  %v335_v31 = vld [vmem:[%s8918_s12 + $0xa0] sm:$0xff] }
  0x1b   : > { %492 = vst.msk [vmem:[#allocation2 + $0x78] sm:$0xff] %vm475_vm0, %v330_v26  ;;  %493 = vst.msk [vmem:[#allocation2 + $0x80] sm:$0xff] %vm475_vm0, %v331_v27  ;;  %v336_v32 = vld [vmem:[%s8918_s12 + $0xa8] sm:$0xff]  ;;  %v337_v33 = vld [vmem:[%s8918_s12 + $0xb0] sm:$0xff] }
  0x1c   : > { %494 = vst.msk [vmem:[#allocation2 + $0x88] sm:$0xff] %vm475_vm0, %v332_v28  ;;  %495 = vst.msk [vmem:[#allocation2 + $0x90] sm:$0xff] %vm475_vm0, %v333_v30  ;;  %v334_v34 = vld [vmem:[%s8918_s12 + $0x98] sm:$0x1]  ;;  %v778_v36 = vld [vmem:[#allocation2 + $0x1] sm:$0xff] }
  0x1d   : > { %497 = vst.msk [vmem:[#allocation2 + $0xa0] sm:$0xff] %vm475_vm0, %v335_v31  ;;  %498 = vst.msk [vmem:[#allocation2 + $0xa8] sm:$0xff] %vm475_vm0, %v336_v32  ;;  %v338_v35 = vld [vmem:[%s8918_s12 + $0xb8] sm:$0xff]  ;;  %v3088_v37 = vld [vmem:[#allocation2 + $0x28] sm:$0xff]  ;;  %7605 = vmatprep.mubr.msk.f32.mxu1 %vm475_vm0, %v778_v36 }
  0x1e   : > { %499 = vst.msk [vmem:[#allocation2 + $0xb0] sm:$0xff] %vm475_vm0, %v337_v33  ;;  %500 = vst.msk [vmem:[#allocation2 + $0xb8] sm:$0xff] %vm475_vm0, %v338_v35  ;;  %v340_v38 = vld [vmem:[%s8918_s12 + $0xc8] sm:$0xff]  ;;  %7997 = vmatprep.mubr.msk.f32.mxu0 %vm475_vm0, %v3088_v37  ;;  %v3089_v40 = vld [vmem:[#allocation2 + $0x30] sm:$0xff] }
  0x1f   : > { %496 = vst.msk [vmem:[#allocation2 + $0x98] sm:$0x1] %vm480_vm1, %v334_v34  ;;  %v779_v39 = vld [vmem:[#allocation2 + $0x9] sm:$0xff]  ;;  %v780_v41 = vld [vmem:[#allocation2 + $0x11] sm:$0xff]  ;;  %7998 = vmatmul.mubr.msk.f32.vlgmr.msra.gmra.mrb[0].mxu0 %vm475_vm0, %v3089_v40  ;;  %v781_v43 = vld [vmem:[#allocation2 + $0x19] sm:$0xff] }
  0x20   : > { %502 = vst.msk [vmem:[#allocation2 + $0xc8] sm:$0xff] %vm475_vm0, %v340_v38  ;;  %7606 = vmatmul.mubr.msk.f32.vlgmr.msra.gmra.mrb[0].mxu1 %vm475_vm0, %v779_v39  ;;  %v3090_v42 = vld [vmem:[#allocation2 + $0x38] sm:$0xff]  ;;  %8400 = vmatpush3.bf16.msra.mxu0 %v8909_v11  ;;  %v3091_v44 = vld [vmem:[#allocation2 + $0x40] sm:$0xff]  ;;  %v782_v45 = vld [vmem:[#allocation2 + $0x29] sm:$0xff] }
  0x21   : > { %8392 = vmatpush3.bf16.msra.mxu1 %v8901_v8  ;;  %7608 = vmatprep.mubr.msk.f32.mxu1 %vm475_vm0, %v780_v41  ;;  %v3092_v46 = vld [vmem:[#allocation2 + $0x50] sm:$0xff]  ;;  %v3093_v48 = vld [vmem:[#allocation2 + $0x58] sm:$0xff]  ;;  %v3094_v50 = vld [vmem:[#allocation2 + $0x60] sm:$0xff] }
  0x22   : > { %8000 = vmatprep.mubr.msk.f32.mxu0 %vm475_vm0, %v3090_v42  ;;  %v783_v47 = vld [vmem:[#allocation2 + $0x31] sm:$0xff]  ;;  %v784_v49 = vld [vmem:[#allocation2 + $0x39] sm:$0xff]  ;;  %v785_v51 = vld [vmem:[#allocation2 + $0x41] sm:$0xff] }
  0x23   : > { %8001 = vmatmul.mubr.msk.f32.gmra.mrb[2].mxu0 %vm475_vm0, %v3091_v44  ;;  %v3095_v52 = vld [vmem:[#allocation2 + $0x68] sm:$0xff]  ;;  %v786_v53 = vld [vmem:[#allocation2 + $0x51] sm:$0xff]  ;;  %v787_v57 = vld [vmem:[#allocation2 + $0x59] sm:$0xff] }
  0x24   : > { %7609 = vmatmul.mubr.msk.f32.gmra.mrb[2].mxu1 %vm475_vm0, %v781_v43  ;;  %8003 = vmatprep.mubr.msk.f32.mxu0 %vm475_vm0, %v3092_v46  ;;  %v3096_v54 = vld [vmem:[#allocation2 + $0x78] sm:$0xff]  ;;  %v341_v55 = vld [vmem:[%s8918_s12 + $0xd0] sm:$0xff]  ;;  %v3097_v58 = vld [vmem:[#allocation2 + $0x80] sm:$0xff] }
  0x25   : > { %7611 = vmatprep.mubr.msk.f32.mxu1 %vm475_vm0, %v782_v45  ;;  %v342_v56 = vld [vmem:[%s8918_s12 + $0xd8] sm:$0xff]  ;;  %503 = vst.msk [vmem:[#allocation2 + $0xd0] sm:$0xff] %vm475_vm0, %v341_v55  ;;  %v339_v59 = vld [vmem:[%s8918_s12 + $0xc0] sm:$0x1]  ;;  %v345_v61 = vld [vmem:[%s8918_s12 + $0xf0] sm:$0xff] }
  0x26   : > { %504 = vst.msk [vmem:[#allocation2 + $0xd8] sm:$0xff] %vm475_vm0, %v342_v56  ;;  %v343_v60 = vld [vmem:[%s8918_s12 + $0xe0] sm:$0xff]  ;;  %v3098_v63 = vld [vmem:[#allocation2 + $0x88] sm:$0xff]  ;;  %507 = vst.msk [vmem:[#allocation2 + $0xf0] sm:$0xff] %vm475_vm0, %v345_v61 }
  0x27   : > { %8004 = vmatmul.mubr.msk.f32.gmra.mrb[4].mxu0 %vm475_vm0, %v3093_v48  ;;  %v788_v62 = vld [vmem:[#allocation2 + $0x61] sm:$0xff]  ;;  %501 = vst.msk [vmem:[#allocation2 + $0xc0] sm:$0x1] %vm480_vm1, %v339_v59  ;;  %v346_v0 = vld [vmem:[%s8918_s12 + $0xf8] sm:$0xff]  ;;  %v349_v7 = vld [vmem:[%s8918_s12 + $0x110] sm:$0x1] }
  0x28   : > { %7612 = vmatmul.mubr.msk.f32.gmra.mrb[4].mxu1 %vm475_vm0, %v783_v47  ;;  %8006 = vmatprep.mubr.msk.f32.mxu0 %vm475_vm0, %v3094_v50  ;;  %505 = vst.msk [vmem:[#allocation2 + $0xe0] sm:$0xff] %vm475_vm0, %v343_v60  ;;  %v347_v1 = vld [vmem:[%s8918_s12 + $0x100] sm:$0xff]  ;;  %v344_v2 = vld [vmem:[%s8918_s12 + $0xe8] sm:$0x1]  ;;  %508 = vst.msk [vmem:[#allocation2 + $0xf8] sm:$0xff] %vm475_vm0, %v346_v0 }
  0x29   : > { %7614 = vmatprep.mubr.msk.f32.mxu1 %vm475_vm0, %v784_v49  ;;  %509 = vst.msk [vmem:[#allocation2 + $0x100] sm:$0xff] %vm475_vm0, %v347_v1  ;;  %v348_v3 = vld [vmem:[%s8918_s12 + $0x108] sm:$0xff]  ;;  %v350_v4 = vld [vmem:[%s8918_s12 + $0x118] sm:$0xff]  ;;  %v351_v5 = vld [vmem:[%s8918_s12 + $0x120] sm:$0xff] }
  0x2a   : > { %506 = vst.msk [vmem:[#allocation2 + $0xe8] sm:$0x1] %vm480_vm1, %v344_v2  ;;  %v352_v6 = vld [vmem:[%s8918_s12 + $0x128] sm:$0xff]  ;;  %v353_v8 = vld [vmem:[%s8918_s12 + $0x130] sm:$0xff]  ;;  %511 = vst.msk [vmem:[#allocation2 + $0x110] sm:$0x1] %vm480_vm1, %v349_v7 }
  0x2b   : > { %8007 = vmatmul.mubr.msk.f32.gmra.mrb[6].mxu0 %vm475_vm0, %v3095_v52  ;;  %510 = vst.msk [vmem:[#allocation2 + $0x108] sm:$0xff] %vm475_vm0, %v348_v3  ;;  %512 = vst.msk [vmem:[#allocation2 + $0x118] sm:$0xff] %vm475_vm0, %v350_v4  ;;  %v789_v9 = vld [vmem:[#allocation2 + $0x69] sm:$0xff]  ;;  %v355_v11 = vld [vmem:[%s8918_s12 + $0x140] sm:$0xff] }
  0x2c   : > { %7615 = vmatmul.mubr.msk.f32.gmra.mrb[6].mxu1 %vm475_vm0, %v785_v51  ;;  %8009 = vmatprep.mubr.msk.f32.mxu0 %vm475_vm0, %v3096_v54  ;;  %513 = vst.msk [vmem:[#allocation2 + $0x120] sm:$0xff] %vm475_vm0, %v351_v5  ;;  %v3099_v10 = vld [vmem:[#allocation2 + $0x90] sm:$0xff]  ;;  %514 = vst.msk [vmem:[#allocation2 + $0x128] sm:$0xff] %vm475_vm0, %v352_v6  ;;  %v356_v12 = vld [vmem:[%s8918_s12 + $0x148] sm:$0xff] }
  0x2d   : > { %7617 = vmatprep.mubr.msk.f32.mxu1 %vm475_vm0, %v786_v53  ;;  %515 = vst.msk [vmem:[#allocation2 + $0x130] sm:$0xff] %vm475_vm0, %v353_v8  ;;  %v357_v13 = vld [vmem:[%s8918_s12 + $0x150] sm:$0xff]  ;;  %517 = vst.msk [vmem:[#allocation2 + $0x140] sm:$0xff] %vm475_vm0, %v355_v11  ;;  %v354_v14 = vld [vmem:[%s8918_s12 + $0x138] sm:$0x1] }
  0x2e   : > { %518 = vst.msk [vmem:[#allocation2 + $0x148] sm:$0xff] %vm475_vm0, %v356_v12  ;;  %519 = vst.msk [vmem:[#allocation2 + $0x150] sm:$0xff] %vm475_vm0, %v357_v13  ;;  %v358_v15 = vld [vmem:[%s8918_s12 + $0x158] sm:$0xff]  ;;  %v360_v16 = vld [vmem:[%s8918_s12 + $0x168] sm:$0xff] }
  0x2f   : > { %8010 = vmatmul.mubr.msk.f32.gmra.mrb[8].mxu0 %vm475_vm0, %v3097_v58  ;;  %516 = vst.msk [vmem:[#allocation2 + $0x138] sm:$0x1] %vm480_vm1, %v354_v14  ;;  %v361_v17 = vld [vmem:[%s8918_s12 + $0x170] sm:$0xff]  ;;  %v362_v18 = vld [vmem:[%s8918_s12 + $0x178] sm:$0xff]  ;;  %v359_v19 = vld [vmem:[%s8918_s12 + $0x160] sm:$0x1] }
  0x30   : > { %7618 = vmatmul.mubr.msk.f32.gmra.mrb[8].mxu1 %vm475_vm0, %v787_v57  ;;  %8012 = vmatprep.mubr.msk.f32.mxu0 %vm475_vm0, %v3098_v63  ;;  %520 = vst.msk [vmem:[#allocation2 + $0x158] sm:$0xff] %vm475_vm0, %v358_v15  ;;  %522 = vst.msk [vmem:[#allocation2 + $0x168] sm:$0xff] %vm475_vm0, %v360_v16  ;;  %v790_v20 = vld [vmem:[#allocation2 + $0x79] sm:$0xff]  ;;  %v791_v22 = vld [vmem:[#allocation2 + $0x81] sm:$0xff] }
  0x31   : > { %7620 = vmatprep.mubr.msk.f32.mxu1 %vm475_vm0, %v788_v62  ;;  %v3100_v21 = vld [vmem:[#allocation2 + $0xa0] sm:$0xff]  ;;  %523 = vst.msk [vmem:[#allocation2 + $0x170] sm:$0xff] %vm475_vm0, %v361_v17  ;;  %524 = vst.msk [vmem:[#allocation2 + $0x178] sm:$0xff] %vm475_vm0, %v362_v18  ;;  %v3101_v23 = vld [vmem:[#allocation2 + $0xa8] sm:$0xff] }
  0x32   : > { %521 = vst.msk [vmem:[#allocation2 + $0x160] sm:$0x1] %vm480_vm1, %v359_v19  ;;  %v792_v24 = vld [vmem:[#allocation2 + $0x89] sm:$0xff]  ;;  %v793_v26 = vld [vmem:[#allocation2 + $0x91] sm:$0xff]  ;;  %v794_v28 = vld [vmem:[#allocation2 + $0xa1] sm:$0xff] }
  0x33   : > { %8013 = vmatmul.mubr.msk.f32.gmra.mrb[10].mxu0 %vm475_vm0, %v3099_v10  ;;  %v3102_v25 = vld [vmem:[#allocation2 + $0xb0] sm:$0xff]  ;;  %v3103_v27 = vld [vmem:[#allocation2 + $0xb8] sm:$0xff]  ;;  %v3104_v29 = vld [vmem:[#allocation2 + $0xc8] sm:$0xff] }
  0x34   : > { %7621 = vmatmul.mubr.msk.f32.gmra.mrb[10].mxu1 %vm475_vm0, %v789_v9  ;;  %8015 = vmatprep.mubr.msk.f32.mxu0 %vm475_vm0, %v3100_v21  ;;  %v795_v30 = vld [vmem:[#allocation2 + $0xa9] sm:$0xff]  ;;  %v363_v32 = vld [vmem:[%s8918_s12 + $0x180] sm:$0xff]  ;;  %v796_v33 = vld [vmem:[#allocation2 + $0xb1] sm:$0xff] }
  0x35   : > { %7623 = vmatprep.mubr.msk.f32.mxu1 %vm475_vm0, %v790_v20  ;;  %v3105_v31 = vld [vmem:[#allocation2 + $0xd0] sm:$0xff]  ;;  %v3106_v34 = vld [vmem:[#allocation2 + $0xd8] sm:$0xff]  ;;  %525 = vst.msk [vmem:[#allocation2 + $0x180] sm:$0xff] %vm475_vm0, %v363_v32  ;;  %v3107_v37 = vld [vmem:[#allocation2 + $0xe0] sm:$0xff] }
  0x36   : > { %v365_v35 = vld [vmem:[%s8918_s12 + $0x190] sm:$0xff]  ;;  %v797_v36 = vld [vmem:[#allocation2 + $0xb9] sm:$0xff]  ;;  %v364_v40 = vld [vmem:[%s8918_s12 + $0x188] sm:$0x1] }
  0x37   : > { %8016 = vmatmul.mubr.msk.f32.gmra.mrb[12].mxu0 %vm475_vm0, %v3101_v23  ;;  %527 = vst.msk [vmem:[#allocation2 + $0x190] sm:$0xff] %vm475_vm0, %v365_v35  ;;  %v366_v38 = vld [vmem:[%s8918_s12 + $0x198] sm:$0xff]  ;;  %v367_v39 = vld [vmem:[%s8918_s12 + $0x1a0] sm:$0xff]  ;;  %v798_v41 = vld [vmem:[#allocation2 + $0xc9] sm:$0xff] }
  0x38   : > { %7624 = vmatmul.mubr.msk.f32.gmra.mrb[12].mxu1 %vm475_vm0, %v791_v22  ;;  %8018 = vmatprep.mubr.msk.f32.mxu0 %vm475_vm0, %v3102_v25  ;;  %v3108_v42 = vld [vmem:[#allocation2 + $0xf0] sm:$0xff]  ;;  %528 = vst.msk [vmem:[#allocation2 + $0x198] sm:$0xff] %vm475_vm0, %v366_v38  ;;  %529 = vst.msk [vmem:[#allocation2 + $0x1a0] sm:$0xff] %vm475_vm0, %v367_v39  ;;  %v368_v43 = vld [vmem:[%s8918_s12 + $0x1a8] sm:$0xff] }
  0x39   : > { %7626 = vmatprep.mubr.msk.f32.mxu1 %vm475_vm0, %v792_v24  ;;  %526 = vst.msk [vmem:[#allocation2 + $0x188] sm:$0x1] %vm480_vm1, %v364_v40  ;;  %v370_v44 = vld [vmem:[%s8918_s12 + $0x1b8] sm:$0xff]  ;;  %v371_v45 = vld [vmem:[%s8918_s12 + $0x1c0] sm:$0xff]  ;;  %v372_v46 = vld [vmem:[%s8918_s12 + $0x1c8] sm:$0xff] }
  0x3a   : > { %530 = vst.msk [vmem:[#allocation2 + $0x1a8] sm:$0xff] %vm475_vm0, %v368_v43  ;;  %532 = vst.msk [vmem:[#allocation2 + $0x1b8] sm:$0xff] %vm475_vm0, %v370_v44  ;;  %v369_v47 = vld [vmem:[%s8918_s12 + $0x1b0] sm:$0x1]  ;;  %v375_v49 = vld [vmem:[%s8918_s12 + $0x1e0] sm:$0xff] }
  0x3b   : > { %8019 = vmatmul.mubr.msk.f32.gmra.mrb[14].mxu0 %vm475_vm0, %v3103_v27  ;;  %533 = vst.msk [vmem:[#allocation2 + $0x1c0] sm:$0xff] %vm475_vm0, %v371_v45  ;;  %v373_v48 = vld [vmem:[%s8918_s12 + $0x1d0] sm:$0xff]  ;;  %534 = vst.msk [vmem:[#allocation2 + $0x1c8] sm:$0xff] %vm475_vm0, %v372_v46  ;;  %v376_v50 = vld [vmem:[%s8918_s12 + $0x1e8] sm:$0xff] }
  0x3c   : > { %7627 = vmatmul.mubr.msk.f32.gmra.mrb[14].mxu1 %vm475_vm0, %v793_v26  ;;  %8021 = vmatprep.mubr.msk.f32.mxu0 %vm475_vm0, %v3104_v29  ;;  %531 = vst.msk [vmem:[#allocation2 + $0x1b0] sm:$0x1] %vm480_vm1, %v369_v47  ;;  %v377_v51 = vld [vmem:[%s8918_s12 + $0x1f0] sm:$0xff]  ;;  %v374_v53 = vld [vmem:[%s8918_s12 + $0x1d8] sm:$0x1]  ;;  %v380_v55 = vld [vmem:[%s8918_s12 + $0x208] sm:$0xff] }
  0x3d   : > { %7629 = vmatprep.mubr.msk.f32.mxu1 %vm475_vm0, %v794_v28  ;;  %535 = vst.msk [vmem:[#allocation2 + $0x1d0] sm:$0xff] %vm475_vm0, %v373_v48  ;;  %v799_v52 = vld [vmem:[#allocation2 + $0xd1] sm:$0xff]  ;;  %537 = vst.msk [vmem:[#allocation2 + $0x1e0] sm:$0xff] %vm475_vm0, %v375_v49  ;;  %v379_v58 = vld [vmem:[%s8918_s12 + $0x200] sm:$0x1] }
  0x3e   : > { %538 = vst.msk [vmem:[#allocation2 + $0x1e8] sm:$0xff] %vm475_vm0, %v376_v50  ;;  %539 = vst.msk [vmem:[#allocation2 + $0x1f0] sm:$0xff] %vm475_vm0, %v377_v51  ;;  %v378_v54 = vld [vmem:[%s8918_s12 + $0x1f8] sm:$0xff]  ;;  %v381_v56 = vld [vmem:[%s8918_s12 + $0x210] sm:$0xff] }
  0x3f   : > { %8022 = vmatmul.mubr.msk.f32.gmra.mrb[16].mxu0 %vm475_vm0, %v3105_v31  ;;  %536 = vst.msk [vmem:[#allocation2 + $0x1d8] sm:$0x1] %vm480_vm1, %v374_v53  ;;  %v382_v57 = vld [vmem:[%s8918_s12 + $0x218] sm:$0xff]  ;;  %541 = vst.msk [vmem:[#allocation2 + $0x200] sm:$0x1] %vm480_vm1, %v379_v58  ;;  %v383_v61 = vld [vmem:[%s8918_s12 + $0x220] sm:$0xff] }
  0x40   : > { %7630 = vmatmul.mubr.msk.f32.gmra.mrb[16].mxu1 %vm475_vm0, %v795_v30  ;;  %8024 = vmatprep.mubr.msk.f32.mxu0 %vm475_vm0, %v3106_v34  ;;  %540 = vst.msk [vmem:[#allocation2 + $0x1f8] sm:$0xff] %vm475_vm0, %v378_v54  ;;  %542 = vst.msk [vmem:[#allocation2 + $0x208] sm:$0xff] %vm475_vm0, %v380_v55  ;;  %v3109_v59 = vld [vmem:[#allocation2 + $0xf8] sm:$0xff]  ;;  %v3110_v62 = vld [vmem:[#allocation2 + $0x100] sm:$0xff] }
  0x41   : > { %7632 = vmatprep.mubr.msk.f32.mxu1 %vm475_vm0, %v796_v33  ;;  %v800_v60 = vld [vmem:[#allocation2 + $0xd9] sm:$0xff]  ;;  %543 = vst.msk [vmem:[#allocation2 + $0x210] sm:$0xff] %vm475_vm0, %v381_v56  ;;  %544 = vst.msk [vmem:[#allocation2 + $0x218] sm:$0xff] %vm475_vm0, %v382_v57  ;;  %v385_v63 = vld [vmem:[%s8918_s12 + $0x230] sm:$0xff] }
  0x42   : > { %545 = vst.msk [vmem:[#allocation2 + $0x220] sm:$0xff] %vm475_vm0, %v383_v61  ;;  %v386_v0 = vld [vmem:[%s8918_s12 + $0x238] sm:$0xff]  ;;  %547 = vst.msk [vmem:[#allocation2 + $0x230] sm:$0xff] %vm475_vm0, %v385_v63  ;;  %v801_v1 = vld [vmem:[#allocation2 + $0xe1] sm:$0xff] }
  0x43   : > { %8025 = vmatmul.mubr.msk.f32.gmra.mrb[18].mxu0 %vm475_vm0, %v3107_v37  ;;  %548 = vst.msk [vmem:[#allocation2 + $0x238] sm:$0xff] %vm475_vm0, %v386_v0  ;;  %v3111_v2 = vld [vmem:[#allocation2 + $0x108] sm:$0xff]  ;;  %v802_v3 = vld [vmem:[#allocation2 + $0xf1] sm:$0xff]  ;;  %v803_v5 = vld [vmem:[#allocation2 + $0xf9] sm:$0xff] }
  0x44   : > { %7633 = vmatmul.mubr.msk.f32.gmra.mrb[18].mxu1 %vm475_vm0, %v797_v36  ;;  %8027 = vmatprep.mubr.msk.f32.mxu0 %vm475_vm0, %v3108_v42  ;;  %v3112_v4 = vld [vmem:[#allocation2 + $0x118] sm:$0xff]  ;;  %v3113_v6 = vld [vmem:[#allocation2 + $0x120] sm:$0xff]  ;;  %v3114_v8 = vld [vmem:[#allocation2 + $0x128] sm:$0xff] }
  0x45   : > { %7635 = vmatprep.mubr.msk.f32.mxu1 %vm475_vm0, %v798_v41  ;;  %v804_v7 = vld [vmem:[#allocation2 + $0x101] sm:$0xff]  ;;  %v805_v9 = vld [vmem:[#allocation2 + $0x109] sm:$0xff]  ;;  %v806_v11 = vld [vmem:[#allocation2 + $0x119] sm:$0xff] }
  0x46   : > { %v3115_v10 = vld [vmem:[#allocation2 + $0x130] sm:$0xff]  ;;  %v3116_v12 = vld [vmem:[#allocation2 + $0x140] sm:$0xff]  ;;  %v384_v14 = vld [vmem:[%s8918_s12 + $0x228] sm:$0x1] }
  0x47   : > { %8028 = vmatmul.mubr.msk.f32.gmra.mrb[20].mxu0 %vm475_vm0, %v3109_v59  ;;  %v387_v13 = vld [vmem:[%s8918_s12 + $0x240] sm:$0xff]  ;;  %v388_v15 = vld [vmem:[%s8918_s12 + $0x248] sm:$0xff]  ;;  %546 = vst.msk [vmem:[#allocation2 + $0x228] sm:$0x1] %vm480_vm1, %v384_v14  ;;  %v390_v18 = vld [vmem:[%s8918_s12 + $0x258] sm:$0xff] }
  0x48   : > { %7636 = vmatmul.mubr.msk.f32.gmra.mrb[20].mxu1 %vm475_vm0, %v799_v52  ;;  %8030 = vmatprep.mubr.msk.f32.mxu0 %vm475_vm0, %v3110_v62  ;;  %v807_v16 = vld [vmem:[#allocation2 + $0x121] sm:$0xff]  ;;  %549 = vst.msk [vmem:[#allocation2 + $0x240] sm:$0xff] %vm475_vm0, %v387_v13  ;;  %550 = vst.msk [vmem:[#allocation2 + $0x248] sm:$0xff] %vm475_vm0, %v388_v15  ;;  %v808_v20 = vld [vmem:[#allocation2 + $0x129] sm:$0xff] }
  0x49   : > { %7638 = vmatprep.mubr.msk.f32.mxu1 %vm475_vm0, %v800_v60  ;;  %v3117_v17 = vld [vmem:[#allocation2 + $0x148] sm:$0xff]  ;;  %v391_v19 = vld [vmem:[%s8918_s12 + $0x260] sm:$0xff]  ;;  %v3118_v21 = vld [vmem:[#allocation2 + $0x150] sm:$0xff]  ;;  %552 = vst.msk [vmem:[#allocation2 + $0x258] sm:$0xff] %vm475_vm0, %v390_v18 }
  0x4a   : > { %553 = vst.msk [vmem:[#allocation2 + $0x260] sm:$0xff] %vm475_vm0, %v391_v19  ;;  %v392_v22 = vld [vmem:[%s8918_s12 + $0x268] sm:$0xff]  ;;  %v389_v23 = vld [vmem:[%s8918_s12 + $0x250] sm:$0x1]  ;;  %v395_v25 = vld [vmem:[%s8918_s12 + $0x280] sm:$0xff] }
  0x4b   : > { %8031 = vmatmul.mubr.msk.f32.gmra.mrb[22].mxu0 %vm475_vm0, %v3111_v2  ;;  %v393_v24 = vld [vmem:[%s8918_s12 + $0x270] sm:$0xff]  ;;  %554 = vst.msk [vmem:[#allocation2 + $0x268] sm:$0xff] %vm475_vm0, %v392_v22  ;;  %v396_v26 = vld [vmem:[%s8918_s12 + $0x288] sm:$0xff]  ;;  %557 = vst.msk [vmem:[#allocation2 + $0x280] sm:$0xff] %vm475_vm0, %v395_v25 }
  0x4c   : > { %7639 = vmatmul.mubr.msk.f32.gmra.mrb[22].mxu1 %vm475_vm0, %v801_v1  ;;  %8033 = vmatprep.mubr.msk.f32.mxu0 %vm475_vm0, %v3112_v4  ;;  %551 = vst.msk [vmem:[#allocation2 + $0x250] sm:$0x1] %vm480_vm1, %v389_v23  ;;  %v397_v27 = vld [vmem:[%s8918_s12 + $0x290] sm:$0xff]  ;;  %v394_v28 = vld [vmem:[%s8918_s12 + $0x278] sm:$0x1]  ;;  %v400_v30 = vld [vmem:[%s8918_s12 + $0x2a8] sm:$0xff] }
  0x4d   : > { %7641 = vmatprep.mubr.msk.f32.mxu1 %vm475_vm0, %v802_v3  ;;  %555 = vst.msk [vmem:[#allocation2 + $0x270] sm:$0xff] %vm475_vm0, %v393_v24  ;;  %558 = vst.msk [vmem:[#allocation2 + $0x288] sm:$0xff] %vm475_vm0, %v396_v26  ;;  %v398_v29 = vld [vmem:[%s8918_s12 + $0x298] sm:$0xff]  ;;  %v401_v33 = vld [vmem:[%s8918_s12 + $0x2b0] sm:$0xff] }
  0x4e   : > { %559 = vst.msk [vmem:[#allocation2 + $0x290] sm:$0xff] %vm475_vm0, %v397_v27  ;;  %v809_v31 = vld [vmem:[#allocation2 + $0x131] sm:$0xff]  ;;  %560 = vst.msk [vmem:[#allocation2 + $0x298] sm:$0xff] %vm475_vm0, %v398_v29  ;;  %v399_v35 = vld [vmem:[%s8918_s12 + $0x2a0] sm:$0x1] }
  0x4f   : > { %8034 = vmatmul.mubr.msk.f32.gmra.mrb[24].mxu0 %vm475_vm0, %v3113_v6  ;;  %v3119_v32 = vld [vmem:[#allocation2 + $0x158] sm:$0xff]  ;;  %556 = vst.msk [vmem:[#allocation2 + $0x278] sm:$0x1] %vm480_vm1, %v394_v28  ;;  %561 = vst.msk [vmem:[#allocation2 + $0x2a0] sm:$0x1] %vm480_vm1, %v399_v35  ;;  %v403_v36 = vld [vmem:[%s8918_s12 + $0x2c0] sm:$0xff] }
  0x50   : > { %7642 = vmatmul.mubr.msk.f32.gmra.mrb[24].mxu1 %vm475_vm0, %v803_v5  ;;  %8036 = vmatprep.mubr.msk.f32.mxu0 %vm475_vm0, %v3114_v8  ;;  %562 = vst.msk [vmem:[#allocation2 + $0x2a8] sm:$0xff] %vm475_vm0, %v400_v30  ;;  %v402_v34 = vld [vmem:[%s8918_s12 + $0x2b8] sm:$0xff]  ;;  %563 = vst.msk [vmem:[#allocation2 + $0x2b0] sm:$0xff] %vm475_vm0, %v401_v33  ;;  %v405_v37 = vld [vmem:[%s8918_s12 + $0x2d0] sm:$0xff] }
  0x51   : > { %7644 = vmatprep.mubr.msk.f32.mxu1 %vm475_vm0, %v804_v7  ;;  %564 = vst.msk [vmem:[#allocation2 + $0x2b8] sm:$0xff] %vm475_vm0, %v402_v34  ;;  %v406_v38 = vld [vmem:[%s8918_s12 + $0x2d8] sm:$0xff]  ;;  %565 = vst.msk [vmem:[#allocation2 + $0x2c0] sm:$0xff] %vm475_vm0, %v403_v36  ;;  %v407_v39 = vld [vmem:[%s8918_s12 + $0x2e0] sm:$0xff] }
  0x52   : > { %567 = vst.msk [vmem:[#allocation2 + $0x2d0] sm:$0xff] %vm475_vm0, %v405_v37  ;;  %568 = vst.msk [vmem:[#allocation2 + $0x2d8] sm:$0xff] %vm475_vm0, %v406_v38  ;;  %v404_v40 = vld [vmem:[%s8918_s12 + $0x2c8] sm:$0x1]  ;;  %v811_v44 = vld [vmem:[#allocation2 + $0x149] sm:$0xff] }
  0x53   : > { %8037 = vmatmul.mubr.msk.f32.gmra.mrb[26].mxu0 %vm475_vm0, %v3115_v10  ;;  %v408_v41 = vld [vmem:[%s8918_s12 + $0x2e8] sm:$0xff]  ;;  %569 = vst.msk [vmem:[#allocation2 + $0x2e0] sm:$0xff] %vm475_vm0, %v407_v39  ;;  %v3121_v45 = vld [vmem:[#allocation2 + $0x170] sm:$0xff]  ;;  %v3122_v47 = vld [vmem:[#allocation2 + $0x178] sm:$0xff] }
  0x54   : > { %7645 = vmatmul.mubr.msk.f32.gmra.mrb[26].mxu1 %vm475_vm0, %v805_v9  ;;  %8039 = vmatprep.mubr.msk.f32.mxu0 %vm475_vm0, %v3116_v12  ;;  %v810_v42 = vld [vmem:[#allocation2 + $0x141] sm:$0xff]  ;;  %566 = vst.msk [vmem:[#allocation2 + $0x2c8] sm:$0x1] %vm480_vm1, %v404_v40  ;;  %v812_v46 = vld [vmem:[#allocation2 + $0x151] sm:$0xff]  ;;  %v813_v48 = vld [vmem:[#allocation2 + $0x159] sm:$0xff] }
  0x55   : > { %7647 = vmatprep.mubr.msk.f32.mxu1 %vm475_vm0, %v806_v11  ;;  %v3120_v43 = vld [vmem:[#allocation2 + $0x168] sm:$0xff]  ;;  %570 = vst.msk [vmem:[#allocation2 + $0x2e8] sm:$0xff] %vm475_vm0, %v408_v41  ;;  %v3123_v49 = vld [vmem:[#allocation2 + $0x180] sm:$0xff]  ;;  %v3124_v51 = vld [vmem:[#allocation2 + $0x190] sm:$0xff] }
  0x56   : > { %v814_v50 = vld [vmem:[#allocation2 + $0x169] sm:$0xff]  ;;  %v815_v52 = vld [vmem:[#allocation2 + $0x171] sm:$0xff]  ;;  %v816_v55 = vld [vmem:[#allocation2 + $0x179] sm:$0xff] }
  0x57   : > { %8040 = vmatmul.mubr.msk.f32.gmra.mrb[28].mxu0 %vm475_vm0, %v3117_v17  ;;  %v3125_v53 = vld [vmem:[#allocation2 + $0x198] sm:$0xff]  ;;  %v3126_v56 = vld [vmem:[#allocation2 + $0x1a0] sm:$0xff]  ;;  %v3127_v59 = vld [vmem:[#allocation2 + $0x1a8] sm:$0xff] }
  0x58   : > { %7648 = vmatmul.mubr.msk.f32.gmra.mrb[28].mxu1 %vm475_vm0, %v807_v16  ;;  %8042 = vmatprep.mubr.msk.f32.mxu0 %vm475_vm0, %v3118_v21  ;;  %v410_v54 = vld [vmem:[%s8918_s12 + $0x2f8] sm:$0xff]  ;;  %v411_v57 = vld [vmem:[%s8918_s12 + $0x300] sm:$0xff]  ;;  %v412_v60 = vld [vmem:[%s8918_s12 + $0x308] sm:$0xff] }
  0x59   : > { %7650 = vmatprep.mubr.msk.f32.mxu1 %vm475_vm0, %v808_v20  ;;  %572 = vst.msk [vmem:[#allocation2 + $0x2f8] sm:$0xff] %vm475_vm0, %v410_v54  ;;  %v817_v58 = vld [vmem:[#allocation2 + $0x181] sm:$0xff]  ;;  %573 = vst.msk [vmem:[#allocation2 + $0x300] sm:$0xff] %vm475_vm0, %v411_v57  ;;  %v409_v61 = vld [vmem:[%s8918_s12 + $0x2f0] sm:$0x1] }
  0x5a   : > { %v413_v62 = vld [vmem:[%s8918_s12 + $0x310] sm:$0xff]  ;;  %v3128_v0 = vld [vmem:[#allocation2 + $0x1b8] sm:$0xff]  ;;  %574 = vst.msk [vmem:[#allocation2 + $0x308] sm:$0xff] %vm475_vm0, %v412_v60  ;;  %v415_v1 = vld [vmem:[%s8918_s12 + $0x320] sm:$0xff] }
  0x5b   : > { %8043 = vmatmul.mubr.msk.f32.gmra.mrb[30].mxu0 %vm475_vm0, %v3119_v32  ;;  %v818_v63 = vld [vmem:[#allocation2 + $0x191] sm:$0xff]  ;;  %571 = vst.msk [vmem:[#allocation2 + $0x2f0] sm:$0x1] %vm480_vm1, %v409_v61  ;;  %v416_v2 = vld [vmem:[%s8918_s12 + $0x328] sm:$0xff]  ;;  %v419_v9 = vld [vmem:[%s8918_s12 + $0x340] sm:$0x1] }
  0x5c   : > { %7651 = vmatmul.mubr.msk.f32.gmra.mrb[30].mxu1 %vm475_vm0, %v809_v31  ;;  %8045 = vmatprep.mubr.msk.f32.mxu0 %vm475_vm0, %v3120_v43  ;;  %575 = vst.msk [vmem:[#allocation2 + $0x310] sm:$0xff] %vm475_vm0, %v413_v62  ;;  %v417_v3 = vld [vmem:[%s8918_s12 + $0x330] sm:$0xff]  ;;  %577 = vst.msk [vmem:[#allocation2 + $0x320] sm:$0xff] %vm475_vm0, %v415_v1  ;;  %v414_v4 = vld [vmem:[%s8918_s12 + $0x318] sm:$0x1] }
  0x5d   : > { %7653 = vmatprep.mubr.msk.f32.mxu1 %vm475_vm0, %v810_v42  ;;  %578 = vst.msk [vmem:[#allocation2 + $0x328] sm:$0xff] %vm475_vm0, %v416_v2  ;;  %579 = vst.msk [vmem:[#allocation2 + $0x330] sm:$0xff] %vm475_vm0, %v417_v3  ;;  %v418_v5 = vld [vmem:[%s8918_s12 + $0x338] sm:$0xff]  ;;  %v420_v6 = vld [vmem:[%s8918_s12 + $0x348] sm:$0xff] }
  0x5e   : > { %576 = vst.msk [vmem:[#allocation2 + $0x318] sm:$0x1] %vm480_vm1, %v414_v4  ;;  %v421_v7 = vld [vmem:[%s8918_s12 + $0x350] sm:$0xff]  ;;  %v422_v8 = vld [vmem:[%s8918_s12 + $0x358] sm:$0xff]  ;;  %581 = vst.msk [vmem:[#allocation2 + $0x340] sm:$0x1] %vm480_vm1, %v419_v9 }
  0x5f   : > { %8046 = vmatmul.mubr.msk.f32.gmra.mrb[32].mxu0 %vm475_vm0, %v3121_v45  ;;  %580 = vst.msk [vmem:[#allocation2 + $0x338] sm:$0xff] %vm475_vm0, %v418_v5  ;;  %582 = vst.msk [vmem:[#allocation2 + $0x348] sm:$0xff] %vm475_vm0, %v420_v6  ;;  %v819_v10 = vld [vmem:[#allocation2 + $0x199] sm:$0xff]  ;;  %v425_v12 = vld [vmem:[%s8918_s12 + $0x370] sm:$0xff] }
  0x60   : > { %7654 = vmatmul.mubr.msk.f32.gmra.mrb[32].mxu1 %vm475_vm0, %v811_v44  ;;  %8048 = vmatprep.mubr.msk.f32.mxu0 %vm475_vm0, %v3122_v47  ;;  %583 = vst.msk [vmem:[#allocation2 + $0x350] sm:$0xff] %vm475_vm0, %v421_v7  ;;  %584 = vst.msk [vmem:[#allocation2 + $0x358] sm:$0xff] %vm475_vm0, %v422_v8  ;;  %v423_v11 = vld [vmem:[%s8918_s12 + $0x360] sm:$0xff]  ;;  %v426_v13 = vld [vmem:[%s8918_s12 + $0x378] sm:$0xff] }
  0x61   : > { %7656 = vmatprep.mubr.msk.f32.mxu1 %vm475_vm0, %v812_v46  ;;  %585 = vst.msk [vmem:[#allocation2 + $0x360] sm:$0xff] %vm475_vm0, %v423_v11  ;;  %587 = vst.msk [vmem:[#allocation2 + $0x370] sm:$0xff] %vm475_vm0, %v425_v12  ;;  %v427_v14 = vld [vmem:[%s8918_s12 + $0x380] sm:$0xff]  ;;  %v424_v15 = vld [vmem:[%s8918_s12 + $0x368] sm:$0x1] }
  0x62   : > { %588 = vst.msk [vmem:[#allocation2 + $0x378] sm:$0xff] %vm475_vm0, %v426_v13  ;;  %v428_v16 = vld [vmem:[%s8918_s12 + $0x388] sm:$0xff]  ;;  %v3129_v17 = vld [vmem:[#allocation2 + $0x1c0] sm:$0xff]  ;;  %589 = vst.msk [vmem:[#allocation2 + $0x380] sm:$0xff] %vm475_vm0, %v427_v14 }
  0x63   : > { %8049 = vmatmul.mubr.msk.f32.gmra.mrb[34].mxu0 %vm475_vm0, %v3123_v49  ;;  %586 = vst.msk [vmem:[#allocation2 + $0x368] sm:$0x1] %vm480_vm1, %v424_v15  ;;  %v430_v18 = vld [vmem:[%s8918_s12 + $0x398] sm:$0xff]  ;;  %v431_v19 = vld [vmem:[%s8918_s12 + $0x3a0] sm:$0xff]  ;;  %v3130_v21 = vld [vmem:[#allocation2 + $0x1c8] sm:$0xff] }
  0x64   : > { %7657 = vmatmul.mubr.msk.f32.gmra.mrb[34].mxu1 %vm475_vm0, %v813_v48  ;;  %8051 = vmatprep.mubr.msk.f32.mxu0 %vm475_vm0, %v3124_v51  ;;  %590 = vst.msk [vmem:[#allocation2 + $0x388] sm:$0xff] %vm475_vm0, %v428_v16  ;;  %v820_v20 = vld [vmem:[#allocation2 + $0x1a1] sm:$0xff]  ;;  %592 = vst.msk [vmem:[#allocation2 + $0x398] sm:$0xff] %vm475_vm0, %v430_v18  ;;  %v821_v23 = vld [vmem:[#allocation2 + $0x1a9] sm:$0xff] }
  0x65   : > { %7659 = vmatprep.mubr.msk.f32.mxu1 %vm475_vm0, %v814_v50  ;;  %593 = vst.msk [vmem:[#allocation2 + $0x3a0] sm:$0xff] %vm475_vm0, %v431_v19  ;;  %v432_v22 = vld [vmem:[%s8918_s12 + $0x3a8] sm:$0xff]  ;;  %v3131_v24 = vld [vmem:[#allocation2 + $0x1d0] sm:$0xff]  ;;  %v822_v25 = vld [vmem:[#allocation2 + $0x1b9] sm:$0xff] }
  0x66   : > { %594 = vst.msk [vmem:[#allocation2 + $0x3a8] sm:$0xff] %vm475_vm0, %v432_v22  ;;  %v3132_v26 = vld [vmem:[#allocation2 + $0x1e0] sm:$0xff]  ;;  %v3133_v28 = vld [vmem:[#allocation2 + $0x1e8] sm:$0xff]  ;;  %v3134_v30 = vld [vmem:[#allocation2 + $0x1f0] sm:$0xff] }
  0x67   : > { %8052 = vmatmul.mubr.msk.f32.gmra.mrb[36].mxu0 %vm475_vm0, %v3125_v53  ;;  %v823_v27 = vld [vmem:[#allocation2 + $0x1c1] sm:$0xff]  ;;  %v824_v29 = vld [vmem:[#allocation2 + $0x1c9] sm:$0xff]  ;;  %v825_v31 = vld [vmem:[#allocation2 + $0x1d1] sm:$0xff] }
  0x68   : > { %7660 = vmatmul.mubr.msk.f32.gmra.mrb[36].mxu1 %vm475_vm0, %v815_v52  ;;  %8054 = vmatprep.mubr.msk.f32.mxu0 %vm475_vm0, %v3126_v56  ;;  %v3135_v32 = vld [vmem:[#allocation2 + $0x1f8] sm:$0xff]  ;;  %v826_v33 = vld [vmem:[#allocation2 + $0x1e1] sm:$0xff]  ;;  %v429_v34 = vld [vmem:[%s8918_s12 + $0x390] sm:$0x1] }
  0x69   : > { %7662 = vmatprep.mubr.msk.f32.mxu1 %vm475_vm0, %v816_v55  ;;  %v3136_v35 = vld [vmem:[#allocation2 + $0x208] sm:$0xff]  ;;  %591 = vst.msk [vmem:[#allocation2 + $0x390] sm:$0x1] %vm480_vm1, %v429_v34  ;;  %v433_v36 = vld [vmem:[%s8918_s12 + $0x3b0] sm:$0xff]  ;;  %v435_v37 = vld [vmem:[%s8918_s12 + $0x3c0] sm:$0xff] }
  0x6a   : > { %v827_v38 = vld [vmem:[#allocation2 + $0x1e9] sm:$0xff]  ;;  %595 = vst.msk [vmem:[#allocation2 + $0x3b0] sm:$0xff] %vm475_vm0, %v433_v36  ;;  %597 = vst.msk [vmem:[#allocation2 + $0x3c0] sm:$0xff] %vm475_vm0, %v435_v37  ;;  %v828_v42 = vld [vmem:[#allocation2 + $0x1f1] sm:$0xff] }
  0x6b   : > { %8055 = vmatmul.mubr.msk.f32.gmra.mrb[38].mxu0 %vm475_vm0, %v3127_v59  ;;  %v3137_v39 = vld [vmem:[#allocation2 + $0x210] sm:$0xff]  ;;  %v436_v40 = vld [vmem:[%s8918_s12 + $0x3c8] sm:$0xff]  ;;  %v3138_v43 = vld [vmem:[#allocation2 + $0x218] sm:$0xff] }
  0x6c   : > { %7663 = vmatmul.mubr.msk.f32.gmra.mrb[38].mxu1 %vm475_vm0, %v817_v58  ;;  %8057 = vmatprep.mubr.msk.f32.mxu0 %vm475_vm0, %v3128_v0  ;;  %v437_v41 = vld [vmem:[%s8918_s12 + $0x3d0] sm:$0xff]  ;;  %598 = vst.msk [vmem:[#allocation2 + $0x3c8] sm:$0xff] %vm475_vm0, %v436_v40  ;;  %v434_v44 = vld [vmem:[%s8918_s12 + $0x3b8] sm:$0x1]  ;;  %v440_v46 = vld [vmem:[%s8918_s12 + $0x3e8] sm:$0xff] }
  0x6d   : > { %7665 = vmatprep.mubr.msk.f32.mxu1 %vm475_vm0, %v818_v63  ;;  %599 = vst.msk [vmem:[#allocation2 + $0x3d0] sm:$0xff] %vm475_vm0, %v437_v41  ;;  %v438_v45 = vld [vmem:[%s8918_s12 + $0x3d8] sm:$0xff]  ;;  %602 = vst.msk [vmem:[#allocation2 + $0x3e8] sm:$0xff] %vm475_vm0, %v440_v46  ;;  %v441_v47 = vld [vmem:[%s8918_s12 + $0x3f0] sm:$0xff] }
  0x6e   : > { %596 = vst.msk [vmem:[#allocation2 + $0x3b8] sm:$0x1] %vm480_vm1, %v434_v44  ;;  %v442_v48 = vld [vmem:[%s8918_s12 + $0x3f8] sm:$0xff]  ;;  %v439_v49 = vld [vmem:[%s8918_s12 + $0x3e0] sm:$0x1]  ;;  %v445_v51 = vld [vmem:[%s8918_s12 + $0x410] sm:$0xff] }
  0x6f   : > { %8058 = vmatmul.mubr.msk.f32.gmra.mrb[40].mxu0 %vm475_vm0, %v3129_v17  ;;  %600 = vst.msk [vmem:[#allocation2 + $0x3d8] sm:$0xff] %vm475_vm0, %v438_v45  ;;  %603 = vst.msk [vmem:[#allocation2 + $0x3f0] sm:$0xff] %vm475_vm0, %v441_v47  ;;  %v443_v50 = vld [vmem:[%s8918_s12 + $0x400] sm:$0xff]  ;;  %v446_v52 = vld [vmem:[%s8918_s12 + $0x418] sm:$0xff] }
  0x70   : > { %7666 = vmatmul.mubr.msk.f32.gmra.mrb[40].mxu1 %vm475_vm0, %v819_v10  ;;  %8060 = vmatprep.mubr.msk.f32.mxu0 %vm475_vm0, %v3130_v21  ;;  %604 = vst.msk [vmem:[#allocation2 + $0x3f8] sm:$0xff] %vm475_vm0, %v442_v48  ;;  %v829_v53 = vld [vmem:[#allocation2 + $0x1f9] sm:$0xff]  ;;  %605 = vst.msk [vmem:[#allocation2 + $0x400] sm:$0xff] %vm475_vm0, %v443_v50  ;;  %v444_v55 = vld [vmem:[%s8918_s12 + $0x408] sm:$0x1] }
  0x71   : > { %7668 = vmatprep.mubr.msk.f32.mxu1 %vm475_vm0, %v820_v20  ;;  %601 = vst.msk [vmem:[#allocation2 + $0x3e0] sm:$0x1] %vm480_vm1, %v439_v49  ;;  %v447_v54 = vld [vmem:[%s8918_s12 + $0x420] sm:$0xff]  ;;  %v448_v56 = vld [vmem:[%s8918_s12 + $0x428] sm:$0xff]  ;;  %606 = vst.msk [vmem:[#allocation2 + $0x408] sm:$0x1] %vm480_vm1, %v444_v55 }
  0x72   : > { %607 = vst.msk [vmem:[#allocation2 + $0x410] sm:$0xff] %vm475_vm0, %v445_v51  ;;  %608 = vst.msk [vmem:[#allocation2 + $0x418] sm:$0xff] %vm475_vm0, %v446_v52  ;;  %v450_v57 = vld [vmem:[%s8918_s12 + $0x438] sm:$0xff]  ;;  %v451_v58 = vld [vmem:[%s8918_s12 + $0x440] sm:$0xff] }
  0x73   : > { %8061 = vmatmul.mubr.msk.f32.gmra.mrb[42].mxu0 %vm475_vm0, %v3131_v24  ;;  %609 = vst.msk [vmem:[#allocation2 + $0x420] sm:$0xff] %vm475_vm0, %v447_v54  ;;  %610 = vst.msk [vmem:[#allocation2 + $0x428] sm:$0xff] %vm475_vm0, %v448_v56  ;;  %v452_v59 = vld [vmem:[%s8918_s12 + $0x448] sm:$0xff]  ;;  %v3139_v60 = vld [vmem:[#allocation2 + $0x220] sm:$0xff] }
  0x74   : > { %7669 = vmatmul.mubr.msk.f32.gmra.mrb[42].mxu1 %vm475_vm0, %v821_v23  ;;  %8063 = vmatprep.mubr.msk.f32.mxu0 %vm475_vm0, %v3132_v26  ;;  %612 = vst.msk [vmem:[#allocation2 + $0x438] sm:$0xff] %vm475_vm0, %v450_v57  ;;  %613 = vst.msk [vmem:[#allocation2 + $0x440] sm:$0xff] %vm475_vm0, %v451_v58  ;;  %v449_v61 = vld [vmem:[%s8918_s12 + $0x430] sm:$0x1]  ;;  %v831_v1 = vld [vmem:[#allocation2 + $0x211] sm:$0xff] }
  0x75   : > { %7671 = vmatprep.mubr.msk.f32.mxu1 %vm475_vm0, %v822_v25  ;;  %614 = vst.msk [vmem:[#allocation2 + $0x448] sm:$0xff] %vm475_vm0, %v452_v59  ;;  %v453_v62 = vld [vmem:[%s8918_s12 + $0x450] sm:$0xff]  ;;  %v3141_v2 = vld [vmem:[#allocation2 + $0x238] sm:$0xff]  ;;  %v3142_v4 = vld [vmem:[#allocation2 + $0x240] sm:$0xff] }
  0x76   : > { %v830_v63 = vld [vmem:[#allocation2 + $0x209] sm:$0xff]  ;;  %611 = vst.msk [vmem:[#allocation2 + $0x430] sm:$0x1] %vm480_vm1, %v449_v61  ;;  %v832_v3 = vld [vmem:[#allocation2 + $0x219] sm:$0xff]  ;;  %v833_v5 = vld [vmem:[#allocation2 + $0x221] sm:$0xff] }
  0x77   : > { %8064 = vmatmul.mubr.msk.f32.gmra.mrb[44].mxu0 %vm475_vm0, %v3133_v28  ;;  %v3140_v0 = vld [vmem:[#allocation2 + $0x230] sm:$0xff]  ;;  %615 = vst.msk [vmem:[#allocation2 + $0x450] sm:$0xff] %vm475_vm0, %v453_v62  ;;  %v3143_v6 = vld [vmem:[#allocation2 + $0x248] sm:$0xff]  ;;  %v3144_v8 = vld [vmem:[#allocation2 + $0x258] sm:$0xff] }
  0x78   : > { %7672 = vmatmul.mubr.msk.f32.gmra.mrb[44].mxu1 %vm475_vm0, %v823_v27  ;;  %8066 = vmatprep.mubr.msk.f32.mxu0 %vm475_vm0, %v3134_v30  ;;  %v834_v7 = vld [vmem:[#allocation2 + $0x231] sm:$0xff]  ;;  %v835_v9 = vld [vmem:[#allocation2 + $0x239] sm:$0xff]  ;;  %v836_v12 = vld [vmem:[#allocation2 + $0x241] sm:$0xff] }
  0x79   : > { %7674 = vmatprep.mubr.msk.f32.mxu1 %vm475_vm0, %v824_v29  ;;  %v3145_v10 = vld [vmem:[#allocation2 + $0x260] sm:$0xff]  ;;  %v3146_v13 = vld [vmem:[#allocation2 + $0x268] sm:$0xff]  ;;  %v457_v15 = vld [vmem:[%s8918_s12 + $0x470] sm:$0xff] }
  0x7a   : > { %v455_v11 = vld [vmem:[%s8918_s12 + $0x460] sm:$0xff]  ;;  %v456_v14 = vld [vmem:[%s8918_s12 + $0x468] sm:$0xff]  ;;  %v454_v16 = vld [vmem:[%s8918_s12 + $0x458] sm:$0x1]  ;;  %619 = vst.msk [vmem:[#allocation2 + $0x470] sm:$0xff] %vm475_vm0, %v457_v15 }
  0x7b   : > { %8067 = vmatmul.mubr.msk.f32.gmra.mrb[46].mxu0 %vm475_vm0, %v3135_v32  ;;  %617 = vst.msk [vmem:[#allocation2 + $0x460] sm:$0xff] %vm475_vm0, %v455_v11  ;;  %618 = vst.msk [vmem:[#allocation2 + $0x468] sm:$0xff] %vm475_vm0, %v456_v14  ;;  %v458_v17 = vld [vmem:[%s8918_s12 + $0x478] sm:$0xff]  ;;  %v837_v18 = vld [vmem:[#allocation2 + $0x249] sm:$0xff] }
  0x7c   : > { %7675 = vmatmul.mubr.msk.f32.gmra.mrb[46].mxu1 %vm475_vm0, %v825_v31  ;;  %8069 = vmatprep.mubr.msk.f32.mxu0 %vm475_vm0, %v3136_v35  ;;  %v3147_v19 = vld [vmem:[#allocation2 + $0x270] sm:$0xff]  ;;  %616 = vst.msk [vmem:[#allocation2 + $0x458] sm:$0x1] %vm480_vm1, %v454_v16  ;;  %v460_v20 = vld [vmem:[%s8918_s12 + $0x488] sm:$0xff]  ;;  %v462_v22 = vld [vmem:[%s8918_s12 + $0x498] sm:$0xff] }
  0x7d   : > { %7677 = vmatprep.mubr.msk.f32.mxu1 %vm475_vm0, %v826_v33  ;;  %620 = vst.msk [vmem:[#allocation2 + $0x478] sm:$0xff] %vm475_vm0, %v458_v17  ;;  %v461_v21 = vld [vmem:[%s8918_s12 + $0x490] sm:$0xff]  ;;  %v838_v23 = vld [vmem:[#allocation2 + $0x259] sm:$0xff]  ;;  %622 = vst.msk [vmem:[#allocation2 + $0x488] sm:$0xff] %vm475_vm0, %v460_v20 }
  0x7e   : > { %v3148_v24 = vld [vmem:[#allocation2 + $0x280] sm:$0xff]  ;;  %623 = vst.msk [vmem:[#allocation2 + $0x490] sm:$0xff] %vm475_vm0, %v461_v21  ;;  %624 = vst.msk [vmem:[#allocation2 + $0x498] sm:$0xff] %vm475_vm0, %v462_v22  ;;  %v465_v27 = vld [vmem:[%s8918_s12 + $0x4b0] sm:$0xff] }
  0x7f   : > { %8070 = vmatmul.mubr.msk.f32.gmra.mrb[48].mxu0 %vm475_vm0, %v3137_v39  ;;  %v459_v25 = vld [vmem:[%s8918_s12 + $0x480] sm:$0x1]  ;;  %627 = vst.msk [vmem:[#allocation2 + $0x4b0] sm:$0xff] %vm475_vm0, %v465_v27  ;;  %v466_v28 = vld [vmem:[%s8918_s12 + $0x4b8] sm:$0xff]  ;;  %v464_v30 = vld [vmem:[%s8918_s12 + $0x4a8] sm:$0x1] }
  0x80   : > { %7678 = vmatmul.mubr.msk.f32.gmra.mrb[48].mxu1 %vm475_vm0, %v827_v38  ;;  %8072 = vmatprep.mubr.msk.f32.mxu0 %vm475_vm0, %v3138_v43  ;;  %v463_v26 = vld [vmem:[%s8918_s12 + $0x4a0] sm:$0xff]  ;;  %621 = vst.msk [vmem:[#allocation2 + $0x480] sm:$0x1] %vm480_vm1, %v459_v25  ;;  %626 = vst.msk [vmem:[#allocation2 + $0x4a8] sm:$0x1] %vm480_vm1, %v464_v30  ;;  %v468_v31 = vld [vmem:[%s8918_s12 + $0x4c8] sm:$0xff] }
  0x81   : > { %7680 = vmatprep.mubr.msk.f32.mxu1 %vm475_vm0, %v828_v42  ;;  %625 = vst.msk [vmem:[#allocation2 + $0x4a0] sm:$0xff] %vm475_vm0, %v463_v26  ;;  %v467_v29 = vld [vmem:[%s8918_s12 + $0x4c0] sm:$0xff]  ;;  %628 = vst.msk [vmem:[#allocation2 + $0x4b8] sm:$0xff] %vm475_vm0, %v466_v28  ;;  %v470_v32 = vld [vmem:[%s8918_s12 + $0x4d8] sm:$0xff] }
  0x82   : > { %629 = vst.msk [vmem:[#allocation2 + $0x4c0] sm:$0xff] %vm475_vm0, %v467_v29  ;;  %v471_v33 = vld [vmem:[%s8918_s12 + $0x4e0] sm:$0xff]  ;;  %630 = vst.msk [vmem:[#allocation2 + $0x4c8] sm:$0xff] %vm475_vm0, %v468_v31  ;;  %v472_v34 = vld [vmem:[%s8918_s12 + $0x4e8] sm:$0xff] }
  0x83   : > { %8073 = vmatmul.mubr.msk.f32.gmra.mrb[50].mxu0 %vm475_vm0, %v3139_v60  ;;  %632 = vst.msk [vmem:[#allocation2 + $0x4d8] sm:$0xff] %vm475_vm0, %v470_v32  ;;  %633 = vst.msk [vmem:[#allocation2 + $0x4e0] sm:$0xff] %vm475_vm0, %v471_v33  ;;  %v469_v35 = vld [vmem:[%s8918_s12 + $0x4d0] sm:$0x1]  ;;  %v637_v37 = vld [vmem:[%s9349_s20] sm:$0xff] }
  0x84   : > { %7681 = vmatmul.mubr.msk.f32.gmra.mrb[50].mxu1 %vm475_vm0, %v829_v53  ;;  %8075 = vmatprep.mubr.msk.f32.mxu0 %vm475_vm0, %v3140_v0  ;;  %v473_v36 = vld [vmem:[%s8918_s12 + $0x4f0] sm:$0xff]  ;;  %634 = vst.msk [vmem:[#allocation2 + $0x4e8] sm:$0xff] %vm475_vm0, %v472_v34  ;;  %v638_v38 = vld [vmem:[%s9349_s20 + $0x8] sm:$0xff]  ;;  %643 = vst.msk [vmem:[#allocation2 + $0x500] sm:$0xff] %vm475_vm0, %v637_v37 }
  0x85   : > { %7683 = vmatprep.mubr.msk.f32.mxu1 %vm475_vm0, %v830_v63  ;;  %631 = vst.msk [vmem:[#allocation2 + $0x4d0] sm:$0x1] %vm480_vm1, %v469_v35  ;;  %v839_v39 = vld [vmem:[#allocation2 + $0x261] sm:$0xff]  ;;  %v639_v41 = vld [vmem:[%s9349_s20 + $0x10] sm:$0xff]  ;;  %v3151_v45 = vld [vmem:[#allocation2 + $0x298] sm:$0xff] }
  0x86   : > { %635 = vst.msk [vmem:[#allocation2 + $0x4f0] sm:$0xff] %vm475_vm0, %v473_v36  ;;  %v3149_v40 = vld [vmem:[#allocation2 + $0x288] sm:$0xff]  ;;  %644 = vst.msk [vmem:[#allocation2 + $0x508] sm:$0xff] %vm475_vm0, %v638_v38  ;;  %v3150_v43 = vld [vmem:[#allocation2 + $0x290] sm:$0xff] }
  0x87   : > { %8076 = vmatmul.mubr.msk.f32.gmra.mrb[52].mxu0 %vm475_vm0, %v3141_v2  ;;  %v840_v42 = vld [vmem:[#allocation2 + $0x269] sm:$0xff]  ;;  %645 = vst.msk [vmem:[#allocation2 + $0x510] sm:$0xff] %vm475_vm0, %v639_v41  ;;  %v841_v44 = vld [vmem:[#allocation2 + $0x271] sm:$0xff]  ;;  %v842_v46 = vld [vmem:[#allocation2 + $0x281] sm:$0xff] }
  0x88   : > { %7684 = vmatmul.mubr.msk.f32.gmra.mrb[52].mxu1 %vm475_vm0, %v831_v1  ;;  %8078 = vmatprep.mubr.msk.f32.mxu0 %vm475_vm0, %v3142_v4  ;;  %v3152_v47 = vld [vmem:[#allocation2 + $0x2a8] sm:$0xff]  ;;  %v3153_v49 = vld [vmem:[#allocation2 + $0x2b0] sm:$0xff]  ;;  %v3154_v51 = vld [vmem:[#allocation2 + $0x2b8] sm:$0xff] }
  0x89   : > { %7686 = vmatprep.mubr.msk.f32.mxu1 %vm475_vm0, %v832_v3  ;;  %v843_v48 = vld [vmem:[#allocation2 + $0x289] sm:$0xff]  ;;  %v844_v50 = vld [vmem:[#allocation2 + $0x291] sm:$0xff]  ;;  %v845_v53 = vld [vmem:[#allocation2 + $0x299] sm:$0xff] }
  0x8a   : > { %v474_v52 = vld [vmem:[%s8918_s12 + $0x4f8] sm:$0x1]  ;;  %v3155_v54 = vld [vmem:[#allocation2 + $0x2c0] sm:$0xff]  ;;  %v846_v56 = vld [vmem:[#allocation2 + $0x2a9] sm:$0xff] }
  0x8b   : > { %8079 = vmatmul.mubr.msk.f32.gmra.mrb[54].mxu0 %vm475_vm0, %v3143_v6  ;;  %636 = vst.msk [vmem:[#allocation2 + $0x4f8] sm:$0x1] %vm480_vm1, %v474_v52  ;;  %v640_v55 = vld [vmem:[%s9349_s20 + $0x18] sm:$0xff]  ;;  %v3156_v57 = vld [vmem:[#allocation2 + $0x2d0] sm:$0xff]  ;;  %v3158_v61 = vld [vmem:[#allocation2 + $0x2e0] sm:$0xff] }
  0x8c   : > { %7687 = vmatmul.mubr.msk.f32.gmra.mrb[54].mxu1 %vm475_vm0, %v833_v5  ;;  %8081 = vmatprep.mubr.msk.f32.mxu0 %vm475_vm0, %v3144_v8  ;;  %646 = vst.msk [vmem:[#allocation2 + $0x518] sm:$0xff] %vm475_vm0, %v640_v55  ;;  %v847_v58 = vld [vmem:[#allocation2 + $0x2b1] sm:$0xff]  ;;  %v848_v60 = vld [vmem:[#allocation2 + $0x2b9] sm:$0xff]  ;;  %v849_v62 = vld [vmem:[#allocation2 + $0x2c1] sm:$0xff] }
  0x8d   : > { %7689 = vmatprep.mubr.msk.f32.mxu1 %vm475_vm0, %v834_v7  ;;  %v3157_v59 = vld [vmem:[#allocation2 + $0x2d8] sm:$0xff]  ;;  %v3159_v63 = vld [vmem:[#allocation2 + $0x2e8] sm:$0xff]  ;;  %v3161_v3 = vld [vmem:[#allocation2 + $0x300] sm:$0xff] }
  0x8e   : > { %v850_v0 = vld [vmem:[#allocation2 + $0x2d1] sm:$0xff]  ;;  %v851_v2 = vld [vmem:[#allocation2 + $0x2d9] sm:$0xff]  ;;  %v852_v4 = vld [vmem:[#allocation2 + $0x2e1] sm:$0xff] }
  0x8f   : > { %8082 = vmatmul.mubr.msk.f32.gmra.mrb[56].mxu0 %vm475_vm0, %v3145_v10  ;;  %v3160_v1 = vld [vmem:[#allocation2 + $0x2f8] sm:$0xff]  ;;  %v3162_v5 = vld [vmem:[#allocation2 + $0x308] sm:$0xff]  ;;  %v3163_v7 = vld [vmem:[#allocation2 + $0x310] sm:$0xff] }
  0x90   : > { %7690 = vmatmul.mubr.msk.f32.gmra.mrb[56].mxu1 %vm475_vm0, %v835_v9  ;;  %8084 = vmatprep.mubr.msk.f32.mxu0 %vm475_vm0, %v3146_v13  ;;  %v853_v6 = vld [vmem:[#allocation2 + $0x2e9] sm:$0xff]  ;;  %v854_v8 = vld [vmem:[#allocation2 + $0x2f9] sm:$0xff]  ;;  %v855_v10 = vld [vmem:[#allocation2 + $0x301] sm:$0xff] }
  0x91   : > { %7692 = vmatprep.mubr.msk.f32.mxu1 %vm475_vm0, %v836_v12  ;;  %v3164_v9 = vld [vmem:[#allocation2 + $0x320] sm:$0xff]  ;;  %v3165_v11 = vld [vmem:[#allocation2 + $0x328] sm:$0xff]  ;;  %v3166_v13 = vld [vmem:[#allocation2 + $0x330] sm:$0xff] }
  0x92   : > { %v856_v12 = vld [vmem:[#allocation2 + $0x309] sm:$0xff]  ;;  %v857_v14 = vld [vmem:[#allocation2 + $0x311] sm:$0xff]  ;;  %v858_v16 = vld [vmem:[#allocation2 + $0x321] sm:$0xff] }
  0x93   : > { %8085 = vmatmul.mubr.msk.f32.gmra.mrb[58].mxu0 %vm475_vm0, %v3147_v19  ;;  %v3167_v15 = vld [vmem:[#allocation2 + $0x338] sm:$0xff]  ;;  %v3168_v17 = vld [vmem:[#allocation2 + $0x348] sm:$0xff]  ;;  %v3169_v19 = vld [vmem:[#allocation2 + $0x350] sm:$0xff] }
  0x94   : > { %7693 = vmatmul.mubr.msk.f32.gmra.mrb[58].mxu1 %vm475_vm0, %v837_v18  ;;  %8087 = vmatprep.mubr.msk.f32.mxu0 %vm475_vm0, %v3148_v24  ;;  %v859_v18 = vld [vmem:[#allocation2 + $0x329] sm:$0xff]  ;;  %v860_v20 = vld [vmem:[#allocation2 + $0x331] sm:$0xff]  ;;  %v861_v22 = vld [vmem:[#allocation2 + $0x339] sm:$0xff] }
  0x95   : > { %7695 = vmatprep.mubr.msk.f32.mxu1 %vm475_vm0, %v838_v23  ;;  %v3170_v21 = vld [vmem:[#allocation2 + $0x358] sm:$0xff]  ;;  %v3171_v23 = vld [vmem:[#allocation2 + $0x360] sm:$0xff]  ;;  %v862_v24 = vld [vmem:[#allocation2 + $0x349] sm:$0xff] }
  0x96   : > { %v3172_v25 = vld [vmem:[#allocation2 + $0x370] sm:$0xff]  ;;  %v3173_v27 = vld [vmem:[#allocation2 + $0x378] sm:$0xff]  ;;  %v3174_v29 = vld [vmem:[#allocation2 + $0x380] sm:$0xff] }
  0x97   : > { %8088 = vmatmul.mubr.msk.f32.gmra.mrb[60].mxu0 %vm475_vm0, %v3149_v40  ;;  %v863_v26 = vld [vmem:[#allocation2 + $0x351] sm:$0xff]  ;;  %v864_v28 = vld [vmem:[#allocation2 + $0x359] sm:$0xff]  ;;  %v865_v30 = vld [vmem:[#allocation2 + $0x361] sm:$0xff] }
  0x98   : > { %7696 = vmatmul.mubr.msk.f32.gmra.mrb[60].mxu1 %vm475_vm0, %v839_v39  ;;  %8090 = vmatprep.mubr.msk.f32.mxu0 %vm475_vm0, %v3150_v43  ;;  %v3175_v31 = vld [vmem:[#allocation2 + $0x388] sm:$0xff]  ;;  %v866_v32 = vld [vmem:[#allocation2 + $0x371] sm:$0xff]  ;;  %v867_v34 = vld [vmem:[#allocation2 + $0x379] sm:$0xff] }
  0x99   : > { %7698 = vmatprep.mubr.msk.f32.mxu1 %vm475_vm0, %v840_v42  ;;  %v3176_v33 = vld [vmem:[#allocation2 + $0x398] sm:$0xff]  ;;  %v3177_v35 = vld [vmem:[#allocation2 + $0x3a0] sm:$0xff]  ;;  %v3178_v37 = vld [vmem:[#allocation2 + $0x3a8] sm:$0xff] }
  0x9a   : > { %v868_v36 = vld [vmem:[#allocation2 + $0x381] sm:$0xff]  ;;  %v869_v38 = vld [vmem:[#allocation2 + $0x389] sm:$0xff]  ;;  %v870_v40 = vld [vmem:[#allocation2 + $0x399] sm:$0xff] }
  0x9b   : > { %8091 = vmatmul.mubr.msk.f32.gmra.mrb[62].mxu0 %vm475_vm0, %v3151_v45  ;;  %v3179_v39 = vld [vmem:[#allocation2 + $0x3b0] sm:$0xff]  ;;  %v3180_v41 = vld [vmem:[#allocation2 + $0x3c0] sm:$0xff]  ;;  %v3181_v43 = vld [vmem:[#allocation2 + $0x3c8] sm:$0xff] }
  0x9c   : > { %7699 = vmatmul.mubr.msk.f32.gmra.mrb[62].mxu1 %vm475_vm0, %v841_v44  ;;  %8093 = vmatprep.mubr.msk.f32.mxu0 %vm475_vm0, %v3152_v47  ;;  %v871_v42 = vld [vmem:[#allocation2 + $0x3a1] sm:$0xff]  ;;  %v872_v44 = vld [vmem:[#allocation2 + $0x3a9] sm:$0xff]  ;;  %v3183_v47 = vld [vmem:[#allocation2 + $0x3d8] sm:$0xff] }
  0x9d   : > { %7701 = vmatprep.mubr.msk.f32.mxu1 %vm475_vm0, %v842_v46  ;;  %v3182_v45 = vld [vmem:[#allocation2 + $0x3d0] sm:$0xff]  ;;  %v3187_v55 = vld [vmem:[#allocation2 + $0x400] sm:$0xff] }
  0x9e   : > { %v873_v46 = vld [vmem:[#allocation2 + $0x3b1] sm:$0xff] }
  0x9f   : > { %8094 = vmatmul.mubr.msk.f32.gmra.mrb[64].mxu0 %vm475_vm0, %v3153_v49  ;;  %v3184_v49 = vld [vmem:[#allocation2 + $0x3e8] sm:$0xff]  ;;  %v876_v52 = vld [vmem:[#allocation2 + $0x3d1] sm:$0xff] }
  0xa0   : > { %7702 = vmatmul.mubr.msk.f32.gmra.mrb[64].mxu1 %vm475_vm0, %v843_v48  ;;  %8096 = vmatprep.mubr.msk.f32.mxu0 %vm475_vm0, %v3154_v51  ;;  %v874_v48 = vld [vmem:[#allocation2 + $0x3c1] sm:$0xff]  ;;  %v3185_v51 = vld [vmem:[#allocation2 + $0x3f0] sm:$0xff] }
  0xa1   : > { %7704 = vmatprep.mubr.msk.f32.mxu1 %vm475_vm0, %v844_v50  ;;  %v875_v50 = vld [vmem:[#allocation2 + $0x3c9] sm:$0xff] }
  0xa3   : > { %8097 = vmatmul.mubr.msk.f32.gmra.mrb[66].mxu0 %vm475_vm0, %v3155_v54  ;;  %v877_v54 = vld [vmem:[#allocation2 + $0x3d9] sm:$0xff] }
  0xa4   : > { %7705 = vmatmul.mubr.msk.f32.gmra.mrb[66].mxu1 %vm475_vm0, %v845_v53  ;;  %8099 = vmatprep.mubr.msk.f32.mxu0 %vm475_vm0, %v3156_v57  ;;  %v3186_v53 = vld [vmem:[#allocation2 + $0x3f8] sm:$0xff]  ;;  %v3188_v57 = vld [vmem:[#allocation2 + $0x410] sm:$0xff] }
  0xa5   : > { %7707 = vmatprep.mubr.msk.f32.mxu1 %vm475_vm0, %v846_v56  ;;  %v878_v56 = vld [vmem:[#allocation2 + $0x3e9] sm:$0xff] }
  0xa7   : > { %8100 = vmatmul.mubr.msk.f32.gmra.mrb[68].mxu0 %vm475_vm0, %v3157_v59  ;;  %v3189_v59 = vld [vmem:[#allocation2 + $0x418] sm:$0xff] }
  0xa8   : > { %7708 = vmatmul.mubr.msk.f32.gmra.mrb[68].mxu1 %vm475_vm0, %v847_v58  ;;  %8102 = vmatprep.mubr.msk.f32.mxu0 %vm475_vm0, %v3158_v61  ;;  %v879_v58 = vld [vmem:[#allocation2 + $0x3f1] sm:$0xff]  ;;  %v3190_v61 = vld [vmem:[#allocation2 + $0x420] sm:$0xff] }
  0xa9   : > { %7710 = vmatprep.mubr.msk.f32.mxu1 %vm475_vm0, %v848_v60  ;;  %v880_v60 = vld [vmem:[#allocation2 + $0x3f9] sm:$0xff] }
  0xab   : > { %8103 = vmatmul.mubr.msk.f32.gmra.mrb[70].mxu0 %vm475_vm0, %v3159_v63  ;;  %v3191_v63 = vld [vmem:[#allocation2 + $0x428] sm:$0xff] }
  0xac   : > { %7711 = vmatmul.mubr.msk.f32.gmra.mrb[70].mxu1 %vm475_vm0, %v849_v62  ;;  %8105 = vmatprep.mubr.msk.f32.mxu0 %vm475_vm0, %v3160_v1  ;;  %v881_v62 = vld [vmem:[#allocation2 + $0x401] sm:$0xff]  ;;  %v3192_v1 = vld [vmem:[#allocation2 + $0x438] sm:$0xff] }
  0xad   : > { %7713 = vmatprep.mubr.msk.f32.mxu1 %vm475_vm0, %v850_v0  ;;  %v882_v0 = vld [vmem:[#allocation2 + $0x411] sm:$0xff] }
  0xaf   : > { %8106 = vmatmul.mubr.msk.f32.gmra.mrb[72].mxu0 %vm475_vm0, %v3161_v3  ;;  %v3193_v3 = vld [vmem:[#allocation2 + $0x440] sm:$0xff] }
  0xb0   : > { %7714 = vmatmul.mubr.msk.f32.gmra.mrb[72].mxu1 %vm475_vm0, %v851_v2  ;;  %8108 = vmatprep.mubr.msk.f32.mxu0 %vm475_vm0, %v3162_v5  ;;  %v883_v2 = vld [vmem:[#allocation2 + $0x419] sm:$0xff]  ;;  %v3194_v5 = vld [vmem:[#allocation2 + $0x448] sm:$0xff] }
  0xb1   : > { %7716 = vmatprep.mubr.msk.f32.mxu1 %vm475_vm0, %v852_v4  ;;  %v884_v4 = vld [vmem:[#allocation2 + $0x421] sm:$0xff] }
  0xb3   : > { %8109 = vmatmul.mubr.msk.f32.gmra.mrb[74].mxu0 %vm475_vm0, %v3163_v7  ;;  %v3195_v7 = vld [vmem:[#allocation2 + $0x450] sm:$0xff] }
  0xb4   : > { %7717 = vmatmul.mubr.msk.f32.gmra.mrb[74].mxu1 %vm475_vm0, %v853_v6  ;;  %8111 = vmatprep.mubr.msk.f32.mxu0 %vm475_vm0, %v3164_v9  ;;  %v885_v6 = vld [vmem:[#allocation2 + $0x429] sm:$0xff]  ;;  %v3196_v9 = vld [vmem:[#allocation2 + $0x460] sm:$0xff] }
  0xb5   : > { %7719 = vmatprep.mubr.msk.f32.mxu1 %vm475_vm0, %v854_v8  ;;  %v886_v8 = vld [vmem:[#allocation2 + $0x439] sm:$0xff] }
  0xb7   : > { %8112 = vmatmul.mubr.msk.f32.gmra.mrb[76].mxu0 %vm475_vm0, %v3165_v11  ;;  %v3197_v11 = vld [vmem:[#allocation2 + $0x468] sm:$0xff] }
  0xb8   : > { %7720 = vmatmul.mubr.msk.f32.gmra.mrb[76].mxu1 %vm475_vm0, %v855_v10  ;;  %8114 = vmatprep.mubr.msk.f32.mxu0 %vm475_vm0, %v3166_v13  ;;  %v887_v10 = vld [vmem:[#allocation2 + $0x441] sm:$0xff]  ;;  %v3198_v13 = vld [vmem:[#allocation2 + $0x470] sm:$0xff] }
  0xb9   : > { %7722 = vmatprep.mubr.msk.f32.mxu1 %vm475_vm0, %v856_v12  ;;  %v888_v12 = vld [vmem:[#allocation2 + $0x449] sm:$0xff] }
  0xbb   : > { %8115 = vmatmul.mubr.msk.f32.gmra.mrb[78].mxu0 %vm475_vm0, %v3167_v15  ;;  %v3199_v15 = vld [vmem:[#allocation2 + $0x478] sm:$0xff] }
  0xbc   : > { %7723 = vmatmul.mubr.msk.f32.gmra.mrb[78].mxu1 %vm475_vm0, %v857_v14  ;;  %8117 = vmatprep.mubr.msk.f32.mxu0 %vm475_vm0, %v3168_v17  ;;  %v889_v14 = vld [vmem:[#allocation2 + $0x451] sm:$0xff]  ;;  %v3200_v17 = vld [vmem:[#allocation2 + $0x488] sm:$0xff] }
  0xbd   : > { %7725 = vmatprep.mubr.msk.f32.mxu1 %vm475_vm0, %v858_v16  ;;  %v890_v16 = vld [vmem:[#allocation2 + $0x461] sm:$0xff] }
  0xbf   : > { %8118 = vmatmul.mubr.msk.f32.gmra.mrb[80].mxu0 %vm475_vm0, %v3169_v19  ;;  %v3201_v19 = vld [vmem:[#allocation2 + $0x490] sm:$0xff] }
  0xc0   : > { %7726 = vmatmul.mubr.msk.f32.gmra.mrb[80].mxu1 %vm475_vm0, %v859_v18  ;;  %8120 = vmatprep.mubr.msk.f32.mxu0 %vm475_vm0, %v3170_v21  ;;  %v891_v18 = vld [vmem:[#allocation2 + $0x469] sm:$0xff]  ;;  %v3202_v21 = vld [vmem:[#allocation2 + $0x498] sm:$0xff] }
  0xc1   : > { %7728 = vmatprep.mubr.msk.f32.mxu1 %vm475_vm0, %v860_v20  ;;  %v892_v20 = vld [vmem:[#allocation2 + $0x471] sm:$0xff] }
  0xc3   : > { %8121 = vmatmul.mubr.msk.f32.gmra.mrb[82].mxu0 %vm475_vm0, %v3171_v23  ;;  %v3203_v23 = vld [vmem:[#allocation2 + $0x4a0] sm:$0xff] }
  0xc4   : > { %7729 = vmatmul.mubr.msk.f32.gmra.mrb[82].mxu1 %vm475_vm0, %v861_v22  ;;  %8123 = vmatprep.mubr.msk.f32.mxu0 %vm475_vm0, %v3172_v25  ;;  %v893_v22 = vld [vmem:[#allocation2 + $0x479] sm:$0xff]  ;;  %v3204_v25 = vld [vmem:[#allocation2 + $0x4b0] sm:$0xff] }
  0xc5   : > { %7731 = vmatprep.mubr.msk.f32.mxu1 %vm475_vm0, %v862_v24  ;;  %v894_v24 = vld [vmem:[#allocation2 + $0x489] sm:$0xff] }
  0xc7   : > { %8124 = vmatmul.mubr.msk.f32.gmra.mrb[84].mxu0 %vm475_vm0, %v3173_v27  ;;  %v3205_v27 = vld [vmem:[#allocation2 + $0x4b8] sm:$0xff] }
  0xc8   : > { %7732 = vmatmul.mubr.msk.f32.gmra.mrb[84].mxu1 %vm475_vm0, %v863_v26  ;;  %8126 = vmatprep.mubr.msk.f32.mxu0 %vm475_vm0, %v3174_v29  ;;  %v895_v26 = vld [vmem:[#allocation2 + $0x491] sm:$0xff]  ;;  %v3206_v29 = vld [vmem:[#allocation2 + $0x4c0] sm:$0xff] }
  0xc9   : > { %7734 = vmatprep.mubr.msk.f32.mxu1 %vm475_vm0, %v864_v28  ;;  %v896_v28 = vld [vmem:[#allocation2 + $0x499] sm:$0xff] }
  0xcb   : > { %8127 = vmatmul.mubr.msk.f32.gmra.mrb[86].mxu0 %vm475_vm0, %v3175_v31  ;;  %v3207_v31 = vld [vmem:[#allocation2 + $0x4c8] sm:$0xff] }
  0xcc   : > { %7735 = vmatmul.mubr.msk.f32.gmra.mrb[86].mxu1 %vm475_vm0, %v865_v30  ;;  %8129 = vmatprep.mubr.msk.f32.mxu0 %vm475_vm0, %v3176_v33  ;;  %v897_v30 = vld [vmem:[#allocation2 + $0x4a1] sm:$0xff]  ;;  %v3208_v33 = vld [vmem:[#allocation2 + $0x4d8] sm:$0xff] }
  0xcd   : > { %7737 = vmatprep.mubr.msk.f32.mxu1 %vm475_vm0, %v866_v32  ;;  %v898_v32 = vld [vmem:[#allocation2 + $0x4b1] sm:$0xff] }
  0xcf   : > { %8130 = vmatmul.mubr.msk.f32.gmra.mrb[88].mxu0 %vm475_vm0, %v3177_v35  ;;  %v3209_v35 = vld [vmem:[#allocation2 + $0x4e0] sm:$0xff] }
  0xd0   : > { %7738 = vmatmul.mubr.msk.f32.gmra.mrb[88].mxu1 %vm475_vm0, %v867_v34  ;;  %8132 = vmatprep.mubr.msk.f32.mxu0 %vm475_vm0, %v3178_v37  ;;  %v899_v34 = vld [vmem:[#allocation2 + $0x4b9] sm:$0xff]  ;;  %v3210_v37 = vld [vmem:[#allocation2 + $0x4e8] sm:$0xff] }
  0xd1   : > { %7740 = vmatprep.mubr.msk.f32.mxu1 %vm475_vm0, %v868_v36  ;;  %v900_v36 = vld [vmem:[#allocation2 + $0x4c1] sm:$0xff] }
  0xd3   : > { %8133 = vmatmul.mubr.msk.f32.gmra.mrb[90].mxu0 %vm475_vm0, %v3179_v39  ;;  %v3211_v39 = vld [vmem:[#allocation2 + $0x4f0] sm:$0xff] }
  0xd4   : > { %7741 = vmatmul.mubr.msk.f32.gmra.mrb[90].mxu1 %vm475_vm0, %v869_v38  ;;  %8135 = vmatprep.mubr.msk.f32.mxu0 %vm475_vm0, %v3180_v41  ;;  %v901_v38 = vld [vmem:[#allocation2 + $0x4c9] sm:$0xff]  ;;  %v3212_v41 = vld [vmem:[#allocation2 + $0x500] sm:$0xff] }
  0xd5   : > { %7743 = vmatprep.mubr.msk.f32.mxu1 %vm475_vm0, %v870_v40  ;;  %v902_v40 = vld [vmem:[#allocation2 + $0x4d9] sm:$0xff] }
  0xd7   : > { %8136 = vmatmul.mubr.msk.f32.gmra.mrb[92].mxu0 %vm475_vm0, %v3181_v43  ;;  %v3213_v43 = vld [vmem:[#allocation2 + $0x508] sm:$0xff] }
  0xd8   : > { %7744 = vmatmul.mubr.msk.f32.gmra.mrb[92].mxu1 %vm475_vm0, %v871_v42  ;;  %8138 = vmatprep.mubr.msk.f32.mxu0 %vm475_vm0, %v3182_v45  ;;  %v903_v42 = vld [vmem:[#allocation2 + $0x4e1] sm:$0xff]  ;;  %v3214_v45 = vld [vmem:[#allocation2 + $0x510] sm:$0xff] }
  0xd9   : > { %7746 = vmatprep.mubr.msk.f32.mxu1 %vm475_vm0, %v872_v44  ;;  %v904_v44 = vld [vmem:[#allocation2 + $0x4e9] sm:$0xff] }
  0xdb   : > { %8139 = vmatmul.mubr.msk.f32.gmra.mrb[94].mxu0 %vm475_vm0, %v3183_v47  ;;  %v3215_v47 = vld [vmem:[#allocation2 + $0x518] sm:$0xff] }
  0xdc   : > { %7747 = vmatmul.mubr.msk.f32.gmra.mrb[94].mxu1 %vm475_vm0, %v873_v46  ;;  %8141 = vmatprep.mubr.msk.f32.mxu0 %vm475_vm0, %v3184_v49  ;;  %v905_v46 = vld [vmem:[#allocation2 + $0x4f1] sm:$0xff]  ;;  %v4436_v49 = vld [vmem:[#allocation2 + $0x29] sm:$0xff] }
  0xdd   : > { %7749 = vmatprep.mubr.msk.f32.mxu1 %vm475_vm0, %v874_v48  ;;  %v648_v48 = vld [vmem:[#allocation2] sm:$0xff] }
  0xdf   : > { %8142 = vmatmul.mubr.msk.f32.gmra.mrb[96].mxu0 %vm475_vm0, %v3185_v51  ;;  %v4437_v51 = vld [vmem:[#allocation2 + $0x31] sm:$0xff] }
  0xe0   : > { %7750 = vmatmul.mubr.msk.f32.gmra.mrb[96].mxu1 %vm475_vm0, %v875_v50  ;;  %8144 = vmatprep.mubr.msk.f32.mxu0 %vm475_vm0, %v3186_v53  ;;  %v649_v50 = vld [vmem:[#allocation2 + $0x8] sm:$0xff]  ;;  %v4438_v53 = vld [vmem:[#allocation2 + $0x39] sm:$0xff] }
  0xe1   : > { %7752 = vmatprep.mubr.msk.f32.mxu1 %vm475_vm0, %v876_v52  ;;  %v650_v52 = vld [vmem:[#allocation2 + $0x10] sm:$0xff] }
  0xe3   : > { %8145 = vmatmul.mubr.msk.f32.gmra.mrb[98].mxu0 %vm475_vm0, %v3187_v55  ;;  %v4439_v55 = vld [vmem:[#allocation2 + $0x41] sm:$0xff] }
  0xe4   : > { %7753 = vmatmul.mubr.msk.f32.gmra.mrb[98].mxu1 %vm475_vm0, %v877_v54  ;;  %8147 = vmatprep.mubr.msk.f32.mxu0 %vm475_vm0, %v3188_v57  ;;  %v651_v54 = vld [vmem:[#allocation2 + $0x18] sm:$0xff] }
  0xe5   : > { %7755 = vmatprep.mubr.msk.f32.mxu1 %vm475_vm0, %v878_v56  ;;  %v652_v56 = vld [vmem:[#allocation2 + $0x28] sm:$0xff]  ;;  %v4440_v57 = vld [vmem:[#allocation2 + $0x51] sm:$0xff] }
  0xe7   : > { %8148 = vmatmul.mubr.msk.f32.gmra.mrb[100].mxu0 %vm475_vm0, %v3189_v59  ;;  %v4441_v59 = vld [vmem:[#allocation2 + $0x59] sm:$0xff] }
  0xe8   : > { %7756 = vmatmul.mubr.msk.f32.gmra.mrb[100].mxu1 %vm475_vm0, %v879_v58  ;;  %8150 = vmatprep.mubr.msk.f32.mxu0 %vm475_vm0, %v3190_v61  ;;  %v653_v58 = vld [vmem:[#allocation2 + $0x30] sm:$0xff]  ;;  %v4442_v61 = vld [vmem:[#allocation2 + $0x61] sm:$0xff] }
  0xe9   : > { %7758 = vmatprep.mubr.msk.f32.mxu1 %vm475_vm0, %v880_v60  ;;  %v654_v60 = vld [vmem:[#allocation2 + $0x38] sm:$0xff] }
  0xeb   : > { %8151 = vmatmul.mubr.msk.f32.gmra.mrb[102].mxu0 %vm475_vm0, %v3191_v63  ;;  %v4443_v63 = vld [vmem:[#allocation2 + $0x69] sm:$0xff] }
  0xec   : > { %7759 = vmatmul.mubr.msk.f32.gmra.mrb[102].mxu1 %vm475_vm0, %v881_v62  ;;  %8153 = vmatprep.mubr.msk.f32.mxu0 %vm475_vm0, %v3192_v1  ;;  %v655_v62 = vld [vmem:[#allocation2 + $0x40] sm:$0xff] }
  0xed   : > { %7761 = vmatprep.mubr.msk.f32.mxu1 %vm475_vm0, %v882_v0  ;;  %v656_v0 = vld [vmem:[#allocation2 + $0x50] sm:$0xff]  ;;  %v4444_v1 = vld [vmem:[#allocation2 + $0x79] sm:$0xff] }
  0xef   : > { %8154 = vmatmul.mubr.msk.f32.gmra.mrb[104].mxu0 %vm475_vm0, %v3193_v3  ;;  %v4445_v3 = vld [vmem:[#allocation2 + $0x81] sm:$0xff] }
  0xf0   : > { %7762 = vmatmul.mubr.msk.f32.gmra.mrb[104].mxu1 %vm475_vm0, %v883_v2  ;;  %8156 = vmatprep.mubr.msk.f32.mxu0 %vm475_vm0, %v3194_v5  ;;  %v657_v2 = vld [vmem:[#allocation2 + $0x58] sm:$0xff]  ;;  %v4446_v5 = vld [vmem:[#allocation2 + $0x89] sm:$0xff] }
  0xf1   : > { %7764 = vmatprep.mubr.msk.f32.mxu1 %vm475_vm0, %v884_v4  ;;  %v658_v4 = vld [vmem:[#allocation2 + $0x60] sm:$0xff] }
  0xf3   : > { %8157 = vmatmul.mubr.msk.f32.gmra.mrb[106].mxu0 %vm475_vm0, %v3195_v7  ;;  %v4447_v7 = vld [vmem:[#allocation2 + $0x91] sm:$0xff] }
  0xf4   : > { %7765 = vmatmul.mubr.msk.f32.gmra.mrb[106].mxu1 %vm475_vm0, %v885_v6  ;;  %8159 = vmatprep.mubr.msk.f32.mxu0 %vm475_vm0, %v3196_v9  ;;  %v659_v6 = vld [vmem:[#allocation2 + $0x68] sm:$0xff] }
  0xf5   : > { %7767 = vmatprep.mubr.msk.f32.mxu1 %vm475_vm0, %v886_v8  ;;  %v660_v8 = vld [vmem:[#allocation2 + $0x78] sm:$0xff]  ;;  %v4448_v9 = vld [vmem:[#allocation2 + $0xa1] sm:$0xff] }
  0xf7   : > { %8160 = vmatmul.mubr.msk.f32.gmra.mrb[108].mxu0 %vm475_vm0, %v3197_v11  ;;  %v4449_v11 = vld [vmem:[#allocation2 + $0xa9] sm:$0xff] }
  0xf8   : > { %7768 = vmatmul.mubr.msk.f32.gmra.mrb[108].mxu1 %vm475_vm0, %v887_v10  ;;  %8162 = vmatprep.mubr.msk.f32.mxu0 %vm475_vm0, %v3198_v13  ;;  %v661_v10 = vld [vmem:[#allocation2 + $0x80] sm:$0xff]  ;;  %v4450_v13 = vld [vmem:[#allocation2 + $0xb1] sm:$0xff] }
  0xf9   : > { %7770 = vmatprep.mubr.msk.f32.mxu1 %vm475_vm0, %v888_v12  ;;  %v662_v12 = vld [vmem:[#allocation2 + $0x88] sm:$0xff] }
  0xfb   : > { %8163 = vmatmul.mubr.msk.f32.gmra.mrb[110].mxu0 %vm475_vm0, %v3199_v15  ;;  %v4451_v15 = vld [vmem:[#allocation2 + $0xb9] sm:$0xff] }
  0xfc   : > { %7771 = vmatmul.mubr.msk.f32.gmra.mrb[110].mxu1 %vm475_vm0, %v889_v14  ;;  %8165 = vmatprep.mubr.msk.f32.mxu0 %vm475_vm0, %v3200_v17  ;;  %v663_v14 = vld [vmem:[#allocation2 + $0x90] sm:$0xff] }
  0xfd   : > { %7773 = vmatprep.mubr.msk.f32.mxu1 %vm475_vm0, %v890_v16  ;;  %v664_v16 = vld [vmem:[#allocation2 + $0xa0] sm:$0xff]  ;;  %v4452_v17 = vld [vmem:[#allocation2 + $0xc9] sm:$0xff] }
  0xff   : > { %8166 = vmatmul.mubr.msk.f32.gmra.mrb[112].mxu0 %vm475_vm0, %v3201_v19  ;;  %v4453_v19 = vld [vmem:[#allocation2 + $0xd1] sm:$0xff] }
 0x100   : > { %7774 = vmatmul.mubr.msk.f32.gmra.mrb[112].mxu1 %vm475_vm0, %v891_v18  ;;  %8168 = vmatprep.mubr.msk.f32.mxu0 %vm475_vm0, %v3202_v21  ;;  %v665_v18 = vld [vmem:[#allocation2 + $0xa8] sm:$0xff]  ;;  %v4454_v21 = vld [vmem:[#allocation2 + $0xd9] sm:$0xff] }
 0x101   : > { %7776 = vmatprep.mubr.msk.f32.mxu1 %vm475_vm0, %v892_v20  ;;  %v666_v20 = vld [vmem:[#allocation2 + $0xb0] sm:$0xff] }
 0x103   : > { %8169 = vmatmul.mubr.msk.f32.gmra.mrb[114].mxu0 %vm475_vm0, %v3203_v23  ;;  %v4455_v23 = vld [vmem:[#allocation2 + $0xe1] sm:$0xff] }
 0x104   : > { %7777 = vmatmul.mubr.msk.f32.gmra.mrb[114].mxu1 %vm475_vm0, %v893_v22  ;;  %8171 = vmatprep.mubr.msk.f32.mxu0 %vm475_vm0, %v3204_v25  ;;  %v667_v22 = vld [vmem:[#allocation2 + $0xb8] sm:$0xff] }
 0x105   : > { %7779 = vmatprep.mubr.msk.f32.mxu1 %vm475_vm0, %v894_v24  ;;  %v668_v24 = vld [vmem:[#allocation2 + $0xc8] sm:$0xff]  ;;  %v4456_v25 = vld [vmem:[#allocation2 + $0xf1] sm:$0xff] }
 0x107   : > { %8172 = vmatmul.mubr.msk.f32.gmra.mrb[116].mxu0 %vm475_vm0, %v3205_v27  ;;  %v4457_v27 = vld [vmem:[#allocation2 + $0xf9] sm:$0xff] }
 0x108   : > { %7780 = vmatmul.mubr.msk.f32.gmra.mrb[116].mxu1 %vm475_vm0, %v895_v26  ;;  %8174 = vmatprep.mubr.msk.f32.mxu0 %vm475_vm0, %v3206_v29  ;;  %v669_v26 = vld [vmem:[#allocation2 + $0xd0] sm:$0xff]  ;;  %v4458_v29 = vld [vmem:[#allocation2 + $0x101] sm:$0xff] }
 0x109   : > { %7782 = vmatprep.mubr.msk.f32.mxu1 %vm475_vm0, %v896_v28  ;;  %v670_v28 = vld [vmem:[#allocation2 + $0xd8] sm:$0xff] }
 0x10b   : > { %8175 = vmatmul.mubr.msk.f32.gmra.mrb[118].mxu0 %vm475_vm0, %v3207_v31  ;;  %v4459_v31 = vld [vmem:[#allocation2 + $0x109] sm:$0xff] }
 0x10c   : > { %7783 = vmatmul.mubr.msk.f32.gmra.mrb[118].mxu1 %vm475_vm0, %v897_v30  ;;  %8177 = vmatprep.mubr.msk.f32.mxu0 %vm475_vm0, %v3208_v33  ;;  %v671_v30 = vld [vmem:[#allocation2 + $0xe0] sm:$0xff] }
 0x10d   : > { %7785 = vmatprep.mubr.msk.f32.mxu1 %vm475_vm0, %v898_v32  ;;  %v672_v32 = vld [vmem:[#allocation2 + $0xf0] sm:$0xff]  ;;  %v4460_v33 = vld [vmem:[#allocation2 + $0x119] sm:$0xff] }
 0x10f   : > { %8178 = vmatmul.mubr.msk.f32.gmra.mrb[120].mxu0 %vm475_vm0, %v3209_v35  ;;  %v4461_v35 = vld [vmem:[#allocation2 + $0x121] sm:$0xff] }
 0x110   : > { %7786 = vmatmul.mubr.msk.f32.gmra.mrb[120].mxu1 %vm475_vm0, %v899_v34  ;;  %8180 = vmatprep.mubr.msk.f32.mxu0 %vm475_vm0, %v3210_v37  ;;  %v673_v34 = vld [vmem:[#allocation2 + $0xf8] sm:$0xff]  ;;  %v4462_v37 = vld [vmem:[#allocation2 + $0x129] sm:$0xff] }
 0x111   : > { %7788 = vmatprep.mubr.msk.f32.mxu1 %vm475_vm0, %v900_v36  ;;  %v674_v36 = vld [vmem:[#allocation2 + $0x100] sm:$0xff] }
 0x113   : > { %8181 = vmatmul.mubr.msk.f32.gmra.mrb[122].mxu0 %vm475_vm0, %v3211_v39  ;;  %v4463_v39 = vld [vmem:[#allocation2 + $0x131] sm:$0xff] }
 0x114   : > { %7789 = vmatmul.mubr.msk.f32.gmra.mrb[122].mxu1 %vm475_vm0, %v901_v38  ;;  %8183 = vmatprep.mubr.msk.f32.mxu0 %vm475_vm0, %v3212_v41  ;;  %v675_v38 = vld [vmem:[#allocation2 + $0x108] sm:$0xff] }
 0x115   : > { %7791 = vmatprep.mubr.msk.f32.mxu1 %vm475_vm0, %v902_v40  ;;  %v676_v40 = vld [vmem:[#allocation2 + $0x118] sm:$0xff]  ;;  %v4464_v41 = vld [vmem:[#allocation2 + $0x141] sm:$0xff] }
 0x117   : > { %8184 = vmatmul.mubr.msk.f32.gmra.mrb[124].mxu0 %vm475_vm0, %v3213_v43  ;;  %v4465_v43 = vld [vmem:[#allocation2 + $0x149] sm:$0xff] }
 0x118   : > { %7792 = vmatmul.mubr.msk.f32.gmra.mrb[124].mxu1 %vm475_vm0, %v903_v42  ;;  %8186 = vmatprep.mubr.msk.f32.mxu0 %vm475_vm0, %v3214_v45  ;;  %v677_v42 = vld [vmem:[#allocation2 + $0x120] sm:$0xff]  ;;  %v4466_v45 = vld [vmem:[#allocation2 + $0x151] sm:$0xff] }
 0x119   : > { %7794 = vmatprep.mubr.msk.f32.mxu1 %vm475_vm0, %v904_v44  ;;  %v678_v44 = vld [vmem:[#allocation2 + $0x128] sm:$0xff] }
 0x11b   : > { %8187 = vmatmul.mubr.msk.f32.gmra.mrb[126].mxu0 %vm475_vm0, %v3215_v47  ;;  %v4467_v47 = vld [vmem:[#allocation2 + $0x159] sm:$0xff] }
 0x11c   : > { %7795 = vmatmul.mubr.msk.f32.gmra.mrb[126].mxu1 %vm475_vm0, %v905_v46  ;;  %8193 = vmatprep.mubr.msk.f32.mxu0 %vm475_vm0, %v4436_v49  ;;  %v679_v46 = vld [vmem:[#allocation2 + $0x130] sm:$0xff] }
 0x11d   : > { %7801 = vmatprep.mubr.msk.f32.mxu1 %vm475_vm0, %v648_v48  ;;  %v680_v48 = vld [vmem:[#allocation2 + $0x140] sm:$0xff]  ;;  %v4468_v49 = vld [vmem:[#allocation2 + $0x169] sm:$0xff] }
 0x11f   : > { %8194 = vmatmul.mubr.msk.f32.vlgmr.msra.gmra.mrb[0].mxu0 %vm475_vm0, %v4437_v51  ;;  %v4469_v51 = vld [vmem:[#allocation2 + $0x171] sm:$0xff] }
 0x120   : > { %7802 = vmatmul.mubr.msk.f32.vlgmr.msra.gmra.mrb[0].mxu1 %vm475_vm0, %v649_v50  ;;  %8196 = vmatprep.mubr.msk.f32.mxu0 %vm475_vm0, %v4438_v53  ;;  %v681_v50 = vld [vmem:[#allocation2 + $0x148] sm:$0xff]  ;;  %v4470_v53 = vld [vmem:[#allocation2 + $0x179] sm:$0xff] }
 0x121   : > { %7804 = vmatprep.mubr.msk.f32.mxu1 %vm475_vm0, %v650_v52  ;;  %v682_v52 = vld [vmem:[#allocation2 + $0x150] sm:$0xff] }
 0x123   : > { %8197 = vmatmul.mubr.msk.f32.gmra.mrb[2].mxu0 %vm475_vm0, %v4439_v55  ;;  %v4471_v55 = vld [vmem:[#allocation2 + $0x181] sm:$0xff] }
 0x124   : > { %7805 = vmatmul.mubr.msk.f32.gmra.mrb[2].mxu1 %vm475_vm0, %v651_v54  ;;  %8199 = vmatprep.mubr.msk.f32.mxu0 %vm475_vm0, %v4440_v57  ;;  %v683_v54 = vld [vmem:[#allocation2 + $0x158] sm:$0xff] }
 0x125   : > { %7807 = vmatprep.mubr.msk.f32.mxu1 %vm475_vm0, %v652_v56  ;;  %v684_v56 = vld [vmem:[#allocation2 + $0x168] sm:$0xff]  ;;  %v4472_v57 = vld [vmem:[#allocation2 + $0x191] sm:$0xff] }
 0x127   : > { %8200 = vmatmul.mubr.msk.f32.gmra.mrb[4].mxu0 %vm475_vm0, %v4441_v59  ;;  %v4473_v59 = vld [vmem:[#allocation2 + $0x199] sm:$0xff] }
 0x128   : > { %7808 = vmatmul.mubr.msk.f32.gmra.mrb[4].mxu1 %vm475_vm0, %v653_v58  ;;  %8202 = vmatprep.mubr.msk.f32.mxu0 %vm475_vm0, %v4442_v61  ;;  %v685_v58 = vld [vmem:[#allocation2 + $0x170] sm:$0xff]  ;;  %v4474_v61 = vld [vmem:[#allocation2 + $0x1a1] sm:$0xff] }
 0x129   : > { %7810 = vmatprep.mubr.msk.f32.mxu1 %vm475_vm0, %v654_v60  ;;  %v686_v60 = vld [vmem:[#allocation2 + $0x178] sm:$0xff] }
 0x12b   : > { %8203 = vmatmul.mubr.msk.f32.gmra.mrb[6].mxu0 %vm475_vm0, %v4443_v63  ;;  %v4475_v63 = vld [vmem:[#allocation2 + $0x1a9] sm:$0xff] }
 0x12c   : > { %7811 = vmatmul.mubr.msk.f32.gmra.mrb[6].mxu1 %vm475_vm0, %v655_v62  ;;  %8205 = vmatprep.mubr.msk.f32.mxu0 %vm475_vm0, %v4444_v1  ;;  %v687_v62 = vld [vmem:[#allocation2 + $0x180] sm:$0xff] }
 0x12d   : > { %7813 = vmatprep.mubr.msk.f32.mxu1 %vm475_vm0, %v656_v0  ;;  %v688_v0 = vld [vmem:[#allocation2 + $0x190] sm:$0xff]  ;;  %v4476_v1 = vld [vmem:[#allocation2 + $0x1b9] sm:$0xff] }
 0x12f   : > { %8206 = vmatmul.mubr.msk.f32.gmra.mrb[8].mxu0 %vm475_vm0, %v4445_v3  ;;  %v4477_v3 = vld [vmem:[#allocation2 + $0x1c1] sm:$0xff] }
 0x130   : > { %7814 = vmatmul.mubr.msk.f32.gmra.mrb[8].mxu1 %vm475_vm0, %v657_v2  ;;  %8208 = vmatprep.mubr.msk.f32.mxu0 %vm475_vm0, %v4446_v5  ;;  %v689_v2 = vld [vmem:[#allocation2 + $0x198] sm:$0xff]  ;;  %v4478_v5 = vld [vmem:[#allocation2 + $0x1c9] sm:$0xff] }
 0x131   : > { %7816 = vmatprep.mubr.msk.f32.mxu1 %vm475_vm0, %v658_v4  ;;  %v690_v4 = vld [vmem:[#allocation2 + $0x1a0] sm:$0xff] }
 0x133   : > { %8209 = vmatmul.mubr.msk.f32.gmra.mrb[10].mxu0 %vm475_vm0, %v4447_v7  ;;  %v4479_v7 = vld [vmem:[#allocation2 + $0x1d1] sm:$0xff] }
 0x134   : > { %7817 = vmatmul.mubr.msk.f32.gmra.mrb[10].mxu1 %vm475_vm0, %v659_v6  ;;  %8211 = vmatprep.mubr.msk.f32.mxu0 %vm475_vm0, %v4448_v9  ;;  %v691_v6 = vld [vmem:[#allocation2 + $0x1a8] sm:$0xff] }
 0x135   : > { %7819 = vmatprep.mubr.msk.f32.mxu1 %vm475_vm0, %v660_v8  ;;  %v692_v8 = vld [vmem:[#allocation2 + $0x1b8] sm:$0xff]  ;;  %v4480_v9 = vld [vmem:[#allocation2 + $0x1e1] sm:$0xff] }
 0x137   : > { %8212 = vmatmul.mubr.msk.f32.gmra.mrb[12].mxu0 %vm475_vm0, %v4449_v11  ;;  %v4481_v11 = vld [vmem:[#allocation2 + $0x1e9] sm:$0xff] }
 0x138   : > { %7820 = vmatmul.mubr.msk.f32.gmra.mrb[12].mxu1 %vm475_vm0, %v661_v10  ;;  %8214 = vmatprep.mubr.msk.f32.mxu0 %vm475_vm0, %v4450_v13  ;;  %v693_v10 = vld [vmem:[#allocation2 + $0x1c0] sm:$0xff]  ;;  %v4482_v13 = vld [vmem:[#allocation2 + $0x1f1] sm:$0xff] }
 0x139   : > { %7822 = vmatprep.mubr.msk.f32.mxu1 %vm475_vm0, %v662_v12  ;;  %v694_v12 = vld [vmem:[#allocation2 + $0x1c8] sm:$0xff] }
 0x13b   : > { %8215 = vmatmul.mubr.msk.f32.gmra.mrb[14].mxu0 %vm475_vm0, %v4451_v15  ;;  %v4483_v15 = vld [vmem:[#allocation2 + $0x1f9] sm:$0xff] }
 0x13c   : > { %7823 = vmatmul.mubr.msk.f32.gmra.mrb[14].mxu1 %vm475_vm0, %v663_v14  ;;  %8217 = vmatprep.mubr.msk.f32.mxu0 %vm475_vm0, %v4452_v17  ;;  %v695_v14 = vld [vmem:[#allocation2 + $0x1d0] sm:$0xff] }
 0x13d   : > { %7825 = vmatprep.mubr.msk.f32.mxu1 %vm475_vm0, %v664_v16  ;;  %v696_v16 = vld [vmem:[#allocation2 + $0x1e0] sm:$0xff]  ;;  %v4484_v17 = vld [vmem:[#allocation2 + $0x209] sm:$0xff] }
 0x13f   : > { %8218 = vmatmul.mubr.msk.f32.gmra.mrb[16].mxu0 %vm475_vm0, %v4453_v19  ;;  %v4485_v19 = vld [vmem:[#allocation2 + $0x211] sm:$0xff] }
 0x140   : > { %7826 = vmatmul.mubr.msk.f32.gmra.mrb[16].mxu1 %vm475_vm0, %v665_v18  ;;  %8220 = vmatprep.mubr.msk.f32.mxu0 %vm475_vm0, %v4454_v21  ;;  %v697_v18 = vld [vmem:[#allocation2 + $0x1e8] sm:$0xff]  ;;  %v4486_v21 = vld [vmem:[#allocation2 + $0x219] sm:$0xff] }
 0x141   : > { %7828 = vmatprep.mubr.msk.f32.mxu1 %vm475_vm0, %v666_v20  ;;  %v698_v20 = vld [vmem:[#allocation2 + $0x1f0] sm:$0xff] }
 0x143   : > { %8221 = vmatmul.mubr.msk.f32.gmra.mrb[18].mxu0 %vm475_vm0, %v4455_v23  ;;  %v4487_v23 = vld [vmem:[#allocation2 + $0x221] sm:$0xff] }
 0x144   : > { %7829 = vmatmul.mubr.msk.f32.gmra.mrb[18].mxu1 %vm475_vm0, %v667_v22  ;;  %8223 = vmatprep.mubr.msk.f32.mxu0 %vm475_vm0, %v4456_v25  ;;  %v699_v22 = vld [vmem:[#allocation2 + $0x1f8] sm:$0xff] }
 0x145   : > { %7831 = vmatprep.mubr.msk.f32.mxu1 %vm475_vm0, %v668_v24  ;;  %v700_v24 = vld [vmem:[#allocation2 + $0x208] sm:$0xff]  ;;  %v4488_v25 = vld [vmem:[#allocation2 + $0x231] sm:$0xff] }
 0x147   : > { %8224 = vmatmul.mubr.msk.f32.gmra.mrb[20].mxu0 %vm475_vm0, %v4457_v27  ;;  %v4489_v27 = vld [vmem:[#allocation2 + $0x239] sm:$0xff] }
 0x148   : > { %7832 = vmatmul.mubr.msk.f32.gmra.mrb[20].mxu1 %vm475_vm0, %v669_v26  ;;  %8226 = vmatprep.mubr.msk.f32.mxu0 %vm475_vm0, %v4458_v29  ;;  %v701_v26 = vld [vmem:[#allocation2 + $0x210] sm:$0xff]  ;;  %v4490_v29 = vld [vmem:[#allocation2 + $0x241] sm:$0xff] }
 0x149   : > { %7834 = vmatprep.mubr.msk.f32.mxu1 %vm475_vm0, %v670_v28  ;;  %v702_v28 = vld [vmem:[#allocation2 + $0x218] sm:$0xff] }
 0x14b   : > { %8227 = vmatmul.mubr.msk.f32.gmra.mrb[22].mxu0 %vm475_vm0, %v4459_v31  ;;  %v4491_v31 = vld [vmem:[#allocation2 + $0x249] sm:$0xff] }
 0x14c   : > { %7835 = vmatmul.mubr.msk.f32.gmra.mrb[22].mxu1 %vm475_vm0, %v671_v30  ;;  %8229 = vmatprep.mubr.msk.f32.mxu0 %vm475_vm0, %v4460_v33  ;;  %v703_v30 = vld [vmem:[#allocation2 + $0x220] sm:$0xff] }
 0x14d   : > { %7837 = vmatprep.mubr.msk.f32.mxu1 %vm475_vm0, %v672_v32  ;;  %v704_v32 = vld [vmem:[#allocation2 + $0x230] sm:$0xff]  ;;  %v4492_v33 = vld [vmem:[#allocation2 + $0x259] sm:$0xff] }
 0x14f   : > { %8230 = vmatmul.mubr.msk.f32.gmra.mrb[24].mxu0 %vm475_vm0, %v4461_v35  ;;  %v4493_v35 = vld [vmem:[#allocation2 + $0x261] sm:$0xff] }
 0x150   : > { %7838 = vmatmul.mubr.msk.f32.gmra.mrb[24].mxu1 %vm475_vm0, %v673_v34  ;;  %8232 = vmatprep.mubr.msk.f32.mxu0 %vm475_vm0, %v4462_v37  ;;  %v705_v34 = vld [vmem:[#allocation2 + $0x238] sm:$0xff]  ;;  %v4494_v37 = vld [vmem:[#allocation2 + $0x269] sm:$0xff] }
 0x151   : > { %7840 = vmatprep.mubr.msk.f32.mxu1 %vm475_vm0, %v674_v36  ;;  %v706_v36 = vld [vmem:[#allocation2 + $0x240] sm:$0xff] }
 0x153   : > { %8233 = vmatmul.mubr.msk.f32.gmra.mrb[26].mxu0 %vm475_vm0, %v4463_v39  ;;  %v4495_v39 = vld [vmem:[#allocation2 + $0x271] sm:$0xff] }
 0x154   : > { %7841 = vmatmul.mubr.msk.f32.gmra.mrb[26].mxu1 %vm475_vm0, %v675_v38  ;;  %8235 = vmatprep.mubr.msk.f32.mxu0 %vm475_vm0, %v4464_v41  ;;  %v707_v38 = vld [vmem:[#allocation2 + $0x248] sm:$0xff] }
 0x155   : > { %7843 = vmatprep.mubr.msk.f32.mxu1 %vm475_vm0, %v676_v40  ;;  %v708_v40 = vld [vmem:[#allocation2 + $0x258] sm:$0xff]  ;;  %v4496_v41 = vld [vmem:[#allocation2 + $0x281] sm:$0xff] }
 0x157   : > { %8236 = vmatmul.mubr.msk.f32.gmra.mrb[28].mxu0 %vm475_vm0, %v4465_v43  ;;  %v709_v43 = vld [vmem:[#allocation2 + $0x260] sm:$0xff] }
 0x158   : > { %7844 = vmatmul.mubr.msk.f32.gmra.mrb[28].mxu1 %vm475_vm0, %v677_v42  ;;  %8238 = vmatprep.mubr.msk.f32.mxu0 %vm475_vm0, %v4466_v45  ;;  %v641_v42 = vld [vmem:[%s9349_s20 + $0x20] sm:$0x1]  ;;  %v710_v45 = vld [vmem:[#allocation2 + $0x268] sm:$0xff] }
 0x159   : > { %7846 = vmatprep.mubr.msk.f32.mxu1 %vm475_vm0, %v678_v44  ;;  %647 = vst.msk [vmem:[#allocation2 + $0x520] sm:$0x1] %vm480_vm1, %v641_v42  ;;  %v4497_v44 = vld [vmem:[#allocation2 + $0x289] sm:$0xff]  ;;  %v4528_v42 = vld [vmem:[#allocation2 + $0x3c1] sm:$0xff] }
 0x15b   : > { %8239 = vmatmul.mubr.msk.f32.gmra.mrb[30].mxu0 %vm475_vm0, %v4467_v47  ;;  %v711_v47 = vld [vmem:[#allocation2 + $0x270] sm:$0xff] }
 0x15c   : > { %7847 = vmatmul.mubr.msk.f32.gmra.mrb[30].mxu1 %vm475_vm0, %v679_v46  ;;  %8241 = vmatprep.mubr.msk.f32.mxu0 %vm475_vm0, %v4468_v49  ;;  %v4498_v46 = vld [vmem:[#allocation2 + $0x291] sm:$0xff]  ;;  %v712_v49 = vld [vmem:[#allocation2 + $0x280] sm:$0xff] }
 0x15d   : > { %7849 = vmatprep.mubr.msk.f32.mxu1 %vm475_vm0, %v680_v48  ;;  %v4499_v48 = vld [vmem:[#allocation2 + $0x299] sm:$0xff] }
 0x15f   : > { %8242 = vmatmul.mubr.msk.f32.gmra.mrb[32].mxu0 %vm475_vm0, %v4469_v51  ;;  %v713_v51 = vld [vmem:[#allocation2 + $0x288] sm:$0xff] }
 0x160   : > { %7850 = vmatmul.mubr.msk.f32.gmra.mrb[32].mxu1 %vm475_vm0, %v681_v50  ;;  %8244 = vmatprep.mubr.msk.f32.mxu0 %vm475_vm0, %v4470_v53  ;;  %v4500_v50 = vld [vmem:[#allocation2 + $0x2a9] sm:$0xff] }
 0x161   : > { %7852 = vmatprep.mubr.msk.f32.mxu1 %vm475_vm0, %v682_v52  ;;  %v4501_v52 = vld [vmem:[#allocation2 + $0x2b1] sm:$0xff] }
 0x162   : > { %v714_v53 = vld [vmem:[#allocation2 + $0x290] sm:$0xff] }
 0x163   : > { %8245 = vmatmul.mubr.msk.f32.gmra.mrb[34].mxu0 %vm475_vm0, %v4471_v55  ;;  %v715_v55 = vld [vmem:[#allocation2 + $0x298] sm:$0xff] }
 0x164   : > { %7853 = vmatmul.mubr.msk.f32.gmra.mrb[34].mxu1 %vm475_vm0, %v683_v54  ;;  %8247 = vmatprep.mubr.msk.f32.mxu0 %vm475_vm0, %v4472_v57  ;;  %v4502_v54 = vld [vmem:[#allocation2 + $0x2b9] sm:$0xff]  ;;  %v716_v57 = vld [vmem:[#allocation2 + $0x2a8] sm:$0xff] }
 0x165   : > { %7855 = vmatprep.mubr.msk.f32.mxu1 %vm475_vm0, %v684_v56  ;;  %v4503_v56 = vld [vmem:[#allocation2 + $0x2c1] sm:$0xff] }
 0x167   : > { %8248 = vmatmul.mubr.msk.f32.gmra.mrb[36].mxu0 %vm475_vm0, %v4473_v59  ;;  %v717_v59 = vld [vmem:[#allocation2 + $0x2b0] sm:$0xff] }
 0x168   : > { %7856 = vmatmul.mubr.msk.f32.gmra.mrb[36].mxu1 %vm475_vm0, %v685_v58  ;;  %8250 = vmatprep.mubr.msk.f32.mxu0 %vm475_vm0, %v4474_v61  ;;  %v4504_v58 = vld [vmem:[#allocation2 + $0x2d1] sm:$0xff] }
 0x169   : > { %7858 = vmatprep.mubr.msk.f32.mxu1 %vm475_vm0, %v686_v60  ;;  %v4505_v60 = vld [vmem:[#allocation2 + $0x2d9] sm:$0xff] }
 0x16a   : > { %v718_v61 = vld [vmem:[#allocation2 + $0x2b8] sm:$0xff] }
 0x16b   : > { %8251 = vmatmul.mubr.msk.f32.gmra.mrb[38].mxu0 %vm475_vm0, %v4475_v63  ;;  %v719_v63 = vld [vmem:[#allocation2 + $0x2c0] sm:$0xff] }
 0x16c   : > { %7859 = vmatmul.mubr.msk.f32.gmra.mrb[38].mxu1 %vm475_vm0, %v687_v62  ;;  %8253 = vmatprep.mubr.msk.f32.mxu0 %vm475_vm0, %v4476_v1  ;;  %v4506_v62 = vld [vmem:[#allocation2 + $0x2e1] sm:$0xff]  ;;  %v720_v1 = vld [vmem:[#allocation2 + $0x2d0] sm:$0xff] }
 0x16d   : > { %7861 = vmatprep.mubr.msk.f32.mxu1 %vm475_vm0, %v688_v0  ;;  %v4507_v0 = vld [vmem:[#allocation2 + $0x2e9] sm:$0xff] }
 0x16f   : > { %8254 = vmatmul.mubr.msk.f32.gmra.mrb[40].mxu0 %vm475_vm0, %v4477_v3  ;;  %v721_v3 = vld [vmem:[#allocation2 + $0x2d8] sm:$0xff] }
 0x170   : > { %7862 = vmatmul.mubr.msk.f32.gmra.mrb[40].mxu1 %vm475_vm0, %v689_v2  ;;  %8256 = vmatprep.mubr.msk.f32.mxu0 %vm475_vm0, %v4478_v5  ;;  %v4508_v2 = vld [vmem:[#allocation2 + $0x2f9] sm:$0xff] }
 0x171   : > { %7864 = vmatprep.mubr.msk.f32.mxu1 %vm475_vm0, %v690_v4  ;;  %v4509_v4 = vld [vmem:[#allocation2 + $0x301] sm:$0xff] }
 0x172   : > { %v722_v5 = vld [vmem:[#allocation2 + $0x2e0] sm:$0xff] }
 0x173   : > { %8257 = vmatmul.mubr.msk.f32.gmra.mrb[42].mxu0 %vm475_vm0, %v4479_v7  ;;  %v723_v7 = vld [vmem:[#allocation2 + $0x2e8] sm:$0xff] }
 0x174   : > { %7865 = vmatmul.mubr.msk.f32.gmra.mrb[42].mxu1 %vm475_vm0, %v691_v6  ;;  %8259 = vmatprep.mubr.msk.f32.mxu0 %vm475_vm0, %v4480_v9  ;;  %v4510_v6 = vld [vmem:[#allocation2 + $0x309] sm:$0xff]  ;;  %v724_v9 = vld [vmem:[#allocation2 + $0x2f8] sm:$0xff] }
 0x175   : > { %7867 = vmatprep.mubr.msk.f32.mxu1 %vm475_vm0, %v692_v8  ;;  %v4511_v8 = vld [vmem:[#allocation2 + $0x311] sm:$0xff] }
 0x177   : > { %8260 = vmatmul.mubr.msk.f32.gmra.mrb[44].mxu0 %vm475_vm0, %v4481_v11  ;;  %v725_v11 = vld [vmem:[#allocation2 + $0x300] sm:$0xff] }
 0x178   : > { %7868 = vmatmul.mubr.msk.f32.gmra.mrb[44].mxu1 %vm475_vm0, %v693_v10  ;;  %8262 = vmatprep.mubr.msk.f32.mxu0 %vm475_vm0, %v4482_v13  ;;  %v4512_v10 = vld [vmem:[#allocation2 + $0x321] sm:$0xff] }
 0x179   : > { %7870 = vmatprep.mubr.msk.f32.mxu1 %vm475_vm0, %v694_v12  ;;  %v4513_v12 = vld [vmem:[#allocation2 + $0x329] sm:$0xff] }
 0x17a   : > { %v726_v13 = vld [vmem:[#allocation2 + $0x308] sm:$0xff] }
 0x17b   : > { %8263 = vmatmul.mubr.msk.f32.gmra.mrb[46].mxu0 %vm475_vm0, %v4483_v15  ;;  %v727_v15 = vld [vmem:[#allocation2 + $0x310] sm:$0xff] }
 0x17c   : > { %7871 = vmatmul.mubr.msk.f32.gmra.mrb[46].mxu1 %vm475_vm0, %v695_v14  ;;  %8265 = vmatprep.mubr.msk.f32.mxu0 %vm475_vm0, %v4484_v17  ;;  %v4514_v14 = vld [vmem:[#allocation2 + $0x331] sm:$0xff]  ;;  %v728_v17 = vld [vmem:[#allocation2 + $0x320] sm:$0xff] }
 0x17d   : > { %7873 = vmatprep.mubr.msk.f32.mxu1 %vm475_vm0, %v696_v16  ;;  %v4515_v16 = vld [vmem:[#allocation2 + $0x339] sm:$0xff] }
 0x17f   : > { %8266 = vmatmul.mubr.msk.f32.gmra.mrb[48].mxu0 %vm475_vm0, %v4485_v19  ;;  %v729_v19 = vld [vmem:[#allocation2 + $0x328] sm:$0xff] }
 0x180   : > { %7874 = vmatmul.mubr.msk.f32.gmra.mrb[48].mxu1 %vm475_vm0, %v697_v18  ;;  %8268 = vmatprep.mubr.msk.f32.mxu0 %vm475_vm0, %v4486_v21  ;;  %v4516_v18 = vld [vmem:[#allocation2 + $0x349] sm:$0xff] }
 0x181   : > { %7876 = vmatprep.mubr.msk.f32.mxu1 %vm475_vm0, %v698_v20  ;;  %v4517_v20 = vld [vmem:[#allocation2 + $0x351] sm:$0xff] }
 0x182   : > { %v730_v21 = vld [vmem:[#allocation2 + $0x330] sm:$0xff] }
 0x183   : > { %8269 = vmatmul.mubr.msk.f32.gmra.mrb[50].mxu0 %vm475_vm0, %v4487_v23  ;;  %v731_v23 = vld [vmem:[#allocation2 + $0x338] sm:$0xff] }
 0x184   : > { %7877 = vmatmul.mubr.msk.f32.gmra.mrb[50].mxu1 %vm475_vm0, %v699_v22  ;;  %8271 = vmatprep.mubr.msk.f32.mxu0 %vm475_vm0, %v4488_v25  ;;  %v4518_v22 = vld [vmem:[#allocation2 + $0x359] sm:$0xff]  ;;  %v732_v25 = vld [vmem:[#allocation2 + $0x348] sm:$0xff] }
 0x185   : > { %7879 = vmatprep.mubr.msk.f32.mxu1 %vm475_vm0, %v700_v24  ;;  %v4519_v24 = vld [vmem:[#allocation2 + $0x361] sm:$0xff] }
 0x187   : > { %8272 = vmatmul.mubr.msk.f32.gmra.mrb[52].mxu0 %vm475_vm0, %v4489_v27  ;;  %v733_v27 = vld [vmem:[#allocation2 + $0x350] sm:$0xff] }
 0x188   : > { %7880 = vmatmul.mubr.msk.f32.gmra.mrb[52].mxu1 %vm475_vm0, %v701_v26  ;;  %8274 = vmatprep.mubr.msk.f32.mxu0 %vm475_vm0, %v4490_v29  ;;  %v4520_v26 = vld [vmem:[#allocation2 + $0x371] sm:$0xff] }
 0x189   : > { %7882 = vmatprep.mubr.msk.f32.mxu1 %vm475_vm0, %v702_v28  ;;  %v4521_v28 = vld [vmem:[#allocation2 + $0x379] sm:$0xff] }
 0x18a   : > { %v734_v29 = vld [vmem:[#allocation2 + $0x358] sm:$0xff] }
 0x18b   : > { %8275 = vmatmul.mubr.msk.f32.gmra.mrb[54].mxu0 %vm475_vm0, %v4491_v31  ;;  %v735_v31 = vld [vmem:[#allocation2 + $0x360] sm:$0xff] }
 0x18c   : > { %7883 = vmatmul.mubr.msk.f32.gmra.mrb[54].mxu1 %vm475_vm0, %v703_v30  ;;  %8277 = vmatprep.mubr.msk.f32.mxu0 %vm475_vm0, %v4492_v33  ;;  %v4522_v30 = vld [vmem:[#allocation2 + $0x381] sm:$0xff]  ;;  %v736_v33 = vld [vmem:[#allocation2 + $0x370] sm:$0xff] }
 0x18d   : > { %7885 = vmatprep.mubr.msk.f32.mxu1 %vm475_vm0, %v704_v32  ;;  %v4523_v32 = vld [vmem:[#allocation2 + $0x389] sm:$0xff] }
 0x18f   : > { %8278 = vmatmul.mubr.msk.f32.gmra.mrb[56].mxu0 %vm475_vm0, %v4493_v35  ;;  %v737_v35 = vld [vmem:[#allocation2 + $0x378] sm:$0xff] }
 0x190   : > { %7886 = vmatmul.mubr.msk.f32.gmra.mrb[56].mxu1 %vm475_vm0, %v705_v34  ;;  %8280 = vmatprep.mubr.msk.f32.mxu0 %vm475_vm0, %v4494_v37  ;;  %v4524_v34 = vld [vmem:[#allocation2 + $0x399] sm:$0xff] }
 0x191   : > { %7888 = vmatprep.mubr.msk.f32.mxu1 %vm475_vm0, %v706_v36  ;;  %v4525_v36 = vld [vmem:[#allocation2 + $0x3a1] sm:$0xff] }
 0x192   : > { %v738_v37 = vld [vmem:[#allocation2 + $0x380] sm:$0xff] }
 0x193   : > { %8281 = vmatmul.mubr.msk.f32.gmra.mrb[58].mxu0 %vm475_vm0, %v4495_v39  ;;  %v739_v39 = vld [vmem:[#allocation2 + $0x388] sm:$0xff] }
 0x194   : > { %7889 = vmatmul.mubr.msk.f32.gmra.mrb[58].mxu1 %vm475_vm0, %v707_v38  ;;  %8283 = vmatprep.mubr.msk.f32.mxu0 %vm475_vm0, %v4496_v41  ;;  %v4526_v38 = vld [vmem:[#allocation2 + $0x3a9] sm:$0xff]  ;;  %v740_v41 = vld [vmem:[#allocation2 + $0x398] sm:$0xff] }
 0x195   : > { %7891 = vmatprep.mubr.msk.f32.mxu1 %vm475_vm0, %v708_v40  ;;  %v4527_v40 = vld [vmem:[#allocation2 + $0x3b1] sm:$0xff] }
 0x197   : > { %8284 = vmatmul.mubr.msk.f32.gmra.mrb[60].mxu0 %vm475_vm0, %v4497_v44  ;;  %v4529_v44 = vld [vmem:[#allocation2 + $0x3c9] sm:$0xff] }
 0x198   : > { %7892 = vmatmul.mubr.msk.f32.gmra.mrb[60].mxu1 %vm475_vm0, %v709_v43  ;;  %8286 = vmatprep.mubr.msk.f32.mxu0 %vm475_vm0, %v4498_v46  ;;  %v741_v43 = vld [vmem:[#allocation2 + $0x3a0] sm:$0xff]  ;;  %v4530_v46 = vld [vmem:[#allocation2 + $0x3d1] sm:$0xff] }
 0x199   : > { %7894 = vmatprep.mubr.msk.f32.mxu1 %vm475_vm0, %v710_v45  ;;  %v742_v45 = vld [vmem:[#allocation2 + $0x3a8] sm:$0xff] }
 0x19b   : > { %8287 = vmatmul.mubr.msk.f32.gmra.mrb[62].mxu0 %vm475_vm0, %v4499_v48  ;;  %v4531_v48 = vld [vmem:[#allocation2 + $0x3d9] sm:$0xff] }
 0x19c   : > { %7895 = vmatmul.mubr.msk.f32.gmra.mrb[62].mxu1 %vm475_vm0, %v711_v47  ;;  %8289 = vmatprep.mubr.msk.f32.mxu0 %vm475_vm0, %v4500_v50  ;;  %v743_v47 = vld [vmem:[#allocation2 + $0x3b0] sm:$0xff] }
 0x19d   : > { %7897 = vmatprep.mubr.msk.f32.mxu1 %vm475_vm0, %v712_v49  ;;  %v744_v49 = vld [vmem:[#allocation2 + $0x3c0] sm:$0xff]  ;;  %v4532_v50 = vld [vmem:[#allocation2 + $0x3e9] sm:$0xff] }
 0x19f   : > { %8290 = vmatmul.mubr.msk.f32.gmra.mrb[64].mxu0 %vm475_vm0, %v4501_v52  ;;  %v4533_v52 = vld [vmem:[#allocation2 + $0x3f1] sm:$0xff] }
 0x1a0   : > { %7898 = vmatmul.mubr.msk.f32.gmra.mrb[64].mxu1 %vm475_vm0, %v713_v51  ;;  %8292 = vmatprep.mubr.msk.f32.mxu0 %vm475_vm0, %v4502_v54  ;;  %v745_v51 = vld [vmem:[#allocation2 + $0x3c8] sm:$0xff]  ;;  %v4534_v54 = vld [vmem:[#allocation2 + $0x3f9] sm:$0xff] }
 0x1a1   : > { %7900 = vmatprep.mubr.msk.f32.mxu1 %vm475_vm0, %v714_v53  ;;  %v746_v53 = vld [vmem:[#allocation2 + $0x3d0] sm:$0xff] }
 0x1a3   : > { %8293 = vmatmul.mubr.msk.f32.gmra.mrb[66].mxu0 %vm475_vm0, %v4503_v56  ;;  %v4535_v56 = vld [vmem:[#allocation2 + $0x401] sm:$0xff] }
 0x1a4   : > { %7901 = vmatmul.mubr.msk.f32.gmra.mrb[66].mxu1 %vm475_vm0, %v715_v55  ;;  %8295 = vmatprep.mubr.msk.f32.mxu0 %vm475_vm0, %v4504_v58  ;;  %v747_v55 = vld [vmem:[#allocation2 + $0x3d8] sm:$0xff] }
 0x1a5   : > { %7903 = vmatprep.mubr.msk.f32.mxu1 %vm475_vm0, %v716_v57  ;;  %v748_v57 = vld [vmem:[#allocation2 + $0x3e8] sm:$0xff]  ;;  %v4536_v58 = vld [vmem:[#allocation2 + $0x411] sm:$0xff] }
 0x1a7   : > { %8296 = vmatmul.mubr.msk.f32.gmra.mrb[68].mxu0 %vm475_vm0, %v4505_v60  ;;  %v4537_v60 = vld [vmem:[#allocation2 + $0x419] sm:$0xff] }
 0x1a8   : > { %7904 = vmatmul.mubr.msk.f32.gmra.mrb[68].mxu1 %vm475_vm0, %v717_v59  ;;  %8298 = vmatprep.mubr.msk.f32.mxu0 %vm475_vm0, %v4506_v62  ;;  %v749_v59 = vld [vmem:[#allocation2 + $0x3f0] sm:$0xff]  ;;  %v4538_v62 = vld [vmem:[#allocation2 + $0x421] sm:$0xff] }
 0x1a9   : > { %7906 = vmatprep.mubr.msk.f32.mxu1 %vm475_vm0, %v718_v61  ;;  %v750_v61 = vld [vmem:[#allocation2 + $0x3f8] sm:$0xff] }
 0x1ab   : > { %8299 = vmatmul.mubr.msk.f32.gmra.mrb[70].mxu0 %vm475_vm0, %v4507_v0  ;;  %v4539_v0 = vld [vmem:[#allocation2 + $0x429] sm:$0xff] }
 0x1ac   : > { %7907 = vmatmul.mubr.msk.f32.gmra.mrb[70].mxu1 %vm475_vm0, %v719_v63  ;;  %8301 = vmatprep.mubr.msk.f32.mxu0 %vm475_vm0, %v4508_v2  ;;  %v751_v63 = vld [vmem:[#allocation2 + $0x400] sm:$0xff] }
 0x1ad   : > { %7909 = vmatprep.mubr.msk.f32.mxu1 %vm475_vm0, %v720_v1  ;;  %v752_v1 = vld [vmem:[#allocation2 + $0x410] sm:$0xff]  ;;  %v4540_v2 = vld [vmem:[#allocation2 + $0x439] sm:$0xff] }
 0x1af   : > { %8302 = vmatmul.mubr.msk.f32.gmra.mrb[72].mxu0 %vm475_vm0, %v4509_v4  ;;  %v4541_v4 = vld [vmem:[#allocation2 + $0x441] sm:$0xff] }
 0x1b0   : > { %7910 = vmatmul.mubr.msk.f32.gmra.mrb[72].mxu1 %vm475_vm0, %v721_v3  ;;  %8304 = vmatprep.mubr.msk.f32.mxu0 %vm475_vm0, %v4510_v6  ;;  %v753_v3 = vld [vmem:[#allocation2 + $0x418] sm:$0xff]  ;;  %v4542_v6 = vld [vmem:[#allocation2 + $0x449] sm:$0xff] }
 0x1b1   : > { %7912 = vmatprep.mubr.msk.f32.mxu1 %vm475_vm0, %v722_v5  ;;  %v754_v5 = vld [vmem:[#allocation2 + $0x420] sm:$0xff] }
 0x1b3   : > { %8305 = vmatmul.mubr.msk.f32.gmra.mrb[74].mxu0 %vm475_vm0, %v4511_v8  ;;  %v4543_v8 = vld [vmem:[#allocation2 + $0x451] sm:$0xff] }
 0x1b4   : > { %7913 = vmatmul.mubr.msk.f32.gmra.mrb[74].mxu1 %vm475_vm0, %v723_v7  ;;  %8307 = vmatprep.mubr.msk.f32.mxu0 %vm475_vm0, %v4512_v10  ;;  %v755_v7 = vld [vmem:[#allocation2 + $0x428] sm:$0xff] }
 0x1b5   : > { %7915 = vmatprep.mubr.msk.f32.mxu1 %vm475_vm0, %v724_v9  ;;  %v756_v9 = vld [vmem:[#allocation2 + $0x438] sm:$0xff]  ;;  %v4544_v10 = vld [vmem:[#allocation2 + $0x461] sm:$0xff] }
 0x1b7   : > { %8308 = vmatmul.mubr.msk.f32.gmra.mrb[76].mxu0 %vm475_vm0, %v4513_v12 }
 0x1b8   : > { %7916 = vmatmul.mubr.msk.f32.gmra.mrb[76].mxu1 %vm475_vm0, %v725_v11  ;;  %8310 = vmatprep.mubr.msk.f32.mxu0 %vm475_vm0, %v4514_v14 }
 0x1b9   : > { %7918 = vmatprep.mubr.msk.f32.mxu1 %vm475_vm0, %v726_v13  ;;  %v9733_v13 = vld [vmem:[%s10061_s3] ss:$0 sm:$0xff] }
 0x1bb   : > { %8311 = vmatmul.mubr.msk.f32.gmra.mrb[78].mxu0 %vm475_vm0, %v4515_v16 }
 0x1bc   : > { %7919 = vmatmul.mubr.msk.f32.gmra.mrb[78].mxu1 %vm475_vm0, %v727_v15  ;;  %8313 = vmatprep.mubr.msk.f32.mxu0 %vm475_vm0, %v4516_v18  ;;  %v757_v18 = vld [vmem:[#allocation2 + $0x440] sm:$0xff] }
 0x1bd   : > { %7921 = vmatprep.mubr.msk.f32.mxu1 %vm475_vm0, %v728_v17 }
 0x1bf   : > { %8314 = vmatmul.mubr.msk.f32.gmra.mrb[80].mxu0 %vm475_vm0, %v4517_v20 }
 0x1c0   : > { %7922 = vmatmul.mubr.msk.f32.gmra.mrb[80].mxu1 %vm475_vm0, %v729_v19  ;;  %8316 = vmatprep.mubr.msk.f32.mxu0 %vm475_vm0, %v4518_v22  ;;  %v4545_v19 = vld [vmem:[#allocation2 + $0x469] sm:$0xff]  ;;  %v4546_v22 = vld [vmem:[#allocation2 + $0x471] sm:$0xff] }
 0x1c1   : > { %7924 = vmatprep.mubr.msk.f32.mxu1 %vm475_vm0, %v730_v21  ;;  %v758_v21 = vld [vmem:[#allocation2 + $0x448] sm:$0xff] }
 0x1c3   : > { %8317 = vmatmul.mubr.msk.f32.gmra.mrb[82].mxu0 %vm475_vm0, %v4519_v24 }
 0x1c4   : > { %7925 = vmatmul.mubr.msk.f32.gmra.mrb[82].mxu1 %vm475_vm0, %v731_v23  ;;  %8319 = vmatprep.mubr.msk.f32.mxu0 %vm475_vm0, %v4520_v26 }
 0x1c5   : > { %7927 = vmatprep.mubr.msk.f32.mxu1 %vm475_vm0, %v732_v25 }
 0x1c7   : > { %8320 = vmatmul.mubr.msk.f32.gmra.mrb[84].mxu0 %vm475_vm0, %v4521_v28 }
 0x1c8   : > { %7928 = vmatmul.mubr.msk.f32.gmra.mrb[84].mxu1 %vm475_vm0, %v733_v27  ;;  %8322 = vmatprep.mubr.msk.f32.mxu0 %vm475_vm0, %v4522_v30 }
 0x1c9   : > { %7930 = vmatprep.mubr.msk.f32.mxu1 %vm475_vm0, %v734_v29 }
 0x1cb   : > { %8323 = vmatmul.mubr.msk.f32.gmra.mrb[86].mxu0 %vm475_vm0, %v4523_v32  ;;  %v759_v32 = vld [vmem:[#allocation2 + $0x450] sm:$0xff] }
 0x1cc   : > { %7931 = vmatmul.mubr.msk.f32.gmra.mrb[86].mxu1 %vm475_vm0, %v735_v31  ;;  %8325 = vmatprep.mubr.msk.f32.mxu0 %vm475_vm0, %v4524_v34 }
 0x1cd   : > { %7933 = vmatprep.mubr.msk.f32.mxu1 %vm475_vm0, %v736_v33  ;;  %v4547_v33 = vld [vmem:[#allocation2 + $0x479] sm:$0xff] }
 0x1cf   : > { %8326 = vmatmul.mubr.msk.f32.gmra.mrb[88].mxu0 %vm475_vm0, %v4525_v36  ;;  %v760_v36 = vld [vmem:[#allocation2 + $0x460] sm:$0xff] }
 0x1d0   : > { %7934 = vmatmul.mubr.msk.f32.gmra.mrb[88].mxu1 %vm475_vm0, %v737_v35  ;;  %8328 = vmatprep.mubr.msk.f32.mxu0 %vm475_vm0, %v4526_v38 }
 0x1d1   : > { %7936 = vmatprep.mubr.msk.f32.mxu1 %vm475_vm0, %v738_v37  ;;  %v4548_v37 = vld [vmem:[#allocation2 + $0x489] sm:$0xff] }
 0x1d3   : > { %8329 = vmatmul.mubr.msk.f32.gmra.mrb[90].mxu0 %vm475_vm0, %v4527_v40 }
 0x1d4   : > { %7937 = vmatmul.mubr.msk.f32.gmra.mrb[90].mxu1 %vm475_vm0, %v739_v39  ;;  %8331 = vmatprep.mubr.msk.f32.mxu0 %vm475_vm0, %v4528_v42 }
 0x1d5   : > { %7939 = vmatprep.mubr.msk.f32.mxu1 %vm475_vm0, %v740_v41 }
 0x1d7   : > { %8332 = vmatmul.mubr.msk.f32.gmra.mrb[92].mxu0 %vm475_vm0, %v4529_v44 }
 0x1d8   : > { %7940 = vmatmul.mubr.msk.f32.gmra.mrb[92].mxu1 %vm475_vm0, %v741_v43  ;;  %8334 = vmatprep.mubr.msk.f32.mxu0 %vm475_vm0, %v4530_v46 }
 0x1d9   : > { %7942 = vmatprep.mubr.msk.f32.mxu1 %vm475_vm0, %v742_v45 }
 0x1db   : > { %8335 = vmatmul.mubr.msk.f32.gmra.mrb[94].mxu0 %vm475_vm0, %v4531_v48  ;;  %v761_v48 = vld [vmem:[#allocation2 + $0x468] sm:$0xff] }
 0x1dc   : > { %7943 = vmatmul.mubr.msk.f32.gmra.mrb[94].mxu1 %vm475_vm0, %v743_v47  ;;  %8337 = vmatprep.mubr.msk.f32.mxu0 %vm475_vm0, %v4532_v50 }
 0x1dd   : > { %7945 = vmatprep.mubr.msk.f32.mxu1 %vm475_vm0, %v744_v49  ;;  %v4549_v49 = vld [vmem:[#allocation2 + $0x491] sm:$0xff] }
 0x1df   : > { %8338 = vmatmul.mubr.msk.f32.gmra.mrb[96].mxu0 %vm475_vm0, %v4533_v52  ;;  %v762_v52 = vld [vmem:[#allocation2 + $0x470] sm:$0xff] }
 0x1e0   : > { %7946 = vmatmul.mubr.msk.f32.gmra.mrb[96].mxu1 %vm475_vm0, %v745_v51  ;;  %8340 = vmatprep.mubr.msk.f32.mxu0 %vm475_vm0, %v4534_v54 }
 0x1e1   : > { %7948 = vmatprep.mubr.msk.f32.mxu1 %vm475_vm0, %v746_v53  ;;  %v4550_v53 = vld [vmem:[#allocation2 + $0x499] sm:$0xff] }
 0x1e3   : > { %8341 = vmatmul.mubr.msk.f32.gmra.mrb[98].mxu0 %vm475_vm0, %v4535_v56 }
 0x1e4   : > { %7949 = vmatmul.mubr.msk.f32.gmra.mrb[98].mxu1 %vm475_vm0, %v747_v55  ;;  %8343 = vmatprep.mubr.msk.f32.mxu0 %vm475_vm0, %v4536_v58 }
 0x1e5   : > { %7951 = vmatprep.mubr.msk.f32.mxu1 %vm475_vm0, %v748_v57 }
 0x1e7   : > { %8344 = vmatmul.mubr.msk.f32.gmra.mrb[100].mxu0 %vm475_vm0, %v4537_v60 }
 0x1e8   : > { %7952 = vmatmul.mubr.msk.f32.gmra.mrb[100].mxu1 %vm475_vm0, %v749_v59  ;;  %8346 = vmatprep.mubr.msk.f32.mxu0 %vm475_vm0, %v4538_v62 }
 0x1e9   : > { %7954 = vmatprep.mubr.msk.f32.mxu1 %vm475_vm0, %v750_v61 }
 0x1eb   : > { %8347 = vmatmul.mubr.msk.f32.gmra.mrb[102].mxu0 %vm475_vm0, %v4539_v0  ;;  %v763_v0 = vld [vmem:[#allocation2 + $0x478] sm:$0xff] }
 0x1ec   : > { %7955 = vmatmul.mubr.msk.f32.gmra.mrb[102].mxu1 %vm475_vm0, %v751_v63  ;;  %8349 = vmatprep.mubr.msk.f32.mxu0 %vm475_vm0, %v4540_v2 }
 0x1ed   : > { %7957 = vmatprep.mubr.msk.f32.mxu1 %vm475_vm0, %v752_v1  ;;  %v4551_v1 = vld [vmem:[#allocation2 + $0x4a1] sm:$0xff] }
 0x1ef   : > { %8350 = vmatmul.mubr.msk.f32.gmra.mrb[104].mxu0 %vm475_vm0, %v4541_v4  ;;  %v764_v4 = vld [vmem:[#allocation2 + $0x488] sm:$0xff] }
 0x1f0   : > { %7958 = vmatmul.mubr.msk.f32.gmra.mrb[104].mxu1 %vm475_vm0, %v753_v3  ;;  %8352 = vmatprep.mubr.msk.f32.mxu0 %vm475_vm0, %v4542_v6 }
 0x1f1   : > { %7960 = vmatprep.mubr.msk.f32.mxu1 %vm475_vm0, %v754_v5  ;;  %v4552_v5 = vld [vmem:[#allocation2 + $0x4b1] sm:$0xff] }
 0x1f2   : > { %v8195_v12 = vpop.f32.mrb[0].mxu0 }
 0x1f3   : > { %v7803_v11 = vpop.f32.mrb[0].mxu1  ;;  %v5017_v16 = vpop.f32.mrb[1].mxu0  ;;  %8353 = vmatmul.mubr.msk.f32.gmra.mrb[106].mxu0 %vm475_vm0, %v4543_v8 }
 0x1f4   : > { %v8401_v14 = vadd.f32 %v8195_v12, %v7803_v11  ;;  %v2448_v15 = vpop.f32.mrb[1].mxu1  ;;  %7961 = vmatmul.mubr.msk.f32.gmra.mrb[106].mxu1 %vm475_vm0, %v755_v7  ;;  %8355 = vmatprep.mubr.msk.f32.mxu0 %vm475_vm0, %v4544_v10 }
 0x1f5   : > { %v8402_v17 = vadd.f32 %v5017_v16, %v2448_v15  ;;  %7963 = vmatprep.mubr.msk.f32.mxu1 %vm475_vm0, %v756_v9 }
 0x1f6   : > { %v5792_v20 = vadd.f32 %v8401_v14, %v9733_v13  ;;  %v8198_v25 = vpop.f32.mrb[2].mxu0 }
 0x1f7   : > { %v5791_v23 = vadd.f32 %v8402_v17, %v9733_v13  ;;  %v7806_v24 = vpop.f32.mrb[2].mxu1  ;;  %v5027_v29 = vpop.f32.mrb[3].mxu0  ;;  %8356 = vmatmul.mubr.msk.f32.gmra.mrb[108].mxu0 %vm475_vm0, %v4545_v19  ;;  %v765_v17 = vld [vmem:[#allocation2 + $0x490] sm:$0xff] }
 0x1f8   : > { %vm5920_vm2 = vcmp.ge.f32.partialorder %v5792_v20, 0.0  ;;  %v6048_v26 = vmul.f32 0.2, %v5792_v20  ;;  %v8403_v27 = vadd.f32 %v8198_v25, %v7806_v24  ;;  %v2458_v28 = vpop.f32.mrb[3].mxu1  ;;  %7964 = vmatmul.mubr.msk.f32.gmra.mrb[108].mxu1 %vm475_vm0, %v757_v18  ;;  %8358 = vmatprep.mubr.msk.f32.mxu0 %vm475_vm0, %v4546_v22  ;;  %v4553_v18 = vld [vmem:[#allocation2 + $0x4b9] sm:$0xff]  ;;  %v4554_v22 = vld [vmem:[#allocation2 + $0x4c1] sm:$0xff] }
 0x1f9   : > { %vm5919_vm3 = vcmp.ge.f32.partialorder %v5791_v23, 0.0  ;;  %v6047_v30 = vmul.f32 0.2, %v5791_v23  ;;  %v8404_v31 = vadd.f32 %v5027_v29, %v2458_v28  ;;  %7966 = vmatprep.mubr.msk.f32.mxu1 %vm475_vm0, %v758_v21  ;;  %v766_v21 = vld [vmem:[#allocation2 + $0x498] sm:$0xff] }
 0x1fa   : > { %v6176_v34 = vsel %vm5920_vm2, %v5792_v20, %v6048_v26  ;;  %v5794_v35 = vadd.f32 %v8403_v27, %v9733_v13  ;;  %v8201_v41 = vpop.f32.mrb[4].mxu0 }
 0x1fb   : > { %6304 = vst [vmem:[%s9745_s26 + $0x8] sm:$0xff] %v6176_v34  ;;  %v6175_v38 = vsel %vm5919_vm3, %v5791_v23, %v6047_v30  ;;  %v5793_v39 = vadd.f32 %v8404_v31, %v9733_v13  ;;  %v7809_v40 = vpop.f32.mrb[4].mxu1  ;;  %v5037_v45 = vpop.f32.mrb[5].mxu0  ;;  %8359 = vmatmul.mubr.msk.f32.gmra.mrb[110].mxu0 %vm475_vm0, %v4547_v33  ;;  %v767_v33 = vld [vmem:[#allocation2 + $0x4a0] sm:$0xff]  ;;  %v4555_v34 = vld [vmem:[#allocation2 + $0x4c9] sm:$0xff] }
 0x1fc   : > { %6303 = vst [vmem:[%s9745_s26] sm:$0xff] %v6175_v38  ;;  %vm5922_vm4 = vcmp.ge.f32.partialorder %v5794_v35, 0.0  ;;  %v6050_v42 = vmul.f32 0.2, %v5794_v35  ;;  %v8405_v43 = vadd.f32 %v8201_v41, %v7809_v40  ;;  %v2468_v44 = vpop.f32.mrb[5].mxu1  ;;  %7967 = vmatmul.mubr.msk.f32.gmra.mrb[110].mxu1 %vm475_vm0, %v759_v32  ;;  %8361 = vmatprep.mubr.msk.f32.mxu0 %vm475_vm0, %v4548_v37  ;;  %v768_v37 = vld [vmem:[#allocation2 + $0x4b0] sm:$0xff]  ;;  %v4556_v38 = vld [vmem:[#allocation2 + $0x4d9] sm:$0xff] }
 0x1fd   : > { %vm5921_vm5 = vcmp.ge.f32.partialorder %v5793_v39, 0.0  ;;  %v6049_v46 = vmul.f32 0.2, %v5793_v39  ;;  %v8406_v47 = vadd.f32 %v5037_v45, %v2468_v44  ;;  %7969 = vmatprep.mubr.msk.f32.mxu1 %vm475_vm0, %v760_v36 }
 0x1fe   : > { %v6178_v50 = vsel %vm5922_vm4, %v5794_v35, %v6050_v42  ;;  %v5796_v51 = vadd.f32 %v8405_v43, %v9733_v13  ;;  %v8204_v57 = vpop.f32.mrb[6].mxu0 }
 0x1ff   : > { %6306 = vst [vmem:[%s9745_s26 + $0x18] sm:$0xff] %v6178_v50  ;;  %v6177_v54 = vsel %vm5921_vm5, %v5793_v39, %v6049_v46  ;;  %v5795_v55 = vadd.f32 %v8406_v47, %v9733_v13  ;;  %v7812_v56 = vpop.f32.mrb[6].mxu1  ;;  %v5047_v61 = vpop.f32.mrb[7].mxu0  ;;  %8362 = vmatmul.mubr.msk.f32.gmra.mrb[112].mxu0 %vm475_vm0, %v4549_v49  ;;  %v769_v49 = vld [vmem:[#allocation2 + $0x4b8] sm:$0xff]  ;;  %v4557_v50 = vld [vmem:[#allocation2 + $0x4e1] sm:$0xff] }
 0x200   : > { %6305 = vst [vmem:[%s9745_s26 + $0x10] sm:$0xff] %v6177_v54  ;;  %vm5924_vm6 = vcmp.ge.f32.partialorder %v5796_v51, 0.0  ;;  %v6052_v58 = vmul.f32 0.2, %v5796_v51  ;;  %v8407_v59 = vadd.f32 %v8204_v57, %v7812_v56  ;;  %v2478_v60 = vpop.f32.mrb[7].mxu1  ;;  %7970 = vmatmul.mubr.msk.f32.gmra.mrb[112].mxu1 %vm475_vm0, %v761_v48  ;;  %8364 = vmatprep.mubr.msk.f32.mxu0 %vm475_vm0, %v4550_v53  ;;  %v770_v53 = vld [vmem:[#allocation2 + $0x4c0] sm:$0xff] }
 0x201   : > { %vm5923_vm7 = vcmp.ge.f32.partialorder %v5795_v55, 0.0  ;;  %v6051_v62 = vmul.f32 0.2, %v5795_v55  ;;  %v8408_v63 = vadd.f32 %v5047_v61, %v2478_v60  ;;  %7972 = vmatprep.mubr.msk.f32.mxu1 %vm475_vm0, %v762_v52  ;;  %v4558_v54 = vld [vmem:[#allocation2 + $0x4e9] sm:$0xff] }
 0x202   : > { %v6180_v2 = vsel %vm5924_vm6, %v5796_v51, %v6052_v58  ;;  %v5798_v3 = vadd.f32 %v8407_v59, %v9733_v13  ;;  %v8207_v9 = vpop.f32.mrb[8].mxu0 }
 0x203   : > { %6308 = vst [vmem:[%s9745_s26 + $0x28] sm:$0xff] %v6180_v2  ;;  %v6179_v6 = vsel %vm5923_vm7, %v5795_v55, %v6051_v62  ;;  %v5797_v7 = vadd.f32 %v8408_v63, %v9733_v13  ;;  %v7815_v8 = vpop.f32.mrb[8].mxu1  ;;  %v5057_v14 = vpop.f32.mrb[9].mxu0  ;;  %8365 = vmatmul.mubr.msk.f32.gmra.mrb[114].mxu0 %vm475_vm0, %v4551_v1  ;;  %v771_v1 = vld [vmem:[#allocation2 + $0x4c8] sm:$0xff]  ;;  %v4559_v2 = vld [vmem:[#allocation2 + $0x4f1] sm:$0xff] }
 0x204   : > { %6307 = vst [vmem:[%s9745_s26 + $0x20] sm:$0xff] %v6179_v6  ;;  %vm5926_vm8 = vcmp.ge.f32.partialorder %v5798_v3, 0.0  ;;  %v6054_v10 = vmul.f32 0.2, %v5798_v3  ;;  %v8409_v11 = vadd.f32 %v8207_v9, %v7815_v8  ;;  %v2488_v12 = vpop.f32.mrb[9].mxu1  ;;  %7973 = vmatmul.mubr.msk.f32.gmra.mrb[114].mxu1 %vm475_vm0, %v763_v0  ;;  %8367 = vmatprep.mubr.msk.f32.mxu0 %vm475_vm0, %v4552_v5  ;;  %v772_v5 = vld [vmem:[#allocation2 + $0x4d8] sm:$0xff] }
 0x205   : > { %vm5925_vm9 = vcmp.ge.f32.partialorder %v5797_v7, 0.0  ;;  %v6053_v15 = vmul.f32 0.2, %v5797_v7  ;;  %v8410_v16 = vadd.f32 %v5057_v14, %v2488_v12  ;;  %7975 = vmatprep.mubr.msk.f32.mxu1 %vm475_vm0, %v764_v4  ;;  %v4560_v6 = vld [vmem:[#allocation2 + $0x501] sm:$0xff] }
 0x206   : > { %v6182_v19 = vsel %vm5926_vm8, %v5798_v3, %v6054_v10  ;;  %v5800_v20 = vadd.f32 %v8409_v11, %v9733_v13  ;;  %v8210_v26 = vpop.f32.mrb[10].mxu0 }
 0x207   : > { %6310 = vst [vmem:[%s9745_s26 + $0x38] sm:$0xff] %v6182_v19  ;;  %v6181_v23 = vsel %vm5925_vm9, %v5797_v7, %v6053_v15  ;;  %v5799_v24 = vadd.f32 %v8410_v16, %v9733_v13  ;;  %v7818_v25 = vpop.f32.mrb[10].mxu1  ;;  %v5067_v30 = vpop.f32.mrb[11].mxu0  ;;  %8368 = vmatmul.mubr.msk.f32.gmra.mrb[116].mxu0 %vm475_vm0, %v4553_v18  ;;  %v773_v18 = vld [vmem:[#allocation2 + $0x4e0] sm:$0xff]  ;;  %v4561_v19 = vld [vmem:[#allocation2 + $0x509] sm:$0xff] }
 0x208   : > { %6309 = vst [vmem:[%s9745_s26 + $0x30] sm:$0xff] %v6181_v23  ;;  %vm5928_vm10 = vcmp.ge.f32.partialorder %v5800_v20, 0.0  ;;  %v6056_v27 = vmul.f32 0.2, %v5800_v20  ;;  %v8411_v28 = vadd.f32 %v8210_v26, %v7818_v25  ;;  %v2498_v29 = vpop.f32.mrb[11].mxu1  ;;  %7976 = vmatmul.mubr.msk.f32.gmra.mrb[116].mxu1 %vm475_vm0, %v765_v17  ;;  %8370 = vmatprep.mubr.msk.f32.mxu0 %vm475_vm0, %v4554_v22  ;;  %v774_v22 = vld [vmem:[#allocation2 + $0x4e8] sm:$0xff] }
 0x209   : > { %vm5927_vm11 = vcmp.ge.f32.partialorder %v5799_v24, 0.0  ;;  %v6055_v31 = vmul.f32 0.2, %v5799_v24  ;;  %v8412_v32 = vadd.f32 %v5067_v30, %v2498_v29  ;;  %7978 = vmatprep.mubr.msk.f32.mxu1 %vm475_vm0, %v766_v21  ;;  %v4562_v23 = vld [vmem:[#allocation2 + $0x511] sm:$0xff] }
 0x20a   : > { %v6184_v35 = vsel %vm5928_vm10, %v5800_v20, %v6056_v27  ;;  %v5802_v36 = vadd.f32 %v8411_v28, %v9733_v13  ;;  %v8213_v42 = vpop.f32.mrb[12].mxu0 }
 0x20b   : > { %6312 = vst [vmem:[%s9745_s26 + $0x48] sm:$0xff] %v6184_v35  ;;  %v6183_v39 = vsel %vm5927_vm11, %v5799_v24, %v6055_v31  ;;  %v5801_v40 = vadd.f32 %v8412_v32, %v9733_v13  ;;  %v7821_v41 = vpop.f32.mrb[12].mxu1  ;;  %v5077_v46 = vpop.f32.mrb[13].mxu0  ;;  %8371 = vmatmul.mubr.msk.f32.gmra.mrb[118].mxu0 %vm475_vm0, %v4555_v34  ;;  %v775_v34 = vld [vmem:[#allocation2 + $0x4f0] sm:$0xff]  ;;  %v4563_v35 = vld [vmem:[#allocation2 + $0x519] sm:$0xff] }
 0x20c   : > { %6311 = vst [vmem:[%s9745_s26 + $0x40] sm:$0xff] %v6183_v39  ;;  %vm5930_vm12 = vcmp.ge.f32.partialorder %v5802_v36, 0.0  ;;  %v6058_v43 = vmul.f32 0.2, %v5802_v36  ;;  %v8413_v44 = vadd.f32 %v8213_v42, %v7821_v41  ;;  %v2508_v45 = vpop.f32.mrb[13].mxu1  ;;  %7979 = vmatmul.mubr.msk.f32.gmra.mrb[118].mxu1 %vm475_vm0, %v767_v33  ;;  %8373 = vmatprep.mubr.msk.f32.mxu0 %vm475_vm0, %v4556_v38 }
 0x20d   : > { %vm5929_vm13 = vcmp.ge.f32.partialorder %v5801_v40, 0.0  ;;  %v6057_v47 = vmul.f32 0.2, %v5801_v40  ;;  %v8414_v48 = vadd.f32 %v5077_v46, %v2508_v45  ;;  %7981 = vmatprep.mubr.msk.f32.mxu1 %vm475_vm0, %v768_v37 }
 0x20e   : > { %v6186_v51 = vsel %vm5930_vm12, %v5802_v36, %v6058_v43  ;;  %v5804_v52 = vadd.f32 %v8413_v44, %v9733_v13  ;;  %v8216_v58 = vpop.f32.mrb[14].mxu0 }
 0x20f   : > { %6314 = vst [vmem:[%s9745_s26 + $0x58] sm:$0xff] %v6186_v51  ;;  %v6185_v55 = vsel %vm5929_vm13, %v5801_v40, %v6057_v47  ;;  %v5803_v56 = vadd.f32 %v8414_v48, %v9733_v13  ;;  %v7824_v57 = vpop.f32.mrb[14].mxu1  ;;  %v5087_v62 = vpop.f32.mrb[15].mxu0  ;;  %8374 = vmatmul.mubr.msk.f32.gmra.mrb[120].mxu0 %vm475_vm0, %v4557_v50 }
 0x210   : > { %6313 = vst [vmem:[%s9745_s26 + $0x50] sm:$0xff] %v6185_v55  ;;  %vm5932_vm14 = vcmp.ge.f32.partialorder %v5804_v52, 0.0  ;;  %v6060_v59 = vmul.f32 0.2, %v5804_v52  ;;  %v8415_v60 = vadd.f32 %v8216_v58, %v7824_v57  ;;  %v2518_v61 = vpop.f32.mrb[15].mxu1  ;;  %7982 = vmatmul.mubr.msk.f32.gmra.mrb[120].mxu1 %vm475_vm0, %v769_v49  ;;  %8376 = vmatprep.mubr.msk.f32.mxu0 %vm475_vm0, %v4558_v54 }
 0x211   : > { %vm5931_vm15 = vcmp.ge.f32.partialorder %v5803_v56, 0.0  ;;  %v6059_v63 = vmul.f32 0.2, %v5803_v56  ;;  %v8416_v0 = vadd.f32 %v5087_v62, %v2518_v61  ;;  %7984 = vmatprep.mubr.msk.f32.mxu1 %vm475_vm0, %v770_v53 }
 0x212   : > { %v6188_v3 = vsel %vm5932_vm14, %v5804_v52, %v6060_v59  ;;  %v5806_v4 = vadd.f32 %v8415_v60, %v9733_v13  ;;  %v8219_v10 = vpop.f32.mrb[16].mxu0 }
 0x213   : > { %6316 = vst [vmem:[%s9745_s26 + $0x68] sm:$0xff] %v6188_v3  ;;  %v6187_v7 = vsel %vm5931_vm15, %v5803_v56, %v6059_v63  ;;  %v5805_v8 = vadd.f32 %v8416_v0, %v9733_v13  ;;  %v7827_v9 = vpop.f32.mrb[16].mxu1  ;;  %v5097_v15 = vpop.f32.mrb[17].mxu0  ;;  %8377 = vmatmul.mubr.msk.f32.gmra.mrb[122].mxu0 %vm475_vm0, %v4559_v2 }
 0x214   : > { %6315 = vst [vmem:[%s9745_s26 + $0x60] sm:$0xff] %v6187_v7  ;;  %vm5934_vm1 = vcmp.ge.f32.partialorder %v5806_v4, 0.0  ;;  %v6062_v11 = vmul.f32 0.2, %v5806_v4  ;;  %v8417_v12 = vadd.f32 %v8219_v10, %v7827_v9  ;;  %v2528_v14 = vpop.f32.mrb[17].mxu1  ;;  %7985 = vmatmul.mubr.msk.f32.gmra.mrb[122].mxu1 %vm475_vm0, %v771_v1  ;;  %8379 = vmatprep.mubr.msk.f32.mxu0 %vm475_vm0, %v4560_v6 }
 0x215   : > { %vm5933_vm2 = vcmp.ge.f32.partialorder %v5805_v8, 0.0  ;;  %v6061_v16 = vmul.f32 0.2, %v5805_v8  ;;  %v8418_v17 = vadd.f32 %v5097_v15, %v2528_v14  ;;  %7987 = vmatprep.mubr.msk.f32.mxu1 %vm475_vm0, %v772_v5 }
 0x216   : > { %v6190_v20 = vsel %vm5934_vm1, %v5806_v4, %v6062_v11  ;;  %v5808_v21 = vadd.f32 %v8417_v12, %v9733_v13  ;;  %v8222_v27 = vpop.f32.mrb[18].mxu0 }
 0x217   : > { %6318 = vst [vmem:[%s9745_s26 + $0x78] sm:$0xff] %v6190_v20  ;;  %v6189_v24 = vsel %vm5933_vm2, %v5805_v8, %v6061_v16  ;;  %v5807_v25 = vadd.f32 %v8418_v17, %v9733_v13  ;;  %v7830_v26 = vpop.f32.mrb[18].mxu1  ;;  %v5107_v31 = vpop.f32.mrb[19].mxu0  ;;  %8380 = vmatmul.mubr.msk.f32.gmra.mrb[124].mxu0 %vm475_vm0, %v4561_v19 }
 0x218   : > { %6317 = vst [vmem:[%s9745_s26 + $0x70] sm:$0xff] %v6189_v24  ;;  %vm5936_vm3 = vcmp.ge.f32.partialorder %v5808_v21, 0.0  ;;  %v6064_v28 = vmul.f32 0.2, %v5808_v21  ;;  %v8419_v29 = vadd.f32 %v8222_v27, %v7830_v26  ;;  %v2538_v30 = vpop.f32.mrb[19].mxu1  ;;  %7988 = vmatmul.mubr.msk.f32.gmra.mrb[124].mxu1 %vm475_vm0, %v773_v18  ;;  %8382 = vmatprep.mubr.msk.f32.mxu0 %vm475_vm0, %v4562_v23 }
 0x219   : > { %vm5935_vm4 = vcmp.ge.f32.partialorder %v5807_v25, 0.0  ;;  %v6063_v32 = vmul.f32 0.2, %v5807_v25  ;;  %v8420_v33 = vadd.f32 %v5107_v31, %v2538_v30  ;;  %7990 = vmatprep.mubr.msk.f32.mxu1 %vm475_vm0, %v774_v22 }
 0x21a   : > { %v6192_v36 = vsel %vm5936_vm3, %v5808_v21, %v6064_v28  ;;  %v5810_v37 = vadd.f32 %v8419_v29, %v9733_v13  ;;  %v8225_v41 = vpop.f32.mrb[20].mxu0 }
 0x21b   : > { %6320 = vst [vmem:[%s9745_s26 + $0x88] sm:$0xff] %v6192_v36  ;;  %v6191_v38 = vsel %vm5935_vm4, %v5807_v25, %v6063_v32  ;;  %v5809_v39 = vadd.f32 %v8420_v33, %v9733_v13  ;;  %v7833_v40 = vpop.f32.mrb[20].mxu1  ;;  %v5117_v45 = vpop.f32.mrb[21].mxu0  ;;  %8383 = vmatmul.mubr.msk.f32.gmra.mrb[126].mxu0 %vm475_vm0, %v4563_v35 }
 0x21c   : > { %6319 = vst [vmem:[%s9745_s26 + $0x80] sm:$0xff] %v6191_v38  ;;  %vm5938_vm5 = vcmp.ge.f32.partialorder %v5810_v37, 0.0  ;;  %v6066_v42 = vmul.f32 0.2, %v5810_v37  ;;  %v8421_v43 = vadd.f32 %v8225_v41, %v7833_v40  ;;  %v2548_v44 = vpop.f32.mrb[21].mxu1  ;;  %7991 = vmatmul.mubr.msk.f32.gmra.mrb[126].mxu1 %vm475_vm0, %v775_v34 }
 0x21d   : > { %vm5937_vm6 = vcmp.ge.f32.partialorder %v5809_v39, 0.0  ;;  %v6065_v46 = vmul.f32 0.2, %v5809_v39  ;;  %v8422_v47 = vadd.f32 %v5117_v45, %v2548_v44 }
 0x21e   : > { %v6194_v48 = vsel %vm5938_vm5, %v5810_v37, %v6066_v42  ;;  %v5812_v49 = vadd.f32 %v8421_v43, %v9733_v13  ;;  %v8228_v53 = vpop.f32.mrb[22].mxu0 }
 0x21f   : > { %6322 = vst [vmem:[%s9745_s26 + $0x98] sm:$0xff] %v6194_v48  ;;  %v6193_v50 = vsel %vm5937_vm6, %v5809_v39, %v6065_v46  ;;  %v5811_v51 = vadd.f32 %v8422_v47, %v9733_v13  ;;  %v7836_v52 = vpop.f32.mrb[22].mxu1  ;;  %v5127_v57 = vpop.f32.mrb[23].mxu0 }
 0x220   : > { %6321 = vst [vmem:[%s9745_s26 + $0x90] sm:$0xff] %v6193_v50  ;;  %vm5940_vm7 = vcmp.ge.f32.partialorder %v5812_v49, 0.0  ;;  %v6068_v54 = vmul.f32 0.2, %v5812_v49  ;;  %v8423_v55 = vadd.f32 %v8228_v53, %v7836_v52  ;;  %v2558_v56 = vpop.f32.mrb[23].mxu1 }
 0x221   : > { %vm5939_vm0 = vcmp.ge.f32.partialorder %v5811_v51, 0.0  ;;  %v6067_v58 = vmul.f32 0.2, %v5811_v51  ;;  %v8424_v59 = vadd.f32 %v5127_v57, %v2558_v56 }
 0x222   : > { %v6196_v60 = vsel %vm5940_vm7, %v5812_v49, %v6068_v54  ;;  %v5814_v61 = vadd.f32 %v8423_v55, %v9733_v13  ;;  %v8231_v1 = vpop.f32.mrb[24].mxu0 }
 0x223   : > { %6324 = vst [vmem:[%s9745_s26 + $0xa8] sm:$0xff] %v6196_v60  ;;  %v6195_v62 = vsel %vm5939_vm0, %v5811_v51, %v6067_v58  ;;  %v5813_v63 = vadd.f32 %v8424_v59, %v9733_v13  ;;  %v7839_v0 = vpop.f32.mrb[24].mxu1  ;;  %v5137_v5 = vpop.f32.mrb[25].mxu0 }
 0x224   : > { %6323 = vst [vmem:[%s9745_s26 + $0xa0] sm:$0xff] %v6195_v62  ;;  %vm5942_vm8 = vcmp.ge.f32.partialorder %v5814_v61, 0.0  ;;  %v6070_v2 = vmul.f32 0.2, %v5814_v61  ;;  %v8425_v3 = vadd.f32 %v8231_v1, %v7839_v0  ;;  %v2568_v4 = vpop.f32.mrb[25].mxu1 }
 0x225   : > { %vm5941_vm9 = vcmp.ge.f32.partialorder %v5813_v63, 0.0  ;;  %v6069_v6 = vmul.f32 0.2, %v5813_v63  ;;  %v8426_v7 = vadd.f32 %v5137_v5, %v2568_v4 }
 0x226   : > { %v6198_v8 = vsel %vm5942_vm8, %v5814_v61, %v6070_v2  ;;  %v5816_v9 = vadd.f32 %v8425_v3, %v9733_v13  ;;  %v8234_v14 = vpop.f32.mrb[26].mxu0 }
 0x227   : > { %6326 = vst [vmem:[%s9745_s26 + $0xb8] sm:$0xff] %v6198_v8  ;;  %v6197_v10 = vsel %vm5941_vm9, %v5813_v63, %v6069_v6  ;;  %v5815_v11 = vadd.f32 %v8426_v7, %v9733_v13  ;;  %v7842_v12 = vpop.f32.mrb[26].mxu1  ;;  %v5147_v18 = vpop.f32.mrb[27].mxu0 }
 0x228   : > { %6325 = vst [vmem:[%s9745_s26 + $0xb0] sm:$0xff] %v6197_v10  ;;  %vm5944_vm10 = vcmp.ge.f32.partialorder %v5816_v9, 0.0  ;;  %v6072_v15 = vmul.f32 0.2, %v5816_v9  ;;  %v8427_v16 = vadd.f32 %v8234_v14, %v7842_v12  ;;  %v2578_v17 = vpop.f32.mrb[27].mxu1 }
 0x229   : > { %vm5943_vm11 = vcmp.ge.f32.partialorder %v5815_v11, 0.0  ;;  %v6071_v19 = vmul.f32 0.2, %v5815_v11  ;;  %v8428_v20 = vadd.f32 %v5147_v18, %v2578_v17 }
 0x22a   : > { %v6200_v21 = vsel %vm5944_vm10, %v5816_v9, %v6072_v15  ;;  %v5818_v22 = vadd.f32 %v8427_v16, %v9733_v13  ;;  %v8237_v26 = vpop.f32.mrb[28].mxu0 }
 0x22b   : > { %6328 = vst [vmem:[%s9745_s26 + $0xc8] sm:$0xff] %v6200_v21  ;;  %v6199_v23 = vsel %vm5943_vm11, %v5815_v11, %v6071_v19  ;;  %v5817_v24 = vadd.f32 %v8428_v20, %v9733_v13  ;;  %v7845_v25 = vpop.f32.mrb[28].mxu1  ;;  %v5157_v30 = vpop.f32.mrb[29].mxu0 }
 0x22c   : > { %6327 = vst [vmem:[%s9745_s26 + $0xc0] sm:$0xff] %v6199_v23  ;;  %vm5946_vm12 = vcmp.ge.f32.partialorder %v5818_v22, 0.0  ;;  %v6074_v27 = vmul.f32 0.2, %v5818_v22  ;;  %v8429_v28 = vadd.f32 %v8237_v26, %v7845_v25  ;;  %v2588_v29 = vpop.f32.mrb[29].mxu1 }
 0x22d   : > { %vm5945_vm13 = vcmp.ge.f32.partialorder %v5817_v24, 0.0  ;;  %v6073_v31 = vmul.f32 0.2, %v5817_v24  ;;  %v8430_v32 = vadd.f32 %v5157_v30, %v2588_v29 }
 0x22e   : > { %v6202_v33 = vsel %vm5946_vm12, %v5818_v22, %v6074_v27  ;;  %v5820_v34 = vadd.f32 %v8429_v28, %v9733_v13  ;;  %v8240_v38 = vpop.f32.mrb[30].mxu0 }
 0x22f   : > { %6330 = vst [vmem:[%s9745_s26 + $0xd8] sm:$0xff] %v6202_v33  ;;  %v6201_v35 = vsel %vm5945_vm13, %v5817_v24, %v6073_v31  ;;  %v5819_v36 = vadd.f32 %v8430_v32, %v9733_v13  ;;  %v7848_v37 = vpop.f32.mrb[30].mxu1  ;;  %v5167_v42 = vpop.f32.mrb[31].mxu0 }
 0x230   : > { %6329 = vst [vmem:[%s9745_s26 + $0xd0] sm:$0xff] %v6201_v35  ;;  %vm5948_vm14 = vcmp.ge.f32.partialorder %v5820_v34, 0.0  ;;  %v6076_v39 = vmul.f32 0.2, %v5820_v34  ;;  %v8431_v40 = vadd.f32 %v8240_v38, %v7848_v37  ;;  %v2598_v41 = vpop.f32.mrb[31].mxu1 }
 0x231   : > { %vm5947_vm15 = vcmp.ge.f32.partialorder %v5819_v36, 0.0  ;;  %v6075_v43 = vmul.f32 0.2, %v5819_v36  ;;  %v8432_v44 = vadd.f32 %v5167_v42, %v2598_v41 }
 0x232   : > { %v6204_v45 = vsel %vm5948_vm14, %v5820_v34, %v6076_v39  ;;  %v5822_v46 = vadd.f32 %v8431_v40, %v9733_v13  ;;  %v8243_v50 = vpop.f32.mrb[32].mxu0 }
 0x233   : > { %6332 = vst [vmem:[%s9745_s26 + $0xe8] sm:$0xff] %v6204_v45  ;;  %v6203_v47 = vsel %vm5947_vm15, %v5819_v36, %v6075_v43  ;;  %v5821_v48 = vadd.f32 %v8432_v44, %v9733_v13  ;;  %v7851_v49 = vpop.f32.mrb[32].mxu1  ;;  %v5177_v54 = vpop.f32.mrb[33].mxu0 }
 0x234   : > { %6331 = vst [vmem:[%s9745_s26 + $0xe0] sm:$0xff] %v6203_v47  ;;  %vm5950_vm1 = vcmp.ge.f32.partialorder %v5822_v46, 0.0  ;;  %v6078_v51 = vmul.f32 0.2, %v5822_v46  ;;  %v8433_v52 = vadd.f32 %v8243_v50, %v7851_v49  ;;  %v2608_v53 = vpop.f32.mrb[33].mxu1 }
 0x235   : > { %vm5949_vm2 = vcmp.ge.f32.partialorder %v5821_v48, 0.0  ;;  %v6077_v55 = vmul.f32 0.2, %v5821_v48  ;;  %v8434_v56 = vadd.f32 %v5177_v54, %v2608_v53 }
 0x236   : > { %v6206_v57 = vsel %vm5950_vm1, %v5822_v46, %v6078_v51  ;;  %v5824_v58 = vadd.f32 %v8433_v52, %v9733_v13  ;;  %v8246_v62 = vpop.f32.mrb[34].mxu0 }
 0x237   : > { %6334 = vst [vmem:[%s9745_s26 + $0xf8] sm:$0xff] %v6206_v57  ;;  %v6205_v59 = vsel %vm5949_vm2, %v5821_v48, %v6077_v55  ;;  %v5823_v60 = vadd.f32 %v8434_v56, %v9733_v13  ;;  %v7854_v61 = vpop.f32.mrb[34].mxu1  ;;  %v5187_v2 = vpop.f32.mrb[35].mxu0 }
 0x238   : > { %6333 = vst [vmem:[%s9745_s26 + $0xf0] sm:$0xff] %v6205_v59  ;;  %vm5952_vm3 = vcmp.ge.f32.partialorder %v5824_v58, 0.0  ;;  %v6080_v63 = vmul.f32 0.2, %v5824_v58  ;;  %v8435_v0 = vadd.f32 %v8246_v62, %v7854_v61  ;;  %v2618_v1 = vpop.f32.mrb[35].mxu1 }
 0x239   : > { %vm5951_vm4 = vcmp.ge.f32.partialorder %v5823_v60, 0.0  ;;  %v6079_v3 = vmul.f32 0.2, %v5823_v60  ;;  %v8436_v4 = vadd.f32 %v5187_v2, %v2618_v1 }
 0x23a   : > { %v6208_v5 = vsel %vm5952_vm3, %v5824_v58, %v6080_v63  ;;  %v5826_v6 = vadd.f32 %v8435_v0, %v9733_v13  ;;  %v8249_v10 = vpop.f32.mrb[36].mxu0 }
 0x23b   : > { %6336 = vst [vmem:[%s9745_s26 + $0x108] sm:$0xff] %v6208_v5  ;;  %v6207_v7 = vsel %vm5951_vm4, %v5823_v60, %v6079_v3  ;;  %v5825_v8 = vadd.f32 %v8436_v4, %v9733_v13  ;;  %v7857_v9 = vpop.f32.mrb[36].mxu1  ;;  %v5197_v15 = vpop.f32.mrb[37].mxu0 }
 0x23c   : > { %6335 = vst [vmem:[%s9745_s26 + $0x100] sm:$0xff] %v6207_v7  ;;  %vm5954_vm5 = vcmp.ge.f32.partialorder %v5826_v6, 0.0  ;;  %v6082_v11 = vmul.f32 0.2, %v5826_v6  ;;  %v8437_v12 = vadd.f32 %v8249_v10, %v7857_v9  ;;  %v2628_v14 = vpop.f32.mrb[37].mxu1 }
 0x23d   : > { %vm5953_vm6 = vcmp.ge.f32.partialorder %v5825_v8, 0.0  ;;  %v6081_v16 = vmul.f32 0.2, %v5825_v8  ;;  %v8438_v17 = vadd.f32 %v5197_v15, %v2628_v14 }
 0x23e   : > { %v6210_v18 = vsel %vm5954_vm5, %v5826_v6, %v6082_v11  ;;  %v5828_v19 = vadd.f32 %v8437_v12, %v9733_v13  ;;  %v8252_v23 = vpop.f32.mrb[38].mxu0 }
 0x23f   : > { %6338 = vst [vmem:[%s9745_s26 + $0x118] sm:$0xff] %v6210_v18  ;;  %v6209_v20 = vsel %vm5953_vm6, %v5825_v8, %v6081_v16  ;;  %v5827_v21 = vadd.f32 %v8438_v17, %v9733_v13  ;;  %v7860_v22 = vpop.f32.mrb[38].mxu1  ;;  %v5207_v27 = vpop.f32.mrb[39].mxu0 }
 0x240   : > { %6337 = vst [vmem:[%s9745_s26 + $0x110] sm:$0xff] %v6209_v20  ;;  %vm5956_vm7 = vcmp.ge.f32.partialorder %v5828_v19, 0.0  ;;  %v6084_v24 = vmul.f32 0.2, %v5828_v19  ;;  %v8439_v25 = vadd.f32 %v8252_v23, %v7860_v22  ;;  %v2638_v26 = vpop.f32.mrb[39].mxu1 }
 0x241   : > { %vm5955_vm0 = vcmp.ge.f32.partialorder %v5827_v21, 0.0  ;;  %v6083_v28 = vmul.f32 0.2, %v5827_v21  ;;  %v8440_v29 = vadd.f32 %v5207_v27, %v2638_v26 }
 0x242   : > { %v6212_v30 = vsel %vm5956_vm7, %v5828_v19, %v6084_v24  ;;  %v5830_v31 = vadd.f32 %v8439_v25, %v9733_v13  ;;  %v8255_v35 = vpop.f32.mrb[40].mxu0 }
 0x243   : > { %6340 = vst [vmem:[%s9745_s26 + $0x128] sm:$0xff] %v6212_v30  ;;  %v6211_v32 = vsel %vm5955_vm0, %v5827_v21, %v6083_v28  ;;  %v5829_v33 = vadd.f32 %v8440_v29, %v9733_v13  ;;  %v7863_v34 = vpop.f32.mrb[40].mxu1  ;;  %v5217_v39 = vpop.f32.mrb[41].mxu0 }
 0x244   : > { %6339 = vst [vmem:[%s9745_s26 + $0x120] sm:$0xff] %v6211_v32  ;;  %vm5958_vm8 = vcmp.ge.f32.partialorder %v5830_v31, 0.0  ;;  %v6086_v36 = vmul.f32 0.2, %v5830_v31  ;;  %v8441_v37 = vadd.f32 %v8255_v35, %v7863_v34  ;;  %v2648_v38 = vpop.f32.mrb[41].mxu1 }
 0x245   : > { %vm5957_vm9 = vcmp.ge.f32.partialorder %v5829_v33, 0.0  ;;  %v6085_v40 = vmul.f32 0.2, %v5829_v33  ;;  %v8442_v41 = vadd.f32 %v5217_v39, %v2648_v38 }
 0x246   : > { %v6214_v42 = vsel %vm5958_vm8, %v5830_v31, %v6086_v36  ;;  %v5832_v43 = vadd.f32 %v8441_v37, %v9733_v13  ;;  %v8258_v47 = vpop.f32.mrb[42].mxu0 }
 0x247   : > { %6342 = vst [vmem:[%s9745_s26 + $0x138] sm:$0xff] %v6214_v42  ;;  %v6213_v44 = vsel %vm5957_vm9, %v5829_v33, %v6085_v40  ;;  %v5831_v45 = vadd.f32 %v8442_v41, %v9733_v13  ;;  %v7866_v46 = vpop.f32.mrb[42].mxu1  ;;  %v5227_v51 = vpop.f32.mrb[43].mxu0 }
 0x248   : > { %6341 = vst [vmem:[%s9745_s26 + $0x130] sm:$0xff] %v6213_v44  ;;  %vm5960_vm10 = vcmp.ge.f32.partialorder %v5832_v43, 0.0  ;;  %v6088_v48 = vmul.f32 0.2, %v5832_v43  ;;  %v8443_v49 = vadd.f32 %v8258_v47, %v7866_v46  ;;  %v2658_v50 = vpop.f32.mrb[43].mxu1 }
 0x249   : > { %vm5959_vm11 = vcmp.ge.f32.partialorder %v5831_v45, 0.0  ;;  %v6087_v52 = vmul.f32 0.2, %v5831_v45  ;;  %v8444_v53 = vadd.f32 %v5227_v51, %v2658_v50 }
 0x24a   : > { %v6216_v54 = vsel %vm5960_vm10, %v5832_v43, %v6088_v48  ;;  %v5834_v55 = vadd.f32 %v8443_v49, %v9733_v13  ;;  %v8261_v59 = vpop.f32.mrb[44].mxu0 }
 0x24b   : > { %6344 = vst [vmem:[%s9745_s26 + $0x148] sm:$0xff] %v6216_v54  ;;  %v6215_v56 = vsel %vm5959_vm11, %v5831_v45, %v6087_v52  ;;  %v5833_v57 = vadd.f32 %v8444_v53, %v9733_v13  ;;  %v7869_v58 = vpop.f32.mrb[44].mxu1  ;;  %v5237_v63 = vpop.f32.mrb[45].mxu0 }
 0x24c   : > { %6343 = vst [vmem:[%s9745_s26 + $0x140] sm:$0xff] %v6215_v56  ;;  %vm5962_vm12 = vcmp.ge.f32.partialorder %v5834_v55, 0.0  ;;  %v6090_v60 = vmul.f32 0.2, %v5834_v55  ;;  %v8445_v61 = vadd.f32 %v8261_v59, %v7869_v58  ;;  %v2668_v62 = vpop.f32.mrb[45].mxu1 }
 0x24d   : > { %vm5961_vm13 = vcmp.ge.f32.partialorder %v5833_v57, 0.0  ;;  %v6089_v0 = vmul.f32 0.2, %v5833_v57  ;;  %v8446_v1 = vadd.f32 %v5237_v63, %v2668_v62 }
 0x24e   : > { %v6218_v2 = vsel %vm5962_vm12, %v5834_v55, %v6090_v60  ;;  %v5836_v3 = vadd.f32 %v8445_v61, %v9733_v13  ;;  %v8264_v7 = vpop.f32.mrb[46].mxu0 }
 0x24f   : > { %6346 = vst [vmem:[%s9745_s26 + $0x158] sm:$0xff] %v6218_v2  ;;  %v6217_v4 = vsel %vm5961_vm13, %v5833_v57, %v6089_v0  ;;  %v5835_v5 = vadd.f32 %v8446_v1, %v9733_v13  ;;  %v7872_v6 = vpop.f32.mrb[46].mxu1  ;;  %v5247_v11 = vpop.f32.mrb[47].mxu0  ;;  %v9892_v0 = vld [vmem:[%s10061_s3] ss:$0 sm:$0xff] }
 0x250   : > { %6345 = vst [vmem:[%s9745_s26 + $0x150] sm:$0xff] %v6217_v4  ;;  %vm5964_vm14 = vcmp.ge.f32.partialorder %v5836_v3, 0.0  ;;  %v6092_v8 = vmul.f32 0.2, %v5836_v3  ;;  %v8447_v9 = vadd.f32 %v8264_v7, %v7872_v6  ;;  %v2678_v10 = vpop.f32.mrb[47].mxu1 }
 0x251   : > { %vm5963_vm15 = vcmp.ge.f32.partialorder %v5835_v5, 0.0  ;;  %v6091_v12 = vmul.f32 0.2, %v5835_v5  ;;  %v8448_v14 = vadd.f32 %v5247_v11, %v2678_v10 }
 0x252   : > { %v6220_v15 = vsel %vm5964_vm14, %v5836_v3, %v6092_v8  ;;  %v5838_v16 = vadd.f32 %v8447_v9, %v9733_v13  ;;  %v8267_v20 = vpop.f32.mrb[48].mxu0 }
 0x253   : > { %6348 = vst [vmem:[%s9745_s26 + $0x168] sm:$0xff] %v6220_v15  ;;  %v6219_v17 = vsel %vm5963_vm15, %v5835_v5, %v6091_v12  ;;  %v5837_v18 = vadd.f32 %v8448_v14, %v9733_v13  ;;  %v7875_v19 = vpop.f32.mrb[48].mxu1  ;;  %v5257_v24 = vpop.f32.mrb[49].mxu0 }
 0x254   : > { %6347 = vst [vmem:[%s9745_s26 + $0x160] sm:$0xff] %v6219_v17  ;;  %vm5966_vm1 = vcmp.ge.f32.partialorder %v5838_v16, 0.0  ;;  %v6094_v21 = vmul.f32 0.2, %v5838_v16  ;;  %v8449_v22 = vadd.f32 %v8267_v20, %v7875_v19  ;;  %v2688_v23 = vpop.f32.mrb[49].mxu1 }
 0x255   : > { %vm5965_vm2 = vcmp.ge.f32.partialorder %v5837_v18, 0.0  ;;  %v6093_v25 = vmul.f32 0.2, %v5837_v18  ;;  %v8450_v26 = vadd.f32 %v5257_v24, %v2688_v23 }
 0x256   : > { %v6222_v27 = vsel %vm5966_vm1, %v5838_v16, %v6094_v21  ;;  %v5840_v28 = vadd.f32 %v8449_v22, %v9733_v13  ;;  %v8270_v32 = vpop.f32.mrb[50].mxu0 }
 0x257   : > { %6350 = vst [vmem:[%s9745_s26 + $0x178] sm:$0xff] %v6222_v27  ;;  %v6221_v29 = vsel %vm5965_vm2, %v5837_v18, %v6093_v25  ;;  %v5839_v30 = vadd.f32 %v8450_v26, %v9733_v13  ;;  %v7878_v31 = vpop.f32.mrb[50].mxu1  ;;  %v5267_v36 = vpop.f32.mrb[51].mxu0 }
 0x258   : > { %6349 = vst [vmem:[%s9745_s26 + $0x170] sm:$0xff] %v6221_v29  ;;  %vm5968_vm3 = vcmp.ge.f32.partialorder %v5840_v28, 0.0  ;;  %v6096_v33 = vmul.f32 0.2, %v5840_v28  ;;  %v8451_v34 = vadd.f32 %v8270_v32, %v7878_v31  ;;  %v2698_v35 = vpop.f32.mrb[51].mxu1 }
 0x259   : > { %vm5967_vm4 = vcmp.ge.f32.partialorder %v5839_v30, 0.0  ;;  %v6095_v37 = vmul.f32 0.2, %v5839_v30  ;;  %v8452_v38 = vadd.f32 %v5267_v36, %v2698_v35 }
 0x25a   : > { %v6224_v39 = vsel %vm5968_vm3, %v5840_v28, %v6096_v33  ;;  %v5842_v40 = vadd.f32 %v8451_v34, %v9733_v13  ;;  %v8273_v44 = vpop.f32.mrb[52].mxu0 }
 0x25b   : > { %6352 = vst [vmem:[%s9745_s26 + $0x188] sm:$0xff] %v6224_v39  ;;  %v6223_v41 = vsel %vm5967_vm4, %v5839_v30, %v6095_v37  ;;  %v5841_v42 = vadd.f32 %v8452_v38, %v9733_v13  ;;  %v7881_v43 = vpop.f32.mrb[52].mxu1  ;;  %v5277_v48 = vpop.f32.mrb[53].mxu0 }
 0x25c   : > { %6351 = vst [vmem:[%s9745_s26 + $0x180] sm:$0xff] %v6223_v41  ;;  %vm5970_vm5 = vcmp.ge.f32.partialorder %v5842_v40, 0.0  ;;  %v6098_v45 = vmul.f32 0.2, %v5842_v40  ;;  %v8453_v46 = vadd.f32 %v8273_v44, %v7881_v43  ;;  %v2708_v47 = vpop.f32.mrb[53].mxu1 }
 0x25d   : > { %vm5969_vm6 = vcmp.ge.f32.partialorder %v5841_v42, 0.0  ;;  %v6097_v49 = vmul.f32 0.2, %v5841_v42  ;;  %v8454_v50 = vadd.f32 %v5277_v48, %v2708_v47 }
 0x25e   : > { %v6226_v51 = vsel %vm5970_vm5, %v5842_v40, %v6098_v45  ;;  %v5844_v52 = vadd.f32 %v8453_v46, %v9733_v13  ;;  %v8276_v56 = vpop.f32.mrb[54].mxu0 }
 0x25f   : > { %6354 = vst [vmem:[%s9745_s26 + $0x198] sm:$0xff] %v6226_v51  ;;  %v6225_v53 = vsel %vm5969_vm6, %v5841_v42, %v6097_v49  ;;  %v5843_v54 = vadd.f32 %v8454_v50, %v9733_v13  ;;  %v7884_v55 = vpop.f32.mrb[54].mxu1  ;;  %v5287_v60 = vpop.f32.mrb[55].mxu0 }
 0x260   : > { %6353 = vst [vmem:[%s9745_s26 + $0x190] sm:$0xff] %v6225_v53  ;;  %vm5972_vm7 = vcmp.ge.f32.partialorder %v5844_v52, 0.0  ;;  %v6100_v57 = vmul.f32 0.2, %v5844_v52  ;;  %v8455_v58 = vadd.f32 %v8276_v56, %v7884_v55  ;;  %v2718_v59 = vpop.f32.mrb[55].mxu1 }
 0x261   : > { %vm5971_vm0 = vcmp.ge.f32.partialorder %v5843_v54, 0.0  ;;  %v6099_v61 = vmul.f32 0.2, %v5843_v54  ;;  %v8456_v62 = vadd.f32 %v5287_v60, %v2718_v59 }
 0x262   : > { %v6228_v63 = vsel %vm5972_vm7, %v5844_v52, %v6100_v57  ;;  %v5846_v13 = vadd.f32 %v9892_v0, %v8455_v58  ;;  %v8279_v4 = vpop.f32.mrb[56].mxu0 }
 0x263   : > { %6356 = vst [vmem:[%s9745_s26 + $0x1a8] sm:$0xff] %v6228_v63  ;;  %v6227_v1 = vsel %vm5971_vm0, %v5843_v54, %v6099_v61  ;;  %v5845_v2 = vadd.f32 %v9892_v0, %v8456_v62  ;;  %v7887_v3 = vpop.f32.mrb[56].mxu1  ;;  %v5297_v8 = vpop.f32.mrb[57].mxu0 }
 0x264   : > { %6355 = vst [vmem:[%s9745_s26 + $0x1a0] sm:$0xff] %v6227_v1  ;;  %vm5974_vm8 = vcmp.ge.f32.partialorder %v5846_v13, 0.0  ;;  %v6102_v5 = vmul.f32 0.2, %v5846_v13  ;;  %v8457_v6 = vadd.f32 %v8279_v4, %v7887_v3  ;;  %v2728_v7 = vpop.f32.mrb[57].mxu1 }
 0x265   : > { %vm5973_vm9 = vcmp.ge.f32.partialorder %v5845_v2, 0.0  ;;  %v6101_v9 = vmul.f32 0.2, %v5845_v2  ;;  %v8458_v10 = vadd.f32 %v5297_v8, %v2728_v7 }
 0x266   : > { %v6230_v11 = vsel %vm5974_vm8, %v5846_v13, %v6102_v5  ;;  %v5848_v12 = vadd.f32 %v9892_v0, %v8457_v6  ;;  %v8282_v17 = vpop.f32.mrb[58].mxu0 }
 0x267   : > { %6358 = vst [vmem:[%s9745_s26 + $0x1b8] sm:$0xff] %v6230_v11  ;;  %v6229_v14 = vsel %vm5973_vm9, %v5845_v2, %v6101_v9  ;;  %v5847_v15 = vadd.f32 %v9892_v0, %v8458_v10  ;;  %v7890_v16 = vpop.f32.mrb[58].mxu1  ;;  %v5307_v21 = vpop.f32.mrb[59].mxu0 }
 0x268   : > { %6357 = vst [vmem:[%s9745_s26 + $0x1b0] sm:$0xff] %v6229_v14  ;;  %vm5976_vm10 = vcmp.ge.f32.partialorder %v5848_v12, 0.0  ;;  %v6104_v18 = vmul.f32 0.2, %v5848_v12  ;;  %v8459_v19 = vadd.f32 %v8282_v17, %v7890_v16  ;;  %v2738_v20 = vpop.f32.mrb[59].mxu1 }
 0x269   : > { %vm5975_vm11 = vcmp.ge.f32.partialorder %v5847_v15, 0.0  ;;  %v6103_v22 = vmul.f32 0.2, %v5847_v15  ;;  %v8460_v23 = vadd.f32 %v5307_v21, %v2738_v20 }
 0x26a   : > { %v6232_v24 = vsel %vm5976_vm10, %v5848_v12, %v6104_v18  ;;  %v5850_v25 = vadd.f32 %v9892_v0, %v8459_v19  ;;  %v8285_v29 = vpop.f32.mrb[60].mxu0 }
 0x26b   : > { %6360 = vst [vmem:[%s9745_s26 + $0x1c8] sm:$0xff] %v6232_v24  ;;  %v6231_v26 = vsel %vm5975_vm11, %v5847_v15, %v6103_v22  ;;  %v5849_v27 = vadd.f32 %v9892_v0, %v8460_v23  ;;  %v7893_v28 = vpop.f32.mrb[60].mxu1  ;;  %v5317_v33 = vpop.f32.mrb[61].mxu0 }
 0x26c   : > { %6359 = vst [vmem:[%s9745_s26 + $0x1c0] sm:$0xff] %v6231_v26  ;;  %vm5978_vm12 = vcmp.ge.f32.partialorder %v5850_v25, 0.0  ;;  %v6106_v30 = vmul.f32 0.2, %v5850_v25  ;;  %v8461_v31 = vadd.f32 %v8285_v29, %v7893_v28  ;;  %v2748_v32 = vpop.f32.mrb[61].mxu1 }
 0x26d   : > { %vm5977_vm13 = vcmp.ge.f32.partialorder %v5849_v27, 0.0  ;;  %v6105_v34 = vmul.f32 0.2, %v5849_v27  ;;  %v8462_v35 = vadd.f32 %v5317_v33, %v2748_v32 }
 0x26e   : > { %v6234_v36 = vsel %vm5978_vm12, %v5850_v25, %v6106_v30  ;;  %v5852_v37 = vadd.f32 %v9892_v0, %v8461_v31  ;;  %v8288_v41 = vpop.f32.mrb[62].mxu0 }
 0x26f   : > { %6362 = vst [vmem:[%s9745_s26 + $0x1d8] sm:$0xff] %v6234_v36  ;;  %v6233_v38 = vsel %vm5977_vm13, %v5849_v27, %v6105_v34  ;;  %v5851_v39 = vadd.f32 %v9892_v0, %v8462_v35  ;;  %v7896_v40 = vpop.f32.mrb[62].mxu1  ;;  %v5327_v45 = vpop.f32.mrb[63].mxu0 }
 0x270   : > { %6361 = vst [vmem:[%s9745_s26 + $0x1d0] sm:$0xff] %v6233_v38  ;;  %vm5980_vm14 = vcmp.ge.f32.partialorder %v5852_v37, 0.0  ;;  %v6108_v42 = vmul.f32 0.2, %v5852_v37  ;;  %v8463_v43 = vadd.f32 %v8288_v41, %v7896_v40  ;;  %v2758_v44 = vpop.f32.mrb[63].mxu1 }
 0x271   : > { %vm5979_vm15 = vcmp.ge.f32.partialorder %v5851_v39, 0.0  ;;  %v6107_v46 = vmul.f32 0.2, %v5851_v39  ;;  %v8464_v47 = vadd.f32 %v5327_v45, %v2758_v44 }
 0x272   : > { %v6236_v48 = vsel %vm5980_vm14, %v5852_v37, %v6108_v42  ;;  %v5854_v49 = vadd.f32 %v9892_v0, %v8463_v43  ;;  %v8291_v53 = vpop.f32.mrb[64].mxu0 }
 0x273   : > { %6364 = vst [vmem:[%s9745_s26 + $0x1e8] sm:$0xff] %v6236_v48  ;;  %v6235_v50 = vsel %vm5979_vm15, %v5851_v39, %v6107_v46  ;;  %v5853_v51 = vadd.f32 %v9892_v0, %v8464_v47  ;;  %v7899_v52 = vpop.f32.mrb[64].mxu1  ;;  %v5337_v57 = vpop.f32.mrb[65].mxu0 }
 0x274   : > { %6363 = vst [vmem:[%s9745_s26 + $0x1e0] sm:$0xff] %v6235_v50  ;;  %vm5982_vm1 = vcmp.ge.f32.partialorder %v5854_v49, 0.0  ;;  %v6110_v54 = vmul.f32 0.2, %v5854_v49  ;;  %v8465_v55 = vadd.f32 %v8291_v53, %v7899_v52  ;;  %v2768_v56 = vpop.f32.mrb[65].mxu1 }
 0x275   : > { %vm5981_vm2 = vcmp.ge.f32.partialorder %v5853_v51, 0.0  ;;  %v6109_v58 = vmul.f32 0.2, %v5853_v51  ;;  %v8466_v59 = vadd.f32 %v5337_v57, %v2768_v56 }
 0x276   : > { %v6238_v60 = vsel %vm5982_vm1, %v5854_v49, %v6110_v54  ;;  %v5856_v61 = vadd.f32 %v9892_v0, %v8465_v55  ;;  %v8294_v1 = vpop.f32.mrb[66].mxu0 }
 0x277   : > { %6366 = vst [vmem:[%s9745_s26 + $0x1f8] sm:$0xff] %v6238_v60  ;;  %v6237_v62 = vsel %vm5981_vm2, %v5853_v51, %v6109_v58  ;;  %v5855_v63 = vadd.f32 %v9892_v0, %v8466_v59  ;;  %v7902_v13 = vpop.f32.mrb[66].mxu1  ;;  %v5347_v5 = vpop.f32.mrb[67].mxu0 }
 0x278   : > { %6365 = vst [vmem:[%s9745_s26 + $0x1f0] sm:$0xff] %v6237_v62  ;;  %vm5984_vm3 = vcmp.ge.f32.partialorder %v5856_v61, 0.0  ;;  %v6112_v2 = vmul.f32 0.2, %v5856_v61  ;;  %v8467_v3 = vadd.f32 %v8294_v1, %v7902_v13  ;;  %v2778_v4 = vpop.f32.mrb[67].mxu1 }
 0x279   : > { %vm5983_vm4 = vcmp.ge.f32.partialorder %v5855_v63, 0.0  ;;  %v6111_v6 = vmul.f32 0.2, %v5855_v63  ;;  %v8468_v7 = vadd.f32 %v5347_v5, %v2778_v4 }
 0x27a   : > { %v6240_v8 = vsel %vm5984_vm3, %v5856_v61, %v6112_v2  ;;  %v5858_v9 = vadd.f32 %v9892_v0, %v8467_v3  ;;  %v8297_v14 = vpop.f32.mrb[68].mxu0 }
 0x27b   : > { %6368 = vst [vmem:[%s9745_s26 + $0x208] sm:$0xff] %v6240_v8  ;;  %v6239_v10 = vsel %vm5983_vm4, %v5855_v63, %v6111_v6  ;;  %v5857_v11 = vadd.f32 %v9892_v0, %v8468_v7  ;;  %v7905_v12 = vpop.f32.mrb[68].mxu1  ;;  %v5357_v18 = vpop.f32.mrb[69].mxu0 }
 0x27c   : > { %6367 = vst [vmem:[%s9745_s26 + $0x200] sm:$0xff] %v6239_v10  ;;  %vm5986_vm5 = vcmp.ge.f32.partialorder %v5858_v9, 0.0  ;;  %v6114_v15 = vmul.f32 0.2, %v5858_v9  ;;  %v8469_v16 = vadd.f32 %v8297_v14, %v7905_v12  ;;  %v2788_v17 = vpop.f32.mrb[69].mxu1 }
 0x27d   : > { %vm5985_vm6 = vcmp.ge.f32.partialorder %v5857_v11, 0.0  ;;  %v6113_v19 = vmul.f32 0.2, %v5857_v11  ;;  %v8470_v20 = vadd.f32 %v5357_v18, %v2788_v17 }
 0x27e   : > { %v6242_v21 = vsel %vm5986_vm5, %v5858_v9, %v6114_v15  ;;  %v5860_v22 = vadd.f32 %v9892_v0, %v8469_v16  ;;  %v8300_v26 = vpop.f32.mrb[70].mxu0 }
 0x27f   : > { %6370 = vst [vmem:[%s9745_s26 + $0x218] sm:$0xff] %v6242_v21  ;;  %v6241_v23 = vsel %vm5985_vm6, %v5857_v11, %v6113_v19  ;;  %v5859_v24 = vadd.f32 %v9892_v0, %v8470_v20  ;;  %v7908_v25 = vpop.f32.mrb[70].mxu1  ;;  %v5367_v30 = vpop.f32.mrb[71].mxu0 }
 0x280   : > { %6369 = vst [vmem:[%s9745_s26 + $0x210] sm:$0xff] %v6241_v23  ;;  %vm5988_vm7 = vcmp.ge.f32.partialorder %v5860_v22, 0.0  ;;  %v6116_v27 = vmul.f32 0.2, %v5860_v22  ;;  %v8471_v28 = vadd.f32 %v8300_v26, %v7908_v25  ;;  %v2798_v29 = vpop.f32.mrb[71].mxu1 }
 0x281   : > { %vm5987_vm0 = vcmp.ge.f32.partialorder %v5859_v24, 0.0  ;;  %v6115_v31 = vmul.f32 0.2, %v5859_v24  ;;  %v8472_v32 = vadd.f32 %v5367_v30, %v2798_v29 }
 0x282   : > { %v6244_v33 = vsel %vm5988_vm7, %v5860_v22, %v6116_v27  ;;  %v5862_v34 = vadd.f32 %v9892_v0, %v8471_v28  ;;  %v8303_v38 = vpop.f32.mrb[72].mxu0 }
 0x283   : > { %6372 = vst [vmem:[%s9745_s26 + $0x228] sm:$0xff] %v6244_v33  ;;  %v6243_v35 = vsel %vm5987_vm0, %v5859_v24, %v6115_v31  ;;  %v5861_v36 = vadd.f32 %v9892_v0, %v8472_v32  ;;  %v7911_v37 = vpop.f32.mrb[72].mxu1  ;;  %v5377_v42 = vpop.f32.mrb[73].mxu0 }
 0x284   : > { %6371 = vst [vmem:[%s9745_s26 + $0x220] sm:$0xff] %v6243_v35  ;;  %vm5990_vm8 = vcmp.ge.f32.partialorder %v5862_v34, 0.0  ;;  %v6118_v39 = vmul.f32 0.2, %v5862_v34  ;;  %v8473_v40 = vadd.f32 %v8303_v38, %v7911_v37  ;;  %v2808_v41 = vpop.f32.mrb[73].mxu1 }
 0x285   : > { %vm5989_vm9 = vcmp.ge.f32.partialorder %v5861_v36, 0.0  ;;  %v6117_v43 = vmul.f32 0.2, %v5861_v36  ;;  %v8474_v44 = vadd.f32 %v5377_v42, %v2808_v41 }
 0x286   : > { %v6246_v45 = vsel %vm5990_vm8, %v5862_v34, %v6118_v39  ;;  %v5864_v46 = vadd.f32 %v9892_v0, %v8473_v40  ;;  %v8306_v50 = vpop.f32.mrb[74].mxu0 }
 0x287   : > { %6374 = vst [vmem:[%s9745_s26 + $0x238] sm:$0xff] %v6246_v45  ;;  %v6245_v47 = vsel %vm5989_vm9, %v5861_v36, %v6117_v43  ;;  %v5863_v48 = vadd.f32 %v9892_v0, %v8474_v44  ;;  %v7914_v49 = vpop.f32.mrb[74].mxu1  ;;  %v5387_v54 = vpop.f32.mrb[75].mxu0 }
 0x288   : > { %6373 = vst [vmem:[%s9745_s26 + $0x230] sm:$0xff] %v6245_v47  ;;  %vm5992_vm10 = vcmp.ge.f32.partialorder %v5864_v46, 0.0  ;;  %v6120_v51 = vmul.f32 0.2, %v5864_v46  ;;  %v8475_v52 = vadd.f32 %v8306_v50, %v7914_v49  ;;  %v2818_v53 = vpop.f32.mrb[75].mxu1 }
 0x289   : > { %vm5991_vm11 = vcmp.ge.f32.partialorder %v5863_v48, 0.0  ;;  %v6119_v55 = vmul.f32 0.2, %v5863_v48  ;;  %v8476_v56 = vadd.f32 %v5387_v54, %v2818_v53 }
 0x28a   : > { %v6248_v57 = vsel %vm5992_vm10, %v5864_v46, %v6120_v51  ;;  %v5866_v58 = vadd.f32 %v9892_v0, %v8475_v52  ;;  %v8309_v62 = vpop.f32.mrb[76].mxu0 }
 0x28b   : > { %6376 = vst [vmem:[%s9745_s26 + $0x248] sm:$0xff] %v6248_v57  ;;  %v6247_v59 = vsel %vm5991_vm11, %v5863_v48, %v6119_v55  ;;  %v5865_v60 = vadd.f32 %v9892_v0, %v8476_v56  ;;  %v7917_v61 = vpop.f32.mrb[76].mxu1  ;;  %v5397_v2 = vpop.f32.mrb[77].mxu0 }
 0x28c   : > { %6375 = vst [vmem:[%s9745_s26 + $0x240] sm:$0xff] %v6247_v59  ;;  %vm5994_vm12 = vcmp.ge.f32.partialorder %v5866_v58, 0.0  ;;  %v6122_v63 = vmul.f32 0.2, %v5866_v58  ;;  %v8477_v13 = vadd.f32 %v8309_v62, %v7917_v61  ;;  %v2828_v1 = vpop.f32.mrb[77].mxu1 }
 0x28d   : > { %vm5993_vm13 = vcmp.ge.f32.partialorder %v5865_v60, 0.0  ;;  %v6121_v3 = vmul.f32 0.2, %v5865_v60  ;;  %v8478_v4 = vadd.f32 %v5397_v2, %v2828_v1 }
 0x28e   : > { %v6250_v5 = vsel %vm5994_vm12, %v5866_v58, %v6122_v63  ;;  %v5868_v6 = vadd.f32 %v9892_v0, %v8477_v13  ;;  %v8312_v10 = vpop.f32.mrb[78].mxu0 }
 0x28f   : > { %6378 = vst [vmem:[%s9745_s26 + $0x258] sm:$0xff] %v6250_v5  ;;  %v6249_v7 = vsel %vm5993_vm13, %v5865_v60, %v6121_v3  ;;  %v5867_v8 = vadd.f32 %v9892_v0, %v8478_v4  ;;  %v7920_v9 = vpop.f32.mrb[78].mxu1  ;;  %v5407_v15 = vpop.f32.mrb[79].mxu0 }
 0x290   : > { %6377 = vst [vmem:[%s9745_s26 + $0x250] sm:$0xff] %v6249_v7  ;;  %vm5996_vm14 = vcmp.ge.f32.partialorder %v5868_v6, 0.0  ;;  %v6124_v11 = vmul.f32 0.2, %v5868_v6  ;;  %v8479_v12 = vadd.f32 %v8312_v10, %v7920_v9  ;;  %v2838_v14 = vpop.f32.mrb[79].mxu1 }
 0x291   : > { %vm5995_vm15 = vcmp.ge.f32.partialorder %v5867_v8, 0.0  ;;  %v6123_v16 = vmul.f32 0.2, %v5867_v8  ;;  %v8480_v17 = vadd.f32 %v5407_v15, %v2838_v14 }
 0x292   : > { %v6252_v18 = vsel %vm5996_vm14, %v5868_v6, %v6124_v11  ;;  %v5870_v19 = vadd.f32 %v9892_v0, %v8479_v12  ;;  %v8315_v23 = vpop.f32.mrb[80].mxu0 }
 0x293   : > { %6380 = vst [vmem:[%s9745_s26 + $0x268] sm:$0xff] %v6252_v18  ;;  %v6251_v20 = vsel %vm5995_vm15, %v5867_v8, %v6123_v16  ;;  %v5869_v21 = vadd.f32 %v9892_v0, %v8480_v17  ;;  %v7923_v22 = vpop.f32.mrb[80].mxu1  ;;  %v5417_v27 = vpop.f32.mrb[81].mxu0 }
 0x294   : > { %6379 = vst [vmem:[%s9745_s26 + $0x260] sm:$0xff] %v6251_v20  ;;  %vm5998_vm1 = vcmp.ge.f32.partialorder %v5870_v19, 0.0  ;;  %v6126_v24 = vmul.f32 0.2, %v5870_v19  ;;  %v8481_v25 = vadd.f32 %v8315_v23, %v7923_v22  ;;  %v2848_v26 = vpop.f32.mrb[81].mxu1 }
 0x295   : > { %vm5997_vm2 = vcmp.ge.f32.partialorder %v5869_v21, 0.0  ;;  %v6125_v28 = vmul.f32 0.2, %v5869_v21  ;;  %v8482_v29 = vadd.f32 %v5417_v27, %v2848_v26 }
 0x296   : > { %v6254_v30 = vsel %vm5998_vm1, %v5870_v19, %v6126_v24  ;;  %v5872_v31 = vadd.f32 %v9892_v0, %v8481_v25  ;;  %v8318_v35 = vpop.f32.mrb[82].mxu0 }
 0x297   : > { %6382 = vst [vmem:[%s9745_s26 + $0x278] sm:$0xff] %v6254_v30  ;;  %v6253_v32 = vsel %vm5997_vm2, %v5869_v21, %v6125_v28  ;;  %v5871_v33 = vadd.f32 %v9892_v0, %v8482_v29  ;;  %v7926_v34 = vpop.f32.mrb[82].mxu1  ;;  %v5427_v39 = vpop.f32.mrb[83].mxu0 }
 0x298   : > { %6381 = vst [vmem:[%s9745_s26 + $0x270] sm:$0xff] %v6253_v32  ;;  %vm6000_vm3 = vcmp.ge.f32.partialorder %v5872_v31, 0.0  ;;  %v6128_v36 = vmul.f32 0.2, %v5872_v31  ;;  %v8483_v37 = vadd.f32 %v8318_v35, %v7926_v34  ;;  %v2858_v38 = vpop.f32.mrb[83].mxu1 }
 0x299   : > { %vm5999_vm4 = vcmp.ge.f32.partialorder %v5871_v33, 0.0  ;;  %v6127_v40 = vmul.f32 0.2, %v5871_v33  ;;  %v8484_v41 = vadd.f32 %v5427_v39, %v2858_v38 }
 0x29a   : > { %v6256_v42 = vsel %vm6000_vm3, %v5872_v31, %v6128_v36  ;;  %v5874_v43 = vadd.f32 %v9892_v0, %v8483_v37  ;;  %v8321_v47 = vpop.f32.mrb[84].mxu0 }
 0x29b   : > { %6384 = vst [vmem:[%s9745_s26 + $0x288] sm:$0xff] %v6256_v42  ;;  %v6255_v44 = vsel %vm5999_vm4, %v5871_v33, %v6127_v40  ;;  %v5873_v45 = vadd.f32 %v9892_v0, %v8484_v41  ;;  %v7929_v46 = vpop.f32.mrb[84].mxu1  ;;  %v5437_v51 = vpop.f32.mrb[85].mxu0 }
 0x29c   : > { %6383 = vst [vmem:[%s9745_s26 + $0x280] sm:$0xff] %v6255_v44  ;;  %vm6002_vm5 = vcmp.ge.f32.partialorder %v5874_v43, 0.0  ;;  %v6130_v48 = vmul.f32 0.2, %v5874_v43  ;;  %v8485_v49 = vadd.f32 %v8321_v47, %v7929_v46  ;;  %v2868_v50 = vpop.f32.mrb[85].mxu1 }
 0x29d   : > { %vm6001_vm6 = vcmp.ge.f32.partialorder %v5873_v45, 0.0  ;;  %v6129_v52 = vmul.f32 0.2, %v5873_v45  ;;  %v8486_v53 = vadd.f32 %v5437_v51, %v2868_v50 }
 0x29e   : > { %v6258_v54 = vsel %vm6002_vm5, %v5874_v43, %v6130_v48  ;;  %v5876_v55 = vadd.f32 %v9892_v0, %v8485_v49  ;;  %v8324_v59 = vpop.f32.mrb[86].mxu0 }
 0x29f   : > { %6386 = vst [vmem:[%s9745_s26 + $0x298] sm:$0xff] %v6258_v54  ;;  %v6257_v56 = vsel %vm6001_vm6, %v5873_v45, %v6129_v52  ;;  %v5875_v57 = vadd.f32 %v9892_v0, %v8486_v53  ;;  %v7932_v58 = vpop.f32.mrb[86].mxu1  ;;  %v5447_v63 = vpop.f32.mrb[87].mxu0 }
 0x2a0   : > { %6385 = vst [vmem:[%s9745_s26 + $0x290] sm:$0xff] %v6257_v56  ;;  %vm6004_vm7 = vcmp.ge.f32.partialorder %v5876_v55, 0.0  ;;  %v6132_v60 = vmul.f32 0.2, %v5876_v55  ;;  %v8487_v61 = vadd.f32 %v8324_v59, %v7932_v58  ;;  %v2878_v62 = vpop.f32.mrb[87].mxu1 }
 0x2a1   : > { %vm6003_vm0 = vcmp.ge.f32.partialorder %v5875_v57, 0.0  ;;  %v6131_v13 = vmul.f32 0.2, %v5875_v57  ;;  %v8488_v1 = vadd.f32 %v5447_v63, %v2878_v62 }
 0x2a2   : > { %v6260_v2 = vsel %vm6004_vm7, %v5876_v55, %v6132_v60  ;;  %v5878_v3 = vadd.f32 %v9892_v0, %v8487_v61  ;;  %v8327_v7 = vpop.f32.mrb[88].mxu0 }
 0x2a3   : > { %6388 = vst [vmem:[%s9745_s26 + $0x2a8] sm:$0xff] %v6260_v2  ;;  %v6259_v4 = vsel %vm6003_vm0, %v5875_v57, %v6131_v13  ;;  %v5877_v5 = vadd.f32 %v9892_v0, %v8488_v1  ;;  %v7935_v6 = vpop.f32.mrb[88].mxu1  ;;  %v5457_v11 = vpop.f32.mrb[89].mxu0 }
 0x2a4   : > { %6387 = vst [vmem:[%s9745_s26 + $0x2a0] sm:$0xff] %v6259_v4  ;;  %vm6006_vm8 = vcmp.ge.f32.partialorder %v5878_v3, 0.0  ;;  %v6134_v8 = vmul.f32 0.2, %v5878_v3  ;;  %v8489_v9 = vadd.f32 %v8327_v7, %v7935_v6  ;;  %v2888_v10 = vpop.f32.mrb[89].mxu1 }
 0x2a5   : > { %vm6005_vm9 = vcmp.ge.f32.partialorder %v5877_v5, 0.0  ;;  %v6133_v12 = vmul.f32 0.2, %v5877_v5  ;;  %v8490_v14 = vadd.f32 %v5457_v11, %v2888_v10 }
 0x2a6   : > { %v6262_v15 = vsel %vm6006_vm8, %v5878_v3, %v6134_v8  ;;  %v5880_v16 = vadd.f32 %v9892_v0, %v8489_v9  ;;  %v8330_v20 = vpop.f32.mrb[90].mxu0 }
 0x2a7   : > { %6390 = vst [vmem:[%s9745_s26 + $0x2b8] sm:$0xff] %v6262_v15  ;;  %v6261_v17 = vsel %vm6005_vm9, %v5877_v5, %v6133_v12  ;;  %v5879_v18 = vadd.f32 %v9892_v0, %v8490_v14  ;;  %v7938_v19 = vpop.f32.mrb[90].mxu1  ;;  %v5467_v24 = vpop.f32.mrb[91].mxu0 }
 0x2a8   : > { %6389 = vst [vmem:[%s9745_s26 + $0x2b0] sm:$0xff] %v6261_v17  ;;  %vm6008_vm10 = vcmp.ge.f32.partialorder %v5880_v16, 0.0  ;;  %v6136_v21 = vmul.f32 0.2, %v5880_v16  ;;  %v8491_v22 = vadd.f32 %v8330_v20, %v7938_v19  ;;  %v2898_v23 = vpop.f32.mrb[91].mxu1 }
 0x2a9   : > { %vm6007_vm11 = vcmp.ge.f32.partialorder %v5879_v18, 0.0  ;;  %v6135_v25 = vmul.f32 0.2, %v5879_v18  ;;  %v8492_v26 = vadd.f32 %v5467_v24, %v2898_v23 }
 0x2aa   : > { %v6264_v27 = vsel %vm6008_vm10, %v5880_v16, %v6136_v21  ;;  %v5882_v28 = vadd.f32 %v9892_v0, %v8491_v22  ;;  %v8333_v32 = vpop.f32.mrb[92].mxu0 }
 0x2ab   : > { %6392 = vst [vmem:[%s9745_s26 + $0x2c8] sm:$0xff] %v6264_v27  ;;  %v6263_v29 = vsel %vm6007_vm11, %v5879_v18, %v6135_v25  ;;  %v5881_v30 = vadd.f32 %v9892_v0, %v8492_v26  ;;  %v7941_v31 = vpop.f32.mrb[92].mxu1  ;;  %v5477_v36 = vpop.f32.mrb[93].mxu0 }
 0x2ac   : > { %6391 = vst [vmem:[%s9745_s26 + $0x2c0] sm:$0xff] %v6263_v29  ;;  %vm6010_vm12 = vcmp.ge.f32.partialorder %v5882_v28, 0.0  ;;  %v6138_v33 = vmul.f32 0.2, %v5882_v28  ;;  %v8493_v34 = vadd.f32 %v8333_v32, %v7941_v31  ;;  %v2908_v35 = vpop.f32.mrb[93].mxu1 }
 0x2ad   : > { %vm6009_vm13 = vcmp.ge.f32.partialorder %v5881_v30, 0.0  ;;  %v6137_v37 = vmul.f32 0.2, %v5881_v30  ;;  %v8494_v38 = vadd.f32 %v5477_v36, %v2908_v35 }
 0x2ae   : > { %v6266_v39 = vsel %vm6010_vm12, %v5882_v28, %v6138_v33  ;;  %v5884_v40 = vadd.f32 %v9892_v0, %v8493_v34  ;;  %v8336_v44 = vpop.f32.mrb[94].mxu0 }
 0x2af   : > { %6394 = vst [vmem:[%s9745_s26 + $0x2d8] sm:$0xff] %v6266_v39  ;;  %v6265_v41 = vsel %vm6009_vm13, %v5881_v30, %v6137_v37  ;;  %v5883_v42 = vadd.f32 %v9892_v0, %v8494_v38  ;;  %v7944_v43 = vpop.f32.mrb[94].mxu1  ;;  %v5487_v48 = vpop.f32.mrb[95].mxu0 }
 0x2b0   : > { %6393 = vst [vmem:[%s9745_s26 + $0x2d0] sm:$0xff] %v6265_v41  ;;  %vm6012_vm14 = vcmp.ge.f32.partialorder %v5884_v40, 0.0  ;;  %v6140_v45 = vmul.f32 0.2, %v5884_v40  ;;  %v8495_v46 = vadd.f32 %v8336_v44, %v7944_v43  ;;  %v2918_v47 = vpop.f32.mrb[95].mxu1 }
 0x2b1   : > { %vm6011_vm15 = vcmp.ge.f32.partialorder %v5883_v42, 0.0  ;;  %v6139_v49 = vmul.f32 0.2, %v5883_v42  ;;  %v8496_v50 = vadd.f32 %v5487_v48, %v2918_v47 }
 0x2b2   : > { %v6268_v51 = vsel %vm6012_vm14, %v5884_v40, %v6140_v45  ;;  %v5886_v52 = vadd.f32 %v9892_v0, %v8495_v46  ;;  %v8339_v56 = vpop.f32.mrb[96].mxu0 }
 0x2b3   : > { %6396 = vst [vmem:[%s9745_s26 + $0x2e8] sm:$0xff] %v6268_v51  ;;  %v6267_v53 = vsel %vm6011_vm15, %v5883_v42, %v6139_v49  ;;  %v5885_v54 = vadd.f32 %v9892_v0, %v8496_v50  ;;  %v7947_v55 = vpop.f32.mrb[96].mxu1  ;;  %v5497_v60 = vpop.f32.mrb[97].mxu0 }
 0x2b4   : > { %6395 = vst [vmem:[%s9745_s26 + $0x2e0] sm:$0xff] %v6267_v53  ;;  %vm6014_vm1 = vcmp.ge.f32.partialorder %v5886_v52, 0.0  ;;  %v6142_v57 = vmul.f32 0.2, %v5886_v52  ;;  %v8497_v58 = vadd.f32 %v8339_v56, %v7947_v55  ;;  %v2928_v59 = vpop.f32.mrb[97].mxu1 }
 0x2b5   : > { %vm6013_vm2 = vcmp.ge.f32.partialorder %v5885_v54, 0.0  ;;  %v6141_v61 = vmul.f32 0.2, %v5885_v54  ;;  %v8498_v62 = vadd.f32 %v5497_v60, %v2928_v59 }
 0x2b6   : > { %v6270_v63 = vsel %vm6014_vm1, %v5886_v52, %v6142_v57  ;;  %v5888_v13 = vadd.f32 %v9892_v0, %v8497_v58  ;;  %v8342_v4 = vpop.f32.mrb[98].mxu0 }
 0x2b7   : > { %6398 = vst [vmem:[%s9745_s26 + $0x2f8] sm:$0xff] %v6270_v63  ;;  %v6269_v1 = vsel %vm6013_vm2, %v5885_v54, %v6141_v61  ;;  %v5887_v2 = vadd.f32 %v9892_v0, %v8498_v62  ;;  %v7950_v3 = vpop.f32.mrb[98].mxu1  ;;  %v5507_v8 = vpop.f32.mrb[99].mxu0 }
 0x2b8   : > { %6397 = vst [vmem:[%s9745_s26 + $0x2f0] sm:$0xff] %v6269_v1  ;;  %vm6016_vm3 = vcmp.ge.f32.partialorder %v5888_v13, 0.0  ;;  %v6144_v5 = vmul.f32 0.2, %v5888_v13  ;;  %v8499_v6 = vadd.f32 %v8342_v4, %v7950_v3  ;;  %v2938_v7 = vpop.f32.mrb[99].mxu1 }
 0x2b9   : > { %vm6015_vm4 = vcmp.ge.f32.partialorder %v5887_v2, 0.0  ;;  %v6143_v9 = vmul.f32 0.2, %v5887_v2  ;;  %v8500_v10 = vadd.f32 %v5507_v8, %v2938_v7 }
 0x2ba   : > { %v6272_v11 = vsel %vm6016_vm3, %v5888_v13, %v6144_v5  ;;  %v5890_v12 = vadd.f32 %v9892_v0, %v8499_v6  ;;  %v8345_v17 = vpop.f32.mrb[100].mxu0 }
 0x2bb   : > { %6400 = vst [vmem:[%s9745_s26 + $0x308] sm:$0xff] %v6272_v11  ;;  %v6271_v14 = vsel %vm6015_vm4, %v5887_v2, %v6143_v9  ;;  %v5889_v15 = vadd.f32 %v9892_v0, %v8500_v10  ;;  %v7953_v16 = vpop.f32.mrb[100].mxu1  ;;  %v5517_v21 = vpop.f32.mrb[101].mxu0 }
 0x2bc   : > { %6399 = vst [vmem:[%s9745_s26 + $0x300] sm:$0xff] %v6271_v14  ;;  %vm6018_vm5 = vcmp.ge.f32.partialorder %v5890_v12, 0.0  ;;  %v6146_v18 = vmul.f32 0.2, %v5890_v12  ;;  %v8501_v19 = vadd.f32 %v8345_v17, %v7953_v16  ;;  %v2948_v20 = vpop.f32.mrb[101].mxu1 }
 0x2bd   : > { %vm6017_vm6 = vcmp.ge.f32.partialorder %v5889_v15, 0.0  ;;  %v6145_v22 = vmul.f32 0.2, %v5889_v15  ;;  %v8502_v23 = vadd.f32 %v5517_v21, %v2948_v20 }
 0x2be   : > { %v6274_v24 = vsel %vm6018_vm5, %v5890_v12, %v6146_v18  ;;  %v5892_v25 = vadd.f32 %v9892_v0, %v8501_v19  ;;  %v8348_v29 = vpop.f32.mrb[102].mxu0 }
 0x2bf   : > { %6402 = vst [vmem:[%s9745_s26 + $0x318] sm:$0xff] %v6274_v24  ;;  %v6273_v26 = vsel %vm6017_vm6, %v5889_v15, %v6145_v22  ;;  %v5891_v27 = vadd.f32 %v9892_v0, %v8502_v23  ;;  %v7956_v28 = vpop.f32.mrb[102].mxu1  ;;  %v5527_v33 = vpop.f32.mrb[103].mxu0 }
 0x2c0   : > { %6401 = vst [vmem:[%s9745_s26 + $0x310] sm:$0xff] %v6273_v26  ;;  %vm6020_vm7 = vcmp.ge.f32.partialorder %v5892_v25, 0.0  ;;  %v6148_v30 = vmul.f32 0.2, %v5892_v25  ;;  %v8503_v31 = vadd.f32 %v8348_v29, %v7956_v28  ;;  %v2958_v32 = vpop.f32.mrb[103].mxu1 }
 0x2c1   : > { %vm6019_vm0 = vcmp.ge.f32.partialorder %v5891_v27, 0.0  ;;  %v6147_v34 = vmul.f32 0.2, %v5891_v27  ;;  %v8504_v35 = vadd.f32 %v5527_v33, %v2958_v32 }
 0x2c2   : > { %v6276_v36 = vsel %vm6020_vm7, %v5892_v25, %v6148_v30  ;;  %v5894_v37 = vadd.f32 %v9892_v0, %v8503_v31  ;;  %v8351_v41 = vpop.f32.mrb[104].mxu0 }
 0x2c3   : > { %6404 = vst [vmem:[%s9745_s26 + $0x328] sm:$0xff] %v6276_v36  ;;  %v6275_v38 = vsel %vm6019_vm0, %v5891_v27, %v6147_v34  ;;  %v5893_v39 = vadd.f32 %v9892_v0, %v8504_v35  ;;  %v7959_v40 = vpop.f32.mrb[104].mxu1  ;;  %v5537_v45 = vpop.f32.mrb[105].mxu0 }
 0x2c4   : > { %6403 = vst [vmem:[%s9745_s26 + $0x320] sm:$0xff] %v6275_v38  ;;  %vm6022_vm8 = vcmp.ge.f32.partialorder %v5894_v37, 0.0  ;;  %v6150_v42 = vmul.f32 0.2, %v5894_v37  ;;  %v8505_v43 = vadd.f32 %v8351_v41, %v7959_v40  ;;  %v2968_v44 = vpop.f32.mrb[105].mxu1 }
 0x2c5   : > { %vm6021_vm9 = vcmp.ge.f32.partialorder %v5893_v39, 0.0  ;;  %v6149_v46 = vmul.f32 0.2, %v5893_v39  ;;  %v8506_v47 = vadd.f32 %v5537_v45, %v2968_v44 }
 0x2c6   : > { %v6278_v48 = vsel %vm6022_vm8, %v5894_v37, %v6150_v42  ;;  %v5896_v49 = vadd.f32 %v9892_v0, %v8505_v43  ;;  %v8354_v53 = vpop.f32.mrb[106].mxu0 }
 0x2c7   : > { %6406 = vst [vmem:[%s9745_s26 + $0x338] sm:$0xff] %v6278_v48  ;;  %v6277_v50 = vsel %vm6021_vm9, %v5893_v39, %v6149_v46  ;;  %v5895_v51 = vadd.f32 %v9892_v0, %v8506_v47  ;;  %v7962_v52 = vpop.f32.mrb[106].mxu1  ;;  %v5547_v57 = vpop.f32.mrb[107].mxu0 }
 0x2c8   : > { %6405 = vst [vmem:[%s9745_s26 + $0x330] sm:$0xff] %v6277_v50  ;;  %vm6024_vm10 = vcmp.ge.f32.partialorder %v5896_v49, 0.0  ;;  %v6152_v54 = vmul.f32 0.2, %v5896_v49  ;;  %v8507_v55 = vadd.f32 %v8354_v53, %v7962_v52  ;;  %v2978_v56 = vpop.f32.mrb[107].mxu1 }
 0x2c9   : > { %vm6023_vm11 = vcmp.ge.f32.partialorder %v5895_v51, 0.0  ;;  %v6151_v58 = vmul.f32 0.2, %v5895_v51  ;;  %v8508_v59 = vadd.f32 %v5547_v57, %v2978_v56 }
 0x2ca   : > { %v6280_v60 = vsel %vm6024_vm10, %v5896_v49, %v6152_v54  ;;  %v5898_v61 = vadd.f32 %v9892_v0, %v8507_v55  ;;  %v8357_v1 = vpop.f32.mrb[108].mxu0 }
 0x2cb   : > { %6408 = vst [vmem:[%s9745_s26 + $0x348] sm:$0xff] %v6280_v60  ;;  %v6279_v62 = vsel %vm6023_vm11, %v5895_v51, %v6151_v58  ;;  %v5897_v63 = vadd.f32 %v9892_v0, %v8508_v59  ;;  %v7965_v13 = vpop.f32.mrb[108].mxu1  ;;  %v5557_v5 = vpop.f32.mrb[109].mxu0 }
 0x2cc   : > { %6407 = vst [vmem:[%s9745_s26 + $0x340] sm:$0xff] %v6279_v62  ;;  %vm6026_vm12 = vcmp.ge.f32.partialorder %v5898_v61, 0.0  ;;  %v6154_v2 = vmul.f32 0.2, %v5898_v61  ;;  %v8509_v3 = vadd.f32 %v8357_v1, %v7965_v13  ;;  %v2988_v4 = vpop.f32.mrb[109].mxu1 }
 0x2cd   : > { %vm6025_vm13 = vcmp.ge.f32.partialorder %v5897_v63, 0.0  ;;  %v6153_v6 = vmul.f32 0.2, %v5897_v63  ;;  %v8510_v7 = vadd.f32 %v5557_v5, %v2988_v4 }
 0x2ce   : > { %v6282_v8 = vsel %vm6026_vm12, %v5898_v61, %v6154_v2  ;;  %v5900_v9 = vadd.f32 %v9892_v0, %v8509_v3  ;;  %v8360_v14 = vpop.f32.mrb[110].mxu0 }
 0x2cf   : > { %6410 = vst [vmem:[%s9745_s26 + $0x358] sm:$0xff] %v6282_v8  ;;  %v6281_v10 = vsel %vm6025_vm13, %v5897_v63, %v6153_v6  ;;  %v5899_v11 = vadd.f32 %v9892_v0, %v8510_v7  ;;  %v7968_v12 = vpop.f32.mrb[110].mxu1  ;;  %v5567_v18 = vpop.f32.mrb[111].mxu0  ;;  %v10025_v6 = vld [vmem:[%s10061_s3] ss:$0 sm:$0xff] }
 0x2d0   : > { %6409 = vst [vmem:[%s9745_s26 + $0x350] sm:$0xff] %v6281_v10  ;;  %vm6028_vm14 = vcmp.ge.f32.partialorder %v5900_v9, 0.0  ;;  %v6156_v15 = vmul.f32 0.2, %v5900_v9  ;;  %v8511_v16 = vadd.f32 %v8360_v14, %v7968_v12  ;;  %v2998_v17 = vpop.f32.mrb[111].mxu1 }
 0x2d1   : > { %vm6027_vm15 = vcmp.ge.f32.partialorder %v5899_v11, 0.0  ;;  %v6155_v19 = vmul.f32 0.2, %v5899_v11  ;;  %v8512_v20 = vadd.f32 %v5567_v18, %v2998_v17 }
 0x2d2   : > { %v6284_v21 = vsel %vm6028_vm14, %v5900_v9, %v6156_v15  ;;  %v5902_v22 = vadd.f32 %v9892_v0, %v8511_v16  ;;  %v8363_v26 = vpop.f32.mrb[112].mxu0 }
 0x2d3   : > { %6412 = vst [vmem:[%s9745_s26 + $0x368] sm:$0xff] %v6284_v21  ;;  %v6283_v23 = vsel %vm6027_vm15, %v5899_v11, %v6155_v19  ;;  %v5901_v24 = vadd.f32 %v9892_v0, %v8512_v20  ;;  %v7971_v25 = vpop.f32.mrb[112].mxu1  ;;  %v5577_v30 = vpop.f32.mrb[113].mxu0 }
 0x2d4   : > { %6411 = vst [vmem:[%s9745_s26 + $0x360] sm:$0xff] %v6283_v23  ;;  %vm6030_vm1 = vcmp.ge.f32.partialorder %v5902_v22, 0.0  ;;  %v6158_v27 = vmul.f32 0.2, %v5902_v22  ;;  %v8513_v28 = vadd.f32 %v8363_v26, %v7971_v25  ;;  %v3008_v29 = vpop.f32.mrb[113].mxu1 }
 0x2d5   : > { %vm6029_vm2 = vcmp.ge.f32.partialorder %v5901_v24, 0.0  ;;  %v6157_v31 = vmul.f32 0.2, %v5901_v24  ;;  %v8514_v32 = vadd.f32 %v5577_v30, %v3008_v29 }
 0x2d6   : > { %v6286_v33 = vsel %vm6030_vm1, %v5902_v22, %v6158_v27  ;;  %v5904_v34 = vadd.f32 %v9892_v0, %v8513_v28  ;;  %v8366_v38 = vpop.f32.mrb[114].mxu0 }
 0x2d7   : > { %6414 = vst [vmem:[%s9745_s26 + $0x378] sm:$0xff] %v6286_v33  ;;  %v6285_v35 = vsel %vm6029_vm2, %v5901_v24, %v6157_v31  ;;  %v5903_v36 = vadd.f32 %v9892_v0, %v8514_v32  ;;  %v7974_v37 = vpop.f32.mrb[114].mxu1  ;;  %v5587_v42 = vpop.f32.mrb[115].mxu0 }
 0x2d8   : > { %6413 = vst [vmem:[%s9745_s26 + $0x370] sm:$0xff] %v6285_v35  ;;  %vm6032_vm3 = vcmp.ge.f32.partialorder %v5904_v34, 0.0  ;;  %v6160_v39 = vmul.f32 0.2, %v5904_v34  ;;  %v8515_v40 = vadd.f32 %v8366_v38, %v7974_v37  ;;  %v3018_v41 = vpop.f32.mrb[115].mxu1 }
 0x2d9   : > { %vm6031_vm4 = vcmp.ge.f32.partialorder %v5903_v36, 0.0  ;;  %v6159_v43 = vmul.f32 0.2, %v5903_v36  ;;  %v8516_v44 = vadd.f32 %v5587_v42, %v3018_v41 }
 0x2da   : > { %v6288_v45 = vsel %vm6032_vm3, %v5904_v34, %v6160_v39  ;;  %v5906_v46 = vadd.f32 %v9892_v0, %v8515_v40  ;;  %v8369_v50 = vpop.f32.mrb[116].mxu0 }
 0x2db   : > { %6416 = vst [vmem:[%s9745_s26 + $0x388] sm:$0xff] %v6288_v45  ;;  %v6287_v47 = vsel %vm6031_vm4, %v5903_v36, %v6159_v43  ;;  %v5905_v48 = vadd.f32 %v9892_v0, %v8516_v44  ;;  %v7977_v49 = vpop.f32.mrb[116].mxu1  ;;  %v5597_v54 = vpop.f32.mrb[117].mxu0 }
 0x2dc   : > { %6415 = vst [vmem:[%s9745_s26 + $0x380] sm:$0xff] %v6287_v47  ;;  %vm6034_vm5 = vcmp.ge.f32.partialorder %v5906_v46, 0.0  ;;  %v6162_v51 = vmul.f32 0.2, %v5906_v46  ;;  %v8517_v52 = vadd.f32 %v8369_v50, %v7977_v49  ;;  %v3028_v53 = vpop.f32.mrb[117].mxu1 }
 0x2dd   : > { %vm6033_vm6 = vcmp.ge.f32.partialorder %v5905_v48, 0.0  ;;  %v6161_v55 = vmul.f32 0.2, %v5905_v48  ;;  %v8518_v56 = vadd.f32 %v5597_v54, %v3028_v53 }
 0x2de   : > { %v6290_v57 = vsel %vm6034_vm5, %v5906_v46, %v6162_v51  ;;  %v5908_v58 = vadd.f32 %v9892_v0, %v8517_v52  ;;  %v8372_v62 = vpop.f32.mrb[118].mxu0 }
 0x2df   : > { %6418 = vst [vmem:[%s9745_s26 + $0x398] sm:$0xff] %v6290_v57  ;;  %v6289_v59 = vsel %vm6033_vm6, %v5905_v48, %v6161_v55  ;;  %v5907_v60 = vadd.f32 %v9892_v0, %v8518_v56  ;;  %v7980_v61 = vpop.f32.mrb[118].mxu1  ;;  %v5607_v2 = vpop.f32.mrb[119].mxu0 }
 0x2e0   : > { %6417 = vst [vmem:[%s9745_s26 + $0x390] sm:$0xff] %v6289_v59  ;;  %vm6036_vm7 = vcmp.ge.f32.partialorder %v5908_v58, 0.0  ;;  %v6164_v63 = vmul.f32 0.2, %v5908_v58  ;;  %v8519_v13 = vadd.f32 %v8372_v62, %v7980_v61  ;;  %v3038_v1 = vpop.f32.mrb[119].mxu1 }
 0x2e1   : > { %vm6035_vm0 = vcmp.ge.f32.partialorder %v5907_v60, 0.0  ;;  %v6163_v3 = vmul.f32 0.2, %v5907_v60  ;;  %v8520_v4 = vadd.f32 %v5607_v2, %v3038_v1 }
 0x2e2   : > { %v6292_v5 = vsel %vm6036_vm7, %v5908_v58, %v6164_v63  ;;  %v5910_v0 = vadd.f32 %v10025_v6, %v8519_v13  ;;  %v8375_v10 = vpop.f32.mrb[120].mxu0 }
 0x2e3   : > { %6420 = vst [vmem:[%s9745_s26 + $0x3a8] sm:$0xff] %v6292_v5  ;;  %v6291_v7 = vsel %vm6035_vm0, %v5907_v60, %v6163_v3  ;;  %v5909_v8 = vadd.f32 %v10025_v6, %v8520_v4  ;;  %v7983_v9 = vpop.f32.mrb[120].mxu1  ;;  %v5617_v15 = vpop.f32.mrb[121].mxu0 }
 0x2e4   : > { %6419 = vst [vmem:[%s9745_s26 + $0x3a0] sm:$0xff] %v6291_v7  ;;  %vm6038_vm8 = vcmp.ge.f32.partialorder %v5910_v0, 0.0  ;;  %v6166_v11 = vmul.f32 0.2, %v5910_v0  ;;  %v8521_v12 = vadd.f32 %v8375_v10, %v7983_v9  ;;  %v3048_v14 = vpop.f32.mrb[121].mxu1 }
 0x2e5   : > { %vm6037_vm9 = vcmp.ge.f32.partialorder %v5909_v8, 0.0  ;;  %v6165_v16 = vmul.f32 0.2, %v5909_v8  ;;  %v8522_v17 = vadd.f32 %v5617_v15, %v3048_v14 }
 0x2e6   : > { %v6294_v18 = vsel %vm6038_vm8, %v5910_v0, %v6166_v11  ;;  %v5912_v19 = vadd.f32 %v10025_v6, %v8521_v12  ;;  %v8378_v23 = vpop.f32.mrb[122].mxu0 }
 0x2e7   : > { %6422 = vst [vmem:[%s9745_s26 + $0x3b8] sm:$0xff] %v6294_v18  ;;  %v6293_v20 = vsel %vm6037_vm9, %v5909_v8, %v6165_v16  ;;  %v5911_v21 = vadd.f32 %v10025_v6, %v8522_v17  ;;  %v7986_v22 = vpop.f32.mrb[122].mxu1  ;;  %v5627_v27 = vpop.f32.mrb[123].mxu0 }
 0x2e8   : > { %6421 = vst [vmem:[%s9745_s26 + $0x3b0] sm:$0xff] %v6293_v20  ;;  %vm6040_vm10 = vcmp.ge.f32.partialorder %v5912_v19, 0.0  ;;  %v6168_v24 = vmul.f32 0.2, %v5912_v19  ;;  %v8523_v25 = vadd.f32 %v8378_v23, %v7986_v22  ;;  %v3058_v26 = vpop.f32.mrb[123].mxu1 }
 0x2e9   : > { %vm6039_vm11 = vcmp.ge.f32.partialorder %v5911_v21, 0.0  ;;  %v6167_v28 = vmul.f32 0.2, %v5911_v21  ;;  %v8524_v29 = vadd.f32 %v5627_v27, %v3058_v26 }
 0x2ea   : > { %v6296_v30 = vsel %vm6040_vm10, %v5912_v19, %v6168_v24  ;;  %v5914_v31 = vadd.f32 %v10025_v6, %v8523_v25  ;;  %v8381_v35 = vpop.f32.mrb[124].mxu0 }
 0x2eb   : > { %6424 = vst [vmem:[%s9745_s26 + $0x3c8] sm:$0xff] %v6296_v30  ;;  %v6295_v32 = vsel %vm6039_vm11, %v5911_v21, %v6167_v28  ;;  %v5913_v33 = vadd.f32 %v10025_v6, %v8524_v29  ;;  %v7989_v34 = vpop.f32.mrb[124].mxu1  ;;  %v5637_v39 = vpop.f32.mrb[125].mxu0 }
 0x2ec   : > { %6423 = vst [vmem:[%s9745_s26 + $0x3c0] sm:$0xff] %v6295_v32  ;;  %vm6042_vm12 = vcmp.ge.f32.partialorder %v5914_v31, 0.0  ;;  %v6170_v36 = vmul.f32 0.2, %v5914_v31  ;;  %v8525_v37 = vadd.f32 %v8381_v35, %v7989_v34  ;;  %v3068_v38 = vpop.f32.mrb[125].mxu1 }
 0x2ed   : > { %vm6041_vm13 = vcmp.ge.f32.partialorder %v5913_v33, 0.0  ;;  %v6169_v40 = vmul.f32 0.2, %v5913_v33  ;;  %v8526_v41 = vadd.f32 %v5637_v39, %v3068_v38 }
 0x2ee   : > { %v6298_v42 = vsel %vm6042_vm12, %v5914_v31, %v6170_v36  ;;  %v5916_v43 = vadd.f32 %v10025_v6, %v8525_v37  ;;  %v8384_v47 = vpop.f32.mrb[126].mxu0 }
 0x2ef   : > { %6426 = vst [vmem:[%s9745_s26 + $0x3d8] sm:$0xff] %v6298_v42  ;;  %v6297_v44 = vsel %vm6041_vm13, %v5913_v33, %v6169_v40  ;;  %v5915_v45 = vadd.f32 %v10025_v6, %v8526_v41  ;;  %v7992_v46 = vpop.f32.mrb[126].mxu1  ;;  %v5647_v51 = vpop.f32.mrb[127].mxu0 }
 0x2f0   : > { %6425 = vst [vmem:[%s9745_s26 + $0x3d0] sm:$0xff] %v6297_v44  ;;  %vm6044_vm14 = vcmp.ge.f32.partialorder %v5916_v43, 0.0  ;;  %v6172_v48 = vmul.f32 0.2, %v5916_v43  ;;  %v8527_v49 = vadd.f32 %v8384_v47, %v7992_v46  ;;  %v3078_v50 = vpop.f32.mrb[127].mxu1 }
 0x2f1   : > { %vm6043_vm15 = vcmp.ge.f32.partialorder %v5915_v45, 0.0  ;;  %v6171_v52 = vmul.f32 0.2, %v5915_v45  ;;  %v8528_v53 = vadd.f32 %v5647_v51, %v3078_v50 }
 0x2f2   : > { %v6300_v54 = vsel %vm6044_vm14, %v5916_v43, %v6172_v48  ;;  %v5918_v55 = vadd.f32 %v10025_v6, %v8527_v49 }
 0x2f3   : > { %6428 = vst [vmem:[%s9745_s26 + $0x3e8] sm:$0xff] %v6300_v54  ;;  %v6299_v56 = vsel %vm6043_vm15, %v5915_v45, %v6171_v52  ;;  %v5917_v57 = vadd.f32 %v10025_v6, %v8528_v53 }
 0x2f4   : > { %6427 = vst [vmem:[%s9745_s26 + $0x3e0] sm:$0xff] %v6299_v56  ;;  %vm6046_vm1 = vcmp.ge.f32.partialorder %v5918_v55, 0.0  ;;  %v6174_v58 = vmul.f32 0.2, %v5918_v55 }
 0x2f5   : > { %vm6045_vm2 = vcmp.ge.f32.partialorder %v5917_v57, 0.0  ;;  %v6173_v59 = vmul.f32 0.2, %v5917_v57 }
 0x2f6   : > { %v6302_v60 = vsel %vm6046_vm1, %v5918_v55, %v6174_v58 }
 0x2f7   : > { %6430 = vst [vmem:[%s9745_s26 + $0x3f8] sm:$0xff] %v6302_v60  ;;  %v6301_v61 = vsel %vm6045_vm2, %v5917_v57, %v6173_v59 }
 0x2f8   : > { %6429 = vst [vmem:[%s9745_s26 + $0x3f0] sm:$0xff] %v6301_v61 }
 0x2f9 PF: > { %s14_s17 = sadd.s32 1, %s8836_s17   ;;  %s10063_s15 = smov %s8832_s16 }
 0x2fa   : > { %p11_p5 = scmp.ge.s32.totalorder %s14_s17, 4   ;;  %s10064_s16 = smov %s10066_s18 }
 0x2fc   :  { %13 = sbr.rel (!%p11_p5) target bundleno = 2 (0x2), region = 74 }

// kernel: fc_discriminator_forward.3
= control target key start
LH: loop header
LB: loop body
LE: loop exit
PB: predicated region body
PF: predicated region fallthrough
CT: control target
= control target key end

     0   :  { %s5744_s15 = smov 0   ;;  %s5746_s16 = smov 0   ;;  %s8631_s0 = inlined_call_operand.vmem [shape: f32[2,17,17,512], index: 0, kind: input, shape index: {}, may-alias: {0,1}]   ;;  %s8632_s1 = inlined_call_operand.vmem [shape: f32[2,17,17,512], index: 1, kind: input, shape index: {}, may-alias: {0,1}]   ;;  %s8633_s2 = inlined_call_operand.vmem [shape: f32[4,512,128], index: 2, kind: input, shape index: {}]   ;;  %s8634_s3 = inlined_call_operand.vmem [shape: f32[1,128], index: 3, kind: input, shape index: {}]   ;;  %s8635_s4 = inlined_call_operand.vmem [shape: f32[2,16,16,128], index: 4, kind: output, shape index: {}]  }
   0x1   :  { %s5748_s17 = smov 0  }
   0x2 LB: > { %s26_s18 = sadd.s32 1, %s5712_s16  ;;  %p4998_p0 = scmp.ge.s32.totalorder %s5716_s17, 1  ;;  %s5716_s17 = sphi %s5748_s17, %s14_s17   ;;  %s5712_s16 = sphi %s5746_s16, %s8640_s16   ;;  %s5708_s15 = sphi %s5744_s15, %s8639_s15  }
   0x3   : > { %p28_p1 = scmp.ge.s32.totalorder %s26_s18, 2  ;;  %p220_p2 = scmp.lt.s32.totalorder %s5716_s17, 3 }
   0x5   : > { %s8642_s18 = smov (%p28_p1, %s26_s18), 0  ;;  %p221_p3 = pnand %p4998_p0, %p220_p2 }
   0x6   : > { %v5003_v0 = vld [vmem:[%s8633_s2 + $0x200] sm:$0xff] (!%p221_p3)  ;;  %v5004_v1 = vld [vmem:[%s8633_s2 + $0x208] sm:$0xff] (!%p221_p3)  ;;  %p280_p4 = scmp.lt.s32.totalorder (!%p221_p3), %s5708_s15, 1  ;;  %v8636_v3 = vmov (!%p221_p3), 0.0|0.0   ;;  %v5005_v6 = vld [vmem:[%s8633_s2 + $0x210] sm:$0xff] (!%p221_p3)  ;;  %vm1241_vm0 = vcmask (!%p221_p3), 1046528  }
   0x7   : > { %224 = sbr.rel (%p221_p3) target bundleno = 820 (0x334), region = 36  ;;  %v5035_v2 = vld [vmem:[%s8633_s2 + $0x300] sm:$0xff] (!%p221_p3)  ;;  %5201 = vmatprep.subr.bf16.mxu0 (!%p221_p3), %v8636_v3  ;;  %5249 = vmatprep.subr.bf16.mxu1 (!%p221_p3), %v8636_v3  ;;  %v5202_v4 = vpack.c.bf16 (!%p221_p3), %v5004_v1, %v5003_v0  ;;  %v5036_v5 = vld [vmem:[%s8633_s2 + $0x308] sm:$0xff] (!%p221_p3)  ;;  %v5006_v7 = vld [vmem:[%s8633_s2 + $0x218] sm:$0xff] (!%p221_p3) }
   0x8   : > { %v5250_v8 = vpack.c.bf16 (!%p221_p3), %v5036_v5, %v5035_v2  ;;  %v5037_v9 = vld [vmem:[%s8633_s2 + $0x310] sm:$0xff] (!%p221_p3)  ;;  %v5038_v10 = vld [vmem:[%s8633_s2 + $0x318] sm:$0xff] (!%p221_p3)  ;;  %v5205_v11 = vpack.c.bf16 (!%p221_p3), %v5006_v7, %v5005_v6  ;;  %v5007_v13 = vld [vmem:[%s8633_s2 + $0x220] sm:$0xff] (!%p221_p3) }
   0x9   : > { %5203 = vmatpush1.bf16.msra.mxu0 (!%p221_p3), %v5202_v4  ;;  %v5253_v12 = vpack.c.bf16 (!%p221_p3), %v5038_v10, %v5037_v9  ;;  %v5008_v14 = vld [vmem:[%s8633_s2 + $0x228] sm:$0xff] (!%p221_p3)  ;;  %v5039_v15 = vld [vmem:[%s8633_s2 + $0x320] sm:$0xff] (!%p221_p3)  ;;  %v5009_v19 = vld [vmem:[%s8633_s2 + $0x230] sm:$0xff] (!%p221_p3) }
   0xa   : > { %5251 = vmatpush1.bf16.msra.mxu1 (!%p221_p3), %v5250_v8  ;;  %5204 = vmatprep.subr.bf16.mxu0 (!%p221_p3), %v8636_v3  ;;  %v5040_v16 = vld [vmem:[%s8633_s2 + $0x328] sm:$0xff] (!%p221_p3)  ;;  %v5208_v17 = vpack.c.bf16 (!%p221_p3), %v5008_v14, %v5007_v13  ;;  %v5010_v20 = vld [vmem:[%s8633_s2 + $0x238] sm:$0xff] (!%p221_p3)  ;;  %v5041_v21 = vld [vmem:[%s8633_s2 + $0x330] sm:$0xff] (!%p221_p3) }
   0xb   : > { %5252 = vmatprep.subr.bf16.mxu1 (!%p221_p3), %v8636_v3  ;;  %v5256_v18 = vpack.c.bf16 (!%p221_p3), %v5040_v16, %v5039_v15  ;;  %v5042_v22 = vld [vmem:[%s8633_s2 + $0x338] sm:$0xff] (!%p221_p3)  ;;  %v5211_v23 = vpack.c.bf16 (!%p221_p3), %v5010_v20, %v5009_v19  ;;  %v5011_v25 = vld [vmem:[%s8633_s2 + $0x240] sm:$0xff] (!%p221_p3)  ;;  %v5012_v26 = vld [vmem:[%s8633_s2 + $0x248] sm:$0xff] (!%p221_p3) }
   0xc   : > { %v5259_v24 = vpack.c.bf16 (!%p221_p3), %v5042_v22, %v5041_v21  ;;  %v5043_v27 = vld [vmem:[%s8633_s2 + $0x340] sm:$0xff] (!%p221_p3)  ;;  %v5044_v28 = vld [vmem:[%s8633_s2 + $0x348] sm:$0xff] (!%p221_p3)  ;;  %v5214_v29 = vpack.c.bf16 (!%p221_p3), %v5012_v26, %v5011_v25  ;;  %v5013_v31 = vld [vmem:[%s8633_s2 + $0x250] sm:$0xff] (!%p221_p3) }
   0xd   : > { %5206 = vmatpush1.bf16.msra.mxu0 (!%p221_p3), %v5205_v11  ;;  %v5262_v30 = vpack.c.bf16 (!%p221_p3), %v5044_v28, %v5043_v27  ;;  %v5014_v32 = vld [vmem:[%s8633_s2 + $0x258] sm:$0xff] (!%p221_p3)  ;;  %v5045_v33 = vld [vmem:[%s8633_s2 + $0x350] sm:$0xff] (!%p221_p3)  ;;  %v5015_v37 = vld [vmem:[%s8633_s2 + $0x260] sm:$0xff] (!%p221_p3) }
   0xe   : > { %s8644_s15 = smov (!%p280_p4, %s5708_s15), 1  ;;  %5254 = vmatpush1.bf16.msra.mxu1 %v5253_v12  ;;  %5207 = vmatprep.subr.bf16.mxu0 %v8636_v3  ;;  %v5046_v34 = vld [vmem:[%s8633_s2 + $0x358] sm:$0xff]  ;;  %v5217_v35 = vpack.c.bf16 %v5014_v32, %v5013_v31  ;;  %v5016_v38 = vld [vmem:[%s8633_s2 + $0x268] sm:$0xff]  ;;  %v5047_v39 = vld [vmem:[%s8633_s2 + $0x360] sm:$0xff] }
   0xf   : > { %5255 = vmatprep.subr.bf16.mxu1 %v8636_v3  ;;  %s5585_s11 = smul.u32 1632, %s8644_s15  ;;  %v5265_v36 = vpack.c.bf16 %v5046_v34, %v5045_v33  ;;  %v5048_v40 = vld [vmem:[%s8633_s2 + $0x368] sm:$0xff]  ;;  %v5220_v46 = vpack.c.bf16 %v5016_v38, %v5015_v37  ;;  %v5017_v51 = vld [vmem:[%s8633_s2 + $0x270] sm:$0xff]  ;;  %v5018_v52 = vld [vmem:[%s8633_s2 + $0x278] sm:$0xff]  ;;  %s5200_s21 = sshll.u32 %s8644_s15, 8 }
  0x10   : > { %v5268_v50 = vpack.c.bf16 %v5048_v40, %v5047_v39  ;;  %v5049_v53 = vld [vmem:[%s8633_s2 + $0x370] sm:$0xff]  ;;  %v5050_v54 = vld [vmem:[%s8633_s2 + $0x378] sm:$0xff]  ;;  %v5019_v57 = vld [vmem:[%s8633_s2 + $0x280] sm:$0xff]  ;;  %v5223_v62 = vpack.c.bf16 %v5018_v52, %v5017_v51  ;;  %s8526_s24 = scalar_lea.vmem %s8635_s4, %s5200_s21 }
  0x11   : > { %5209 = vmatpush1.bf16.msra.mxu0 %v5208_v17  ;;  %s5852_s26 = scalar_lea.vmem %s8631_s0, %s5585_s11  ;;  %v5020_v58 = vld [vmem:[%s8633_s2 + $0x288] sm:$0xff]  ;;  %v5051_v63 = vld [vmem:[%s8633_s2 + $0x380] sm:$0xff]  ;;  %v5271_v4 = vpack.c.bf16 %v5050_v54, %v5049_v53  ;;  %v5021_v16 = vld [vmem:[%s8633_s2 + $0x290] sm:$0xff]  ;;  %s5199_s10 = sadd.s32 1536, %s5585_s11 }
  0x12   : > { %5257 = vmatpush1.bf16.msra.mxu1 %v5256_v18  ;;  %5210 = vmatprep.subr.bf16.mxu0 %v8636_v3  ;;  %v321_v41 = vld [vmem:[%s5852_s26 + $0x8] sm:$0xff]  ;;  %v323_v43 = vld [vmem:[%s5852_s26 + $0x18] sm:$0xff]  ;;  %v320_v45 = vld [vmem:[%s5852_s26] sm:$0xff]  ;;  %v5226_v15 = vpack.c.bf16 %v5020_v58, %v5019_v57  ;;  %s7691_s14 = scalar_lea.vmem %s8632_s1, %s5199_s10 }
  0x13   : > { %5258 = vmatprep.subr.bf16.mxu1 %v8636_v3  ;;  %v5870_v42 = vld [vmem:[%s5852_s26 + $0x28] sm:$0xff]  ;;  %513 = vst [vmem:[#allocation2 + $0x8] sm:$0xff] %v321_v41  ;;  %v5875_v44 = vld [vmem:[%s5852_s26 + $0x38] sm:$0xff]  ;;  %515 = vst [vmem:[#allocation2 + $0x18] sm:$0xff] %v323_v43 }
  0x14   : > { %517 = vst [vmem:[#allocation2 + $0x28] sm:$0xff] %v5870_v42  ;;  %519 = vst [vmem:[#allocation2 + $0x38] sm:$0xff] %v5875_v44  ;;  %v5880_v47 = vld [vmem:[%s5852_s26 + $0x20] sm:$0xff]  ;;  %v322_v48 = vld [vmem:[%s5852_s26 + $0x10] sm:$0xff]  ;;  %v1246_v5 = vrot.slane %v5870_v42, 1  ;;  %v1252_v11 = vrot.slane %v5875_v44, 1 }
  0x15   : > { %5212 = vmatpush1.bf16.msra.mxu0 %v5211_v23  ;;  %512 = vst [vmem:[#allocation2] sm:$0xff] %v320_v45  ;;  %v5884_v49 = vld [vmem:[%s5852_s26 + $0x30] sm:$0xff]  ;;  %516 = vst [vmem:[#allocation2 + $0x20] sm:$0xff] %v5880_v47  ;;  %v329_v55 = vld [vmem:[%s5852_s26 + $0x48] sm:$0x1] }
  0x16   : > { %5260 = vmatpush1.bf16.msra.mxu1 %v5259_v24  ;;  %5213 = vmatprep.subr.bf16.mxu0 %v8636_v3  ;;  %514 = vst [vmem:[#allocation2 + $0x10] sm:$0xff] %v322_v48  ;;  %518 = vst [vmem:[#allocation2 + $0x30] sm:$0xff] %v5884_v49  ;;  %v331_v56 = vld [vmem:[%s5852_s26 + $0x58] sm:$0x1]  ;;  %v328_v59 = vld [vmem:[%s5852_s26 + $0x40] sm:$0x1] }
  0x17   : > { %5261 = vmatprep.subr.bf16.mxu1 %v8636_v3  ;;  %521 = vst [vmem:[#allocation2 + $0x48] sm:$0x1] %v329_v55  ;;  %523 = vst [vmem:[#allocation2 + $0x58] sm:$0x1] %v331_v56  ;;  %v330_v60 = vld [vmem:[%s5852_s26 + $0x50] sm:$0x1] }
  0x18   : > { %v333_v61 = vld [vmem:[%s5852_s26 + $0x68] sm:$0xff]  ;;  %520 = vst [vmem:[#allocation2 + $0x40] sm:$0x1] %v328_v59  ;;  %522 = vst [vmem:[#allocation2 + $0x50] sm:$0x1] %v330_v60  ;;  %v335_v1 = vld [vmem:[%s5852_s26 + $0x78] sm:$0xff] }
  0x19   : > { %5215 = vmatpush1.bf16.msra.mxu0 %v5214_v29  ;;  %v5917_v0 = vld [vmem:[%s5852_s26 + $0x88] sm:$0xff]  ;;  %525 = vst [vmem:[#allocation2 + $0x68] sm:$0xff] %v333_v61  ;;  %v5921_v2 = vld [vmem:[%s5852_s26 + $0x98] sm:$0xff]  ;;  %527 = vst [vmem:[#allocation2 + $0x78] sm:$0xff] %v335_v1 }
  0x1a   : > { %5263 = vmatpush1.bf16.msra.mxu1 %v5262_v30  ;;  %5216 = vmatprep.subr.bf16.mxu0 %v8636_v3  ;;  %529 = vst [vmem:[#allocation2 + $0x88] sm:$0xff] %v5917_v0  ;;  %531 = vst [vmem:[#allocation2 + $0x98] sm:$0xff] %v5921_v2  ;;  %v332_v6 = vld [vmem:[%s5852_s26 + $0x60] sm:$0xff]  ;;  %v334_v8 = vld [vmem:[%s5852_s26 + $0x70] sm:$0xff] }
  0x1b   : > { %5264 = vmatprep.subr.bf16.mxu1 %v8636_v3  ;;  %v5929_v7 = vld [vmem:[%s5852_s26 + $0x80] sm:$0xff]  ;;  %v5052_v9 = vld [vmem:[%s8633_s2 + $0x388] sm:$0xff]  ;;  %524 = vst [vmem:[#allocation2 + $0x60] sm:$0xff] %v332_v6  ;;  %v5939_v12 = vld [vmem:[%s5852_s26 + $0x90] sm:$0xff] }
  0x1c   : > { %v922_v10 = vld [vmem:[#allocation2 + $0x8] sm:$0xfe]  ;;  %528 = vst [vmem:[#allocation2 + $0x80] sm:$0xff] %v5929_v7  ;;  %526 = vst [vmem:[#allocation2 + $0x70] sm:$0xff] %v334_v8  ;;  %v924_v14 = vld [vmem:[#allocation2 + $0x18] sm:$0xfe]  ;;  %v5274_v18 = vpack.c.bf16 %v5052_v9, %v5051_v63 }
  0x1d   : > { %5218 = vmatpush1.bf16.msra.mxu0 %v5217_v35  ;;  %v1245_v13 = vrot.slane %v922_v10, 1  ;;  %530 = vst [vmem:[#allocation2 + $0x90] sm:$0xff] %v5939_v12  ;;  %v1251_v17 = vrot.slane %v924_v14, 1  ;;  %v5022_v19 = vld [vmem:[%s8633_s2 + $0x298] sm:$0xff]  ;;  %v341_v21 = vld [vmem:[%s5852_s26 + $0xa8] sm:$0x1] }
  0x1e   : > { %5266 = vmatpush1.bf16.msra.mxu1 %v5265_v36  ;;  %5219 = vmatprep.subr.bf16.mxu0 %v8636_v3  ;;  %v343_v22 = vld [vmem:[%s5852_s26 + $0xb8] sm:$0x1]  ;;  %v5053_v23 = vld [vmem:[%s8633_s2 + $0x390] sm:$0xff]  ;;  %533 = vst [vmem:[#allocation2 + $0xa8] sm:$0x1] %v341_v21  ;;  %v5229_v27 = vpack.c.bf16 %v5022_v19, %v5021_v16  ;;  %v5023_v28 = vld [vmem:[%s8633_s2 + $0x2a0] sm:$0xff] }
  0x1f   : > { %5267 = vmatprep.subr.bf16.mxu1 %v8636_v3  ;;  %v1247_v20 = vsel %vm1241_vm0, %v1245_v13, %v1246_v5  ;;  %v5054_v24 = vld [vmem:[%s8633_s2 + $0x398] sm:$0xff]  ;;  %v1253_v25 = vsel %vm1241_vm0, %v1251_v17, %v1252_v11  ;;  %535 = vst [vmem:[#allocation2 + $0xb8] sm:$0x1] %v343_v22  ;;  %v340_v26 = vld [vmem:[%s5852_s26 + $0xa0] sm:$0x1]  ;;  %v5024_v30 = vld [vmem:[%s8633_s2 + $0x2a8] sm:$0xff] }
  0x20   : > { %1819 = vmatprep.mubr.f32.mxu0 %v1247_v20  ;;  %2044 = vmatprep.mubr.f32.mxu1 %v1253_v25  ;;  %532 = vst [vmem:[#allocation2 + $0xa0] sm:$0x1] %v340_v26  ;;  %v5277_v29 = vpack.c.bf16 %v5054_v24, %v5053_v23  ;;  %v5055_v31 = vld [vmem:[%s8633_s2 + $0x3a0] sm:$0xff]  ;;  %v5056_v32 = vld [vmem:[%s8633_s2 + $0x3a8] sm:$0xff]  ;;  %v342_v33 = vld [vmem:[%s5852_s26 + $0xb0] sm:$0x1]  ;;  %v5232_v39 = vpack.c.bf16 %v5024_v30, %v5023_v28 }
  0x21   : > { %5221 = vmatpush1.bf16.msra.mxu0 %v5220_v46  ;;  %v345_v34 = vld [vmem:[%s5852_s26 + $0xc8] sm:$0xff]  ;;  %534 = vst [vmem:[#allocation2 + $0xb0] sm:$0x1] %v342_v33  ;;  %v347_v36 = vld [vmem:[%s5852_s26 + $0xd8] sm:$0xff]  ;;  %v344_v38 = vld [vmem:[%s5852_s26 + $0xc0] sm:$0xff]  ;;  %v5280_v45 = vpack.c.bf16 %v5056_v32, %v5055_v31 }
  0x22   : > { %5269 = vmatpush1.bf16.msra.mxu1 %v5268_v50  ;;  %5222 = vmatprep.subr.bf16.mxu0 %v8636_v3  ;;  %v5982_v35 = vld [vmem:[%s5852_s26 + $0xe8] sm:$0xff]  ;;  %537 = vst [vmem:[#allocation2 + $0xc8] sm:$0xff] %v345_v34  ;;  %v5987_v37 = vld [vmem:[%s5852_s26 + $0xf8] sm:$0xff]  ;;  %539 = vst [vmem:[#allocation2 + $0xd8] sm:$0xff] %v347_v36 }
  0x23   : > { %5270 = vmatprep.subr.bf16.mxu1 %v8636_v3  ;;  %541 = vst [vmem:[#allocation2 + $0xe8] sm:$0xff] %v5982_v35  ;;  %543 = vst [vmem:[#allocation2 + $0xf8] sm:$0xff] %v5987_v37  ;;  %v5992_v40 = vld [vmem:[%s5852_s26 + $0xe0] sm:$0xff]  ;;  %v346_v41 = vld [vmem:[%s5852_s26 + $0xd0] sm:$0xff] }
  0x24   : > { %536 = vst [vmem:[#allocation2 + $0xc0] sm:$0xff] %v344_v38  ;;  %v5996_v43 = vld [vmem:[%s5852_s26 + $0xf0] sm:$0xff]  ;;  %v5026_v48 = vld [vmem:[%s8633_s2 + $0x2b8] sm:$0xff]  ;;  %540 = vst [vmem:[#allocation2 + $0xe0] sm:$0xff] %v5992_v40 }
  0x25   : > { %5224 = vmatpush1.bf16.msra.mxu0 %v5223_v62  ;;  %v5025_v46 = vld [vmem:[%s8633_s2 + $0x2b0] sm:$0xff]  ;;  %538 = vst [vmem:[#allocation2 + $0xd0] sm:$0xff] %v346_v41  ;;  %542 = vst [vmem:[#allocation2 + $0xf0] sm:$0xff] %v5996_v43  ;;  %v5058_v51 = vld [vmem:[%s8633_s2 + $0x3b8] sm:$0xff] }
  0x26   : > { %5272 = vmatpush1.bf16.msra.mxu1 %v5271_v4  ;;  %5225 = vmatprep.subr.bf16.mxu0 %v8636_v3  ;;  %v5057_v50 = vld [vmem:[%s8633_s2 + $0x3b0] sm:$0xff]  ;;  %v5027_v52 = vld [vmem:[%s8633_s2 + $0x2c0] sm:$0xff]  ;;  %v5028_v53 = vld [vmem:[%s8633_s2 + $0x2c8] sm:$0xff]  ;;  %v5235_v55 = vpack.c.bf16 %v5026_v48, %v5025_v46  ;;  %v1243_v46 = vrot.slane %v5880_v47, 1 }
  0x27   : > { %5273 = vmatprep.subr.bf16.mxu1 %v8636_v3  ;;  %v353_v54 = vld [vmem:[%s5852_s26 + $0x108] sm:$0x1]  ;;  %v355_v56 = vld [vmem:[%s5852_s26 + $0x118] sm:$0x1]  ;;  %v352_v57 = vld [vmem:[%s5852_s26 + $0x100] sm:$0x1]  ;;  %v5283_v59 = vpack.c.bf16 %v5058_v51, %v5057_v50  ;;  %v5238_v6 = vpack.c.bf16 %v5028_v53, %v5027_v52 }
  0x28   : > { %545 = vst [vmem:[#allocation2 + $0x108] sm:$0x1] %v353_v54  ;;  %v354_v58 = vld [vmem:[%s5852_s26 + $0x110] sm:$0x1]  ;;  %547 = vst [vmem:[#allocation2 + $0x118] sm:$0x1] %v355_v56 }
  0x29   : > { %5227 = vmatpush1.bf16.msra.mxu0 %v5226_v15  ;;  %544 = vst [vmem:[#allocation2 + $0x100] sm:$0x1] %v352_v57  ;;  %546 = vst [vmem:[#allocation2 + $0x110] sm:$0x1] %v354_v58  ;;  %v357_v60 = vld [vmem:[%s5852_s26 + $0x128] sm:$0xff]  ;;  %v359_v62 = vld [vmem:[%s5852_s26 + $0x138] sm:$0xff] }
  0x2a   : > { %5275 = vmatpush1.bf16.msra.mxu1 %v5274_v18  ;;  %5228 = vmatprep.subr.bf16.mxu0 %v8636_v3  ;;  %v6027_v61 = vld [vmem:[%s5852_s26 + $0x148] sm:$0xff]  ;;  %v5059_v63 = vld [vmem:[%s8633_s2 + $0x3c0] sm:$0xff]  ;;  %549 = vst [vmem:[#allocation2 + $0x128] sm:$0xff] %v357_v60  ;;  %v6039_v4 = vld [vmem:[%s5852_s26 + $0x158] sm:$0xff]  ;;  %v1249_v52 = vrot.slane %v5884_v49, 1  ;;  %v1266_v53 = vrot.slane %v5917_v0, 1 }
  0x2b   : > { %5276 = vmatprep.subr.bf16.mxu1 %v8636_v3  ;;  %v5060_v1 = vld [vmem:[%s8633_s2 + $0x3c8] sm:$0xff]  ;;  %553 = vst [vmem:[#allocation2 + $0x148] sm:$0xff] %v6027_v61  ;;  %551 = vst [vmem:[#allocation2 + $0x138] sm:$0xff] %v359_v62  ;;  %v5029_v8 = vld [vmem:[%s8633_s2 + $0x2d0] sm:$0xff]  ;;  %v1272_v62 = vrot.slane %v5921_v2, 1 }
  0x2c   : > { %555 = vst [vmem:[#allocation2 + $0x158] sm:$0xff] %v6039_v4  ;;  %v5030_v9 = vld [vmem:[%s8633_s2 + $0x2d8] sm:$0xff]  ;;  %v356_v10 = vld [vmem:[%s5852_s26 + $0x120] sm:$0xff]  ;;  %v5286_v13 = vpack.c.bf16 %v5060_v1, %v5059_v63  ;;  %v358_v15 = vld [vmem:[%s5852_s26 + $0x130] sm:$0xff] }
  0x2d   : > { %5230 = vmatpush1.bf16.msra.mxu0 %v5229_v27  ;;  %v6051_v14 = vld [vmem:[%s5852_s26 + $0x140] sm:$0xff]  ;;  %548 = vst [vmem:[#allocation2 + $0x120] sm:$0xff] %v356_v10  ;;  %v6055_v16 = vld [vmem:[%s5852_s26 + $0x150] sm:$0xff]  ;;  %v5062_v18 = vld [vmem:[%s8633_s2 + $0x3d8] sm:$0xff]  ;;  %v5241_v20 = vpack.c.bf16 %v5030_v9, %v5029_v8 }
  0x2e   : > { %5278 = vmatpush1.bf16.msra.mxu1 %v5277_v29  ;;  %5231 = vmatprep.subr.bf16.mxu0 %v8636_v3  ;;  %v5061_v17 = vld [vmem:[%s8633_s2 + $0x3d0] sm:$0xff]  ;;  %552 = vst [vmem:[#allocation2 + $0x140] sm:$0xff] %v6051_v14  ;;  %550 = vst [vmem:[#allocation2 + $0x130] sm:$0xff] %v358_v15  ;;  %v365_v19 = vld [vmem:[%s5852_s26 + $0x168] sm:$0x1] }
  0x2f   : > { %5279 = vmatprep.subr.bf16.mxu1 %v8636_v3  ;;  %554 = vst [vmem:[#allocation2 + $0x150] sm:$0xff] %v6055_v16  ;;  %557 = vst [vmem:[#allocation2 + $0x168] sm:$0x1] %v365_v19  ;;  %v369_v21 = vld [vmem:[%s5852_s26 + $0x188] sm:$0xff]  ;;  %v5289_v22 = vpack.c.bf16 %v5062_v18, %v5061_v17  ;;  %v5031_v23 = vld [vmem:[%s8633_s2 + $0x2e0] sm:$0xff] }
  0x30   : > { %v5032_v24 = vld [vmem:[%s8633_s2 + $0x2e8] sm:$0xff]  ;;  %561 = vst [vmem:[#allocation2 + $0x188] sm:$0xff] %v369_v21  ;;  %v5063_v25 = vld [vmem:[%s8633_s2 + $0x3e0] sm:$0xff]  ;;  %v367_v27 = vld [vmem:[%s5852_s26 + $0x178] sm:$0x1] }
  0x31   : > { %5233 = vmatpush1.bf16.msra.mxu0 %v5232_v39  ;;  %v5064_v26 = vld [vmem:[%s8633_s2 + $0x3e8] sm:$0xff]  ;;  %v6086_v28 = vld [vmem:[%s8633_s2 + $0x2f0] sm:$0xff]  ;;  %v6091_v29 = vld [vmem:[%s8633_s2 + $0x2f8] sm:$0xff]  ;;  %559 = vst [vmem:[#allocation2 + $0x178] sm:$0x1] %v367_v27  ;;  %v5244_v33 = vpack.c.bf16 %v5032_v24, %v5031_v23 }
  0x32   : > { %5281 = vmatpush1.bf16.msra.mxu1 %v5280_v45  ;;  %5234 = vmatprep.subr.bf16.mxu0 %v8636_v3  ;;  %v364_v30 = vld [vmem:[%s5852_s26 + $0x160] sm:$0x1]  ;;  %v366_v31 = vld [vmem:[%s5852_s26 + $0x170] sm:$0x1]  ;;  %v6096_v32 = vld [vmem:[%s5852_s26 + $0x1a8] sm:$0xff]  ;;  %v5292_v41 = vpack.c.bf16 %v5064_v26, %v5063_v25  ;;  %v5247_v63 = vpack.c.bf16 %v6091_v29, %v6086_v28 }
  0x33   : > { %5282 = vmatprep.subr.bf16.mxu1 %v8636_v3  ;;  %v6101_v34 = vld [vmem:[%s8633_s2 + $0x3f0] sm:$0xff]  ;;  %v6103_v36 = vld [vmem:[#allocation2] sm:$0xfe]  ;;  %556 = vst [vmem:[#allocation2 + $0x160] sm:$0x1] %v364_v30  ;;  %565 = vst [vmem:[#allocation2 + $0x1a8] sm:$0xff] %v6096_v32 }
  0x34   : > { %558 = vst [vmem:[#allocation2 + $0x170] sm:$0x1] %v366_v31  ;;  %v371_v38 = vld [vmem:[%s5852_s26 + $0x198] sm:$0xff]  ;;  %v368_v48 = vld [vmem:[%s5852_s26 + $0x180] sm:$0xff]  ;;  %v923_v51 = vld [vmem:[#allocation2 + $0x10] sm:$0xfe] }
  0x35   : > { %5236 = vmatpush1.bf16.msra.mxu0 %v5235_v55  ;;  %v6108_v39 = vld [vmem:[%s5852_s26 + $0x1b8] sm:$0xff]  ;;  %563 = vst [vmem:[#allocation2 + $0x198] sm:$0xff] %v371_v38  ;;  %v6118_v50 = vld [vmem:[%s5852_s26 + $0x1a0] sm:$0xff]  ;;  %560 = vst [vmem:[#allocation2 + $0x180] sm:$0xff] %v368_v48  ;;  %v1242_v56 = vrot.slane %v6103_v36, 1  ;;  %v1248_v15 = vrot.slane %v923_v51, 1 }
  0x36   : > { %5284 = vmatpush1.bf16.msra.mxu1 %v5283_v59  ;;  %5237 = vmatprep.subr.bf16.mxu0 %v8636_v3  ;;  %v5066_v45 = vld [vmem:[%s8633_s2 + $0x3f8] sm:$0xff]  ;;  %567 = vst [vmem:[#allocation2 + $0x1b8] sm:$0xff] %v6108_v39  ;;  %564 = vst [vmem:[#allocation2 + $0x1a0] sm:$0xff] %v6118_v50  ;;  %v370_v54 = vld [vmem:[%s5852_s26 + $0x190] sm:$0xff] }
  0x37   : > { %5285 = vmatprep.subr.bf16.mxu1 %v8636_v3  ;;  %v6126_v55 = vld [vmem:[%s5852_s26 + $0x1b0] sm:$0xff]  ;;  %v6132_v57 = vld [vmem:[%s8633_s2] sm:$0xff]  ;;  %v6137_v58 = vld [vmem:[%s8633_s2 + $0x8] sm:$0xff]  ;;  %562 = vst [vmem:[#allocation2 + $0x190] sm:$0xff] %v370_v54  ;;  %v1244_v29 = vsel %vm1241_vm0, %v1242_v56, %v1243_v46 }
  0x38   : > { %v926_v59 = vld [vmem:[#allocation2 + $0x48] sm:$0x1]  ;;  %v6139_v60 = vld [vmem:[#allocation2 + $0x58] sm:$0x1]  ;;  %566 = vst [vmem:[#allocation2 + $0x1b0] sm:$0xff] %v6126_v55  ;;  %v6148_v1 = vld [vmem:[%s8633_s2 + $0x100] sm:$0xff]  ;;  %v5298_v30 = vpack.c.bf16 %v6137_v58, %v6132_v57 }
  0x39   : > { %5239 = vmatpush1.bf16.msra.mxu0 %v5238_v6  ;;  %v6153_v6 = vld [vmem:[%s8633_s2 + $0x108] sm:$0xff]  ;;  %v6155_v8 = vld [vmem:[#allocation2 + $0x40] sm:$0x1]  ;;  %v6157_v9 = vld [vmem:[#allocation2 + $0x50] sm:$0x1]  ;;  %v1260_v24 = vrot.slane %v6139_v60, 1 }
  0x3a   : > { %5287 = vmatpush1.bf16.msra.mxu1 %v5286_v13  ;;  %5240 = vmatprep.subr.bf16.mxu0 %v8636_v3  ;;  %v377_v10 = vld [vmem:[%s5852_s26 + $0x1c8] sm:$0x1]  ;;  %v5295_v13 = vpack.c.bf16 %v5066_v45, %v6101_v34  ;;  %v379_v17 = vld [vmem:[%s5852_s26 + $0x1d8] sm:$0x1]  ;;  %v376_v18 = vld [vmem:[%s5852_s26 + $0x1c0] sm:$0x1]  ;;  %v5346_v45 = vpack.c.bf16 %v6153_v6, %v6148_v1 }
  0x3b   : > { %5288 = vmatprep.subr.bf16.mxu1 %v8636_v3  ;;  %569 = vst [vmem:[#allocation2 + $0x1c8] sm:$0x1] %v377_v10  ;;  %v381_v19 = vld [vmem:[%s5852_s26 + $0x1e8] sm:$0xff]  ;;  %571 = vst [vmem:[#allocation2 + $0x1d8] sm:$0x1] %v379_v17  ;;  %v6180_v27 = vld [vmem:[%s8633_s2 + $0x10] sm:$0xff] }
  0x3c   : > { %v6166_v21 = vld [vmem:[#allocation2 + $0x68] sm:$0xfe]  ;;  %568 = vst [vmem:[#allocation2 + $0x1c0] sm:$0x1] %v376_v18  ;;  %573 = vst [vmem:[#allocation2 + $0x1e8] sm:$0xff] %v381_v19  ;;  %v6185_v28 = vld [vmem:[%s8633_s2 + $0x18] sm:$0xff] }
  0x3d   : > { %5242 = vmatpush1.bf16.msra.mxu0 %v5241_v20  ;;  %v1256_v20 = vrot.slane %v926_v59, 1  ;;  %v6170_v23 = vld [vmem:[%s5852_s26 + $0x208] sm:$0xff]  ;;  %v6173_v25 = vld [vmem:[#allocation2 + $0x78] sm:$0xfe]  ;;  %v6175_v26 = vld [vmem:[#allocation2 + $0x60] sm:$0xfe] }
  0x3e   : > { %5290 = vmatpush1.bf16.msra.mxu1 %v5289_v22  ;;  %5243 = vmatprep.subr.bf16.mxu0 %v8636_v3  ;;  %v378_v22 = vld [vmem:[%s5852_s26 + $0x1d0] sm:$0x1]  ;;  %577 = vst [vmem:[#allocation2 + $0x208] sm:$0xff] %v6170_v23  ;;  %v1254_v31 = vrot.slane %v6155_v8, 1  ;;  %v6195_v34 = vld [vmem:[#allocation2 + $0x70] sm:$0xfe]  ;;  %v1261_v8 = vsel %vm1241_vm0, %v1252_v11, %v1260_v24  ;;  %v5301_v11 = vpack.c.bf16 %v6185_v28, %v6180_v27 }
  0x3f   : > { %5291 = vmatprep.subr.bf16.mxu1 %v8636_v3  ;;  %570 = vst [vmem:[#allocation2 + $0x1d0] sm:$0x1] %v378_v22  ;;  %v383_v36 = vld [vmem:[%s5852_s26 + $0x1f8] sm:$0xff]  ;;  %v1258_v48 = vrot.slane %v6157_v9, 1  ;;  %v1265_v51 = vrot.slane %v6166_v21, 1  ;;  %v380_v56 = vld [vmem:[%s5852_s26 + $0x1e0] sm:$0xff]  ;;  %v1257_v58 = vsel %vm1241_vm0, %v1246_v5, %v1256_v20 }
  0x40   : > { %v6199_v38 = vld [vmem:[%s5852_s26 + $0x218] sm:$0xff]  ;;  %v6209_v54 = vld [vmem:[#allocation2 + $0xa8] sm:$0x1]  ;;  %575 = vst [vmem:[#allocation2 + $0x1f8] sm:$0xff] %v383_v36  ;;  %v6214_v57 = vld [vmem:[%s5852_s26 + $0x200] sm:$0xff]  ;;  %v1271_v59 = vrot.slane %v6173_v25, 1  ;;  %v1255_v44 = vsel %vm1241_vm0, %v1243_v46, %v1254_v31 }
  0x41   : > { %5245 = vmatpush1.bf16.msra.mxu0 %v5244_v33  ;;  %v1263_v33 = vrot.slane %v5929_v7, 1  ;;  %579 = vst [vmem:[#allocation2 + $0x218] sm:$0xff] %v6199_v38  ;;  %v1269_v60 = vrot.slane %v5939_v12, 1  ;;  %572 = vst [vmem:[#allocation2 + $0x1e0] sm:$0xff] %v380_v56  ;;  %v382_v1 = vld [vmem:[%s5852_s26 + $0x1f0] sm:$0xff]  ;;  %v1262_v42 = vrot.slane %v6175_v26, 1  ;;  %v1259_v46 = vsel %vm1241_vm0, %v1249_v52, %v1258_v48 }
  0x42   : > { %5293 = vmatpush1.bf16.msra.mxu1 %v5292_v41  ;;  %5246 = vmatprep.subr.bf16.mxu0 %v8636_v3  ;;  %v1250_v41 = vsel %vm1241_vm0, %v1248_v15, %v1249_v52  ;;  %576 = vst [vmem:[#allocation2 + $0x200] sm:$0xff] %v6214_v57  ;;  %v6227_v6 = vld [vmem:[%s5852_s26 + $0x210] sm:$0xff]  ;;  %v1268_v5 = vrot.slane %v6195_v34, 1  ;;  %v892_v10 = vld [vmem:[%s8633_s2 + $0x118] sm:$0xff]  ;;  %574 = vst [vmem:[#allocation2 + $0x1f0] sm:$0xff] %v382_v1  ;;  %v1286_v15 = vrot.slane %v5982_v35, 1 }
  0x43   : > { %5294 = vmatprep.subr.bf16.mxu1 %v8636_v3  ;;  %v891_v9 = vld [vmem:[%s8633_s2 + $0x110] sm:$0xff]  ;;  %578 = vst [vmem:[#allocation2 + $0x210] sm:$0xff] %v6227_v6  ;;  %v1292_v17 = vrot.slane %v5987_v37, 1  ;;  %v6253_v18 = vld [vmem:[%s8633_s2 + $0x20] sm:$0xff]  ;;  %v6258_v19 = vld [vmem:[%s8633_s2 + $0x28] sm:$0xff]  ;;  %v1267_v20 = vsel %vm1241_vm0, %v1265_v51, %v1266_v53  ;;  %v1276_v21 = vrot.slane %v6209_v54, 1  ;;  %v1273_v26 = vsel %vm1241_vm0, %v1271_v59, %v1272_v62 }
  0x44   : > { %v389_v47 = vld [vmem:[%s5852_s26 + $0x228] sm:$0x1]  ;;  %v6269_v24 = vld [vmem:[#allocation2 + $0xb0] sm:$0x1]  ;;  %v6274_v25 = vld [vmem:[%s8633_s2 + $0x120] sm:$0xff]  ;;  %v5349_v27 = vpack.c.bf16 %v892_v10, %v891_v9  ;;  %v1283_v51 = vrot.slane %v5992_v40, 1 }
  0x45   : > { %5248 = vmatpush1.bf16.msra.mxu0 %v5247_v63  ;;  %v6222_v63 = vld [vmem:[#allocation2 + $0xb8] sm:$0x1]  ;;  %v6279_v49 = vld [vmem:[%s8633_s2 + $0x128] sm:$0xff]  ;;  %581 = vst [vmem:[#allocation2 + $0x228] sm:$0x1] %v389_v47  ;;  %v6308_v54 = vld [vmem:[%s8633_s2 + $0x30] sm:$0xff] }
  0x46   : > { %5296 = vmatpush1.bf16.msra.mxu1 %v5295_v13  ;;  %5297 = vmatprep.subr.bf16.mxu0 %v8636_v3  ;;  %v6240_v13 = vld [vmem:[#allocation2 + $0xa0] sm:$0x1]  ;;  %v1280_v22 = vrot.slane %v6222_v63, 1  ;;  %v393_v52 = vld [vmem:[%s5852_s26 + $0x248] sm:$0xff]  ;;  %v6293_v31 = vld [vmem:[#allocation2 + $0xd0] sm:$0xfe]  ;;  %v1277_v63 = vsel %vm1241_vm0, %v1266_v53, %v1276_v21 }
  0x47   : > { %5345 = vmatprep.subr.bf16.mxu1 %v8636_v3  ;;  %v6286_v28 = vld [vmem:[#allocation2 + $0xc8] sm:$0xfe]  ;;  %585 = vst [vmem:[#allocation2 + $0x248] sm:$0xff] %v393_v52  ;;  %v391_v34 = vld [vmem:[%s5852_s26 + $0x238] sm:$0x1]  ;;  %v1274_v48 = vrot.slane %v6240_v13, 1 }
  0x48   : > { %1820 = vmatmul.mubr.f32.vlgmr.msra.gmra.mrb[0].mxu0 %v1244_v29  ;;  %v6288_v29 = vld [vmem:[#allocation2 + $0xd8] sm:$0xfe]  ;;  %v388_v36 = vld [vmem:[%s5852_s26 + $0x220] sm:$0x1]  ;;  %583 = vst [vmem:[#allocation2 + $0x238] sm:$0x1] %v391_v34  ;;  %v1281_v10 = vsel %vm1241_vm0, %v1272_v62, %v1280_v22 }
  0x49   : > { %2045 = vmatmul.mubr.f32.vlgmr.msra.gmra.mrb[0].mxu1 %v1250_v41  ;;  %5299 = vmatpush1.bf16.msra.mxu0 %v5298_v30  ;;  %v6290_v30 = vld [vmem:[#allocation2 + $0xc0] sm:$0xfe]  ;;  %v1264_v41 = vsel %vm1241_vm0, %v1262_v42, %v1263_v33  ;;  %v6313_v56 = vld [vmem:[%s8633_s2 + $0x38] sm:$0xff]  ;;  %580 = vst [vmem:[#allocation2 + $0x220] sm:$0x1] %v388_v36  ;;  %v6317_v59 = vld [vmem:[%s5852_s26 + $0x268] sm:$0xff]  ;;  %v5304_v42 = vpack.c.bf16 %v6258_v19, %v6253_v18 }
  0x4a   : > { %5347 = vmatpush1.bf16.msra.mxu1 %v5346_v45  ;;  %1824 = vmatprep.mubr.f32.mxu0 %v1257_v58  ;;  %v1270_v45 = vsel %vm1241_vm0, %v1268_v5, %v1269_v60  ;;  %v390_v58 = vld [vmem:[%s5852_s26 + $0x230] sm:$0x1]  ;;  %v1278_v1 = vrot.slane %v6269_v24, 1  ;;  %v6326_v5 = vld [vmem:[#allocation2 + $0x108] sm:$0x1]  ;;  %589 = vst [vmem:[#allocation2 + $0x268] sm:$0xff] %v6317_v59  ;;  %v1275_v22 = vsel %vm1241_vm0, %v1263_v33, %v1274_v48 }
  0x4b   : > { %2049 = vmatprep.mubr.f32.mxu1 %v1261_v8  ;;  %5300 = vmatprep.subr.bf16.mxu0 %v8636_v3  ;;  %v1285_v8 = vrot.slane %v6286_v28, 1  ;;  %v6331_v9 = vld [vmem:[%s8633_s2 + $0x130] sm:$0xff]  ;;  %582 = vst [vmem:[#allocation2 + $0x230] sm:$0x1] %v390_v58  ;;  %v395_v0 = vld [vmem:[%s5852_s26 + $0x258] sm:$0xff]  ;;  %v1291_v13 = vrot.slane %v6288_v29, 1 }
  0x4c   : > { %1825 = vmatmul.mubr.f32.gmra.mrb[2].mxu0 %v1255_v44  ;;  %5348 = vmatprep.subr.bf16.mxu1 %v8636_v3  ;;  %v6336_v53 = vld [vmem:[%s5852_s26 + $0x278] sm:$0xff]  ;;  %v1289_v44 = vrot.slane %v5996_v43, 1  ;;  %587 = vst [vmem:[#allocation2 + $0x258] sm:$0xff] %v395_v0  ;;  %v392_v2 = vld [vmem:[%s5852_s26 + $0x240] sm:$0xff]  ;;  %v1282_v19 = vrot.slane %v6290_v30, 1  ;;  %v1288_v47 = vrot.slane %v6293_v31, 1  ;;  %v1279_v52 = vsel %vm1241_vm0, %v1269_v60, %v1278_v1 }
  0x4d   : > { %2050 = vmatmul.mubr.f32.gmra.mrb[2].mxu1 %v1259_v46  ;;  %1829 = vmatprep.mubr.f32.mxu0 %v1267_v20  ;;  %v6349_v18 = vld [vmem:[%s8633_s2 + $0x138] sm:$0xff]  ;;  %591 = vst [vmem:[#allocation2 + $0x278] sm:$0xff] %v6336_v53  ;;  %v6354_v62 = vld [vmem:[%s5852_s26 + $0x260] sm:$0xff]  ;;  %584 = vst [vmem:[#allocation2 + $0x240] sm:$0xff] %v392_v2  ;;  %v1287_v7 = vsel %vm1241_vm0, %v1285_v8, %v1286_v15  ;;  %v1296_v33 = vrot.slane %v6326_v5, 1  ;;  %v1293_v29 = vsel %vm1241_vm0, %v1291_v13, %v1292_v17 }
  0x4e   : > { %2054 = vmatprep.mubr.f32.mxu1 %v1273_v26  ;;  %5302 = vmatpush1.bf16.msra.mxu0 %v5301_v11  ;;  %v5352_v11 = vpack.c.bf16 %v6279_v49, %v6274_v25  ;;  %v6359_v46 = vld [vmem:[#allocation2 + $0x118] sm:$0x1]  ;;  %588 = vst [vmem:[#allocation2 + $0x260] sm:$0xff] %v6354_v62  ;;  %v394_v20 = vld [vmem:[%s5852_s26 + $0x250] sm:$0xff]  ;;  %v6369_v24 = vld [vmem:[#allocation2 + $0x100] sm:$0x1]  ;;  %v5355_v36 = vpack.c.bf16 %v6349_v18, %v6331_v9 }
  0x4f   : > { %5350 = vmatpush1.bf16.msra.mxu1 %v5349_v27  ;;  %5303 = vmatprep.subr.bf16.mxu0 %v8636_v3  ;;  %v6364_v21 = vld [vmem:[%s5852_s26 + $0x270] sm:$0xff]  ;;  %v6373_v49 = vld [vmem:[#allocation2 + $0x128] sm:$0xfe]  ;;  %586 = vst [vmem:[#allocation2 + $0x250] sm:$0xff] %v394_v20  ;;  %v6383_v26 = vld [vmem:[#allocation2 + $0x138] sm:$0xfe]  ;;  %v5307_v27 = vpack.c.bf16 %v6313_v56, %v6308_v54  ;;  %v1284_v8 = vsel %vm1241_vm0, %v1282_v19, %v1283_v51 }
  0x50   : > { %1830 = vmatmul.mubr.f32.gmra.mrb[4].mxu0 %v1264_v41  ;;  %5351 = vmatprep.subr.bf16.mxu1 %v8636_v3  ;;  %v6371_v25 = vld [vmem:[#allocation2 + $0x110] sm:$0x1]  ;;  %590 = vst [vmem:[#allocation2 + $0x270] sm:$0xff] %v6364_v21  ;;  %v6390_v12 = vld [vmem:[%s8633_s2 + $0x40] sm:$0xff]  ;;  %v6395_v60 = vld [vmem:[%s8633_s2 + $0x48] sm:$0xff]  ;;  %v1300_v30 = vrot.slane %v6359_v46, 1 }
  0x51   : > { %2055 = vmatmul.mubr.f32.gmra.mrb[4].mxu1 %v1270_v45  ;;  %1834 = vmatprep.mubr.f32.mxu0 %v1277_v63  ;;  %v401_v28 = vld [vmem:[%s5852_s26 + $0x288] sm:$0x1]  ;;  %v6402_v31 = vld [vmem:[#allocation2 + $0x120] sm:$0xfe]  ;;  %v6404_v34 = vld [vmem:[#allocation2 + $0x130] sm:$0xfe] }
  0x52   : > { %2059 = vmatprep.mubr.f32.mxu1 %v1281_v10  ;;  %5305 = vmatpush1.bf16.msra.mxu0 %v5304_v42  ;;  %593 = vst [vmem:[#allocation2 + $0x288] sm:$0x1] %v401_v28  ;;  %v403_v41 = vld [vmem:[%s5852_s26 + $0x298] sm:$0x1]  ;;  %v400_v45 = vld [vmem:[%s5852_s26 + $0x280] sm:$0x1]  ;;  %v1290_v42 = vsel %vm1241_vm0, %v1288_v47, %v1289_v44  ;;  %v5310_v47 = vpack.c.bf16 %v6395_v60, %v6390_v12 }
  0x53   : > { %5353 = vmatpush1.bf16.msra.mxu1 %v5352_v11  ;;  %5306 = vmatprep.subr.bf16.mxu0 %v8636_v3  ;;  %v405_v48 = vld [vmem:[%s5852_s26 + $0x2a8] sm:$0xff]  ;;  %v1306_v54 = vrot.slane %v6027_v61, 1  ;;  %v1312_v56 = vrot.slane %v6039_v4, 1  ;;  %v6418_v58 = vld [vmem:[%s8633_s2 + $0x140] sm:$0xff]  ;;  %595 = vst [vmem:[#allocation2 + $0x298] sm:$0x1] %v403_v41  ;;  %v1297_v11 = vsel %vm1241_vm0, %v1286_v15, %v1296_v33  ;;  %v1301_v20 = vsel %vm1241_vm0, %v1292_v17, %v1300_v30 }
  0x54   : > { %1835 = vmatmul.mubr.f32.gmra.mrb[6].mxu0 %v1275_v22  ;;  %5354 = vmatprep.subr.bf16.mxu1 %v8636_v3  ;;  %v6423_v63 = vld [vmem:[%s8633_s2 + $0x148] sm:$0xff]  ;;  %592 = vst [vmem:[#allocation2 + $0x280] sm:$0x1] %v400_v45  ;;  %v402_v1 = vld [vmem:[%s5852_s26 + $0x290] sm:$0x1]  ;;  %597 = vst [vmem:[#allocation2 + $0x2a8] sm:$0xff] %v405_v48 }
  0x55   : > { %2060 = vmatmul.mubr.f32.gmra.mrb[6].mxu1 %v1279_v52  ;;  %1839 = vmatprep.mubr.f32.mxu0 %v1287_v7  ;;  %v1294_v5 = vrot.slane %v6369_v24, 1  ;;  %v1303_v9 = vrot.slane %v6051_v14, 1  ;;  %v6434_v0 = vld [vmem:[#allocation2 + $0x168] sm:$0x1]  ;;  %594 = vst [vmem:[#allocation2 + $0x290] sm:$0x1] %v402_v1 }
  0x56   : > { %v6437_v10 = vld [vmem:[%s5852_s26 + $0x2c8] sm:$0xff]  ;;  %v407_v13 = vld [vmem:[%s5852_s26 + $0x2b8] sm:$0xff]  ;;  %2064 = vmatprep.mubr.f32.mxu1 %v1293_v29  ;;  %v1298_v18 = vrot.slane %v6371_v25, 1  ;;  %v1305_v2 = vrot.slane %v6373_v49, 1  ;;  %5308 = vmatpush1.bf16.msra.mxu0 %v5307_v27  ;;  %v6452_v46 = vld [vmem:[%s8633_s2 + $0x50] sm:$0xff]  ;;  %v1311_v22 = vrot.slane %v6383_v26, 1  ;;  %v5358_v25 = vpack.c.bf16 %v6423_v63, %v6418_v58 }
  0x57   : > { %v6445_v19 = vld [vmem:[#allocation2 + $0x178] sm:$0x1]  ;;  %601 = vst [vmem:[#allocation2 + $0x2c8] sm:$0xff] %v6437_v10  ;;  %599 = vst [vmem:[#allocation2 + $0x2b8] sm:$0xff] %v407_v13  ;;  %v404_v15 = vld [vmem:[%s5852_s26 + $0x2a0] sm:$0xff]  ;;  %v1309_v24 = vrot.slane %v6055_v16, 1  ;;  %5356 = vmatpush1.bf16.msra.mxu1 %v5355_v36  ;;  %5309 = vmatprep.subr.bf16.mxu0 %v8636_v3  ;;  %v1295_v60 = vsel %vm1241_vm0, %v1283_v51, %v1294_v5 }
  0x58   : > { %v6456_v35 = vld [vmem:[%s5852_s26 + $0x2d8] sm:$0xff]  ;;  %v6472_v37 = vld [vmem:[%s5852_s26 + $0x2c0] sm:$0xff]  ;;  %596 = vst [vmem:[#allocation2 + $0x2a0] sm:$0xff] %v404_v15  ;;  %v406_v17 = vld [vmem:[%s5852_s26 + $0x2b0] sm:$0xff]  ;;  %1840 = vmatmul.mubr.f32.gmra.mrb[8].mxu0 %v1284_v8  ;;  %v1302_v52 = vrot.slane %v6402_v31, 1  ;;  %v1308_v7 = vrot.slane %v6404_v34, 1  ;;  %5357 = vmatprep.subr.bf16.mxu1 %v8636_v3  ;;  %v1299_v31 = vsel %vm1241_vm0, %v1289_v44, %v1298_v18  ;;  %v1307_v34 = vsel %vm1241_vm0, %v1305_v2, %v1306_v54 }
  0x59   : > { %v868_v49 = vld [vmem:[%s8633_s2 + $0x58] sm:$0xff]  ;;  %603 = vst [vmem:[#allocation2 + $0x2d8] sm:$0xff] %v6456_v35  ;;  %v1316_v33 = vrot.slane %v6434_v0, 1  ;;  %v899_v26 = vld [vmem:[%s8633_s2 + $0x150] sm:$0xff]  ;;  %600 = vst [vmem:[#allocation2 + $0x2c0] sm:$0xff] %v6472_v37  ;;  %2065 = vmatmul.mubr.f32.gmra.mrb[8].mxu1 %v1290_v42  ;;  %1844 = vmatprep.mubr.f32.mxu0 %v1297_v11  ;;  %v1313_v45 = vsel %vm1241_vm0, %v1311_v22, %v1312_v56  ;;  %v1320_v43 = vrot.slane %v6445_v19, 1 }
  0x5a   : > { %v900_v27 = vld [vmem:[%s8633_s2 + $0x158] sm:$0xff]  ;;  %v6487_v12 = vld [vmem:[%s5852_s26 + $0x2d0] sm:$0xff]  ;;  %598 = vst [vmem:[#allocation2 + $0x2b0] sm:$0xff] %v406_v17  ;;  %v6492_v28 = vld [vmem:[#allocation2 + $0x160] sm:$0x1]  ;;  %2069 = vmatprep.mubr.f32.mxu1 %v1301_v20  ;;  %5311 = vmatpush1.bf16.msra.mxu0 %v5310_v47  ;;  %v5313_v51 = vpack.c.bf16 %v868_v49, %v6452_v46  ;;  %v1304_v0 = vsel %vm1241_vm0, %v1302_v52, %v1303_v9  ;;  %v1326_v18 = vrot.slane %v6096_v32, 1 }
  0x5b   : > { %v6494_v29 = vld [vmem:[#allocation2 + $0x170] sm:$0x1]  ;;  %v6496_v30 = vld [vmem:[#allocation2 + $0x188] sm:$0xfe]  ;;  %602 = vst [vmem:[#allocation2 + $0x2d0] sm:$0xff] %v6487_v12  ;;  %5359 = vmatpush1.bf16.msra.mxu1 %v5358_v25  ;;  %5312 = vmatprep.subr.bf16.mxu0 %v8636_v3  ;;  %v5361_v44 = vpack.c.bf16 %v900_v27, %v899_v26  ;;  %v6520_v58 = vld [vmem:[%s8633_s2 + $0x60] sm:$0xff]  ;;  %v1310_v13 = vsel %vm1241_vm0, %v1308_v7, %v1309_v24 }
  0x5c   : > { %v6505_v40 = vld [vmem:[#allocation2 + $0x198] sm:$0xfe]  ;;  %v413_v36 = vld [vmem:[%s5852_s26 + $0x2e8] sm:$0x1]  ;;  %v415_v41 = vld [vmem:[%s5852_s26 + $0x2f8] sm:$0x1]  ;;  %1845 = vmatmul.mubr.f32.gmra.mrb[10].mxu0 %v1295_v60  ;;  %5360 = vmatprep.subr.bf16.mxu1 %v8636_v3  ;;  %v1317_v15 = vsel %vm1241_vm0, %v1306_v54, %v1316_v33  ;;  %v1321_v52 = vsel %vm1241_vm0, %v1312_v56, %v1320_v43 }
  0x5d   : > { %v6514_v48 = vld [vmem:[#allocation2 + $0x180] sm:$0xfe]  ;;  %v6525_v63 = vld [vmem:[%s8633_s2 + $0x68] sm:$0xff]  ;;  %605 = vst [vmem:[#allocation2 + $0x2e8] sm:$0x1] %v413_v36  ;;  %2070 = vmatmul.mubr.f32.gmra.mrb[10].mxu1 %v1299_v31  ;;  %1849 = vmatprep.mubr.f32.mxu0 %v1307_v34  ;;  %v1314_v11 = vrot.slane %v6492_v28, 1 }
  0x5e   : > { %607 = vst [vmem:[#allocation2 + $0x2f8] sm:$0x1] %v415_v41  ;;  %v417_v1 = vld [vmem:[%s5852_s26 + $0x308] sm:$0xff]  ;;  %v6528_v8 = vld [vmem:[#allocation2 + $0x190] sm:$0xfe]  ;;  %v6534_v42 = vld [vmem:[%s8633_s2 + $0x160] sm:$0xff]  ;;  %2074 = vmatprep.mubr.f32.mxu1 %v1313_v45  ;;  %5314 = vmatpush1.bf16.msra.mxu0 %v5313_v51  ;;  %v5316_v49 = vpack.c.bf16 %v6525_v63, %v6520_v58 }
  0x5f   : > { %v6539_v5 = vld [vmem:[%s8633_s2 + $0x168] sm:$0xff]  ;;  %609 = vst [vmem:[#allocation2 + $0x308] sm:$0xff] %v417_v1  ;;  %v6554_v19 = vld [vmem:[%s8633_s2 + $0x70] sm:$0xff]  ;;  %v6559_v47 = vld [vmem:[%s8633_s2 + $0x78] sm:$0xff]  ;;  %v1318_v20 = vrot.slane %v6494_v29, 1  ;;  %v1325_v22 = vrot.slane %v6496_v30, 1  ;;  %5362 = vmatpush1.bf16.msra.mxu1 %v5361_v44  ;;  %5315 = vmatprep.subr.bf16.mxu0 %v8636_v3  ;;  %v1315_v51 = vsel %vm1241_vm0, %v1303_v9, %v1314_v11 }
  0x60   : > { %v6549_v2 = vld [vmem:[#allocation2 + $0x1c8] sm:$0x1]  ;;  %v412_v46 = vld [vmem:[%s5852_s26 + $0x2e0] sm:$0x1]  ;;  %v6567_v25 = vld [vmem:[#allocation2 + $0x1d8] sm:$0x1]  ;;  %v5364_v27 = vpack.c.bf16 %v6539_v5, %v6534_v42  ;;  %1850 = vmatmul.mubr.f32.gmra.mrb[12].mxu0 %v1304_v0  ;;  %5363 = vmatprep.subr.bf16.mxu1 %v8636_v3  ;;  %v5319_v58 = vpack.c.bf16 %v6559_v47, %v6554_v19 }
  0x61   : > { %v6574_v17 = vld [vmem:[%s8633_s2 + $0x170] sm:$0xff]  ;;  %604 = vst [vmem:[#allocation2 + $0x2e0] sm:$0x1] %v412_v46  ;;  %v6578_v54 = vld [vmem:[%s5852_s26 + $0x328] sm:$0xff]  ;;  %v1331_v7 = vrot.slane %v6505_v40, 1  ;;  %v1332_v33 = vrot.slane %v6108_v39, 1  ;;  %2075 = vmatmul.mubr.f32.gmra.mrb[12].mxu1 %v1310_v13  ;;  %1854 = vmatprep.mubr.f32.mxu0 %v1317_v15  ;;  %v1327_v14 = vsel %vm1241_vm0, %v1325_v22, %v1326_v18 }
  0x62   : > { %v414_v61 = vld [vmem:[%s5852_s26 + $0x2f0] sm:$0x1]  ;;  %v6585_v26 = vld [vmem:[#allocation2 + $0x1c0] sm:$0x1]  ;;  %v6593_v4 = vld [vmem:[%s8633_s2 + $0x178] sm:$0xff]  ;;  %613 = vst [vmem:[#allocation2 + $0x328] sm:$0xff] %v6578_v54  ;;  %2079 = vmatprep.mubr.f32.mxu1 %v1321_v52  ;;  %5317 = vmatpush1.bf16.msra.mxu0 %v5316_v49 }
  0x63   : > { %606 = vst [vmem:[#allocation2 + $0x2f0] sm:$0x1] %v414_v61  ;;  %v419_v56 = vld [vmem:[%s5852_s26 + $0x318] sm:$0xff]  ;;  %v1322_v28 = vrot.slane %v6514_v48, 1  ;;  %v1323_v29 = vrot.slane %v6118_v50, 1  ;;  %v1329_v30 = vrot.slane %v6126_v55, 1  ;;  %v1319_v48 = vsel %vm1241_vm0, %v1309_v24, %v1318_v20  ;;  %5365 = vmatpush1.bf16.msra.mxu1 %v5364_v27  ;;  %5318 = vmatprep.subr.bf16.mxu0 %v8636_v3 }
  0x64   : > { %v6598_v60 = vld [vmem:[%s5852_s26 + $0x338] sm:$0xff]  ;;  %611 = vst [vmem:[#allocation2 + $0x318] sm:$0xff] %v419_v56  ;;  %v416_v31 = vld [vmem:[%s5852_s26 + $0x300] sm:$0xff]  ;;  %v418_v40 = vld [vmem:[%s5852_s26 + $0x310] sm:$0xff]  ;;  %v1328_v36 = vrot.slane %v6528_v8, 1  ;;  %v1336_v9 = vrot.slane %v6549_v2, 1  ;;  %v1333_v63 = vsel %vm1241_vm0, %v1331_v7, %v1332_v33  ;;  %v5367_v42 = vpack.c.bf16 %v6593_v4, %v6574_v17  ;;  %1855 = vmatmul.mubr.f32.gmra.mrb[14].mxu0 %v1315_v51  ;;  %5366 = vmatprep.subr.bf16.mxu1 %v8636_v3 }
  0x65   : > { %615 = vst [vmem:[#allocation2 + $0x338] sm:$0xff] %v6598_v60  ;;  %v6607_v34 = vld [vmem:[%s5852_s26 + $0x320] sm:$0xff]  ;;  %v6614_v41 = vld [vmem:[#allocation2 + $0x1d0] sm:$0x1]  ;;  %v6616_v45 = vld [vmem:[#allocation2 + $0x1e8] sm:$0xfe]  ;;  %2080 = vmatmul.mubr.f32.gmra.mrb[14].mxu1 %v1319_v48  ;;  %1859 = vmatprep.mubr.f32.mxu0 %v1327_v14  ;;  %v1324_v15 = vsel %vm1241_vm0, %v1322_v28, %v1323_v29 }
  0x66   : > { %608 = vst [vmem:[#allocation2 + $0x300] sm:$0xff] %v416_v31  ;;  %612 = vst [vmem:[#allocation2 + $0x320] sm:$0xff] %v6607_v34  ;;  %v6620_v43 = vld [vmem:[%s5852_s26 + $0x330] sm:$0xff]  ;;  %v6629_v44 = vld [vmem:[#allocation2 + $0x1f8] sm:$0xfe]  ;;  %v1340_v1 = vrot.slane %v6567_v25, 1  ;;  %v1330_v20 = vsel %vm1241_vm0, %v1328_v36, %v1329_v30  ;;  %2084 = vmatprep.mubr.f32.mxu1 %v1333_v63  ;;  %v1337_v17 = vsel %vm1241_vm0, %v1326_v18, %v1336_v9  ;;  %5320 = vmatpush1.bf16.msra.mxu0 %v5319_v58 }
  0x67   : > { %610 = vst [vmem:[#allocation2 + $0x310] sm:$0xff] %v418_v40  ;;  %614 = vst [vmem:[#allocation2 + $0x330] sm:$0xff] %v6620_v43  ;;  %v6637_v16 = vld [vmem:[%s8633_s2 + $0x80] sm:$0xff]  ;;  %v6642_v24 = vld [vmem:[%s8633_s2 + $0x88] sm:$0xff]  ;;  %v1346_v8 = vrot.slane %v6170_v23, 1  ;;  %v1334_v11 = vrot.slane %v6585_v26, 1  ;;  %5368 = vmatpush1.bf16.msra.mxu1 %v5367_v42  ;;  %5321 = vmatprep.subr.bf16.mxu0 %v8636_v3 }
  0x68   : > { %v6655_v5 = vld [vmem:[%s8633_s2 + $0x180] sm:$0xff]  ;;  %v6660_v0 = vld [vmem:[%s8633_s2 + $0x188] sm:$0xff]  ;;  %v427_v47 = vld [vmem:[%s5852_s26 + $0x358] sm:$0x1]  ;;  %v1338_v61 = vrot.slane %v6614_v41, 1  ;;  %v1345_v52 = vrot.slane %v6616_v45, 1  ;;  %v5322_v26 = vpack.c.bf16 %v6642_v24, %v6637_v16  ;;  %v1341_v32 = vsel %vm1241_vm0, %v1332_v33, %v1340_v1  ;;  %1860 = vmatmul.mubr.f32.gmra.mrb[16].mxu0 %v1324_v15  ;;  %5369 = vmatprep.subr.bf16.mxu1 %v8636_v3 }
  0x69   : > { %v429_v13 = vld [vmem:[%s5852_s26 + $0x368] sm:$0xff]  ;;  %v6664_v2 = vld [vmem:[#allocation2 + $0x1e0] sm:$0xfe]  ;;  %v6678_v22 = vld [vmem:[#allocation2 + $0x1f0] sm:$0xfe]  ;;  %v1351_v18 = vrot.slane %v6629_v44, 1  ;;  %v5370_v31 = vpack.c.bf16 %v6660_v0, %v6655_v5  ;;  %2085 = vmatmul.mubr.f32.gmra.mrb[16].mxu1 %v1330_v20  ;;  %1864 = vmatprep.mubr.f32.mxu0 %v1337_v17  ;;  %v1335_v41 = vsel %vm1241_vm0, %v1323_v29, %v1334_v11 }
  0x6a   : > { %v425_v19 = vld [vmem:[%s5852_s26 + $0x348] sm:$0x1]  ;;  %621 = vst [vmem:[#allocation2 + $0x368] sm:$0xff] %v429_v13  ;;  %619 = vst [vmem:[#allocation2 + $0x358] sm:$0x1] %v427_v47  ;;  %v431_v27 = vld [vmem:[%s5852_s26 + $0x378] sm:$0xff]  ;;  %2089 = vmatprep.mubr.f32.mxu1 %v1341_v32  ;;  %v1339_v50 = vsel %vm1241_vm0, %v1329_v30, %v1338_v61  ;;  %v1347_v29 = vsel %vm1241_vm0, %v1345_v52, %v1346_v8  ;;  %5323 = vmatpush1.bf16.msra.mxu0 %v5322_v26 }
  0x6b   : > { %v6670_v46 = vld [vmem:[%s5852_s26 + $0x388] sm:$0xff]  ;;  %617 = vst [vmem:[#allocation2 + $0x348] sm:$0x1] %v425_v19  ;;  %v424_v25 = vld [vmem:[%s5852_s26 + $0x340] sm:$0x1]  ;;  %v6694_v4 = vld [vmem:[%s5852_s26 + $0x398] sm:$0xff]  ;;  %5371 = vmatpush1.bf16.msra.mxu1 %v5370_v31  ;;  %5324 = vmatprep.subr.bf16.mxu0 %v8636_v3 }
  0x6c   : > { %v426_v49 = vld [vmem:[%s5852_s26 + $0x350] sm:$0x1]  ;;  %625 = vst [vmem:[#allocation2 + $0x388] sm:$0xff] %v6670_v46  ;;  %v6688_v7 = vld [vmem:[#allocation2 + $0x228] sm:$0x1]  ;;  %v1352_v56 = vrot.slane %v6199_v38, 1  ;;  %1865 = vmatmul.mubr.f32.gmra.mrb[18].mxu0 %v1335_v41  ;;  %5372 = vmatprep.subr.bf16.mxu1 %v8636_v3 }
  0x6d   : > { %616 = vst [vmem:[#allocation2 + $0x340] sm:$0x1] %v424_v25  ;;  %618 = vst [vmem:[#allocation2 + $0x350] sm:$0x1] %v426_v49  ;;  %v6701_v28 = vld [vmem:[#allocation2 + $0x248] sm:$0xfe]  ;;  %2090 = vmatmul.mubr.f32.gmra.mrb[18].mxu1 %v1339_v50  ;;  %1869 = vmatprep.mubr.f32.mxu0 %v1347_v29 }
  0x6e   : > { %623 = vst [vmem:[#allocation2 + $0x378] sm:$0xff] %v431_v27  ;;  %627 = vst [vmem:[#allocation2 + $0x398] sm:$0xff] %v6694_v4  ;;  %v428_v40 = vld [vmem:[%s5852_s26 + $0x360] sm:$0xff]  ;;  %v968_v33 = vld [vmem:[#allocation2 + $0x238] sm:$0x1]  ;;  %v1342_v45 = vrot.slane %v6664_v2, 1  ;;  %v1353_v1 = vsel %vm1241_vm0, %v1351_v18, %v1352_v56 }
  0x6f   : > { %v6709_v39 = vld [vmem:[%s5852_s26 + $0x380] sm:$0xff]  ;;  %v6713_v36 = vld [vmem:[#allocation2 + $0x230] sm:$0x1]  ;;  %620 = vst [vmem:[#allocation2 + $0x360] sm:$0xff] %v428_v40  ;;  %v1343_v48 = vrot.slane %v6214_v57, 1  ;;  %v1349_v14 = vrot.slane %v6227_v6, 1  ;;  %2094 = vmatprep.mubr.f32.mxu1 %v1353_v1 }
  0x70   : > { %v6711_v51 = vld [vmem:[#allocation2 + $0x220] sm:$0x1]  ;;  %624 = vst [vmem:[#allocation2 + $0x380] sm:$0xff] %v6709_v39  ;;  %v430_v9 = vld [vmem:[%s5852_s26 + $0x370] sm:$0xff]  ;;  %v1348_v16 = vrot.slane %v6678_v22, 1  ;;  %v1356_v24 = vrot.slane %v6688_v7, 1 }
  0x71   : > { %v6725_v44 = vld [vmem:[%s5852_s26 + $0x390] sm:$0xff]  ;;  %622 = vst [vmem:[#allocation2 + $0x370] sm:$0xff] %v430_v9  ;;  %v876_v55 = vld [vmem:[%s8633_s2 + $0x98] sm:$0xff]  ;;  %v1360_v42 = vrot.slane %v968_v33, 1  ;;  %v437_v0 = vld [vmem:[%s5852_s26 + $0x3a8] sm:$0x1]  ;;  %v1344_v22 = vsel %vm1241_vm0, %v1342_v45, %v1343_v48 }
  0x72   : > { %v875_v58 = vld [vmem:[%s8633_s2 + $0x90] sm:$0xff]  ;;  %626 = vst [vmem:[#allocation2 + $0x390] sm:$0xff] %v6725_v44  ;;  %v908_v63 = vld [vmem:[%s8633_s2 + $0x198] sm:$0xff]  ;;  %v1365_v11 = vrot.slane %v6701_v28, 1  ;;  %v1366_v2 = vrot.slane %v6317_v59, 1  ;;  %v1372_v47 = vrot.slane %v6336_v53, 1  ;;  %v1350_v52 = vsel %vm1241_vm0, %v1348_v16, %v1349_v14  ;;  %1870 = vmatmul.mubr.f32.gmra.mrb[20].mxu0 %v1344_v22 }
  0x73   : > { %v907_v30 = vld [vmem:[%s8633_s2 + $0x190] sm:$0xff]  ;;  %v5325_v5 = vpack.c.bf16 %v876_v55, %v875_v58  ;;  %v439_v13 = vld [vmem:[%s5852_s26 + $0x3b8] sm:$0x1]  ;;  %v6756_v19 = vld [vmem:[#allocation2 + $0x258] sm:$0xfe]  ;;  %v1354_v25 = vrot.slane %v6711_v51, 1  ;;  %v1357_v7 = vsel %vm1241_vm0, %v1346_v8, %v1356_v24  ;;  %v1361_v18 = vsel %vm1241_vm0, %v1352_v56, %v1360_v42  ;;  %2095 = vmatmul.mubr.f32.gmra.mrb[20].mxu1 %v1350_v52 }
  0x74   : > { %v5373_v15 = vpack.c.bf16 %v908_v63, %v907_v30  ;;  %629 = vst [vmem:[#allocation2 + $0x3a8] sm:$0x1] %v437_v0  ;;  %631 = vst [vmem:[#allocation2 + $0x3b8] sm:$0x1] %v439_v13  ;;  %v441_v20 = vld [vmem:[%s5852_s26 + $0x3c8] sm:$0xff]  ;;  %v1358_v49 = vrot.slane %v6713_v36, 1  ;;  %1874 = vmatprep.mubr.f32.mxu0 %v1357_v7  ;;  %v1367_v41 = vsel %vm1241_vm0, %v1365_v11, %v1366_v2  ;;  %2099 = vmatprep.mubr.f32.mxu1 %v1361_v18 }
  0x75   : > { %v6766_v17 = vld [vmem:[#allocation2 + $0x240] sm:$0xfe]  ;;  %v6768_v61 = vld [vmem:[#allocation2 + $0x250] sm:$0xfe]  ;;  %633 = vst [vmem:[#allocation2 + $0x3c8] sm:$0xff] %v441_v20  ;;  %5326 = vmatpush1.bf16.msra.mxu0 %v5325_v5  ;;  %v1371_v28 = vrot.slane %v6756_v19, 1  ;;  %v1355_v36 = vsel %vm1241_vm0, %v1343_v48, %v1354_v25 }
  0x76   : > { %v6776_v26 = vld [vmem:[#allocation2 + $0x288] sm:$0x1]  ;;  %v6778_v27 = vld [vmem:[#allocation2 + $0x298] sm:$0x1]  ;;  %v436_v32 = vld [vmem:[%s5852_s26 + $0x3a0] sm:$0x1]  ;;  %5374 = vmatpush1.bf16.msra.mxu1 %v5373_v15  ;;  %5327 = vmatprep.subr.bf16.mxu0 %v8636_v3  ;;  %v1359_v48 = vsel %vm1241_vm0, %v1349_v14, %v1358_v49 }
  0x77   : > { %v6785_v31 = vld [vmem:[#allocation2 + $0x280] sm:$0x1]  ;;  %v6787_v23 = vld [vmem:[#allocation2 + $0x290] sm:$0x1]  ;;  %628 = vst [vmem:[#allocation2 + $0x3a0] sm:$0x1] %v436_v32  ;;  %5375 = vmatprep.subr.bf16.mxu1 %v8636_v3  ;;  %v1373_v14 = vsel %vm1241_vm0, %v1371_v28, %v1372_v47  ;;  %1875 = vmatmul.mubr.f32.gmra.mrb[22].mxu0 %v1355_v36 }
  0x78   : > { %v438_v8 = vld [vmem:[%s5852_s26 + $0x3b0] sm:$0x1]  ;;  %v6791_v40 = vld [vmem:[%s5852_s26 + $0x3e8] sm:$0xff]  ;;  %v1363_v33 = vrot.slane %v6354_v62, 1  ;;  %v443_v38 = vld [vmem:[%s5852_s26 + $0x3d8] sm:$0xff]  ;;  %v1362_v45 = vrot.slane %v6766_v17, 1  ;;  %2100 = vmatmul.mubr.f32.gmra.mrb[22].mxu1 %v1359_v48  ;;  %1879 = vmatprep.mubr.f32.mxu0 %v1367_v41 }
  0x79   : > { %630 = vst [vmem:[#allocation2 + $0x3b0] sm:$0x1] %v438_v8  ;;  %637 = vst [vmem:[#allocation2 + $0x3e8] sm:$0xff] %v6791_v40  ;;  %v6798_v56 = vld [vmem:[%s5852_s26 + $0x3f8] sm:$0xff]  ;;  %v440_v51 = vld [vmem:[%s5852_s26 + $0x3c0] sm:$0xff]  ;;  %v1369_v9 = vrot.slane %v6364_v21, 1  ;;  %2104 = vmatprep.mubr.f32.mxu1 %v1373_v14 }
  0x7a   : > { %v6810_v58 = vld [vmem:[#allocation2 + $0x2a8] sm:$0xfe]  ;;  %635 = vst [vmem:[#allocation2 + $0x3d8] sm:$0xff] %v443_v38  ;;  %639 = vst [vmem:[#allocation2 + $0x3f8] sm:$0xff] %v6798_v56  ;;  %v6814_v50 = vld [vmem:[%s5852_s26 + $0x3e0] sm:$0xff]  ;;  %v1368_v29 = vrot.slane %v6768_v61, 1  ;;  %v1364_v22 = vsel %vm1241_vm0, %v1362_v45, %v1363_v33 }
  0x7b   : > { %632 = vst [vmem:[#allocation2 + $0x3c0] sm:$0xff] %v440_v51  ;;  %v442_v57 = vld [vmem:[%s5852_s26 + $0x3d0] sm:$0xff]  ;;  %v1376_v16 = vrot.slane %v6776_v26, 1  ;;  %v1386_v24 = vrot.slane %v6437_v10, 1  ;;  %636 = vst [vmem:[#allocation2 + $0x3e0] sm:$0xff] %v6814_v50  ;;  %v877_v30 = vld [vmem:[%s8633_s2 + $0xa0] sm:$0xff]  ;;  %1880 = vmatmul.mubr.f32.gmra.mrb[24].mxu0 %v1364_v22 }
  0x7c   : > { %v6825_v55 = vld [vmem:[%s5852_s26 + $0x3f0] sm:$0xff]  ;;  %634 = vst [vmem:[#allocation2 + $0x3d0] sm:$0xff] %v442_v57  ;;  %v878_v6 = vld [vmem:[%s8633_s2 + $0xa8] sm:$0xff]  ;;  %v1380_v63 = vrot.slane %v6778_v27, 1  ;;  %v6837_v1 = vld [vmem:[#allocation2 + $0x2b8] sm:$0xfe]  ;;  %v1370_v7 = vsel %vm1241_vm0, %v1368_v29, %v1369_v9 }
  0x7d   : > { %v1392_v42 = vrot.slane %v6456_v35, 1  ;;  %638 = vst [vmem:[#allocation2 + $0x3f0] sm:$0xff] %v6825_v55  ;;  %v5328_v5 = vpack.c.bf16 %v878_v6, %v877_v30  ;;  %v909_v0 = vld [vmem:[%s8633_s2 + $0x1a0] sm:$0xff]  ;;  %v1374_v13 = vrot.slane %v6785_v31, 1  ;;  %v1378_v11 = vrot.slane %v6787_v23, 1  ;;  %v910_v15 = vld [vmem:[%s8633_s2 + $0x1a8] sm:$0xff]  ;;  %2105 = vmatmul.mubr.f32.gmra.mrb[24].mxu1 %v1370_v7 }
  0x7e   : > { %v6846_v19 = vld [vmem:[#allocation2 + $0x2a0] sm:$0xfe]  ;;  %v453_v20 = vld [vmem:[%s5852_s26 + $0x428] sm:$0xff]  ;;  %v1385_v25 = vrot.slane %v6810_v58, 1  ;;  %v5376_v49 = vpack.c.bf16 %v910_v15, %v909_v0  ;;  %v451_v61 = vld [vmem:[%s5852_s26 + $0x418] sm:$0x1]  ;;  %v1377_v26 = vsel %vm1241_vm0, %v1366_v2, %v1376_v16  ;;  %v1381_v28 = vsel %vm1241_vm0, %v1372_v47, %v1380_v63 }
  0x7f   : > { %v449_v17 = vld [vmem:[%s5852_s26 + $0x408] sm:$0x1]  ;;  %645 = vst [vmem:[#allocation2 + $0x428] sm:$0xff] %v453_v20  ;;  %v6867_v27 = vld [vmem:[#allocation2 + $0x2b0] sm:$0xfe]  ;;  %5329 = vmatpush1.bf16.msra.mxu0 %v5328_v5  ;;  %v1391_v31 = vrot.slane %v6837_v1, 1  ;;  %1884 = vmatprep.mubr.f32.mxu0 %v1377_v26  ;;  %v1375_v51 = vsel %vm1241_vm0, %v1363_v33, %v1374_v13  ;;  %v1379_v29 = vsel %vm1241_vm0, %v1369_v9, %v1378_v11 }
  0x80   : > { %v6859_v52 = vld [vmem:[%s5852_s26 + $0x448] sm:$0xff]  ;;  %641 = vst [vmem:[#allocation2 + $0x408] sm:$0x1] %v449_v17  ;;  %643 = vst [vmem:[#allocation2 + $0x418] sm:$0x1] %v451_v61  ;;  %v1383_v59 = vrot.slane %v6472_v37, 1  ;;  %5377 = vmatpush1.bf16.msra.mxu1 %v5376_v49  ;;  %5330 = vmatprep.subr.bf16.mxu0 %v8636_v3  ;;  %v1387_v62 = vsel %vm1241_vm0, %v1385_v25, %v1386_v24 }
  0x81   : > { %v448_v32 = vld [vmem:[%s5852_s26 + $0x400] sm:$0x1]  ;;  %v450_v18 = vld [vmem:[%s5852_s26 + $0x410] sm:$0x1]  ;;  %649 = vst [vmem:[#allocation2 + $0x448] sm:$0xff] %v6859_v52  ;;  %v455_v2 = vld [vmem:[%s5852_s26 + $0x438] sm:$0xff]  ;;  %5378 = vmatprep.subr.bf16.mxu1 %v8636_v3  ;;  %2109 = vmatprep.mubr.f32.mxu1 %v1381_v28  ;;  %v1393_v9 = vsel %vm1241_vm0, %v1391_v31, %v1392_v42 }
  0x82   : > { %v982_v23 = vld [vmem:[#allocation2 + $0x2e8] sm:$0x1]  ;;  %640 = vst [vmem:[#allocation2 + $0x400] sm:$0x1] %v448_v32  ;;  %642 = vst [vmem:[#allocation2 + $0x410] sm:$0x1] %v450_v18  ;;  %1885 = vmatmul.mubr.f32.gmra.mrb[26].mxu0 %v1375_v51  ;;  %2110 = vmatmul.mubr.f32.gmra.mrb[26].mxu1 %v1379_v29 }
  0x83   : > { %v6879_v8 = vld [vmem:[%s5852_s26 + $0x458] sm:$0xff]  ;;  %v6882_v53 = vld [vmem:[#allocation2 + $0x2e0] sm:$0x1]  ;;  %v6884_v47 = vld [vmem:[#allocation2 + $0x308] sm:$0xfe]  ;;  %647 = vst [vmem:[#allocation2 + $0x438] sm:$0xff] %v455_v2  ;;  %1889 = vmatprep.mubr.f32.mxu0 %v1387_v62  ;;  %2114 = vmatprep.mubr.f32.mxu1 %v1393_v9 }
  0x84   : > { %v984_v38 = vld [vmem:[#allocation2 + $0x2f8] sm:$0x1]  ;;  %651 = vst [vmem:[#allocation2 + $0x458] sm:$0xff] %v6879_v8  ;;  %v1382_v36 = vrot.slane %v6846_v19, 1  ;;  %v1389_v41 = vrot.slane %v6487_v12, 1  ;;  %v452_v57 = vld [vmem:[%s5852_s26 + $0x420] sm:$0xff] }
  0x85   : > { %v6893_v45 = vld [vmem:[#allocation2 + $0x2f0] sm:$0x1]  ;;  %v6895_v58 = vld [vmem:[#allocation2 + $0x318] sm:$0xfe]  ;;  %v6899_v48 = vld [vmem:[%s5852_s26 + $0x440] sm:$0xff]  ;;  %v1388_v33 = vrot.slane %v6867_v27, 1 }
  0x86   : > { %v1396_v16 = vrot.slane %v982_v23, 1  ;;  %644 = vst [vmem:[#allocation2 + $0x420] sm:$0xff] %v452_v57  ;;  %648 = vst [vmem:[#allocation2 + $0x440] sm:$0xff] %v6899_v48  ;;  %v454_v30 = vld [vmem:[%s5852_s26 + $0x430] sm:$0xff]  ;;  %v1400_v14 = vrot.slane %v984_v38, 1  ;;  %v880_v63 = vld [vmem:[%s8633_s2 + $0xb8] sm:$0xff]  ;;  %v1384_v20 = vsel %vm1241_vm0, %v1382_v36, %v1383_v59 }
  0x87   : > { %v6911_v6 = vld [vmem:[%s5852_s26 + $0x450] sm:$0xff]  ;;  %646 = vst [vmem:[#allocation2 + $0x430] sm:$0xff] %v454_v30  ;;  %v912_v5 = vld [vmem:[%s8633_s2 + $0x1b8] sm:$0xff]  ;;  %v1406_v0 = vrot.slane %v6578_v54, 1  ;;  %v461_v19 = vld [vmem:[%s5852_s26 + $0x468] sm:$0x1]  ;;  %v1390_v61 = vsel %vm1241_vm0, %v1388_v33, %v1389_v41  ;;  %1890 = vmatmul.mubr.f32.gmra.mrb[28].mxu0 %v1384_v20 }
  0x88   : > { %v879_v21 = vld [vmem:[%s8633_s2 + $0xb0] sm:$0xff]  ;;  %650 = vst [vmem:[#allocation2 + $0x450] sm:$0xff] %v6911_v6  ;;  %v463_v15 = vld [vmem:[%s5852_s26 + $0x478] sm:$0x1]  ;;  %v1394_v22 = vrot.slane %v6882_v53, 1  ;;  %v1405_v25 = vrot.slane %v6884_v47, 1  ;;  %v1397_v7 = vsel %vm1241_vm0, %v1386_v24, %v1396_v16  ;;  %v1401_v28 = vsel %vm1241_vm0, %v1392_v42, %v1400_v14  ;;  %2115 = vmatmul.mubr.f32.gmra.mrb[28].mxu1 %v1390_v61 }
  0x89   : > { %v911_v1 = vld [vmem:[%s8633_s2 + $0x1b0] sm:$0xff]  ;;  %v5331_v13 = vpack.c.bf16 %v880_v63, %v879_v21  ;;  %v1412_v49 = vrot.slane %v6598_v60, 1  ;;  %653 = vst [vmem:[#allocation2 + $0x468] sm:$0x1] %v461_v19  ;;  %655 = vst [vmem:[#allocation2 + $0x478] sm:$0x1] %v463_v15  ;;  %1894 = vmatprep.mubr.f32.mxu0 %v1397_v7  ;;  %2119 = vmatprep.mubr.f32.mxu1 %v1401_v28 }
  0x8a   : > { %v5379_v11 = vpack.c.bf16 %v912_v5, %v911_v1  ;;  %v465_v17 = vld [vmem:[%s5852_s26 + $0x488] sm:$0xff]  ;;  %v1398_v26 = vrot.slane %v6893_v45, 1  ;;  %v1411_v27 = vrot.slane %v6895_v58, 1  ;;  %v985_v32 = vld [vmem:[#allocation2 + $0x300] sm:$0xfe]  ;;  %v1403_v2 = vrot.slane %v6607_v34, 1 }
  0x8b   : > { %v6947_v18 = vld [vmem:[#allocation2 + $0x310] sm:$0xfe]  ;;  %5332 = vmatpush1.bf16.msra.mxu0 %v5331_v13  ;;  %657 = vst [vmem:[#allocation2 + $0x488] sm:$0xff] %v465_v17  ;;  %v990_v31 = vld [vmem:[#allocation2 + $0x348] sm:$0x1]  ;;  %v467_v42 = vld [vmem:[%s5852_s26 + $0x498] sm:$0xff]  ;;  %v1395_v47 = vsel %vm1241_vm0, %v1383_v59, %v1394_v22  ;;  %v1407_v59 = vsel %vm1241_vm0, %v1405_v25, %v1406_v0 }
  0x8c   : > { %v6952_v10 = vld [vmem:[#allocation2 + $0x358] sm:$0x1]  ;;  %v6954_v24 = vld [vmem:[#allocation2 + $0x368] sm:$0xfe]  ;;  %5380 = vmatpush1.bf16.msra.mxu1 %v5379_v11  ;;  %v460_v23 = vld [vmem:[%s5852_s26 + $0x460] sm:$0x1]  ;;  %5333 = vmatprep.subr.bf16.mxu0 %v8636_v3  ;;  %v1399_v37 = vsel %vm1241_vm0, %v1389_v41, %v1398_v26  ;;  %v1413_v12 = vsel %vm1241_vm0, %v1411_v27, %v1412_v49 }
  0x8d   : > { %v6959_v38 = vld [vmem:[#allocation2 + $0x340] sm:$0x1]  ;;  %652 = vst [vmem:[#allocation2 + $0x460] sm:$0x1] %v460_v23  ;;  %v462_v35 = vld [vmem:[%s5852_s26 + $0x470] sm:$0x1]  ;;  %5381 = vmatprep.subr.bf16.mxu1 %v8636_v3  ;;  %1895 = vmatmul.mubr.f32.gmra.mrb[30].mxu0 %v1395_v47 }
  0x8e   : > { %v6963_v53 = vld [vmem:[%s5852_s26 + $0x4a8] sm:$0xff]  ;;  %v1402_v51 = vrot.slane %v985_v32, 1  ;;  %v1409_v36 = vrot.slane %v6620_v43, 1  ;;  %v6971_v45 = vld [vmem:[#allocation2 + $0x350] sm:$0x1]  ;;  %v6975_v58 = vld [vmem:[%s5852_s26 + $0x4b8] sm:$0xff]  ;;  %2120 = vmatmul.mubr.f32.gmra.mrb[30].mxu1 %v1399_v37  ;;  %1899 = vmatprep.mubr.f32.mxu0 %v1407_v59 }
  0x8f   : > { %654 = vst [vmem:[#allocation2 + $0x470] sm:$0x1] %v462_v35  ;;  %661 = vst [vmem:[#allocation2 + $0x4a8] sm:$0xff] %v6963_v53  ;;  %v464_v57 = vld [vmem:[%s5852_s26 + $0x480] sm:$0xff]  ;;  %v1408_v29 = vrot.slane %v6947_v18, 1  ;;  %v1416_v62 = vrot.slane %v990_v31, 1  ;;  %2124 = vmatprep.mubr.f32.mxu1 %v1413_v12 }
  0x90   : > { %659 = vst [vmem:[#allocation2 + $0x498] sm:$0xff] %v467_v42  ;;  %v6985_v33 = vld [vmem:[#allocation2 + $0x378] sm:$0xfe]  ;;  %663 = vst [vmem:[#allocation2 + $0x4b8] sm:$0xff] %v6975_v58  ;;  %v6989_v16 = vld [vmem:[%s5852_s26 + $0x4a0] sm:$0xff]  ;;  %v1420_v41 = vrot.slane %v6952_v10, 1  ;;  %v1404_v15 = vsel %vm1241_vm0, %v1402_v51, %v1403_v2 }
  0x91   : > { %656 = vst [vmem:[#allocation2 + $0x480] sm:$0xff] %v464_v57  ;;  %v466_v30 = vld [vmem:[%s5852_s26 + $0x490] sm:$0xff]  ;;  %660 = vst [vmem:[#allocation2 + $0x4a0] sm:$0xff] %v6989_v16  ;;  %v881_v9 = vld [vmem:[%s8633_s2 + $0xc0] sm:$0xff]  ;;  %v1425_v63 = vrot.slane %v6954_v24, 1  ;;  %v1426_v1 = vrot.slane %v6670_v46, 1  ;;  %v1410_v7 = vsel %vm1241_vm0, %v1408_v29, %v1409_v36  ;;  %v1417_v26 = vsel %vm1241_vm0, %v1406_v0, %v1416_v62  ;;  %1900 = vmatmul.mubr.f32.gmra.mrb[32].mxu0 %v1404_v15 }
  0x92   : > { %v6998_v21 = vld [vmem:[%s5852_s26 + $0x4b0] sm:$0xff]  ;;  %658 = vst [vmem:[#allocation2 + $0x490] sm:$0xff] %v466_v30  ;;  %v882_v14 = vld [vmem:[%s8633_s2 + $0xc8] sm:$0xff]  ;;  %v1432_v5 = vrot.slane %v6694_v4, 1  ;;  %v7009_v13 = vld [vmem:[#allocation2 + $0x360] sm:$0xfe]  ;;  %v1421_v10 = vsel %vm1241_vm0, %v1412_v49, %v1420_v41  ;;  %2125 = vmatmul.mubr.f32.gmra.mrb[32].mxu1 %v1410_v7  ;;  %1904 = vmatprep.mubr.f32.mxu0 %v1417_v26 }
  0x93   : > { %662 = vst [vmem:[#allocation2 + $0x4b0] sm:$0xff] %v6998_v21  ;;  %v5334_v11 = vpack.c.bf16 %v882_v14, %v881_v9  ;;  %v913_v19 = vld [vmem:[%s8633_s2 + $0x1c0] sm:$0xff]  ;;  %v1414_v20 = vrot.slane %v6959_v38, 1  ;;  %v1418_v22 = vrot.slane %v6971_v45, 1  ;;  %v7020_v25 = vld [vmem:[#allocation2 + $0x370] sm:$0xfe]  ;;  %2129 = vmatprep.mubr.f32.mxu1 %v1421_v10 }
  0x94   : > { %v914_v17 = vld [vmem:[%s8633_s2 + $0x1c8] sm:$0xff]  ;;  %v1431_v27 = vrot.slane %v6985_v33, 1  ;;  %v475_v28 = vld [vmem:[%s5852_s26 + $0x4d8] sm:$0x1]  ;;  %v472_v23 = vld [vmem:[%s5852_s26 + $0x4c0] sm:$0x1] }
  0x95   : > { %v477_v61 = vld [vmem:[%s5852_s26 + $0x4e8] sm:$0xff]  ;;  %5335 = vmatpush1.bf16.msra.mxu0 %v5334_v11  ;;  %v5382_v32 = vpack.c.bf16 %v914_v17, %v913_v19  ;;  %667 = vst [vmem:[#allocation2 + $0x4d8] sm:$0x1] %v475_v28  ;;  %v474_v54 = vld [vmem:[%s5852_s26 + $0x4d0] sm:$0x1]  ;;  %v1423_v0 = vrot.slane %v6709_v39, 1  ;;  %v1415_v60 = vsel %vm1241_vm0, %v1403_v2, %v1414_v20  ;;  %v1419_v34 = vsel %vm1241_vm0, %v1409_v36, %v1418_v22 }
  0x96   : > { %v473_v18 = vld [vmem:[%s5852_s26 + $0x4c8] sm:$0x1]  ;;  %669 = vst [vmem:[#allocation2 + $0x4e8] sm:$0xff] %v477_v61  ;;  %5336 = vmatprep.subr.bf16.mxu0 %v8636_v3  ;;  %v1000_v38 = vld [vmem:[#allocation2 + $0x3b8] sm:$0x1]  ;;  %v1422_v49 = vrot.slane %v7009_v13, 1  ;;  %v1427_v2 = vsel %vm1241_vm0, %v1425_v63, %v1426_v1  ;;  %v1433_v43 = vsel %vm1241_vm0, %v1431_v27, %v1432_v5  ;;  %1905 = vmatmul.mubr.f32.gmra.mrb[34].mxu0 %v1415_v60 }
  0x97   : > { %v7036_v31 = vld [vmem:[%s5852_s26 + $0x508] sm:$0xff]  ;;  %665 = vst [vmem:[#allocation2 + $0x4c8] sm:$0x1] %v473_v18  ;;  %v7046_v35 = vld [vmem:[#allocation2 + $0x3a0] sm:$0x1]  ;;  %5383 = vmatpush1.bf16.msra.mxu1 %v5382_v32  ;;  %v1429_v42 = vrot.slane %v6725_v44, 1  ;;  %1909 = vmatprep.mubr.f32.mxu0 %v1427_v2 }
  0x98   : > { %v998_v24 = vld [vmem:[#allocation2 + $0x3a8] sm:$0x1]  ;;  %673 = vst [vmem:[#allocation2 + $0x508] sm:$0xff] %v7036_v31  ;;  %664 = vst [vmem:[#allocation2 + $0x4c0] sm:$0x1] %v472_v23  ;;  %v479_v45 = vld [vmem:[%s5852_s26 + $0x4f8] sm:$0xff]  ;;  %5384 = vmatprep.subr.bf16.mxu1 %v8636_v3  ;;  %2130 = vmatmul.mubr.f32.gmra.mrb[34].mxu1 %v1419_v34  ;;  %v1424_v19 = vsel %vm1241_vm0, %v1422_v49, %v1423_v0 }
  0x99   : > { %666 = vst [vmem:[#allocation2 + $0x4d0] sm:$0x1] %v474_v54  ;;  %v7053_v47 = vld [vmem:[#allocation2 + $0x3b0] sm:$0x1]  ;;  %v7055_v51 = vld [vmem:[#allocation2 + $0x3c8] sm:$0xfe]  ;;  %2134 = vmatprep.mubr.f32.mxu1 %v1433_v43 }
  0x9a   : > { %v7059_v57 = vld [vmem:[%s5852_s26 + $0x518] sm:$0xff]  ;;  %v1428_v37 = vrot.slane %v7020_v25, 1  ;;  %v1436_v59 = vrot.slane %v998_v24, 1  ;;  %671 = vst [vmem:[#allocation2 + $0x4f8] sm:$0xff] %v479_v45  ;;  %v476_v62 = vld [vmem:[%s5852_s26 + $0x4e0] sm:$0xff]  ;;  %v1440_v36 = vrot.slane %v1000_v38, 1  ;;  %1910 = vmatmul.mubr.f32.gmra.mrb[36].mxu0 %v1424_v19 }
  0x9b   : > { %v7068_v29 = vld [vmem:[#allocation2 + $0x3d8] sm:$0xfe]  ;;  %675 = vst [vmem:[#allocation2 + $0x518] sm:$0xff] %v7059_v57  ;;  %v7073_v33 = vld [vmem:[%s5852_s26 + $0x500] sm:$0xff]  ;;  %668 = vst [vmem:[#allocation2 + $0x4e0] sm:$0xff] %v476_v62  ;;  %v1446_v9 = vrot.slane %v6791_v40, 1 }
  0x9c   : > { %672 = vst [vmem:[#allocation2 + $0x500] sm:$0xff] %v7073_v33  ;;  %v478_v30 = vld [vmem:[%s5852_s26 + $0x4f0] sm:$0xff]  ;;  %v1452_v14 = vrot.slane %v6798_v56, 1  ;;  %v884_v63 = vld [vmem:[%s8633_s2 + $0xd8] sm:$0xff]  ;;  %v1434_v15 = vrot.slane %v7046_v35, 1  ;;  %v1430_v61 = vsel %vm1241_vm0, %v1428_v37, %v1429_v42  ;;  %v1437_v7 = vsel %vm1241_vm0, %v1426_v1, %v1436_v59  ;;  %v489_v18 = vld [vmem:[%s5852_s26 + $0x548] sm:$0xff] }
  0x9d   : > { %v7082_v12 = vld [vmem:[%s5852_s26 + $0x510] sm:$0xff]  ;;  %670 = vst [vmem:[#allocation2 + $0x4f0] sm:$0xff] %v478_v30  ;;  %v916_v11 = vld [vmem:[%s8633_s2 + $0x1d8] sm:$0xff]  ;;  %v485_v25 = vld [vmem:[%s5852_s26 + $0x528] sm:$0x1]  ;;  %v1438_v26 = vrot.slane %v7053_v47, 1  ;;  %v1441_v28 = vsel %vm1241_vm0, %v1432_v5, %v1440_v36  ;;  %2135 = vmatmul.mubr.f32.gmra.mrb[36].mxu1 %v1430_v61  ;;  %1914 = vmatprep.mubr.f32.mxu0 %v1437_v7 }
  0x9e   : > { %v883_v41 = vld [vmem:[%s8633_s2 + $0xd0] sm:$0xff]  ;;  %674 = vst [vmem:[#allocation2 + $0x510] sm:$0xff] %v7082_v12  ;;  %v487_v17 = vld [vmem:[%s5852_s26 + $0x538] sm:$0x1]  ;;  %v1445_v27 = vrot.slane %v7055_v51, 1  ;;  %v1451_v10 = vrot.slane %v7068_v29, 1  ;;  %v1435_v4 = vsel %vm1241_vm0, %v1423_v0, %v1434_v15  ;;  %2139 = vmatprep.mubr.f32.mxu1 %v1441_v28 }
  0x9f   : > { %v915_v13 = vld [vmem:[%s8633_s2 + $0x1d0] sm:$0xff]  ;;  %v5337_v20 = vpack.c.bf16 %v884_v63, %v883_v41  ;;  %v1001_v32 = vld [vmem:[#allocation2 + $0x3c0] sm:$0xfe]  ;;  %677 = vst [vmem:[#allocation2 + $0x528] sm:$0x1] %v485_v25  ;;  %v1443_v46 = vrot.slane %v6814_v50, 1  ;;  %v1439_v39 = vsel %vm1241_vm0, %v1429_v42, %v1438_v26  ;;  %1915 = vmatmul.mubr.f32.gmra.mrb[38].mxu0 %v1435_v4 }
  0xa0   : > { %v5385_v22 = vpack.c.bf16 %v916_v11, %v915_v13  ;;  %679 = vst [vmem:[#allocation2 + $0x538] sm:$0x1] %v487_v17  ;;  %v1003_v24 = vld [vmem:[#allocation2 + $0x3d0] sm:$0xfe]  ;;  %v1006_v1 = vld [vmem:[#allocation2 + $0x408] sm:$0x1]  ;;  %v1447_v0 = vsel %vm1241_vm0, %v1445_v27, %v1446_v9  ;;  %v1453_v44 = vsel %vm1241_vm0, %v1451_v10, %v1452_v14 }
  0xa1   : > { %5338 = vmatpush1.bf16.msra.mxu0 %v5337_v20  ;;  %681 = vst [vmem:[#allocation2 + $0x548] sm:$0xff] %v489_v18  ;;  %v1008_v23 = vld [vmem:[#allocation2 + $0x418] sm:$0x1]  ;;  %v484_v54 = vld [vmem:[%s5852_s26 + $0x520] sm:$0x1]  ;;  %v1442_v5 = vrot.slane %v1001_v32, 1  ;;  %2140 = vmatmul.mubr.f32.gmra.mrb[38].mxu1 %v1439_v39 }
  0xa2   : > { %5386 = vmatpush1.bf16.msra.mxu1 %v5385_v22  ;;  %v486_v38 = vld [vmem:[%s5852_s26 + $0x530] sm:$0x1]  ;;  %5339 = vmatprep.subr.bf16.mxu0 %v8636_v3  ;;  %v1449_v35 = vrot.slane %v6825_v55, 1  ;;  %v7126_v60 = vld [vmem:[#allocation2 + $0x400] sm:$0x1]  ;;  %v7131_v47 = vld [vmem:[%s5852_s26 + $0x568] sm:$0xff] }
  0xa3   : > { %v7128_v49 = vld [vmem:[#allocation2 + $0x428] sm:$0xfe]  ;;  %676 = vst [vmem:[#allocation2 + $0x520] sm:$0x1] %v484_v54  ;;  %678 = vst [vmem:[#allocation2 + $0x530] sm:$0x1] %v486_v38  ;;  %5387 = vmatprep.subr.bf16.mxu1 %v8636_v3  ;;  %1919 = vmatprep.mubr.f32.mxu0 %v1447_v0  ;;  %v1444_v19 = vsel %vm1241_vm0, %v1442_v5, %v1443_v46 }
  0xa4   : > { %v491_v51 = vld [vmem:[%s5852_s26 + $0x558] sm:$0xff]  ;;  %v1448_v45 = vrot.slane %v1003_v24, 1  ;;  %v1456_v34 = vrot.slane %v1006_v1, 1  ;;  %v7140_v2 = vld [vmem:[#allocation2 + $0x410] sm:$0x1]  ;;  %685 = vst [vmem:[#allocation2 + $0x568] sm:$0xff] %v7131_v47  ;;  %2144 = vmatprep.mubr.f32.mxu1 %v1453_v44  ;;  %1920 = vmatmul.mubr.f32.gmra.mrb[40].mxu0 %v1444_v19 }
  0xa5   : > { %v7144_v37 = vld [vmem:[%s5852_s26 + $0x578] sm:$0xff]  ;;  %683 = vst [vmem:[#allocation2 + $0x558] sm:$0xff] %v491_v51  ;;  %v488_v59 = vld [vmem:[%s5852_s26 + $0x540] sm:$0xff]  ;;  %v1460_v42 = vrot.slane %v1008_v23, 1  ;;  %v490_v43 = vld [vmem:[%s5852_s26 + $0x550] sm:$0xff]  ;;  %v1466_v36 = vrot.slane %v6859_v52, 1 }
  0xa6   : > { %v7151_v29 = vld [vmem:[#allocation2 + $0x438] sm:$0xfe]  ;;  %687 = vst [vmem:[#allocation2 + $0x578] sm:$0xff] %v7144_v37  ;;  %v7155_v62 = vld [vmem:[%s5852_s26 + $0x560] sm:$0xff]  ;;  %680 = vst [vmem:[#allocation2 + $0x540] sm:$0xff] %v488_v59  ;;  %v1472_v30 = vrot.slane %v6879_v8, 1  ;;  %v1450_v61 = vsel %vm1241_vm0, %v1448_v45, %v1449_v35  ;;  %v1457_v7 = vsel %vm1241_vm0, %v1446_v9, %v1456_v34 }
  0xa7   : > { %v1463_v41 = vrot.slane %v6899_v48, 1  ;;  %684 = vst [vmem:[#allocation2 + $0x560] sm:$0xff] %v7155_v62  ;;  %v7163_v63 = vld [vmem:[%s5852_s26 + $0x570] sm:$0xff]  ;;  %682 = vst [vmem:[#allocation2 + $0x550] sm:$0xff] %v490_v43  ;;  %v885_v13 = vld [vmem:[%s8633_s2 + $0xe0] sm:$0xff]  ;;  %v1454_v15 = vrot.slane %v7126_v60, 1  ;;  %v1461_v10 = vsel %vm1241_vm0, %v1452_v14, %v1460_v42  ;;  %2145 = vmatmul.mubr.f32.gmra.mrb[40].mxu1 %v1450_v61  ;;  %1924 = vmatprep.mubr.f32.mxu0 %v1457_v7 }
  0xa8   : > { %v886_v11 = vld [vmem:[%s8633_s2 + $0xe8] sm:$0xff]  ;;  %v7175_v20 = vld [vmem:[#allocation2 + $0x420] sm:$0xfe]  ;;  %v7177_v22 = vld [vmem:[#allocation2 + $0x430] sm:$0xfe]  ;;  %686 = vst [vmem:[#allocation2 + $0x570] sm:$0xff] %v7163_v63  ;;  %2149 = vmatprep.mubr.f32.mxu1 %v1461_v10 }
  0xa9   : > { %v5340_v25 = vpack.c.bf16 %v886_v11, %v885_v13  ;;  %v917_v17 = vld [vmem:[%s8633_s2 + $0x1e0] sm:$0xff]  ;;  %v1458_v26 = vrot.slane %v7140_v2, 1  ;;  %v1465_v27 = vrot.slane %v7128_v49, 1  ;;  %v7191_v32 = vld [vmem:[#allocation2 + $0x468] sm:$0x1]  ;;  %v1471_v40 = vrot.slane %v7151_v29, 1 }
  0xaa   : > { %v918_v18 = vld [vmem:[%s8633_s2 + $0x1e8] sm:$0xff]  ;;  %v499_v1 = vld [vmem:[%s5852_s26 + $0x598] sm:$0x1]  ;;  %v1462_v54 = vrot.slane %v7175_v20, 1  ;;  %v1469_v38 = vrot.slane %v6911_v6, 1  ;;  %v1455_v14 = vsel %vm1241_vm0, %v1443_v46, %v1454_v15  ;;  %v1468_v50 = vrot.slane %v7177_v22, 1 }
  0xab   : > { %v501_v28 = vld [vmem:[%s5852_s26 + $0x5a8] sm:$0xff]  ;;  %5341 = vmatpush1.bf16.msra.mxu0 %v5340_v25  ;;  %v5388_v9 = vpack.c.bf16 %v918_v18, %v917_v17  ;;  %v1016_v4 = vld [vmem:[#allocation2 + $0x478] sm:$0x1]  ;;  %691 = vst [vmem:[#allocation2 + $0x598] sm:$0x1] %v499_v1  ;;  %v1459_v51 = vsel %vm1241_vm0, %v1449_v35, %v1458_v26  ;;  %v1467_v39 = vsel %vm1241_vm0, %v1465_v27, %v1466_v36  ;;  %v1476_v46 = vrot.slane %v7191_v32, 1 }
  0xac   : > { %v497_v24 = vld [vmem:[%s5852_s26 + $0x588] sm:$0x1]  ;;  %693 = vst [vmem:[#allocation2 + $0x5a8] sm:$0xff] %v501_v28  ;;  %v496_v56 = vld [vmem:[%s5852_s26 + $0x580] sm:$0x1]  ;;  %5342 = vmatprep.subr.bf16.mxu0 %v8636_v3  ;;  %v503_v45 = vld [vmem:[%s5852_s26 + $0x5b8] sm:$0xff]  ;;  %v1473_v55 = vsel %vm1241_vm0, %v1471_v40, %v1472_v30  ;;  %1925 = vmatmul.mubr.f32.gmra.mrb[42].mxu0 %v1455_v14  ;;  %v1464_v11 = vsel %vm1241_vm0, %v1462_v54, %v1463_v41 }
  0xad   : > { %v7204_v23 = vld [vmem:[%s5852_s26 + $0x5c8] sm:$0xff]  ;;  %689 = vst [vmem:[#allocation2 + $0x588] sm:$0x1] %v497_v24  ;;  %v7214_v5 = vld [vmem:[#allocation2 + $0x460] sm:$0x1]  ;;  %5389 = vmatpush1.bf16.msra.mxu1 %v5388_v9  ;;  %v7229_v34 = vld [vmem:[%s5852_s26 + $0x5d8] sm:$0xff]  ;;  %1929 = vmatprep.mubr.f32.mxu0 %v1467_v39  ;;  %v1470_v61 = vsel %vm1241_vm0, %v1468_v50, %v1469_v38  ;;  %v1477_v7 = vsel %vm1241_vm0, %v1466_v36, %v1476_v46 }
  0xae   : > { %697 = vst [vmem:[#allocation2 + $0x5c8] sm:$0xff] %v7204_v23  ;;  %v7216_v60 = vld [vmem:[#allocation2 + $0x488] sm:$0xfe]  ;;  %688 = vst [vmem:[#allocation2 + $0x580] sm:$0x1] %v496_v56  ;;  %v1480_v35 = vrot.slane %v1016_v4, 1  ;;  %5390 = vmatprep.subr.bf16.mxu1 %v8636_v3  ;;  %2150 = vmatmul.mubr.f32.gmra.mrb[42].mxu1 %v1459_v51 }
  0xaf   : > { %v498_v49 = vld [vmem:[%s5852_s26 + $0x590] sm:$0x1]  ;;  %v1020_v2 = vld [vmem:[#allocation2 + $0x498] sm:$0xfe]  ;;  %695 = vst [vmem:[#allocation2 + $0x5b8] sm:$0xff] %v503_v45  ;;  %699 = vst [vmem:[#allocation2 + $0x5d8] sm:$0xff] %v7229_v34  ;;  %2154 = vmatprep.mubr.f32.mxu1 %v1473_v55 }
  0xb0   : > { %v1015_v0 = vld [vmem:[#allocation2 + $0x470] sm:$0x1]  ;;  %690 = vst [vmem:[#allocation2 + $0x590] sm:$0x1] %v498_v49  ;;  %v500_v59 = vld [vmem:[%s5852_s26 + $0x5a0] sm:$0xff]  ;;  %v1486_v42 = vrot.slane %v6963_v53, 1  ;;  %v1481_v10 = vsel %vm1241_vm0, %v1472_v30, %v1480_v35  ;;  %1930 = vmatmul.mubr.f32.gmra.mrb[44].mxu0 %v1464_v11 }
  0xb1   : > { %v7237_v44 = vld [vmem:[%s5852_s26 + $0x5c0] sm:$0xff]  ;;  %692 = vst [vmem:[#allocation2 + $0x5a0] sm:$0xff] %v500_v59  ;;  %v502_v29 = vld [vmem:[%s5852_s26 + $0x5b0] sm:$0xff]  ;;  %v1474_v19 = vrot.slane %v7214_v5, 1  ;;  %v1478_v15 = vrot.slane %v1015_v0, 1  ;;  %v1485_v20 = vrot.slane %v7216_v60, 1  ;;  %1934 = vmatprep.mubr.f32.mxu0 %v1477_v7 }
  0xb2   : > { %696 = vst [vmem:[#allocation2 + $0x5c0] sm:$0xff] %v7237_v44  ;;  %v7244_v43 = vld [vmem:[%s5852_s26 + $0x5d0] sm:$0xff]  ;;  %694 = vst [vmem:[#allocation2 + $0x5b0] sm:$0xff] %v502_v29  ;;  %v888_v22 = vld [vmem:[%s8633_s2 + $0xf8] sm:$0xff]  ;;  %v1491_v40 = vrot.slane %v1020_v2, 1  ;;  %v1492_v9 = vrot.slane %v6975_v58, 1  ;;  %2155 = vmatmul.mubr.f32.gmra.mrb[44].mxu1 %v1470_v61 }
  0xb3   : > { %v887_v13 = vld [vmem:[%s8633_s2 + $0xf0] sm:$0xff]  ;;  %698 = vst [vmem:[#allocation2 + $0x5d0] sm:$0xff] %v7244_v43  ;;  %v920_v17 = vld [vmem:[%s8633_s2 + $0x1f8] sm:$0xff]  ;;  %v1017_v26 = vld [vmem:[#allocation2 + $0x480] sm:$0xfe]  ;;  %v1475_v8 = vsel %vm1241_vm0, %v1463_v41, %v1474_v19  ;;  %v1483_v30 = vrot.slane %v6989_v16, 1  ;;  %2159 = vmatprep.mubr.f32.mxu1 %v1481_v10  ;;  %v1479_v56 = vsel %vm1241_vm0, %v1469_v38, %v1478_v15  ;;  %v1487_v14 = vsel %vm1241_vm0, %v1485_v20, %v1486_v42 }
  0xb4   : > { %v919_v25 = vld [vmem:[%s8633_s2 + $0x1f0] sm:$0xff]  ;;  %v5343_v27 = vpack.c.bf16 %v888_v22, %v887_v13  ;;  %v509_v18 = vld [vmem:[%s5852_s26 + $0x5e8] sm:$0x1]  ;;  %v511_v28 = vld [vmem:[%s5852_s26 + $0x5f8] sm:$0x1]  ;;  %v1482_v54 = vrot.slane %v1017_v26, 1  ;;  %v1493_v16 = vsel %vm1241_vm0, %v1491_v40, %v1492_v9  ;;  %1935 = vmatmul.mubr.f32.gmra.mrb[46].mxu0 %v1475_v8 }
  0xb5   : > { %v5391_v32 = vpack.c.bf16 %v920_v17, %v919_v25  ;;  %v1019_v24 = vld [vmem:[#allocation2 + $0x490] sm:$0xfe]  ;;  %v1022_v1 = vld [vmem:[#allocation2 + $0x4c8] sm:$0x1]  ;;  %701 = vst [vmem:[#allocation2 + $0x5e8] sm:$0x1] %v509_v18  ;;  %1939 = vmatprep.mubr.f32.mxu0 %v1487_v14 }
  0xb6   : > { %703 = vst [vmem:[#allocation2 + $0x5f8] sm:$0x1] %v511_v28  ;;  %v1024_v52 = vld [vmem:[#allocation2 + $0x4d8] sm:$0x1]  ;;  %v508_v36 = vld [vmem:[%s5852_s26 + $0x5e0] sm:$0x1]  ;;  %5344 = vmatpush1.bf16.msra.mxu0 %v5343_v27  ;;  %2160 = vmatmul.mubr.f32.gmra.mrb[46].mxu1 %v1479_v56  ;;  %v1484_v38 = vsel %vm1241_vm0, %v1482_v54, %v1483_v30 }
  0xb7   : > { %5392 = vmatpush1.bf16.msra.mxu1 %v5391_v32  ;;  %v1489_v58 = vrot.slane %v6998_v21, 1  ;;  %700 = vst [vmem:[#allocation2 + $0x5e0] sm:$0x1] %v508_v36  ;;  %v510_v4 = vld [vmem:[%s5852_s26 + $0x5f0] sm:$0x1]  ;;  %v1488_v5 = vrot.slane %v1019_v24, 1  ;;  %5393 = vmatprep.subr.bf16.mxu0 %v8636_v3 }
  0xb8   : > { %v1496_v48 = vrot.slane %v1022_v1, 1  ;;  %v1021_v60 = vld [vmem:[#allocation2 + $0x4c0] sm:$0x1]  ;;  %702 = vst [vmem:[#allocation2 + $0x5f0] sm:$0x1] %v510_v4  ;;  %v1500_v41 = vrot.slane %v1024_v52, 1  ;;  %5441 = vmatprep.subr.bf16.mxu1 %v8636_v3  ;;  %2164 = vmatprep.mubr.f32.mxu1 %v1493_v16 }
  0xb9   : > { %v1023_v21 = vld [vmem:[#allocation2 + $0x4d0] sm:$0x1]  ;;  %v1026_v49 = vld [vmem:[#allocation2 + $0x4e8] sm:$0xfe]  ;;  %v1028_v6 = vld [vmem:[#allocation2 + $0x4f8] sm:$0xfe]  ;;  %v1490_v50 = vsel %vm1241_vm0, %v1488_v5, %v1489_v58  ;;  %1940 = vmatmul.mubr.f32.gmra.mrb[48].mxu0 %v1484_v38 }
  0xba   : > { %v1494_v51 = vrot.slane %v1021_v60, 1  ;;  %v1506_v39 = vrot.slane %v7036_v31, 1  ;;  %v1497_v46 = vsel %vm1241_vm0, %v1486_v42, %v1496_v48  ;;  %v1498_v0 = vrot.slane %v1023_v21, 1  ;;  %v1025_v55 = vld [vmem:[#allocation2 + $0x4e0] sm:$0xfe]  ;;  %2165 = vmatmul.mubr.f32.gmra.mrb[48].mxu1 %v1490_v50 }
  0xbb   : > { %v1505_v45 = vrot.slane %v1026_v49, 1  ;;  %v1501_v35 = vsel %vm1241_vm0, %v1492_v9, %v1500_v41  ;;  %v1511_v2 = vrot.slane %v1028_v6, 1  ;;  %v1512_v59 = vrot.slane %v7059_v57, 1  ;;  %v1027_v29 = vld [vmem:[#allocation2 + $0x4f0] sm:$0xfe]  ;;  %1944 = vmatprep.mubr.f32.mxu0 %v1497_v46 }
  0xbc   : > { %v1030_v13 = vld [vmem:[#allocation2 + $0x528] sm:$0x1]  ;;  %v1032_v11 = vld [vmem:[#allocation2 + $0x538] sm:$0x1]  ;;  %v1495_v31 = vsel %vm1241_vm0, %v1483_v30, %v1494_v51  ;;  %v1502_v19 = vrot.slane %v1025_v55, 1  ;;  %v1503_v53 = vrot.slane %v7073_v33, 1  ;;  %2169 = vmatprep.mubr.f32.mxu1 %v1501_v35  ;;  %v1499_v15 = vsel %vm1241_vm0, %v1489_v58, %v1498_v0 }
  0xbd   : > { %v1509_v42 = vrot.slane %v7082_v12, 1  ;;  %v1507_v20 = vsel %vm1241_vm0, %v1505_v45, %v1506_v39  ;;  %v1508_v22 = vrot.slane %v1027_v29, 1  ;;  %v1516_v57 = vrot.slane %v1030_v13, 1  ;;  %v1029_v25 = vld [vmem:[#allocation2 + $0x520] sm:$0x1]  ;;  %1945 = vmatmul.mubr.f32.gmra.mrb[50].mxu0 %v1495_v31 }
  0xbe   : > { %v1513_v17 = vsel %vm1241_vm0, %v1511_v2, %v1512_v59  ;;  %v1520_v61 = vrot.slane %v1032_v11, 1  ;;  %v1031_v7 = vld [vmem:[#allocation2 + $0x530] sm:$0x1]  ;;  %v1034_v26 = vld [vmem:[#allocation2 + $0x548] sm:$0xfe]  ;;  %2170 = vmatmul.mubr.f32.gmra.mrb[50].mxu1 %v1499_v15  ;;  %1949 = vmatprep.mubr.f32.mxu0 %v1507_v20  ;;  %v1504_v33 = vsel %vm1241_vm0, %v1502_v19, %v1503_v53  ;;  %v1514_v12 = vrot.slane %v1029_v25, 1 }
  0xbf   : > { %v1036_v27 = vld [vmem:[#allocation2 + $0x558] sm:$0xfe]  ;;  %v1526_v32 = vrot.slane %v7131_v47, 1  ;;  %2174 = vmatprep.mubr.f32.mxu1 %v1513_v17  ;;  %v1510_v18 = vsel %vm1241_vm0, %v1508_v22, %v1509_v42  ;;  %v1517_v28 = vsel %vm1241_vm0, %v1506_v39, %v1516_v57  ;;  %v1518_v10 = vrot.slane %v1031_v7, 1  ;;  %v1033_v9 = vld [vmem:[#allocation2 + $0x540] sm:$0xfe] }
  0xc0   : > { %v1525_v40 = vrot.slane %v1034_v26, 1  ;;  %v1521_v24 = vsel %vm1241_vm0, %v1512_v59, %v1520_v61  ;;  %v1531_v1 = vrot.slane %v1036_v27, 1  ;;  %v1532_v52 = vrot.slane %v7144_v37, 1  ;;  %v1035_v36 = vld [vmem:[#allocation2 + $0x550] sm:$0xfe]  ;;  %v730_v27 = vld [vmem:[#allocation2 + $0x8] sm:$0xff] }
  0xc1   : > { %v1038_v8 = vld [vmem:[#allocation2 + $0x588] sm:$0x1]  ;;  %1950 = vmatmul.mubr.f32.gmra.mrb[52].mxu0 %v1504_v33  ;;  %v1040_v54 = vld [vmem:[#allocation2 + $0x598] sm:$0x1]  ;;  %v1515_v47 = vsel %vm1241_vm0, %v1503_v53, %v1514_v12  ;;  %v1522_v30 = vrot.slane %v1033_v9, 1  ;;  %v1523_v58 = vrot.slane %v7155_v62, 1  ;;  %v1519_v56 = vsel %vm1241_vm0, %v1509_v42, %v1518_v10 }
  0xc2   : > { %2175 = vmatmul.mubr.f32.gmra.mrb[52].mxu1 %v1510_v18  ;;  %1954 = vmatprep.mubr.f32.mxu0 %v1517_v28  ;;  %v1529_v4 = vrot.slane %v7163_v63, 1  ;;  %v1527_v14 = vsel %vm1241_vm0, %v1525_v40, %v1526_v32  ;;  %v1528_v5 = vrot.slane %v1035_v36, 1  ;;  %v1536_v37 = vrot.slane %v1038_v8, 1  ;;  %v1037_v48 = vld [vmem:[#allocation2 + $0x580] sm:$0x1]  ;;  %v5068_v12 = vld [vmem:[%s8633_s2 + $0x408] sm:$0xff] }
  0xc3   : > { %2179 = vmatprep.mubr.f32.mxu1 %v1521_v24  ;;  %v1533_v60 = vsel %vm1241_vm0, %v1531_v1, %v1532_v52  ;;  %v1540_v16 = vrot.slane %v1040_v54, 1  ;;  %v1039_v41 = vld [vmem:[#allocation2 + $0x590] sm:$0x1]  ;;  %v1042_v21 = vld [vmem:[#allocation2 + $0x5a8] sm:$0xfe]  ;;  %v1524_v62 = vsel %vm1241_vm0, %v1522_v30, %v1523_v58  ;;  %v1534_v63 = vrot.slane %v1037_v48, 1 }
  0xc4   : > { %v1044_v49 = vld [vmem:[#allocation2 + $0x5b8] sm:$0xfe]  ;;  %v1546_v6 = vrot.slane %v7204_v23, 1  ;;  %v1530_v38 = vsel %vm1241_vm0, %v1528_v5, %v1529_v4  ;;  %v1537_v51 = vsel %vm1241_vm0, %v1526_v32, %v1536_v37  ;;  %v1538_v39 = vrot.slane %v1039_v41, 1  ;;  %v1041_v46 = vld [vmem:[#allocation2 + $0x5a0] sm:$0xfe] }
  0xc5   : > { %1955 = vmatmul.mubr.f32.gmra.mrb[54].mxu0 %v1515_v47  ;;  %v1545_v50 = vrot.slane %v1042_v21, 1  ;;  %v1541_v0 = vsel %vm1241_vm0, %v1532_v52, %v1540_v16  ;;  %v1551_v45 = vrot.slane %v1044_v49, 1  ;;  %v1552_v55 = vrot.slane %v7229_v34, 1  ;;  %v1043_v35 = vld [vmem:[#allocation2 + $0x5b0] sm:$0xfe]  ;;  %v5067_v33 = vld [vmem:[%s8633_s2 + $0x400] sm:$0xff] }
  0xc6   : > { %2180 = vmatmul.mubr.f32.gmra.mrb[54].mxu1 %v1519_v56  ;;  %1959 = vmatprep.mubr.f32.mxu0 %v1527_v14  ;;  %v1046_v2 = vld [vmem:[#allocation2 + $0x5e8] sm:$0x1]  ;;  %v1048_v59 = vld [vmem:[#allocation2 + $0x5f8] sm:$0x1]  ;;  %v1535_v23 = vsel %vm1241_vm0, %v1523_v58, %v1534_v63  ;;  %v1542_v29 = vrot.slane %v1041_v46, 1  ;;  %v1543_v13 = vrot.slane %v7237_v44, 1  ;;  %v1539_v31 = vsel %vm1241_vm0, %v1529_v4, %v1538_v39 }
  0xc7   : > { %2184 = vmatprep.mubr.f32.mxu1 %v1533_v60  ;;  %v1549_v11 = vrot.slane %v7244_v43, 1  ;;  %v1547_v19 = vsel %vm1241_vm0, %v1545_v50, %v1546_v6  ;;  %v1548_v53 = vrot.slane %v1043_v35, 1  ;;  %v1556_v34 = vrot.slane %v1046_v2, 1  ;;  %v1045_v42 = vld [vmem:[#allocation2 + $0x5e0] sm:$0x1]  ;;  %v732_v32 = vld [vmem:[#allocation2 + $0x18] sm:$0xff] }
  0xc8   : > { %v1553_v15 = vsel %vm1241_vm0, %v1551_v45, %v1552_v55  ;;  %v1560_v20 = vrot.slane %v1048_v59, 1  ;;  %v1047_v22 = vld [vmem:[#allocation2 + $0x5f0] sm:$0x1]  ;;  %v1544_v57 = vsel %vm1241_vm0, %v1542_v29, %v1543_v13  ;;  %v1554_v44 = vrot.slane %v1045_v42, 1  ;;  %v5099_v18 = vld [vmem:[%s8633_s2 + $0x500] sm:$0xff]  ;;  %v5100_v28 = vld [vmem:[%s8633_s2 + $0x508] sm:$0xff] }
  0xc9   : > { %1960 = vmatmul.mubr.f32.gmra.mrb[56].mxu0 %v1524_v62  ;;  %v1550_v43 = vsel %vm1241_vm0, %v1548_v53, %v1549_v11  ;;  %v1557_v25 = vsel %vm1241_vm0, %v1546_v6, %v1556_v34  ;;  %v1558_v17 = vrot.slane %v1047_v22, 1  ;;  %v729_v10 = vld [vmem:[#allocation2] sm:$0xff]  ;;  %v5394_v40 = vpack.c.bf16 %v5068_v12, %v5067_v33  ;;  %v731_v9 = vld [vmem:[#allocation2 + $0x10] sm:$0xff]  ;;  %v5070_v52 = vld [vmem:[%s8633_s2 + $0x418] sm:$0xff] }
  0xca   : > { %2185 = vmatmul.mubr.f32.gmra.mrb[56].mxu1 %v1530_v38  ;;  %1964 = vmatprep.mubr.f32.mxu0 %v1537_v51  ;;  %v1561_v61 = vsel %vm1241_vm0, %v1552_v55, %v1560_v20  ;;  %v1555_v7 = vsel %vm1241_vm0, %v1543_v13, %v1554_v44  ;;  %v5442_v24 = vpack.c.bf16 %v5100_v28, %v5099_v18  ;;  %v5069_v1 = vld [vmem:[%s8633_s2 + $0x410] sm:$0xff]  ;;  %v5102_v8 = vld [vmem:[%s8633_s2 + $0x518] sm:$0xff]  ;;  %v5613_v54 = vld [vmem:[#allocation2 + $0x28] sm:$0xff] }
  0xcb   : > { %2189 = vmatprep.mubr.f32.mxu1 %v1541_v0  ;;  %v1559_v26 = vsel %vm1241_vm0, %v1549_v11, %v1558_v17  ;;  %v5101_v36 = vld [vmem:[%s8633_s2 + $0x510] sm:$0xff]  ;;  %v7360_v47 = vld [vmem:[#allocation2 + $0x68] sm:$0xff]  ;;  %v5397_v30 = vpack.c.bf16 %v5070_v52, %v5069_v1  ;;  %v5614_v58 = vld [vmem:[#allocation2 + $0x38] sm:$0xff] }
  0xcc   : > { %v7362_v4 = vld [vmem:[#allocation2 + $0x78] sm:$0xff]  ;;  %v5445_v56 = vpack.c.bf16 %v5102_v8, %v5101_v36  ;;  %v5071_v14 = vld [vmem:[%s8633_s2 + $0x420] sm:$0xff]  ;;  %v5072_v5 = vld [vmem:[%s8633_s2 + $0x428] sm:$0xff] }
  0xcd   : > { %1965 = vmatmul.mubr.f32.gmra.mrb[58].mxu0 %v1535_v23  ;;  %v5615_v37 = vld [vmem:[#allocation2 + $0x20] sm:$0xff]  ;;  %v5104_v60 = vld [vmem:[%s8633_s2 + $0x528] sm:$0xff]  ;;  %v5616_v16 = vld [vmem:[#allocation2 + $0x30] sm:$0xff]  ;;  %v5400_v49 = vpack.c.bf16 %v5072_v5, %v5071_v14 }
  0xce   : > { %2190 = vmatmul.mubr.f32.gmra.mrb[58].mxu1 %v1539_v31  ;;  %1969 = vmatprep.mubr.f32.mxu0 %v1547_v19  ;;  %v5103_v48 = vld [vmem:[%s8633_s2 + $0x520] sm:$0xff]  ;;  %v7382_v21 = vld [vmem:[#allocation2 + $0x70] sm:$0xff]  ;;  %v5074_v6 = vld [vmem:[%s8633_s2 + $0x438] sm:$0xff] }
  0xcf   : > { %2194 = vmatprep.mubr.f32.mxu1 %v1553_v15  ;;  %v7379_v41 = vld [vmem:[#allocation2 + $0x60] sm:$0xff]  ;;  %v5448_v62 = vpack.c.bf16 %v5104_v60, %v5103_v48  ;;  %v5073_v63 = vld [vmem:[%s8633_s2 + $0x430] sm:$0xff]  ;;  %v5106_v51 = vld [vmem:[%s8633_s2 + $0x538] sm:$0xff] }
  0xd0   : > { %v5105_v38 = vld [vmem:[%s8633_s2 + $0x530] sm:$0xff]  ;;  %v5617_v39 = vld [vmem:[#allocation2 + $0x88] sm:$0xff]  ;;  %v5618_v50 = vld [vmem:[#allocation2 + $0x98] sm:$0xff]  ;;  %v5403_v0 = vpack.c.bf16 %v5074_v6, %v5073_v63 }
  0xd1   : > { %1970 = vmatmul.mubr.f32.gmra.mrb[60].mxu0 %v1544_v57  ;;  %v7400_v46 = vld [vmem:[#allocation2 + $0xc8] sm:$0xff]  ;;  %v7402_v45 = vld [vmem:[#allocation2 + $0xd8] sm:$0xff]  ;;  %v5451_v55 = vpack.c.bf16 %v5106_v51, %v5105_v38  ;;  %v5075_v35 = vld [vmem:[%s8633_s2 + $0x440] sm:$0xff] }
  0xd2   : > { %2195 = vmatmul.mubr.f32.gmra.mrb[60].mxu1 %v1550_v43  ;;  %1974 = vmatprep.mubr.f32.mxu0 %v1557_v25  ;;  %v5076_v2 = vld [vmem:[%s8633_s2 + $0x448] sm:$0xff]  ;;  %v5619_v59 = vld [vmem:[#allocation2 + $0x80] sm:$0xff]  ;;  %v5620_v13 = vld [vmem:[#allocation2 + $0x90] sm:$0xff] }
  0xd3   : > { %2199 = vmatprep.mubr.f32.mxu1 %v1561_v61  ;;  %v5107_v23 = vld [vmem:[%s8633_s2 + $0x540] sm:$0xff]  ;;  %v5108_v29 = vld [vmem:[%s8633_s2 + $0x548] sm:$0xff]  ;;  %v7422_v31 = vld [vmem:[#allocation2 + $0xd0] sm:$0xff]  ;;  %v5406_v19 = vpack.c.bf16 %v5076_v2, %v5075_v35 }
  0xd4   : > { %v7419_v11 = vld [vmem:[#allocation2 + $0xc0] sm:$0xff]  ;;  %v5454_v53 = vpack.c.bf16 %v5108_v29, %v5107_v23  ;;  %v5077_v34 = vld [vmem:[%s8633_s2 + $0x450] sm:$0xff]  ;;  %v5078_v42 = vld [vmem:[%s8633_s2 + $0x458] sm:$0xff] }
  0xd5   : > { %1975 = vmatmul.mubr.f32.gmra.mrb[62].mxu0 %v1555_v7  ;;  %v5109_v15 = vld [vmem:[%s8633_s2 + $0x550] sm:$0xff]  ;;  %v5110_v20 = vld [vmem:[%s8633_s2 + $0x558] sm:$0xff]  ;;  %v5621_v22 = vld [vmem:[#allocation2 + $0xe8] sm:$0xff]  ;;  %v5409_v43 = vpack.c.bf16 %v5078_v42, %v5077_v34 }
  0xd6   : > { %2200 = vmatmul.mubr.f32.gmra.mrb[62].mxu1 %v1559_v26  ;;  %2269 = vmatprep.mubr.f32.mxu0 %v730_v27  ;;  %v5622_v57 = vld [vmem:[#allocation2 + $0xf8] sm:$0xff]  ;;  %v7440_v44 = vld [vmem:[#allocation2 + $0x128] sm:$0xff]  ;;  %v5457_v17 = vpack.c.bf16 %v5110_v20, %v5109_v15  ;;  %v5079_v61 = vld [vmem:[%s8633_s2 + $0x460] sm:$0xff] }
  0xd7   : > { %2494 = vmatprep.mubr.f32.mxu1 %v732_v32  ;;  %v7442_v25 = vld [vmem:[#allocation2 + $0x138] sm:$0xff]  ;;  %v5080_v7 = vld [vmem:[%s8633_s2 + $0x468] sm:$0xff]  ;;  %v5623_v26 = vld [vmem:[#allocation2 + $0xe0] sm:$0xff] }
  0xd8   : > { %v5111_v27 = vld [vmem:[%s8633_s2 + $0x560] sm:$0xff]  ;;  %v5112_v33 = vld [vmem:[%s8633_s2 + $0x568] sm:$0xff]  ;;  %v5624_v12 = vld [vmem:[#allocation2 + $0xf0] sm:$0xff]  ;;  %v5412_v28 = vpack.c.bf16 %v5080_v7, %v5079_v61 }
  0xd9   : > { %2270 = vmatmul.mubr.f32.vlgmr.msra.gmra.mrb[64].mxu0 %v729_v10  ;;  %v7459_v32 = vld [vmem:[#allocation2 + $0x120] sm:$0xff]  ;;  %v7462_v18 = vld [vmem:[#allocation2 + $0x130] sm:$0xff]  ;;  %v5460_v10 = vpack.c.bf16 %v5112_v33, %v5111_v27  ;;  %v5114_v1 = vld [vmem:[%s8633_s2 + $0x578] sm:$0xff] }
  0xda   : > { %2495 = vmatmul.mubr.f32.vlgmr.msra.gmra.mrb[64].mxu1 %v731_v9  ;;  %5395 = vmatpush1.bf16.msra.mxu0 %v5394_v40  ;;  %v5081_v40 = vld [vmem:[%s8633_s2 + $0x470] sm:$0xff]  ;;  %v5082_v9 = vld [vmem:[%s8633_s2 + $0x478] sm:$0xff]  ;;  %v5625_v52 = vld [vmem:[#allocation2 + $0x148] sm:$0xff] }
  0xdb   : > { %5443 = vmatpush1.bf16.msra.mxu1 %v5442_v24  ;;  %2274 = vmatprep.mubr.f32.mxu0 %v5613_v54  ;;  %v5113_v24 = vld [vmem:[%s8633_s2 + $0x570] sm:$0xff]  ;;  %v5626_v36 = vld [vmem:[#allocation2 + $0x158] sm:$0xff]  ;;  %v7480_v8 = vld [vmem:[#allocation2 + $0x188] sm:$0xff]  ;;  %v5415_v54 = vpack.c.bf16 %v5082_v9, %v5081_v40 }
  0xdc   : > { %2499 = vmatprep.mubr.f32.mxu1 %v5614_v58  ;;  %5396 = vmatprep.subr.bf16.mxu0 %v8636_v3  ;;  %v5463_v58 = vpack.c.bf16 %v5114_v1, %v5113_v24  ;;  %v5084_v14 = vld [vmem:[%s8633_s2 + $0x488] sm:$0xff]  ;;  %v5627_v5 = vld [vmem:[#allocation2 + $0x140] sm:$0xff]  ;;  %v5628_v60 = vld [vmem:[#allocation2 + $0x150] sm:$0xff] }
  0xdd   : > { %2275 = vmatmul.mubr.f32.gmra.mrb[66].mxu0 %v5615_v37  ;;  %5444 = vmatprep.subr.bf16.mxu1 %v8636_v3  ;;  %v5115_v37 = vld [vmem:[%s8633_s2 + $0x580] sm:$0xff]  ;;  %v5116_v48 = vld [vmem:[%s8633_s2 + $0x588] sm:$0xff]  ;;  %v5085_v6 = vld [vmem:[%s8633_s2 + $0x490] sm:$0xff] }
  0xde   : > { %2500 = vmatmul.mubr.f32.gmra.mrb[66].mxu1 %v5616_v16  ;;  %2279 = vmatprep.mubr.f32.mxu0 %v7360_v47  ;;  %v7499_v16 = vld [vmem:[#allocation2 + $0x180] sm:$0xff]  ;;  %v5466_v63 = vpack.c.bf16 %v5116_v48, %v5115_v37  ;;  %v5086_v38 = vld [vmem:[%s8633_s2 + $0x498] sm:$0xff]  ;;  %v5117_v51 = vld [vmem:[%s8633_s2 + $0x590] sm:$0xff] }
  0xdf   : > { %2504 = vmatprep.mubr.f32.mxu1 %v7362_v4  ;;  %5398 = vmatpush1.bf16.msra.mxu0 %v5397_v30  ;;  %v7482_v30 = vld [vmem:[#allocation2 + $0x198] sm:$0xff]  ;;  %v5421_v35 = vpack.c.bf16 %v5086_v38, %v5085_v6  ;;  %v5087_v23 = vld [vmem:[%s8633_s2 + $0x4a0] sm:$0xff]  ;;  %v5088_v29 = vld [vmem:[%s8633_s2 + $0x4a8] sm:$0xff] }
  0xe0   : > { %5446 = vmatpush1.bf16.msra.mxu1 %v5445_v56  ;;  %5399 = vmatprep.subr.bf16.mxu0 %v8636_v3  ;;  %v5083_v56 = vld [vmem:[%s8633_s2 + $0x480] sm:$0xff]  ;;  %v7522_v2 = vld [vmem:[#allocation2 + $0x1f8] sm:$0xff]  ;;  %v5632_v34 = vld [vmem:[#allocation2 + $0x1b0] sm:$0xff]  ;;  %v5424_v20 = vpack.c.bf16 %v5088_v29, %v5087_v23 }
  0xe1   : > { %2280 = vmatmul.mubr.f32.gmra.mrb[68].mxu0 %v7379_v41  ;;  %5447 = vmatprep.subr.bf16.mxu1 %v8636_v3  ;;  %v7539_v42 = vld [vmem:[#allocation2 + $0x1e0] sm:$0xff]  ;;  %v7542_v15 = vld [vmem:[#allocation2 + $0x1f0] sm:$0xff]  ;;  %v5122_v61 = vld [vmem:[%s8633_s2 + $0x5b8] sm:$0xff] }
  0xe2   : > { %2505 = vmatmul.mubr.f32.gmra.mrb[68].mxu1 %v7382_v21  ;;  %2284 = vmatprep.mubr.f32.mxu0 %v5617_v39  ;;  %v5118_v39 = vld [vmem:[%s8633_s2 + $0x598] sm:$0xff]  ;;  %v5633_v7 = vld [vmem:[#allocation2 + $0x208] sm:$0xff]  ;;  %v5635_v9 = vld [vmem:[#allocation2 + $0x200] sm:$0xff] }
  0xe3   : > { %2509 = vmatprep.mubr.f32.mxu1 %v5618_v50  ;;  %5401 = vmatpush1.bf16.msra.mxu0 %v5400_v49  ;;  %v7502_v49 = vld [vmem:[#allocation2 + $0x190] sm:$0xff]  ;;  %v5629_v50 = vld [vmem:[#allocation2 + $0x1a8] sm:$0xff]  ;;  %v5123_v24 = vld [vmem:[%s8633_s2 + $0x5c0] sm:$0xff] }
  0xe4   : > { %5449 = vmatpush1.bf16.msra.mxu1 %v5448_v62  ;;  %5402 = vmatprep.subr.bf16.mxu0 %v8636_v3  ;;  %v5418_v62 = vpack.c.bf16 %v5084_v14, %v5083_v56  ;;  %v7560_v27 = vld [vmem:[#allocation2 + $0x248] sm:$0xff]  ;;  %v5093_v14 = vld [vmem:[%s8633_s2 + $0x4d0] sm:$0xff]  ;;  %v5126_v48 = vld [vmem:[%s8633_s2 + $0x5d8] sm:$0xff] }
  0xe5   : > { %2285 = vmatmul.mubr.f32.gmra.mrb[70].mxu0 %v5619_v59  ;;  %5450 = vmatprep.subr.bf16.mxu1 %v8636_v3  ;;  %v5469_v59 = vpack.c.bf16 %v5118_v39, %v5117_v51  ;;  %v5092_v40 = vld [vmem:[%s8633_s2 + $0x4c8] sm:$0xff]  ;;  %v5125_v37 = vld [vmem:[%s8633_s2 + $0x5d0] sm:$0xff]  ;;  %v7602_v38 = vld [vmem:[#allocation2 + $0x2b8] sm:$0xff] }
  0xe6   : > { %2510 = vmatmul.mubr.f32.gmra.mrb[70].mxu1 %v5620_v13  ;;  %2289 = vmatprep.mubr.f32.mxu0 %v7400_v46  ;;  %v5631_v13 = vld [vmem:[#allocation2 + $0x1a0] sm:$0xff]  ;;  %v5124_v1 = vld [vmem:[%s8633_s2 + $0x5c8] sm:$0xff]  ;;  %v5481_v51 = vpack.c.bf16 %v5126_v48, %v5125_v37  ;;  %v5640_v23 = vld [vmem:[#allocation2 + $0x270] sm:$0xff] }
  0xe7   : > { %2514 = vmatprep.mubr.f32.mxu1 %v7402_v45  ;;  %5404 = vmatpush1.bf16.msra.mxu0 %v5403_v0  ;;  %v5630_v0 = vld [vmem:[#allocation2 + $0x1b8] sm:$0xff]  ;;  %v5478_v56 = vpack.c.bf16 %v5124_v1, %v5123_v24  ;;  %v5095_v39 = vld [vmem:[%s8633_s2 + $0x4e0] sm:$0xff]  ;;  %v5645_v24 = vld [vmem:[#allocation2 + $0x328] sm:$0xff] }
  0xe8   : > { %5452 = vmatpush1.bf16.msra.mxu1 %v5451_v55  ;;  %5405 = vmatprep.subr.bf16.mxu0 %v8636_v3  ;;  %v7520_v55 = vld [vmem:[#allocation2 + $0x1e8] sm:$0xff]  ;;  %v7619_v29 = vld [vmem:[#allocation2 + $0x2a0] sm:$0xff]  ;;  %v5646_v1 = vld [vmem:[#allocation2 + $0x338] sm:$0xff] }
  0xe9   : > { %2290 = vmatmul.mubr.f32.gmra.mrb[72].mxu0 %v7419_v11  ;;  %5453 = vmatprep.subr.bf16.mxu1 %v8636_v3  ;;  %v7664_v37 = vld [vmem:[#allocation2 + $0x370] sm:$0xff]  ;;  %v5649_v48 = vld [vmem:[#allocation2 + $0x388] sm:$0xff] }
  0xea   : > { %2515 = vmatmul.mubr.f32.gmra.mrb[72].mxu1 %v7422_v31  ;;  %2294 = vmatprep.mubr.f32.mxu0 %v5621_v22 }
  0xeb   : > { %2519 = vmatprep.mubr.f32.mxu1 %v5622_v57  ;;  %5407 = vmatpush1.bf16.msra.mxu0 %v5406_v19  ;;  %v5119_v19 = vld [vmem:[%s8633_s2 + $0x5a0] sm:$0xff]  ;;  %v5089_v57 = vld [vmem:[%s8633_s2 + $0x4b0] sm:$0xff] }
  0xec   : > { %5455 = vmatpush1.bf16.msra.mxu1 %v5454_v53  ;;  %5408 = vmatprep.subr.bf16.mxu0 %v8636_v3  ;;  %v5120_v53 = vld [vmem:[%s8633_s2 + $0x5a8] sm:$0xff] }
  0xed   : > { %2295 = vmatmul.mubr.f32.gmra.mrb[74].mxu0 %v5623_v26  ;;  %5456 = vmatprep.subr.bf16.mxu1 %v8636_v3  ;;  %v5472_v22 = vpack.c.bf16 %v5120_v53, %v5119_v19  ;;  %v5634_v26 = vld [vmem:[#allocation2 + $0x218] sm:$0xff] }
  0xee   : > { %2520 = vmatmul.mubr.f32.gmra.mrb[74].mxu1 %v5624_v12  ;;  %2299 = vmatprep.mubr.f32.mxu0 %v7440_v44  ;;  %v7562_v12 = vld [vmem:[#allocation2 + $0x258] sm:$0xff] }
  0xef   : > { %2524 = vmatprep.mubr.f32.mxu1 %v7442_v25  ;;  %5410 = vmatpush1.bf16.msra.mxu0 %v5409_v43  ;;  %v5090_v43 = vld [vmem:[%s8633_s2 + $0x4b8] sm:$0xff] }
  0xf0   : > { %5458 = vmatpush1.bf16.msra.mxu1 %v5457_v17  ;;  %5411 = vmatprep.subr.bf16.mxu0 %v8636_v3  ;;  %v5121_v17 = vld [vmem:[%s8633_s2 + $0x5b0] sm:$0xff]  ;;  %v5427_v33 = vpack.c.bf16 %v5090_v43, %v5089_v57  ;;  %v5130_v57 = vld [vmem:[%s8633_s2 + $0x5f8] sm:$0xff]  ;;  %v5641_v43 = vld [vmem:[#allocation2 + $0x2c8] sm:$0xff] }
  0xf1   : > { %2300 = vmatmul.mubr.f32.gmra.mrb[76].mxu0 %v7459_v32  ;;  %5459 = vmatprep.subr.bf16.mxu1 %v8636_v3 }
  0xf2   : > { %2525 = vmatmul.mubr.f32.gmra.mrb[76].mxu1 %v7462_v18  ;;  %2304 = vmatprep.mubr.f32.mxu0 %v5625_v52  ;;  %v5636_v52 = vld [vmem:[#allocation2 + $0x210] sm:$0xff] }
  0xf3   : > { %2529 = vmatprep.mubr.f32.mxu1 %v5626_v36  ;;  %5413 = vmatpush1.bf16.msra.mxu0 %v5412_v28  ;;  %v5475_v28 = vpack.c.bf16 %v5122_v61, %v5121_v17  ;;  %v7579_v36 = vld [vmem:[#allocation2 + $0x240] sm:$0xff]  ;;  %v5642_v17 = vld [vmem:[#allocation2 + $0x2d8] sm:$0xff]  ;;  %v7640_v61 = vld [vmem:[#allocation2 + $0x308] sm:$0xff] }
  0xf4   : > { %5461 = vmatpush1.bf16.msra.mxu1 %v5460_v10  ;;  %5414 = vmatprep.subr.bf16.mxu0 %v8636_v3  ;;  %v5091_v10 = vld [vmem:[%s8633_s2 + $0x4c0] sm:$0xff] }
  0xf5   : > { %2305 = vmatmul.mubr.f32.gmra.mrb[78].mxu0 %v5627_v5  ;;  %5462 = vmatprep.subr.bf16.mxu1 %v8636_v3  ;;  %v5094_v5 = vld [vmem:[%s8633_s2 + $0x4d8] sm:$0xff] }
  0xf6   : > { %2530 = vmatmul.mubr.f32.gmra.mrb[78].mxu1 %v5628_v60  ;;  %2309 = vmatprep.mubr.f32.mxu0 %v7480_v8  ;;  %v5637_v60 = vld [vmem:[#allocation2 + $0x268] sm:$0xff]  ;;  %v5433_v6 = vpack.c.bf16 %v5094_v5, %v5093_v14  ;;  %v5648_v14 = vld [vmem:[#allocation2 + $0x330] sm:$0xff]  ;;  %v7661_v5 = vld [vmem:[#allocation2 + $0x360] sm:$0xff] }
  0xf7   : > { %2534 = vmatprep.mubr.f32.mxu1 %v7482_v30  ;;  %5416 = vmatpush1.bf16.msra.mxu0 %v5415_v54  ;;  %v7582_v54 = vld [vmem:[#allocation2 + $0x250] sm:$0xff] }
  0xf8   : > { %5464 = vmatpush1.bf16.msra.mxu1 %v5463_v58  ;;  %5417 = vmatprep.subr.bf16.mxu0 %v8636_v3  ;;  %v5430_v58 = vpack.c.bf16 %v5092_v40, %v5091_v10  ;;  %v5644_v10 = vld [vmem:[#allocation2 + $0x2d0] sm:$0xff]  ;;  %v7647_v40 = vld [vmem:[#allocation2 + $0x300] sm:$0xff] }
  0xf9   : > { %2310 = vmatmul.mubr.f32.gmra.mrb[80].mxu0 %v7499_v16  ;;  %5465 = vmatprep.subr.bf16.mxu1 %v8636_v3 }
  0xfa   : > { %2535 = vmatmul.mubr.f32.gmra.mrb[80].mxu1 %v7502_v49  ;;  %2314 = vmatprep.mubr.f32.mxu0 %v5629_v50  ;;  %v5096_v50 = vld [vmem:[%s8633_s2 + $0x4e8] sm:$0xff] }
  0xfb   : > { %2539 = vmatprep.mubr.f32.mxu1 %v5630_v0  ;;  %5419 = vmatpush1.bf16.msra.mxu0 %v5418_v62  ;;  %v5638_v62 = vld [vmem:[#allocation2 + $0x278] sm:$0xff]  ;;  %v5639_v0 = vld [vmem:[#allocation2 + $0x260] sm:$0xff]  ;;  %v5436_v19 = vpack.c.bf16 %v5096_v50, %v5095_v39  ;;  %v5652_v39 = vld [vmem:[#allocation2 + $0x390] sm:$0xff] }
  0xfc   : > { %5467 = vmatpush1.bf16.msra.mxu1 %v5466_v63  ;;  %5420 = vmatprep.subr.bf16.mxu0 %v8636_v3  ;;  %v7600_v63 = vld [vmem:[#allocation2 + $0x2a8] sm:$0xff]  ;;  %v809_v50 = vld [vmem:[#allocation2 + $0x3c0] sm:$0xff] }
  0xfd   : > { %2315 = vmatmul.mubr.f32.gmra.mrb[82].mxu0 %v5631_v13  ;;  %5468 = vmatprep.subr.bf16.mxu1 %v8636_v3  ;;  %v7622_v13 = vld [vmem:[#allocation2 + $0x2b0] sm:$0xff] }
  0xfe   : > { %2540 = vmatmul.mubr.f32.gmra.mrb[82].mxu1 %v5632_v34  ;;  %2319 = vmatprep.mubr.f32.mxu0 %v7520_v55  ;;  %v5097_v34 = vld [vmem:[%s8633_s2 + $0x4f0] sm:$0xff] }
  0xff   : > { %2544 = vmatprep.mubr.f32.mxu1 %v7522_v2  ;;  %5422 = vmatpush1.bf16.msra.mxu0 %v5421_v35  ;;  %v5127_v35 = vld [vmem:[%s8633_s2 + $0x5e0] sm:$0xff] }
 0x100   : > { %5470 = vmatpush1.bf16.msra.mxu1 %v5469_v59  ;;  %5423 = vmatprep.subr.bf16.mxu0 %v8636_v3  ;;  %v5128_v59 = vld [vmem:[%s8633_s2 + $0x5e8] sm:$0xff] }
 0x101   : > { %2320 = vmatmul.mubr.f32.gmra.mrb[84].mxu0 %v7539_v42  ;;  %5471 = vmatprep.subr.bf16.mxu1 %v8636_v3  ;;  %v5484_v53 = vpack.c.bf16 %v5128_v59, %v5127_v35  ;;  %v5653_v35 = vld [vmem:[#allocation2 + $0x3e8] sm:$0xff]  ;;  %v5654_v59 = vld [vmem:[#allocation2 + $0x3f8] sm:$0xff] }
 0x102   : > { %2545 = vmatmul.mubr.f32.gmra.mrb[84].mxu1 %v7542_v15  ;;  %2324 = vmatprep.mubr.f32.mxu0 %v5633_v7 }
 0x103   : > { %2549 = vmatprep.mubr.f32.mxu1 %v5634_v26  ;;  %5425 = vmatpush1.bf16.msra.mxu0 %v5424_v20  ;;  %v5098_v20 = vld [vmem:[%s8633_s2 + $0x4f8] sm:$0xff] }
 0x104   : > { %5473 = vmatpush1.bf16.msra.mxu1 %v5472_v22  ;;  %5426 = vmatprep.subr.bf16.mxu0 %v8636_v3  ;;  %v5129_v22 = vld [vmem:[%s8633_s2 + $0x5f0] sm:$0xff]  ;;  %v5439_v7 = vpack.c.bf16 %v5098_v20, %v5097_v34  ;;  %v7642_v26 = vld [vmem:[#allocation2 + $0x318] sm:$0xff] }
 0x105   : > { %2325 = vmatmul.mubr.f32.gmra.mrb[86].mxu0 %v5635_v9  ;;  %5474 = vmatprep.subr.bf16.mxu1 %v8636_v3  ;;  %v7650_v9 = vld [vmem:[#allocation2 + $0x310] sm:$0xff] }
 0x106   : > { %2550 = vmatmul.mubr.f32.gmra.mrb[86].mxu1 %v5636_v52  ;;  %2329 = vmatprep.mubr.f32.mxu0 %v7560_v27  ;;  %v7656_v52 = vld [vmem:[#allocation2 + $0x368] sm:$0xff] }
 0x107   : > { %2554 = vmatprep.mubr.f32.mxu1 %v7562_v12  ;;  %5428 = vmatpush1.bf16.msra.mxu0 %v5427_v33  ;;  %v5487_v33 = vpack.c.bf16 %v5130_v57, %v5129_v22  ;;  %v5655_v22 = vld [vmem:[#allocation2 + $0x3e0] sm:$0xff] }
 0x108   : > { %5476 = vmatpush1.bf16.msra.mxu1 %v5475_v28  ;;  %5429 = vmatprep.subr.bf16.mxu0 %v8636_v3  ;;  %v5643_v28 = vld [vmem:[#allocation2 + $0x2c0] sm:$0xff] }
 0x109   : > { %2330 = vmatmul.mubr.f32.gmra.mrb[88].mxu0 %v7579_v36  ;;  %5477 = vmatprep.subr.bf16.mxu1 %v8636_v3 }
 0x10a   : > { %2555 = vmatmul.mubr.f32.gmra.mrb[88].mxu1 %v7582_v54  ;;  %2334 = vmatprep.mubr.f32.mxu0 %v5637_v60  ;;  %v5650_v60 = vld [vmem:[#allocation2 + $0x398] sm:$0xff] }
 0x10b   : > { %2559 = vmatprep.mubr.f32.mxu1 %v5638_v62  ;;  %5431 = vmatpush1.bf16.msra.mxu0 %v5430_v58  ;;  %v7658_v58 = vld [vmem:[#allocation2 + $0x378] sm:$0xff]  ;;  %v810_v62 = vld [vmem:[#allocation2 + $0x3c8] sm:$0xff] }
 0x10c   : > { %5479 = vmatpush1.bf16.msra.mxu1 %v5478_v56  ;;  %5432 = vmatprep.subr.bf16.mxu0 %v8636_v3  ;;  %v5647_v56 = vld [vmem:[#allocation2 + $0x320] sm:$0xff] }
 0x10d   : > { %2335 = vmatmul.mubr.f32.gmra.mrb[90].mxu0 %v5639_v0  ;;  %5480 = vmatprep.subr.bf16.mxu1 %v8636_v3  ;;  %v811_v0 = vld [vmem:[#allocation2 + $0x3d0] sm:$0xff] }
 0x10e   : > { %2560 = vmatmul.mubr.f32.gmra.mrb[90].mxu1 %v5640_v23  ;;  %2339 = vmatprep.mubr.f32.mxu0 %v7600_v63  ;;  %v818_v23 = vld [vmem:[#allocation2 + $0x428] sm:$0xff] }
 0x10f   : > { %2564 = vmatprep.mubr.f32.mxu1 %v7602_v38  ;;  %5434 = vmatpush1.bf16.msra.mxu0 %v5433_v6  ;;  %v812_v6 = vld [vmem:[#allocation2 + $0x3d8] sm:$0xff] }
 0x110   : > { %5482 = vmatpush1.bf16.msra.mxu1 %v5481_v51  ;;  %5435 = vmatprep.subr.bf16.mxu0 %v8636_v3  ;;  %v5651_v51 = vld [vmem:[#allocation2 + $0x380] sm:$0xff] }
 0x111   : > { %2340 = vmatmul.mubr.f32.gmra.mrb[92].mxu0 %v7619_v29  ;;  %5483 = vmatprep.subr.bf16.mxu1 %v8636_v3 }
 0x112   : > { %2565 = vmatmul.mubr.f32.gmra.mrb[92].mxu1 %v7622_v13  ;;  %2344 = vmatprep.mubr.f32.mxu0 %v5641_v43 }
 0x113   : > { %2569 = vmatprep.mubr.f32.mxu1 %v5642_v17  ;;  %5437 = vmatpush1.bf16.msra.mxu0 %v5436_v19  ;;  %v5656_v17 = vld [vmem:[#allocation2 + $0x3f0] sm:$0xff] }
 0x114   : > { %5485 = vmatpush1.bf16.msra.mxu1 %v5484_v53  ;;  %5438 = vmatprep.subr.bf16.mxu0 %v8636_v3  ;;  %v820_v53 = vld [vmem:[#allocation2 + $0x438] sm:$0xff] }
 0x115   : > { %2345 = vmatmul.mubr.f32.gmra.mrb[94].mxu0 %v5643_v28  ;;  %5486 = vmatprep.subr.bf16.mxu1 %v8636_v3 }
 0x116   : > { %2570 = vmatmul.mubr.f32.gmra.mrb[94].mxu1 %v5644_v10  ;;  %2349 = vmatprep.mubr.f32.mxu0 %v7640_v61 }
 0x117   : > { %2574 = vmatprep.mubr.f32.mxu1 %v7642_v26  ;;  %5440 = vmatpush1.bf16.msra.mxu0 %v5439_v7  ;;  %v817_v7 = vld [vmem:[#allocation2 + $0x420] sm:$0xff] }
 0x118   : > { %5488 = vmatpush1.bf16.msra.mxu1 %v5487_v33  ;;  %5489 = vmatprep.subr.bf16.mxu0 %v8636_v3  ;;  %v819_v33 = vld [vmem:[#allocation2 + $0x430] sm:$0xff] }
 0x119   : > { %2350 = vmatmul.mubr.f32.gmra.mrb[96].mxu0 %v7647_v40  ;;  %5537 = vmatprep.subr.bf16.mxu1 %v8636_v3  ;;  %v2661_v3 = vld [vmem:[#allocation2 + $0x88] sm:$0xff] }
 0x11a   : > { %2575 = vmatmul.mubr.f32.gmra.mrb[96].mxu1 %v7650_v9  ;;  %2354 = vmatprep.mubr.f32.mxu0 %v5645_v24 }
 0x11b   : > { %2579 = vmatprep.mubr.f32.mxu1 %v5646_v1  ;;  %v1821_v19 = vpop.f32.mrb[0].mxu0 }
 0x11c   : > { %v2046_v34 = vpop.f32.mrb[0].mxu1  ;;  %v1823_v20 = vpop.f32.mrb[1].mxu0 }
 0x11d   : > { %2355 = vmatmul.mubr.f32.gmra.mrb[98].mxu0 %v5647_v56  ;;  %v7668_v57 = vadd.f32 %v2046_v34, %v1821_v19  ;;  %v2048_v43 = vpop.f32.mrb[1].mxu1  ;;  %v827_v19 = vld [vmem:[#allocation2 + $0x490] sm:$0xff] }
 0x11e   : > { %2580 = vmatmul.mubr.f32.gmra.mrb[98].mxu1 %v5648_v14  ;;  %2359 = vmatprep.mubr.f32.mxu0 %v7656_v52  ;;  %v5657_v14 = vld [vmem:[#allocation2 + $0x448] sm:$0xff] }
 0x11f   : > { %2584 = vmatprep.mubr.f32.mxu1 %v7658_v58  ;;  %v1826_v28 = vpop.f32.mrb[2].mxu0 }
 0x120   : > { %v2051_v10 = vpop.f32.mrb[2].mxu1  ;;  %v1828_v24 = vpop.f32.mrb[3].mxu0 }
 0x121   : > { %2360 = vmatmul.mubr.f32.gmra.mrb[100].mxu0 %v7661_v5  ;;  %v7670_v1 = vadd.f32 %v2051_v10, %v1826_v28  ;;  %v2053_v56 = vpop.f32.mrb[3].mxu1  ;;  %v836_v10 = vld [vmem:[#allocation2 + $0x4f8] sm:$0xff] }
 0x122   : > { %2585 = vmatmul.mubr.f32.gmra.mrb[100].mxu1 %v7664_v37  ;;  %2364 = vmatprep.mubr.f32.mxu0 %v5649_v48  ;;  %v5658_v48 = vld [vmem:[#allocation2 + $0x458] sm:$0xff] }
 0x123   : > { %2589 = vmatprep.mubr.f32.mxu1 %v5650_v60  ;;  %v826_v60 = vld [vmem:[#allocation2 + $0x488] sm:$0xff] }
 0x125   : > { %2365 = vmatmul.mubr.f32.gmra.mrb[102].mxu0 %v5651_v51  ;;  %v2056_v51 = vpop.f32.mrb[4].mxu1 }
 0x126   : > { %2590 = vmatmul.mubr.f32.gmra.mrb[102].mxu1 %v5652_v39  ;;  %2369 = vmatprep.mubr.f32.mxu0 %v810_v62  ;;  %v1831_v62 = vpop.f32.mrb[4].mxu0 }
 0x127   : > { %2594 = vmatprep.mubr.f32.mxu1 %v812_v6  ;;  %v828_v6 = vld [vmem:[#allocation2 + $0x498] sm:$0xff]  ;;  %v1833_v39 = vpop.f32.mrb[5].mxu0 }
 0x129   : > { %2370 = vmatmul.mubr.f32.gmra.mrb[104].mxu0 %v809_v50  ;;  %v5659_v50 = vld [vmem:[#allocation2 + $0x440] sm:$0xff] }
 0x12a   : > { %2595 = vmatmul.mubr.f32.gmra.mrb[104].mxu1 %v811_v0  ;;  %2374 = vmatprep.mubr.f32.mxu0 %v5653_v35  ;;  %v7672_v0 = vadd.f32 %v2056_v51, %v1831_v62  ;;  %v2058_v35 = vpop.f32.mrb[5].mxu1  ;;  %v5664_v62 = vld [vmem:[#allocation2 + $0x4b0] sm:$0xff] }
 0x12b   : > { %2599 = vmatprep.mubr.f32.mxu1 %v5654_v59  ;;  %v5660_v59 = vld [vmem:[#allocation2 + $0x450] sm:$0xff]  ;;  %v2061_v34 = vpop.f32.mrb[6].mxu1 }
 0x12c   : > { %v2063_v43 = vpop.f32.mrb[7].mxu1 }
 0x12d   : > { %2375 = vmatmul.mubr.f32.gmra.mrb[106].mxu0 %v5655_v22  ;;  %v2066_v24 = vpop.f32.mrb[8].mxu1 }
 0x12e   : > { %2600 = vmatmul.mubr.f32.gmra.mrb[106].mxu1 %v5656_v17  ;;  %2379 = vmatprep.mubr.f32.mxu0 %v818_v23  ;;  %v825_v23 = vld [vmem:[#allocation2 + $0x480] sm:$0xff]  ;;  %v5661_v17 = vld [vmem:[#allocation2 + $0x4a8] sm:$0xff] }
 0x12f   : > { %2604 = vmatprep.mubr.f32.mxu1 %v820_v53  ;;  %v1836_v53 = vpop.f32.mrb[6].mxu0 }
 0x130   : > { %v1838_v20 = vpop.f32.mrb[7].mxu0  ;;  %v7674_v22 = vadd.f32 %v2061_v34, %v1836_v53  ;;  %v5667_v53 = vld [vmem:[#allocation2 + $0x518] sm:$0xff] }
 0x131   : > { %2380 = vmatmul.mubr.f32.gmra.mrb[108].mxu0 %v817_v7  ;;  %v5662_v7 = vld [vmem:[#allocation2 + $0x4b8] sm:$0xff]  ;;  %v1841_v28 = vpop.f32.mrb[8].mxu0 }
 0x132   : > { %2605 = vmatmul.mubr.f32.gmra.mrb[108].mxu1 %v819_v33  ;;  %2384 = vmatprep.mubr.f32.mxu0 %v5657_v14  ;;  %v834_v33 = vld [vmem:[#allocation2 + $0x4e8] sm:$0xff]  ;;  %v1843_v56 = vpop.f32.mrb[9].mxu0  ;;  %v5663_v14 = vld [vmem:[#allocation2 + $0x4a0] sm:$0xff] }
 0x133   : > { %2609 = vmatprep.mubr.f32.mxu1 %v5658_v48  ;;  %v7676_v48 = vadd.f32 %v2066_v24, %v1841_v28  ;;  %v1846_v51 = vpop.f32.mrb[10].mxu0  ;;  %v5669_v28 = vld [vmem:[#allocation2 + $0x510] sm:$0xff]  ;;  %v5671_v24 = vld [vmem:[#allocation2 + $0x558] sm:$0xff] }
 0x135   : > { %2385 = vmatmul.mubr.f32.gmra.mrb[110].mxu0 %v5659_v50  ;;  %v1848_v50 = vpop.f32.mrb[11].mxu0 }
 0x136   : > { %2610 = vmatmul.mubr.f32.gmra.mrb[110].mxu1 %v5660_v59  ;;  %2389 = vmatprep.mubr.f32.mxu0 %v826_v60  ;;  %v2068_v60 = vpop.f32.mrb[9].mxu1  ;;  %v1851_v34 = vpop.f32.mrb[12].mxu0  ;;  %v5674_v50 = vld [vmem:[#allocation2 + $0x568] sm:$0xff] }
 0x137   : > { %2614 = vmatprep.mubr.f32.mxu1 %v828_v6  ;;  %v833_v6 = vld [vmem:[#allocation2 + $0x4e0] sm:$0xff]  ;;  %v2071_v39 = vpop.f32.mrb[10].mxu1  ;;  %v1853_v43 = vpop.f32.mrb[13].mxu0 }
 0x138   : > { %v7678_v35 = vadd.f32 %v2071_v39, %v1846_v51  ;;  %v2073_v59 = vpop.f32.mrb[11].mxu1  ;;  %v1856_v56 = vpop.f32.mrb[14].mxu0  ;;  %v5673_v39 = vld [vmem:[#allocation2 + $0x550] sm:$0xff] }
 0x139   : > { %2390 = vmatmul.mubr.f32.gmra.mrb[112].mxu0 %v825_v23  ;;  %v5665_v23 = vld [vmem:[#allocation2 + $0x4f0] sm:$0xff]  ;;  %v2076_v20 = vpop.f32.mrb[12].mxu1  ;;  %v1858_v60 = vpop.f32.mrb[15].mxu0  ;;  %v5675_v59 = vld [vmem:[#allocation2 + $0x578] sm:$0xff] }
 0x13a   : > { %2615 = vmatmul.mubr.f32.gmra.mrb[112].mxu1 %v827_v19  ;;  %2394 = vmatprep.mubr.f32.mxu0 %v5661_v17  ;;  %v5666_v19 = vld [vmem:[#allocation2 + $0x508] sm:$0xff]  ;;  %v5668_v17 = vld [vmem:[#allocation2 + $0x500] sm:$0xff] }
 0x13b   : > { %2619 = vmatprep.mubr.f32.mxu1 %v5662_v7  ;;  %v7680_v7 = vadd.f32 %v2076_v20, %v1851_v34  ;;  %v5676_v34 = vld [vmem:[#allocation2 + $0x560] sm:$0xff] }
 0x13d   : > { %2395 = vmatmul.mubr.f32.gmra.mrb[114].mxu0 %v5663_v14 }
 0x13e   : > { %2620 = vmatmul.mubr.f32.gmra.mrb[114].mxu1 %v5664_v62  ;;  %2399 = vmatprep.mubr.f32.mxu0 %v834_v33  ;;  %v2078_v33 = vpop.f32.mrb[13].mxu1  ;;  %v5672_v62 = vld [vmem:[#allocation2 + $0x540] sm:$0xff] }
 0x13f   : > { %2624 = vmatprep.mubr.f32.mxu1 %v836_v10  ;;  %v5670_v10 = vld [vmem:[#allocation2 + $0x548] sm:$0xff]  ;;  %v2081_v14 = vpop.f32.mrb[14].mxu1 }
 0x140   : > { %v2083_v51 = vpop.f32.mrb[15].mxu1  ;;  %v5678_v33 = vld [vmem:[#allocation2 + $0x5a8] sm:$0xff] }
 0x141   : > { %2400 = vmatmul.mubr.f32.gmra.mrb[116].mxu0 %v833_v6  ;;  %v7682_v6 = vadd.f32 %v2081_v14, %v1856_v56  ;;  %v707_v56 = vld [vmem:[%s7691_s14 + $0x18] sm:$0xff]  ;;  %v704_v51 = vld [vmem:[%s7691_s14] sm:$0xff] }
 0x142   : > { %2625 = vmatmul.mubr.f32.gmra.mrb[116].mxu1 %v5665_v23  ;;  %2404 = vmatprep.mubr.f32.mxu0 %v5666_v19  ;;  %v1861_v23 = vpop.f32.mrb[16].mxu0  ;;  %v2086_v19 = vpop.f32.mrb[16].mxu1  ;;  %720 = vst [vmem:[#allocation2 + $0x618] sm:$0xff] %v707_v56  ;;  %717 = vst [vmem:[#allocation2 + $0x600] sm:$0xff] %v704_v51  ;;  %v710_v51 = vld [vmem:[%s7691_s14 + $0x30] sm:$0xff] }
 0x143   : > { %2629 = vmatprep.mubr.f32.mxu1 %v5667_v53  ;;  %v1863_v53 = vpop.f32.mrb[17].mxu0  ;;  %v7684_v20 = vadd.f32 %v2086_v19, %v1861_v23  ;;  %v2088_v43 = vpop.f32.mrb[17].mxu1  ;;  %v5681_v23 = vld [vmem:[#allocation2 + $0x5b0] sm:$0xff]  ;;  %v5682_v19 = vld [vmem:[#allocation2 + $0x5c8] sm:$0xff]  ;;  %723 = vst [vmem:[#allocation2 + $0x630] sm:$0xff] %v710_v51  ;;  %v8638_v51 = vmov 0.0|0.0  }
 0x144   : > { %v2091_v14 = vpop.f32.mrb[18].mxu1  ;;  %v5683_v53 = vld [vmem:[#allocation2 + $0x5d8] sm:$0xff]  ;;  %v5132_v43 = vld [vmem:[%s8633_s2 + $0x608] sm:$0xff] }
 0x145   : > { %2405 = vmatmul.mubr.f32.gmra.mrb[118].mxu0 %v5668_v17  ;;  %v5677_v17 = vld [vmem:[#allocation2 + $0x570] sm:$0xff] }
 0x146   : > { %2630 = vmatmul.mubr.f32.gmra.mrb[118].mxu1 %v5669_v28  ;;  %2409 = vmatprep.mubr.f32.mxu0 %v5670_v10  ;;  %v5679_v28 = vld [vmem:[#allocation2 + $0x5b8] sm:$0xff]  ;;  %v1866_v10 = vpop.f32.mrb[18].mxu0 }
 0x147   : > { %2634 = vmatprep.mubr.f32.mxu1 %v5671_v24  ;;  %v705_v24 = vld [vmem:[%s7691_s14 + $0x8] sm:$0xff]  ;;  %v1868_v60 = vpop.f32.mrb[19].mxu0 }
 0x148   : > { %718 = vst [vmem:[#allocation2 + $0x608] sm:$0xff] %v705_v24  ;;  %v711_v24 = vld [vmem:[%s7691_s14 + $0x38] sm:$0xff]  ;;  %v5684_v60 = vld [vmem:[#allocation2 + $0x5c0] sm:$0xff] }
 0x149   : > { %2410 = vmatmul.mubr.f32.gmra.mrb[120].mxu0 %v5672_v62  ;;  %v5680_v62 = vld [vmem:[#allocation2 + $0x5a0] sm:$0xff]  ;;  %724 = vst [vmem:[#allocation2 + $0x638] sm:$0xff] %v711_v24 }
 0x14a   : > { %2635 = vmatmul.mubr.f32.gmra.mrb[120].mxu1 %v5673_v39  ;;  %2414 = vmatprep.mubr.f32.mxu0 %v5674_v50  ;;  %v706_v39 = vld [vmem:[%s7691_s14 + $0x10] sm:$0xff]  ;;  %v7697_v50 = vadd.f32 %v2091_v14, %v1866_v10  ;;  %v709_v10 = vld [vmem:[%s7691_s14 + $0x28] sm:$0xff] }
 0x14b   : > { %2639 = vmatprep.mubr.f32.mxu1 %v5675_v59  ;;  %v2093_v59 = vpop.f32.mrb[19].mxu1  ;;  %719 = vst [vmem:[#allocation2 + $0x610] sm:$0xff] %v706_v39  ;;  %722 = vst [vmem:[#allocation2 + $0x628] sm:$0xff] %v709_v10  ;;  %v5133_v10 = vld [vmem:[%s8633_s2 + $0x610] sm:$0xff] }
 0x14c   : > { %v2096_v56 = vpop.f32.mrb[20].mxu1 }
 0x14d   : > { %2415 = vmatmul.mubr.f32.gmra.mrb[122].mxu0 %v5676_v34  ;;  %v5131_v34 = vld [vmem:[%s8633_s2 + $0x600] sm:$0xff]  ;;  %v2098_v59 = vpop.f32.mrb[21].mxu1 }
 0x14e   : > { %2640 = vmatmul.mubr.f32.gmra.mrb[122].mxu1 %v5677_v17  ;;  %2419 = vmatprep.mubr.f32.mxu0 %v5678_v33  ;;  %v5163_v17 = vld [vmem:[%s8633_s2 + $0x700] sm:$0xff]  ;;  %v1871_v33 = vpop.f32.mrb[20].mxu0  ;;  %v2101_v24 = vpop.f32.mrb[22].mxu1 }
 0x14f   : > { %2644 = vmatprep.mubr.f32.mxu1 %v5679_v28  ;;  %v5164_v28 = vld [vmem:[%s8633_s2 + $0x708] sm:$0xff]  ;;  %v1873_v14 = vpop.f32.mrb[21].mxu0  ;;  %v7715_v39 = vadd.f32 %v2096_v56, %v1871_v33  ;;  %v5134_v33 = vld [vmem:[%s8633_s2 + $0x618] sm:$0xff] }
 0x150   : > { %v1876_v14 = vpop.f32.mrb[22].mxu0 }
 0x151   : > { %2420 = vmatmul.mubr.f32.gmra.mrb[124].mxu0 %v5680_v62  ;;  %v708_v62 = vld [vmem:[%s7691_s14 + $0x20] sm:$0xff]  ;;  %v1878_v56 = vpop.f32.mrb[23].mxu0 }
 0x152   : > { %2645 = vmatmul.mubr.f32.gmra.mrb[124].mxu1 %v5681_v23  ;;  %2424 = vmatprep.mubr.f32.mxu0 %v5682_v19  ;;  %v5685_v23 = vld [vmem:[#allocation2 + $0x5d0] sm:$0xff]  ;;  %v5490_v19 = vpack.c.bf16 %v5132_v43, %v5131_v34  ;;  %721 = vst [vmem:[#allocation2 + $0x620] sm:$0xff] %v708_v62  ;;  %v5166_v34 = vld [vmem:[%s8633_s2 + $0x718] sm:$0xff]  ;;  %v7732_v43 = vadd.f32 %v2101_v24, %v1876_v14  ;;  %v1881_v62 = vpop.f32.mrb[24].mxu0  ;;  %v5136_v14 = vld [vmem:[%s8633_s2 + $0x628] sm:$0xff] }
 0x153   : > { %2649 = vmatprep.mubr.f32.mxu1 %v5683_v53  ;;  %v5538_v53 = vpack.c.bf16 %v5164_v28, %v5163_v17  ;;  %v2103_v17 = vpop.f32.mrb[23].mxu1  ;;  %v2660_v28 = vld [vmem:[#allocation2 + $0x80] sm:$0xff]  ;;  %v2669_v24 = vld [vmem:[#allocation2 + $0xe8] sm:$0xff] }
 0x154   : > { %v5137_v17 = vld [vmem:[%s8633_s2 + $0x630] sm:$0xff] }
 0x155   : > { %2425 = vmatmul.mubr.f32.gmra.mrb[126].mxu0 %v5684_v60  ;;  %v2662_v60 = vld [vmem:[#allocation2 + $0x90] sm:$0xff] }
 0x156   : > { %2650 = vmatmul.mubr.f32.gmra.mrb[126].mxu1 %v5685_v23  ;;  %2913 = vmatprep.mubr.f32.mxu0 %v7360_v47  ;;  %v2663_v47 = vld [vmem:[#allocation2 + $0x98] sm:$0xff]  ;;  %v5135_v23 = vld [vmem:[%s8633_s2 + $0x620] sm:$0xff] }
 0x157   : > { %3138 = vmatprep.mubr.f32.mxu1 %v7362_v4  ;;  %v5165_v4 = vld [vmem:[%s8633_s2 + $0x710] sm:$0xff]  ;;  %v5496_v56 = vpack.c.bf16 %v5136_v14, %v5135_v23  ;;  %v2668_v23 = vld [vmem:[#allocation2 + $0xe0] sm:$0xff] }
 0x158   : > { %v5541_v59 = vpack.c.bf16 %v5166_v34, %v5165_v4  ;;  %v2671_v4 = vld [vmem:[#allocation2 + $0xf8] sm:$0xff]  ;;  %v2670_v14 = vld [vmem:[#allocation2 + $0xf0] sm:$0xff] }
 0x159   : > { %2914 = vmatmul.mubr.f32.vlgmr.msra.gmra.mrb[128].mxu0 %v7379_v41  ;;  %v5493_v41 = vpack.c.bf16 %v5134_v33, %v5133_v10 }
 0x15a   : > { %3139 = vmatmul.mubr.f32.vlgmr.msra.gmra.mrb[128].mxu1 %v7382_v21  ;;  %5491 = vmatpush1.bf16.msra.mxu0 %v5490_v19  ;;  %v2106_v21 = vpop.f32.mrb[24].mxu1  ;;  %v1883_v19 = vpop.f32.mrb[25].mxu0 }
 0x15b   : > { %5539 = vmatpush1.bf16.msra.mxu1 %v5538_v53  ;;  %2918 = vmatprep.mubr.f32.mxu0 %v2661_v3  ;;  %v5167_v3 = vld [vmem:[%s8633_s2 + $0x720] sm:$0xff]  ;;  %v5168_v53 = vld [vmem:[%s8633_s2 + $0x728] sm:$0xff]  ;;  %v7749_v10 = vadd.f32 %v2106_v21, %v1881_v62  ;;  %v2108_v33 = vpop.f32.mrb[25].mxu1 }
 0x15c   : > { %3143 = vmatprep.mubr.f32.mxu1 %v2663_v47  ;;  %5492 = vmatprep.subr.bf16.mxu0 %v8638_v51  ;;  %v1886_v47 = vpop.f32.mrb[26].mxu0  ;;  %v5544_v34 = vpack.c.bf16 %v5168_v53, %v5167_v3  ;;  %v5139_v3 = vld [vmem:[%s8633_s2 + $0x640] sm:$0xff]  ;;  %v5140_v53 = vld [vmem:[%s8633_s2 + $0x648] sm:$0xff] }
 0x15d   : > { %2919 = vmatmul.mubr.f32.gmra.mrb[130].mxu0 %v2660_v28  ;;  %5540 = vmatprep.subr.bf16.mxu1 %v8638_v51  ;;  %v5138_v28 = vld [vmem:[%s8633_s2 + $0x638] sm:$0xff] }
 0x15e   : > { %3144 = vmatmul.mubr.f32.gmra.mrb[130].mxu1 %v2662_v60  ;;  %2923 = vmatprep.mubr.f32.mxu0 %v7400_v46  ;;  %v2111_v46 = vpop.f32.mrb[26].mxu1  ;;  %v1888_v60 = vpop.f32.mrb[27].mxu0 }
 0x15f   : > { %3148 = vmatprep.mubr.f32.mxu1 %v7402_v45  ;;  %5494 = vmatpush1.bf16.msra.mxu0 %v5493_v41  ;;  %v5169_v45 = vld [vmem:[%s8633_s2 + $0x730] sm:$0xff]  ;;  %v5170_v41 = vld [vmem:[%s8633_s2 + $0x738] sm:$0xff]  ;;  %v7768_v62 = vadd.f32 %v2111_v46, %v1886_v47  ;;  %v1891_v21 = vpop.f32.mrb[28].mxu0 }
 0x160   : > { %5542 = vmatpush1.bf16.msra.mxu1 %v5541_v59  ;;  %5495 = vmatprep.subr.bf16.mxu0 %v8638_v51  ;;  %v2113_v59 = vpop.f32.mrb[27].mxu1  ;;  %v5547_v19 = vpack.c.bf16 %v5170_v41, %v5169_v45  ;;  %v1893_v33 = vpop.f32.mrb[29].mxu0  ;;  %v2679_v46 = vld [vmem:[#allocation2 + $0x158] sm:$0xff]  ;;  %v5141_v45 = vld [vmem:[%s8633_s2 + $0x650] sm:$0xff] }
 0x161   : > { %2924 = vmatmul.mubr.f32.gmra.mrb[132].mxu0 %v7419_v11  ;;  %5543 = vmatprep.subr.bf16.mxu1 %v8638_v51  ;;  %v5499_v11 = vpack.c.bf16 %v5138_v28, %v5137_v17  ;;  %v5502_v17 = vpack.c.bf16 %v5140_v53, %v5139_v3  ;;  %v1896_v28 = vpop.f32.mrb[30].mxu0  ;;  %v5142_v41 = vld [vmem:[%s8633_s2 + $0x658] sm:$0xff]  ;;  %v5144_v33 = vld [vmem:[%s8633_s2 + $0x668] sm:$0xff] }
 0x162   : > { %3149 = vmatmul.mubr.f32.gmra.mrb[132].mxu1 %v7422_v31  ;;  %2928 = vmatprep.mubr.f32.mxu0 %v2669_v24  ;;  %v2116_v31 = vpop.f32.mrb[28].mxu1  ;;  %v5171_v24 = vld [vmem:[%s8633_s2 + $0x740] sm:$0xff]  ;;  %v1898_v59 = vpop.f32.mrb[31].mxu0 }
 0x163   : > { %3153 = vmatprep.mubr.f32.mxu1 %v2671_v4  ;;  %5497 = vmatpush1.bf16.msra.mxu0 %v5496_v56  ;;  %v5172_v56 = vld [vmem:[%s8633_s2 + $0x748] sm:$0xff]  ;;  %v7785_v47 = vadd.f32 %v2116_v31, %v1891_v21  ;;  %v2118_v4 = vpop.f32.mrb[29].mxu1  ;;  %v2676_v21 = vld [vmem:[#allocation2 + $0x140] sm:$0xff]  ;;  %v5146_v59 = vld [vmem:[%s8633_s2 + $0x678] sm:$0xff] }
 0x164   : > { %5545 = vmatpush1.bf16.msra.mxu1 %v5544_v34  ;;  %5498 = vmatprep.subr.bf16.mxu0 %v8638_v51  ;;  %v2677_v34 = vld [vmem:[#allocation2 + $0x148] sm:$0xff]  ;;  %v5550_v60 = vpack.c.bf16 %v5172_v56, %v5171_v24  ;;  %v1901_v3 = vpop.f32.mrb[32].mxu0  ;;  %v5143_v31 = vld [vmem:[%s8633_s2 + $0x660] sm:$0xff] }
 0x165   : > { %2929 = vmatmul.mubr.f32.gmra.mrb[134].mxu0 %v2668_v23  ;;  %5546 = vmatprep.subr.bf16.mxu1 %v8638_v51  ;;  %v5174_v23 = vld [vmem:[%s8633_s2 + $0x758] sm:$0xff]  ;;  %v1903_v24 = vpop.f32.mrb[33].mxu0  ;;  %v5175_v56 = vld [vmem:[%s8633_s2 + $0x760] sm:$0xff]  ;;  %v5176_v4 = vld [vmem:[%s8633_s2 + $0x768] sm:$0xff] }
 0x166   : > { %3154 = vmatmul.mubr.f32.gmra.mrb[134].mxu1 %v2670_v14  ;;  %2933 = vmatprep.mubr.f32.mxu0 %v7440_v44  ;;  %v2121_v44 = vpop.f32.mrb[30].mxu1  ;;  %v5179_v24 = vld [vmem:[%s8633_s2 + $0x780] sm:$0xff] }
 0x167   : > { %3158 = vmatprep.mubr.f32.mxu1 %v7442_v25  ;;  %5500 = vmatpush1.bf16.msra.mxu0 %v5499_v11  ;;  %v5173_v25 = vld [vmem:[%s8633_s2 + $0x750] sm:$0xff]  ;;  %v7804_v14 = vadd.f32 %v2121_v44, %v1896_v28  ;;  %v2123_v11 = vpop.f32.mrb[31].mxu1  ;;  %v2685_v28 = vld [vmem:[#allocation2 + $0x1a8] sm:$0xff] }
 0x168   : > { %5548 = vmatpush1.bf16.msra.mxu1 %v5547_v19  ;;  %5501 = vmatprep.subr.bf16.mxu0 %v8638_v51  ;;  %v2678_v19 = vld [vmem:[#allocation2 + $0x150] sm:$0xff]  ;;  %v5553_v53 = vpack.c.bf16 %v5174_v23, %v5173_v25  ;;  %v5178_v23 = vld [vmem:[%s8633_s2 + $0x778] sm:$0xff] }
 0x169   : > { %2934 = vmatmul.mubr.f32.gmra.mrb[136].mxu0 %v7459_v32  ;;  %5549 = vmatprep.subr.bf16.mxu1 %v8638_v51  ;;  %v5505_v32 = vpack.c.bf16 %v5142_v41, %v5141_v45  ;;  %v2687_v45 = vld [vmem:[#allocation2 + $0x1b8] sm:$0xff]  ;;  %v5556_v41 = vpack.c.bf16 %v5176_v4, %v5175_v56  ;;  %v5145_v44 = vld [vmem:[%s8633_s2 + $0x670] sm:$0xff]  ;;  %v5180_v56 = vld [vmem:[%s8633_s2 + $0x788] sm:$0xff] }
 0x16a   : > { %3159 = vmatmul.mubr.f32.gmra.mrb[136].mxu1 %v7462_v18  ;;  %2938 = vmatprep.mubr.f32.mxu0 %v2677_v34  ;;  %v2126_v18 = vpop.f32.mrb[32].mxu1 }
 0x16b   : > { %3163 = vmatprep.mubr.f32.mxu1 %v2679_v46  ;;  %5503 = vmatpush1.bf16.msra.mxu0 %v5502_v17  ;;  %v7821_v34 = vadd.f32 %v2126_v18, %v1901_v3  ;;  %v2128_v17 = vpop.f32.mrb[33].mxu1  ;;  %v5508_v46 = vpack.c.bf16 %v5144_v33, %v5143_v31  ;;  %v5147_v31 = vld [vmem:[%s8633_s2 + $0x680] sm:$0xff]  ;;  %v5148_v33 = vld [vmem:[%s8633_s2 + $0x688] sm:$0xff] }
 0x16c   : > { %5551 = vmatpush1.bf16.msra.mxu1 %v5550_v60  ;;  %5504 = vmatprep.subr.bf16.mxu0 %v8638_v51  ;;  %v1906_v60 = vpop.f32.mrb[34].mxu0 }
 0x16d   : > { %2939 = vmatmul.mubr.f32.gmra.mrb[138].mxu0 %v2676_v21  ;;  %5552 = vmatprep.subr.bf16.mxu1 %v8638_v51  ;;  %v1908_v25 = vpop.f32.mrb[35].mxu0 }
 0x16e   : > { %3164 = vmatmul.mubr.f32.gmra.mrb[138].mxu1 %v2678_v19  ;;  %2943 = vmatprep.mubr.f32.mxu0 %v7480_v8  ;;  %v2131_v8 = vpop.f32.mrb[34].mxu1  ;;  %v2684_v19 = vld [vmem:[#allocation2 + $0x1a0] sm:$0xff]  ;;  %v1911_v3 = vpop.f32.mrb[36].mxu0  ;;  %v5182_v25 = vld [vmem:[%s8633_s2 + $0x798] sm:$0xff] }
 0x16f   : > { %3168 = vmatprep.mubr.f32.mxu1 %v7482_v30  ;;  %5506 = vmatpush1.bf16.msra.mxu0 %v5505_v32  ;;  %v5177_v30 = vld [vmem:[%s8633_s2 + $0x770] sm:$0xff]  ;;  %v7840_v11 = vadd.f32 %v2131_v8, %v1906_v60  ;;  %v2133_v21 = vpop.f32.mrb[35].mxu1  ;;  %v1913_v18 = vpop.f32.mrb[37].mxu0 }
 0x170   : > { %5554 = vmatpush1.bf16.msra.mxu1 %v5553_v53  ;;  %5507 = vmatprep.subr.bf16.mxu0 %v8638_v51  ;;  %v2686_v32 = vld [vmem:[#allocation2 + $0x1b0] sm:$0xff]  ;;  %v5559_v53 = vpack.c.bf16 %v5178_v23, %v5177_v30  ;;  %v2692_v21 = vld [vmem:[#allocation2 + $0x200] sm:$0xff] }
 0x171   : > { %2944 = vmatmul.mubr.f32.gmra.mrb[140].mxu0 %v7499_v16  ;;  %5555 = vmatprep.subr.bf16.mxu1 %v8638_v51  ;;  %v5511_v16 = vpack.c.bf16 %v5146_v59, %v5145_v44  ;;  %v5149_v44 = vld [vmem:[%s8633_s2 + $0x690] sm:$0xff]  ;;  %v5150_v59 = vld [vmem:[%s8633_s2 + $0x698] sm:$0xff] }
 0x172   : > { %3169 = vmatmul.mubr.f32.gmra.mrb[140].mxu1 %v7502_v49  ;;  %2948 = vmatprep.mubr.f32.mxu0 %v2685_v28  ;;  %v2136_v49 = vpop.f32.mrb[36].mxu1  ;;  %v2693_v28 = vld [vmem:[#allocation2 + $0x208] sm:$0xff]  ;;  %v1916_v60 = vpop.f32.mrb[38].mxu0 }
 0x173   : > { %3173 = vmatprep.mubr.f32.mxu1 %v2687_v45  ;;  %5509 = vmatpush1.bf16.msra.mxu0 %v5508_v46  ;;  %v7857_v4 = vadd.f32 %v2136_v49, %v1911_v3  ;;  %v2138_v17 = vpop.f32.mrb[37].mxu1  ;;  %v5514_v46 = vpack.c.bf16 %v5148_v33, %v5147_v31  ;;  %v2695_v45 = vld [vmem:[#allocation2 + $0x218] sm:$0xff]  ;;  %v1918_v8 = vpop.f32.mrb[39].mxu0  ;;  %v5151_v3 = vld [vmem:[%s8633_s2 + $0x6a0] sm:$0xff]  ;;  %v5184_v49 = vld [vmem:[%s8633_s2 + $0x7a8] sm:$0xff] }
 0x174   : > { %5557 = vmatpush1.bf16.msra.mxu1 %v5556_v41  ;;  %5510 = vmatprep.subr.bf16.mxu0 %v8638_v51  ;;  %v5562_v41 = vpack.c.bf16 %v5180_v56, %v5179_v24  ;;  %v5183_v33 = vld [vmem:[%s8633_s2 + $0x7a0] sm:$0xff]  ;;  %v2701_v56 = vld [vmem:[#allocation2 + $0x268] sm:$0xff] }
 0x175   : > { %2949 = vmatmul.mubr.f32.gmra.mrb[142].mxu0 %v2684_v19  ;;  %5558 = vmatprep.subr.bf16.mxu1 %v8638_v51  ;;  %v2694_v19 = vld [vmem:[#allocation2 + $0x210] sm:$0xff] }
 0x176   : > { %3174 = vmatmul.mubr.f32.gmra.mrb[142].mxu1 %v2686_v32  ;;  %2953 = vmatprep.mubr.f32.mxu0 %v7520_v55  ;;  %v2141_v55 = vpop.f32.mrb[38].mxu1 }
 0x177   : > { %3178 = vmatprep.mubr.f32.mxu1 %v7522_v2  ;;  %5512 = vmatpush1.bf16.msra.mxu0 %v5511_v16  ;;  %v5181_v2 = vld [vmem:[%s8633_s2 + $0x790] sm:$0xff]  ;;  %v7876_v30 = vadd.f32 %v2141_v55, %v1916_v60  ;;  %v2143_v23 = vpop.f32.mrb[39].mxu1  ;;  %v1921_v32 = vpop.f32.mrb[40].mxu0  ;;  %v5568_v60 = vpack.c.bf16 %v5184_v49, %v5183_v33 }
 0x178   : > { %5560 = vmatpush1.bf16.msra.mxu1 %v5559_v53  ;;  %5513 = vmatprep.subr.bf16.mxu0 %v8638_v51  ;;  %v5565_v16 = vpack.c.bf16 %v5182_v25, %v5181_v2  ;;  %v5152_v53 = vld [vmem:[%s8633_s2 + $0x6a8] sm:$0xff]  ;;  %v1923_v31 = vpop.f32.mrb[41].mxu0  ;;  %v2700_v2 = vld [vmem:[#allocation2 + $0x260] sm:$0xff]  ;;  %v2702_v25 = vld [vmem:[#allocation2 + $0x270] sm:$0xff] }
 0x179   : > { %2954 = vmatmul.mubr.f32.gmra.mrb[144].mxu0 %v7539_v42  ;;  %5561 = vmatprep.subr.bf16.mxu1 %v8638_v51  ;;  %v5517_v42 = vpack.c.bf16 %v5150_v59, %v5149_v44  ;;  %v5520_v17 = vpack.c.bf16 %v5152_v53, %v5151_v3  ;;  %v5186_v59 = vld [vmem:[%s8633_s2 + $0x7b8] sm:$0xff]  ;;  %v5188_v3 = vld [vmem:[%s8633_s2 + $0x7c8] sm:$0xff] }
 0x17a   : > { %3179 = vmatmul.mubr.f32.gmra.mrb[144].mxu1 %v7542_v15  ;;  %2958 = vmatprep.mubr.f32.mxu0 %v2693_v28  ;;  %v2146_v15 = vpop.f32.mrb[40].mxu1  ;;  %v2709_v31 = vld [vmem:[#allocation2 + $0x2c8] sm:$0xff] }
 0x17b   : > { %3183 = vmatprep.mubr.f32.mxu1 %v2695_v45  ;;  %5515 = vmatpush1.bf16.msra.mxu0 %v5514_v46  ;;  %v7893_v18 = vadd.f32 %v2146_v15, %v1921_v32  ;;  %v2148_v24 = vpop.f32.mrb[41].mxu1  ;;  %v2703_v46 = vld [vmem:[#allocation2 + $0x278] sm:$0xff]  ;;  %v5153_v45 = vld [vmem:[%s8633_s2 + $0x6b0] sm:$0xff] }
 0x17c   : > { %5563 = vmatpush1.bf16.msra.mxu1 %v5562_v41  ;;  %5516 = vmatprep.subr.bf16.mxu0 %v8638_v51  ;;  %v5154_v41 = vld [vmem:[%s8633_s2 + $0x6b8] sm:$0xff] }
 0x17d   : > { %2959 = vmatmul.mubr.f32.gmra.mrb[146].mxu0 %v2692_v21  ;;  %5564 = vmatprep.subr.bf16.mxu1 %v8638_v51  ;;  %v2711_v24 = vld [vmem:[#allocation2 + $0x2d8] sm:$0xff] }
 0x17e   : > { %3184 = vmatmul.mubr.f32.gmra.mrb[146].mxu1 %v2694_v19  ;;  %2963 = vmatprep.mubr.f32.mxu0 %v7560_v27  ;;  %v5155_v19 = vld [vmem:[%s8633_s2 + $0x6c0] sm:$0xff] }
 0x17f   : > { %3188 = vmatprep.mubr.f32.mxu1 %v7562_v12  ;;  %5518 = vmatpush1.bf16.msra.mxu0 %v5517_v42  ;;  %v1926_v28 = vpop.f32.mrb[42].mxu0  ;;  %v5185_v12 = vld [vmem:[%s8633_s2 + $0x7b0] sm:$0xff]  ;;  %v5156_v42 = vld [vmem:[%s8633_s2 + $0x6c8] sm:$0xff] }
 0x180   : > { %5566 = vmatpush1.bf16.msra.mxu1 %v5565_v16  ;;  %5519 = vmatprep.subr.bf16.mxu0 %v8638_v51  ;;  %v1928_v44 = vpop.f32.mrb[43].mxu0  ;;  %v5571_v21 = vpack.c.bf16 %v5186_v59, %v5185_v12  ;;  %v5187_v16 = vld [vmem:[%s8633_s2 + $0x7c0] sm:$0xff]  ;;  %v5526_v33 = vpack.c.bf16 %v5156_v42, %v5155_v19  ;;  %v2717_v42 = vld [vmem:[#allocation2 + $0x328] sm:$0xff] }
 0x181   : > { %v2151_v27 = vpop.f32.mrb[42].mxu1  ;;  %2964 = vmatmul.mubr.f32.gmra.mrb[148].mxu0 %v7579_v36  ;;  %5567 = vmatprep.subr.bf16.mxu1 %v8638_v51  ;;  %v5523_v36 = vpack.c.bf16 %v5154_v41, %v5153_v45  ;;  %v2710_v44 = vld [vmem:[#allocation2 + $0x2d0] sm:$0xff] }
 0x182   : > { %v7912_v55 = vadd.f32 %v2151_v27, %v1926_v28  ;;  %v2153_v8 = vpop.f32.mrb[43].mxu1  ;;  %3189 = vmatmul.mubr.f32.gmra.mrb[148].mxu1 %v7582_v54  ;;  %2968 = vmatprep.mubr.f32.mxu0 %v2701_v56  ;;  %v5574_v56 = vpack.c.bf16 %v5188_v3, %v5187_v16  ;;  %v5158_v28 = vld [vmem:[%s8633_s2 + $0x6d8] sm:$0xff]  ;;  %v2708_v27 = vld [vmem:[#allocation2 + $0x2c0] sm:$0xff] }
 0x183   : > { %3193 = vmatprep.mubr.f32.mxu1 %v2703_v46  ;;  %5521 = vmatpush1.bf16.msra.mxu0 %v5520_v17  ;;  %v1931_v23 = vpop.f32.mrb[44].mxu0  ;;  %v5157_v17 = vld [vmem:[%s8633_s2 + $0x6d0] sm:$0xff]  ;;  %v5159_v8 = vld [vmem:[%s8633_s2 + $0x6e0] sm:$0xff]  ;;  %v2719_v16 = vld [vmem:[#allocation2 + $0x338] sm:$0xff] }
 0x184   : > { %5569 = vmatpush1.bf16.msra.mxu1 %v5568_v60  ;;  %5522 = vmatprep.subr.bf16.mxu0 %v8638_v51  ;;  %v1933_v32 = vpop.f32.mrb[45].mxu0  ;;  %v5190_v60 = vld [vmem:[%s8633_s2 + $0x7d8] sm:$0xff] }
 0x185   : > { %v2156_v54 = vpop.f32.mrb[44].mxu1  ;;  %2969 = vmatmul.mubr.f32.gmra.mrb[150].mxu0 %v2700_v2  ;;  %5570 = vmatprep.subr.bf16.mxu1 %v8638_v51  ;;  %v5160_v2 = vld [vmem:[%s8633_s2 + $0x6e8] sm:$0xff] }
 0x186   : > { %v7929_v53 = vadd.f32 %v2156_v54, %v1931_v23  ;;  %v2158_v15 = vpop.f32.mrb[45].mxu1  ;;  %3194 = vmatmul.mubr.f32.gmra.mrb[150].mxu1 %v2702_v25  ;;  %2973 = vmatprep.mubr.f32.mxu0 %v7600_v63  ;;  %v5192_v23 = vld [vmem:[%s8633_s2 + $0x7e8] sm:$0xff]  ;;  %v5532_v54 = vpack.c.bf16 %v5160_v2, %v5159_v8  ;;  %v2724_v2 = vld [vmem:[#allocation2 + $0x380] sm:$0xff] }
 0x187   : > { %3198 = vmatprep.mubr.f32.mxu1 %v7602_v38  ;;  %5524 = vmatpush1.bf16.msra.mxu0 %v5523_v36  ;;  %v1936_v49 = vpop.f32.mrb[46].mxu0  ;;  %v5189_v38 = vld [vmem:[%s8633_s2 + $0x7d0] sm:$0xff]  ;;  %v5191_v36 = vld [vmem:[%s8633_s2 + $0x7e0] sm:$0xff] }
 0x188   : > { %5572 = vmatpush1.bf16.msra.mxu1 %v5571_v21  ;;  %5525 = vmatprep.subr.bf16.mxu0 %v8638_v51  ;;  %v1938_v46 = vpop.f32.mrb[47].mxu0  ;;  %v5577_v59 = vpack.c.bf16 %v5190_v60, %v5189_v38  ;;  %v5580_v3 = vpack.c.bf16 %v5192_v23, %v5191_v36  ;;  %v5161_v15 = vld [vmem:[%s8633_s2 + $0x6f0] sm:$0xff] }
 0x189   : > { %v2161_v63 = vpop.f32.mrb[46].mxu1  ;;  %2974 = vmatmul.mubr.f32.gmra.mrb[152].mxu0 %v7619_v29  ;;  %5573 = vmatprep.subr.bf16.mxu1 %v8638_v51  ;;  %v5529_v29 = vpack.c.bf16 %v5158_v28, %v5157_v17  ;;  %v2716_v17 = vld [vmem:[#allocation2 + $0x320] sm:$0xff]  ;;  %v2718_v28 = vld [vmem:[#allocation2 + $0x330] sm:$0xff] }
 0x18a   : > { %v7948_v45 = vadd.f32 %v2161_v63, %v1936_v49  ;;  %v2163_v41 = vpop.f32.mrb[47].mxu1  ;;  %3199 = vmatmul.mubr.f32.gmra.mrb[152].mxu1 %v7622_v13  ;;  %2978 = vmatprep.mubr.f32.mxu0 %v2709_v31  ;;  %v5162_v31 = vld [vmem:[%s8633_s2 + $0x6f8] sm:$0xff] }
 0x18b   : > { %3203 = vmatprep.mubr.f32.mxu1 %v2711_v24  ;;  %5527 = vmatpush1.bf16.msra.mxu0 %v5526_v33  ;;  %v5194_v49 = vld [vmem:[%s8633_s2 + $0x7f8] sm:$0xff] }
 0x18c   : > { %v1941_v12 = vpop.f32.mrb[48].mxu0  ;;  %5575 = vmatpush1.bf16.msra.mxu1 %v5574_v56  ;;  %5528 = vmatprep.subr.bf16.mxu0 %v8638_v51 }
 0x18d   : > { %v2166_v13 = vpop.f32.mrb[48].mxu1  ;;  %v1943_v25 = vpop.f32.mrb[49].mxu0  ;;  %2979 = vmatmul.mubr.f32.gmra.mrb[154].mxu0 %v2708_v27  ;;  %5576 = vmatprep.subr.bf16.mxu1 %v8638_v51 }
 0x18e   : > { %v7965_v21 = vadd.f32 %v2166_v13, %v1941_v12  ;;  %v2168_v19 = vpop.f32.mrb[49].mxu1  ;;  %3204 = vmatmul.mubr.f32.gmra.mrb[154].mxu1 %v2710_v44  ;;  %2983 = vmatprep.mubr.f32.mxu0 %v7640_v61  ;;  %v2729_v13 = vld [vmem:[#allocation2 + $0x3c8] sm:$0xff]  ;;  %v2731_v25 = vld [vmem:[#allocation2 + $0x3d8] sm:$0xff] }
 0x18f   : > { %3208 = vmatprep.mubr.f32.mxu1 %v7642_v26  ;;  %5530 = vmatpush1.bf16.msra.mxu0 %v5529_v29  ;;  %v5193_v26 = vld [vmem:[%s8633_s2 + $0x7f0] sm:$0xff]  ;;  %v2727_v29 = vld [vmem:[#allocation2 + $0x398] sm:$0xff] }
 0x190   : > { %v1946_v32 = vpop.f32.mrb[50].mxu0  ;;  %5578 = vmatpush1.bf16.msra.mxu1 %v5577_v59  ;;  %5531 = vmatprep.subr.bf16.mxu0 %v8638_v51  ;;  %v5583_v46 = vpack.c.bf16 %v5194_v49, %v5193_v26  ;;  %v2734_v26 = vld [vmem:[#allocation2 + $0x3f0] sm:$0xff]  ;;  %v2737_v49 = vld [vmem:[#allocation2 + $0x428] sm:$0xff] }
 0x191   : > { %v2171_v61 = vpop.f32.mrb[50].mxu1  ;;  %v1948_v33 = vpop.f32.mrb[51].mxu0  ;;  %2984 = vmatmul.mubr.f32.gmra.mrb[156].mxu0 %v7647_v40  ;;  %5579 = vmatprep.subr.bf16.mxu1 %v8638_v51  ;;  %v5535_v40 = vpack.c.bf16 %v5162_v31, %v5161_v15 }
 0x192   : > { %v7984_v24 = vadd.f32 %v2171_v61, %v1946_v32  ;;  %v2173_v56 = vpop.f32.mrb[51].mxu1  ;;  %3209 = vmatmul.mubr.f32.gmra.mrb[156].mxu1 %v7650_v9  ;;  %2988 = vmatprep.mubr.f32.mxu0 %v2717_v42  ;;  %v2725_v9 = vld [vmem:[#allocation2 + $0x388] sm:$0xff]  ;;  %v2732_v33 = vld [vmem:[#allocation2 + $0x3e0] sm:$0xff] }
 0x193   : > { %3213 = vmatprep.mubr.f32.mxu1 %v2719_v16  ;;  %5533 = vmatpush1.bf16.msra.mxu0 %v5532_v54  ;;  %v2730_v54 = vld [vmem:[#allocation2 + $0x3d0] sm:$0xff]  ;;  %v2733_v32 = vld [vmem:[#allocation2 + $0x3e8] sm:$0xff]  ;;  %v2735_v16 = vld [vmem:[#allocation2 + $0x3f8] sm:$0xff] }
 0x194   : > { %v1951_v63 = vpop.f32.mrb[52].mxu0  ;;  %5581 = vmatpush1.bf16.msra.mxu1 %v5580_v3  ;;  %5534 = vmatprep.subr.bf16.mxu0 %v8638_v51 }
 0x195   : > { %v2176_v38 = vpop.f32.mrb[52].mxu1  ;;  %v1953_v60 = vpop.f32.mrb[53].mxu0  ;;  %2989 = vmatmul.mubr.f32.gmra.mrb[158].mxu0 %v2716_v17  ;;  %5582 = vmatprep.subr.bf16.mxu1 %v8638_v51  ;;  %v2739_v17 = vld [vmem:[#allocation2 + $0x438] sm:$0xff] }
 0x196   : > { %v7989_v41 = vadd.f32 %v2176_v38, %v1951_v63  ;;  %v2178_v27 = vpop.f32.mrb[53].mxu1  ;;  %3214 = vmatmul.mubr.f32.gmra.mrb[158].mxu1 %v2718_v28  ;;  %2993 = vmatprep.mubr.f32.mxu0 %v7656_v52  ;;  %v2726_v52 = vld [vmem:[#allocation2 + $0x390] sm:$0xff]  ;;  %v2736_v38 = vld [vmem:[#allocation2 + $0x420] sm:$0xff] }
 0x197   : > { %3218 = vmatprep.mubr.f32.mxu1 %v7658_v58  ;;  %5536 = vmatpush1.bf16.msra.mxu0 %v5535_v40  ;;  %v2738_v60 = vld [vmem:[#allocation2 + $0x430] sm:$0xff]  ;;  %v2741_v27 = vld [vmem:[#allocation2 + $0x448] sm:$0xff] }
 0x198   : > { %v1956_v44 = vpop.f32.mrb[54].mxu0  ;;  %5584 = vmatpush1.bf16.msra.mxu1 %v5583_v46 }
 0x199   : > { %v2181_v12 = vpop.f32.mrb[54].mxu1  ;;  %v1958_v59 = vpop.f32.mrb[55].mxu0  ;;  %2994 = vmatmul.mubr.f32.gmra.mrb[160].mxu0 %v7661_v5  ;;  %v2728_v5 = vld [vmem:[#allocation2 + $0x3c0] sm:$0xff] }
 0x19a   : > { %v7994_v8 = vadd.f32 %v2181_v12, %v1956_v44  ;;  %v2183_v51 = vpop.f32.mrb[55].mxu1  ;;  %3219 = vmatmul.mubr.f32.gmra.mrb[160].mxu1 %v7664_v37  ;;  %2998 = vmatprep.mubr.f32.mxu0 %v2725_v9  ;;  %v2743_v44 = vld [vmem:[#allocation2 + $0x458] sm:$0xff] }
 0x19b   : > { %3223 = vmatprep.mubr.f32.mxu1 %v2727_v29 }
 0x19c   : > { %v1961_v58 = vpop.f32.mrb[56].mxu0 }
 0x19d   : > { %v2186_v36 = vpop.f32.mrb[56].mxu1  ;;  %v1963_v23 = vpop.f32.mrb[57].mxu0  ;;  %2999 = vmatmul.mubr.f32.gmra.mrb[162].mxu0 %v2724_v2  ;;  %v2740_v2 = vld [vmem:[#allocation2 + $0x440] sm:$0xff] }
 0x19e   : > { %v7997_v19 = vadd.f32 %v2186_v36, %v1961_v58  ;;  %v2188_v42 = vpop.f32.mrb[57].mxu1  ;;  %3224 = vmatmul.mubr.f32.gmra.mrb[162].mxu1 %v2726_v52  ;;  %3003 = vmatprep.mubr.f32.mxu0 %v2729_v13  ;;  %v2742_v52 = vld [vmem:[#allocation2 + $0x450] sm:$0xff]  ;;  %v2745_v13 = vld [vmem:[#allocation2 + $0x488] sm:$0xff] }
 0x19f   : > { %3228 = vmatprep.mubr.f32.mxu1 %v2731_v25  ;;  %v2747_v25 = vld [vmem:[#allocation2 + $0x498] sm:$0xff] }
 0x1a0   : > { %v1966_v37 = vpop.f32.mrb[58].mxu0 }
 0x1a1   : > { %v2191_v3 = vpop.f32.mrb[58].mxu1  ;;  %v1968_v15 = vpop.f32.mrb[59].mxu0  ;;  %3004 = vmatmul.mubr.f32.gmra.mrb[164].mxu0 %v2728_v5 }
 0x1a2   : > { %v7999_v31 = vadd.f32 %v2191_v3, %v1966_v37  ;;  %v2193_v61 = vpop.f32.mrb[59].mxu1  ;;  %3229 = vmatmul.mubr.f32.gmra.mrb[164].mxu1 %v2730_v54  ;;  %3008 = vmatprep.mubr.f32.mxu0 %v2733_v32  ;;  %v2744_v54 = vld [vmem:[#allocation2 + $0x480] sm:$0xff]  ;;  %v2746_v37 = vld [vmem:[#allocation2 + $0x490] sm:$0xff]  ;;  %v2751_v15 = vld [vmem:[#allocation2 + $0x4b8] sm:$0xff] }
 0x1a3   : > { %3233 = vmatprep.mubr.f32.mxu1 %v2735_v16  ;;  %v2749_v16 = vld [vmem:[#allocation2 + $0x4a8] sm:$0xff] }
 0x1a4   : > { %v1971_v56 = vpop.f32.mrb[60].mxu0 }
 0x1a5   : > { %v2196_v28 = vpop.f32.mrb[60].mxu1  ;;  %v1973_v40 = vpop.f32.mrb[61].mxu0  ;;  %3009 = vmatmul.mubr.f32.gmra.mrb[166].mxu0 %v2732_v33 }
 0x1a6   : > { %v8001_v63 = vadd.f32 %v2196_v28, %v1971_v56  ;;  %v2198_v46 = vpop.f32.mrb[61].mxu1  ;;  %3234 = vmatmul.mubr.f32.gmra.mrb[166].mxu1 %v2734_v26  ;;  %3013 = vmatprep.mubr.f32.mxu0 %v2737_v49  ;;  %v2748_v49 = vld [vmem:[#allocation2 + $0x4a0] sm:$0xff]  ;;  %v2753_v28 = vld [vmem:[#allocation2 + $0x4e8] sm:$0xff] }
 0x1a7   : > { %3238 = vmatprep.mubr.f32.mxu1 %v2739_v17  ;;  %v2750_v17 = vld [vmem:[#allocation2 + $0x4b0] sm:$0xff]  ;;  %v2755_v46 = vld [vmem:[#allocation2 + $0x4f8] sm:$0xff] }
 0x1a8   : > { %v1976_v9 = vpop.f32.mrb[62].mxu0 }
 0x1a9   : > { %v2201_v29 = vpop.f32.mrb[62].mxu1  ;;  %v1978_v12 = vpop.f32.mrb[63].mxu0  ;;  %3014 = vmatmul.mubr.f32.gmra.mrb[168].mxu0 %v2736_v38 }
 0x1aa   : > { %v8003_v59 = vadd.f32 %v2201_v29, %v1976_v9  ;;  %v2203_v51 = vpop.f32.mrb[63].mxu1  ;;  %3239 = vmatmul.mubr.f32.gmra.mrb[168].mxu1 %v2738_v60  ;;  %3018 = vmatprep.mubr.f32.mxu0 %v2741_v27  ;;  %v2752_v9 = vld [vmem:[#allocation2 + $0x4e0] sm:$0xff]  ;;  %v2754_v29 = vld [vmem:[#allocation2 + $0x4f0] sm:$0xff]  ;;  %v2757_v12 = vld [vmem:[#allocation2 + $0x508] sm:$0xff] }
 0x1ab   : > { %3243 = vmatprep.mubr.f32.mxu1 %v2743_v44 }
 0x1ac   : > { %v2271_v58 = vpop.f32.mrb[64].mxu0 }
 0x1ad   : > { %v2272_v36 = vadd.f32 %v2271_v58, %v7668_v57  ;;  %v2496_v23 = vpop.f32.mrb[64].mxu1  ;;  %v2273_v42 = vpop.f32.mrb[65].mxu0  ;;  %3019 = vmatmul.mubr.f32.gmra.mrb[170].mxu0 %v2740_v2  ;;  %v2759_v2 = vld [vmem:[#allocation2 + $0x518] sm:$0xff] }
 0x1ae   : > { %v2498_v5 = vpop.f32.mrb[65].mxu1  ;;  %3244 = vmatmul.mubr.f32.gmra.mrb[170].mxu1 %v2742_v52  ;;  %3023 = vmatprep.mubr.f32.mxu0 %v2745_v13  ;;  %v2761_v42 = vld [vmem:[#allocation2 + $0x548] sm:$0xff] }
 0x1af   : > { %v8006_v32 = vadd.f32 %v2496_v23, %v2272_v36  ;;  %3248 = vmatprep.mubr.f32.mxu1 %v2747_v25  ;;  %v2756_v25 = vld [vmem:[#allocation2 + $0x500] sm:$0xff]  ;;  %v2758_v23 = vld [vmem:[#allocation2 + $0x510] sm:$0xff] }
 0x1b0   : > { %v2276_v3 = vpop.f32.mrb[66].mxu0 }
 0x1b1   : > { %v2277_v61 = vadd.f32 %v2276_v3, %v7670_v1  ;;  %v2501_v33 = vpop.f32.mrb[66].mxu1  ;;  %v2278_v26 = vpop.f32.mrb[67].mxu0  ;;  %3024 = vmatmul.mubr.f32.gmra.mrb[172].mxu0 %v2744_v54  ;;  %v2763_v54 = vld [vmem:[#allocation2 + $0x558] sm:$0xff] }
 0x1b2   : > { %v2503_v57 = vpop.f32.mrb[67].mxu1  ;;  %3249 = vmatmul.mubr.f32.gmra.mrb[172].mxu1 %v2746_v37  ;;  %3028 = vmatprep.mubr.f32.mxu0 %v2749_v16  ;;  %v2765_v26 = vld [vmem:[#allocation2 + $0x568] sm:$0xff] }
 0x1b3   : > { %v8009_v56 = vadd.f32 %v2501_v33, %v2277_v61  ;;  %3253 = vmatprep.mubr.f32.mxu1 %v2751_v15  ;;  %v2760_v15 = vld [vmem:[#allocation2 + $0x540] sm:$0xff]  ;;  %v2762_v33 = vld [vmem:[#allocation2 + $0x550] sm:$0xff] }
 0x1b4   : > { %v2281_v40 = vpop.f32.mrb[68].mxu0 }
 0x1b5   : > { %v2282_v38 = vadd.f32 %v2281_v40, %v7672_v0  ;;  %v2506_v60 = vpop.f32.mrb[68].mxu1  ;;  %v2283_v27 = vpop.f32.mrb[69].mxu0  ;;  %3029 = vmatmul.mubr.f32.gmra.mrb[174].mxu0 %v2748_v49  ;;  %v2767_v49 = vld [vmem:[#allocation2 + $0x578] sm:$0xff] }
 0x1b6   : > { %v2508_v1 = vpop.f32.mrb[69].mxu1  ;;  %3254 = vmatmul.mubr.f32.gmra.mrb[174].mxu1 %v2750_v17  ;;  %3033 = vmatprep.mubr.f32.mxu0 %v2753_v28  ;;  %v2769_v27 = vld [vmem:[#allocation2 + $0x5a8] sm:$0xff] }
 0x1b7   : > { %v8012_v44 = vadd.f32 %v2506_v60, %v2282_v38  ;;  %3258 = vmatprep.mubr.f32.mxu1 %v2755_v46  ;;  %v2764_v46 = vld [vmem:[#allocation2 + $0x560] sm:$0xff]  ;;  %v2766_v60 = vld [vmem:[#allocation2 + $0x570] sm:$0xff] }
 0x1b8   : > { %v2286_v51 = vpop.f32.mrb[70].mxu0 }
 0x1b9   : > { %v2287_v52 = vadd.f32 %v2286_v51, %v7674_v22  ;;  %v2511_v13 = vpop.f32.mrb[70].mxu1  ;;  %v2288_v58 = vpop.f32.mrb[71].mxu0  ;;  %3034 = vmatmul.mubr.f32.gmra.mrb[176].mxu0 %v2752_v9  ;;  %v2771_v9 = vld [vmem:[#allocation2 + $0x5b8] sm:$0xff] }
 0x1ba   : > { %v2513_v0 = vpop.f32.mrb[71].mxu1  ;;  %3259 = vmatmul.mubr.f32.gmra.mrb[176].mxu1 %v2754_v29  ;;  %3038 = vmatprep.mubr.f32.mxu0 %v2757_v12  ;;  %v2773_v58 = vld [vmem:[#allocation2 + $0x5c8] sm:$0xff] }
 0x1bb   : > { %v8015_v36 = vadd.f32 %v2511_v13, %v2287_v52  ;;  %3263 = vmatprep.mubr.f32.mxu1 %v2759_v2  ;;  %v2768_v2 = vld [vmem:[#allocation2 + $0x5a0] sm:$0xff]  ;;  %v2770_v13 = vld [vmem:[#allocation2 + $0x5b0] sm:$0xff] }
 0x1bc   : > { %v2291_v5 = vpop.f32.mrb[72].mxu0 }
 0x1bd   : > { %v2292_v37 = vadd.f32 %v2291_v5, %v7676_v48  ;;  %v2516_v16 = vpop.f32.mrb[72].mxu1  ;;  %v2293_v3 = vpop.f32.mrb[73].mxu0  ;;  %3039 = vmatmul.mubr.f32.gmra.mrb[178].mxu0 %v2756_v25  ;;  %v2775_v25 = vld [vmem:[#allocation2 + $0x5d8] sm:$0xff] }
 0x1be   : > { %v2518_v22 = vpop.f32.mrb[73].mxu1  ;;  %3264 = vmatmul.mubr.f32.gmra.mrb[178].mxu1 %v2758_v23  ;;  %3043 = vmatprep.mubr.f32.mxu0 %v2761_v42  ;;  %v3332_v3 = vld [vmem:[#allocation2 + $0x68] sm:$0xfe] }
 0x1bf   : > { %v8018_v61 = vadd.f32 %v2516_v16, %v2292_v37  ;;  %3268 = vmatprep.mubr.f32.mxu1 %v2763_v54  ;;  %v2772_v54 = vld [vmem:[#allocation2 + $0x5c0] sm:$0xff]  ;;  %v2774_v37 = vld [vmem:[#allocation2 + $0x5d0] sm:$0xff]  ;;  %v3334_v22 = vld [vmem:[#allocation2 + $0x78] sm:$0xfe] }
 0x1c0   : > { %v2296_v57 = vpop.f32.mrb[74].mxu0 }
 0x1c1   : > { %v2297_v17 = vadd.f32 %v2296_v57, %v7678_v35  ;;  %v2521_v28 = vpop.f32.mrb[74].mxu1  ;;  %v2298_v40 = vpop.f32.mrb[75].mxu0  ;;  %3044 = vmatmul.mubr.f32.gmra.mrb[180].mxu0 %v2760_v15  ;;  %v713_v15 = vld [vmem:[%s7691_s14 + $0x48] sm:$0x1]  ;;  %v712_v57 = vld [vmem:[%s7691_s14 + $0x40] sm:$0x1] }
 0x1c2   : > { %v2523_v48 = vpop.f32.mrb[75].mxu1  ;;  %3269 = vmatmul.mubr.f32.gmra.mrb[180].mxu1 %v2762_v33  ;;  %3048 = vmatprep.mubr.f32.mxu0 %v2765_v26  ;;  %v8030_v26 = vld [vmem:[#allocation2 + $0x88] sm:$0xff]  ;;  %726 = vst [vmem:[#allocation2 + $0x648] sm:$0x1] %v713_v15  ;;  %v8035_v40 = vld [vmem:[#allocation2 + $0x98] sm:$0xff] }
 0x1c3   : > { %v8021_v38 = vadd.f32 %v2521_v28, %v2297_v17  ;;  %3273 = vmatprep.mubr.f32.mxu1 %v2767_v49  ;;  %v3331_v48 = vld [vmem:[#allocation2 + $0x60] sm:$0xfe]  ;;  %725 = vst [vmem:[#allocation2 + $0x640] sm:$0x1] %v712_v57  ;;  %v5690_v15 = vld [vmem:[#allocation2 + $0x628] sm:$0xff] }
 0x1c4   : > { %v2301_v1 = vpop.f32.mrb[76].mxu0 }
 0x1c5   : > { %v2302_v29 = vadd.f32 %v2301_v1, %v7680_v7  ;;  %v2526_v12 = vpop.f32.mrb[76].mxu1  ;;  %v2303_v51 = vpop.f32.mrb[77].mxu0  ;;  %3049 = vmatmul.mubr.f32.gmra.mrb[182].mxu0 %v2764_v46  ;;  %v5687_v1 = vld [vmem:[#allocation2 + $0x618] sm:$0xff] }
 0x1c6   : > { %v2528_v35 = vpop.f32.mrb[77].mxu1  ;;  %3274 = vmatmul.mubr.f32.gmra.mrb[182].mxu1 %v2766_v60  ;;  %3053 = vmatprep.mubr.f32.mxu0 %v2769_v27  ;;  %v5686_v60 = vld [vmem:[#allocation2 + $0x608] sm:$0xff]  ;;  %v8042_v51 = vld [vmem:[#allocation2 + $0x90] sm:$0xff] }
 0x1c7   : > { %v8024_v52 = vadd.f32 %v2526_v12, %v2302_v29  ;;  %3278 = vmatprep.mubr.f32.mxu1 %v2771_v9  ;;  %v3718_v9 = vrot.slane %v3332_v3, 1  ;;  %v8040_v29 = vld [vmem:[#allocation2 + $0x80] sm:$0xff]  ;;  %v3333_v12 = vld [vmem:[#allocation2 + $0x70] sm:$0xfe] }
 0x1c8   : > { %v2306_v0 = vpop.f32.mrb[78].mxu0  ;;  %v5689_v3 = vld [vmem:[#allocation2 + $0x610] sm:$0xff] }
 0x1c9   : > { %v2307_v23 = vadd.f32 %v2306_v0, %v7682_v6  ;;  %v2531_v42 = vpop.f32.mrb[78].mxu1  ;;  %v2308_v7 = vpop.f32.mrb[79].mxu0  ;;  %3054 = vmatmul.mubr.f32.gmra.mrb[184].mxu0 %v2768_v2  ;;  %v715_v6 = vld [vmem:[%s7691_s14 + $0x58] sm:$0x1]  ;;  %v3724_v2 = vrot.slane %v3334_v22, 1  ;;  %v3721_v22 = vrot.slane %v3333_v12, 1 }
 0x1ca   : > { %v2533_v5 = vpop.f32.mrb[79].mxu1  ;;  %3279 = vmatmul.mubr.f32.gmra.mrb[184].mxu1 %v2770_v13  ;;  %3058 = vmatprep.mubr.f32.mxu0 %v2773_v58  ;;  %728 = vst [vmem:[#allocation2 + $0x658] sm:$0x1] %v715_v6  ;;  %v3725_v13 = vrot.slane %v8035_v40, 1  ;;  %v3715_v58 = vrot.slane %v3331_v48, 1  ;;  %v5688_v7 = vld [vmem:[#allocation2 + $0x600] sm:$0xff] }
 0x1cb   : > { %v8027_v16 = vadd.f32 %v2531_v42, %v2307_v23  ;;  %3283 = vmatprep.mubr.f32.mxu1 %v2775_v25  ;;  %v3340_v0 = vld [vmem:[#allocation2 + $0xa8] sm:$0x1]  ;;  %v3342_v5 = vld [vmem:[#allocation2 + $0xb8] sm:$0x1]  ;;  %v3339_v6 = vld [vmem:[#allocation2 + $0xa0] sm:$0x1] }
 0x1cc   : > { %v2311_v33 = vpop.f32.mrb[80].mxu0  ;;  %v3344_v40 = vld [vmem:[#allocation2 + $0xc8] sm:$0xfe] }
 0x1cd   : > { %v2312_v49 = vadd.f32 %v2311_v33, %v7684_v20  ;;  %v2536_v17 = vpop.f32.mrb[80].mxu1  ;;  %v2313_v28 = vpop.f32.mrb[81].mxu0  ;;  %3059 = vmatmul.mubr.f32.gmra.mrb[186].mxu0 %v2772_v54  ;;  %v3719_v20 = vrot.slane %v8030_v26, 1  ;;  %v714_v54 = vld [vmem:[%s7691_s14 + $0x50] sm:$0x1]  ;;  %v3716_v33 = vrot.slane %v8040_v29, 1 }
 0x1ce   : > { %v2538_v46 = vpop.f32.mrb[81].mxu1  ;;  %3284 = vmatmul.mubr.f32.gmra.mrb[186].mxu1 %v2774_v37  ;;  %3063 = vmatprep.mubr.f32.mxu0 %v5686_v60  ;;  %v3722_v26 = vrot.slane %v8042_v51, 1  ;;  %727 = vst [vmem:[#allocation2 + $0x650] sm:$0x1] %v714_v54  ;;  %v3341_v28 = vld [vmem:[#allocation2 + $0xb0] sm:$0x1] }
 0x1cf   : > { %v8037_v27 = vadd.f32 %v2536_v17, %v2312_v49  ;;  %3288 = vmatprep.mubr.f32.mxu1 %v5687_v1  ;;  %v3720_v49 = vsel %vm1241_vm0, %v3718_v9, %v3719_v20  ;;  %v3729_v17 = vrot.slane %v3340_v0, 1  ;;  %v3726_v46 = vsel %vm1241_vm0, %v3724_v2, %v3725_v13  ;;  %v8053_v1 = vld [vmem:[#allocation2 + $0xe8] sm:$0xff]  ;;  %v3346_v29 = vld [vmem:[#allocation2 + $0xd8] sm:$0xfe]  ;;  %v5693_v0 = vld [vmem:[#allocation2 + $0x630] sm:$0xff] }
 0x1d0   : > { %v2316_v35 = vpop.f32.mrb[82].mxu0  ;;  %v3733_v60 = vrot.slane %v3342_v5, 1  ;;  %v3723_v2 = vsel %vm1241_vm0, %v3721_v22, %v3722_v26  ;;  %v3731_v5 = vrot.slane %v3341_v28, 1  ;;  %v3738_v54 = vrot.slane %v3344_v40, 1  ;;  %v3345_v28 = vld [vmem:[#allocation2 + $0xd0] sm:$0xfe] }
 0x1d1   : > { %v2317_v25 = vadd.f32 %v2316_v35, %v7697_v50  ;;  %v2541_v23 = vpop.f32.mrb[82].mxu1  ;;  %v2318_v42 = vpop.f32.mrb[83].mxu0  ;;  %3064 = vmatmul.mubr.f32.gmra.mrb[188].mxu0 %v5688_v7  ;;  %v5691_v50 = vld [vmem:[#allocation2 + $0x638] sm:$0xff]  ;;  %v3717_v7 = vsel %vm1241_vm0, %v3715_v58, %v3716_v33  ;;  %v3352_v40 = vld [vmem:[#allocation2 + $0x108] sm:$0x1] }
 0x1d2   : > { %v2543_v37 = vpop.f32.mrb[83].mxu1  ;;  %3289 = vmatmul.mubr.f32.gmra.mrb[188].mxu1 %v5689_v3  ;;  %3068 = vmatprep.mubr.f32.mxu0 %v5690_v15  ;;  %v8056_v42 = vld [vmem:[#allocation2 + $0xf8] sm:$0xff]  ;;  %v3739_v3 = vrot.slane %v8053_v1, 1  ;;  %v3744_v15 = vrot.slane %v3346_v29, 1  ;;  %v3734_v58 = vsel %vm1241_vm0, %v3725_v13, %v3733_v60  ;;  %v3732_v29 = vsel %vm1241_vm0, %v3722_v26, %v3731_v5  ;;  %v8079_v26 = vld [vmem:[#allocation2 + $0x148] sm:$0xff] }
 0x1d3   : > { %v8049_v57 = vadd.f32 %v2541_v23, %v2317_v25  ;;  %3293 = vmatprep.mubr.f32.mxu1 %v5691_v50  ;;  %v5692_v25 = vld [vmem:[#allocation2 + $0x620] sm:$0xff]  ;;  %v3727_v23 = vrot.slane %v3339_v6, 1  ;;  %v3745_v22 = vrot.slane %v8056_v42, 1 }
 0x1d4   : > { %v2321_v48 = vpop.f32.mrb[84].mxu0  ;;  %v3343_v6 = vld [vmem:[#allocation2 + $0xc0] sm:$0xfe] }
 0x1d5   : > { %v2322_v12 = vadd.f32 %v2321_v48, %v7715_v39  ;;  %v2546_v51 = vpop.f32.mrb[84].mxu1  ;;  %v2323_v35 = vpop.f32.mrb[85].mxu0  ;;  %3069 = vmatmul.mubr.f32.gmra.mrb[190].mxu0 %v5692_v25  ;;  %v3730_v39 = vsel %vm1241_vm0, %v3719_v20, %v3729_v17  ;;  %v8064_v50 = vld [vmem:[#allocation2 + $0xe0] sm:$0xff]  ;;  %v8066_v48 = vld [vmem:[#allocation2 + $0xf0] sm:$0xff]  ;;  %v3728_v20 = vsel %vm1241_vm0, %v3716_v33, %v3727_v23  ;;  %v3354_v17 = vld [vmem:[#allocation2 + $0x118] sm:$0x1] }
 0x1d6   : > { %v2548_v9 = vpop.f32.mrb[85].mxu1  ;;  %3294 = vmatmul.mubr.f32.gmra.mrb[190].mxu1 %v5693_v0  ;;  %4292 = vmatprep.mubr.f32.mxu0 %v3720_v49  ;;  %v3735_v35 = vrot.slane %v3343_v6, 1  ;;  %v3736_v13 = vrot.slane %v8064_v50, 1  ;;  %v3742_v60 = vrot.slane %v8066_v48, 1  ;;  %v3351_v25 = vld [vmem:[#allocation2 + $0x100] sm:$0x1] }
 0x1d7   : > { %v8060_v37 = vadd.f32 %v2546_v51, %v2322_v12  ;;  %4517 = vmatprep.mubr.f32.mxu1 %v3726_v46  ;;  %v3741_v9 = vrot.slane %v3345_v28, 1  ;;  %v3749_v0 = vrot.slane %v3352_v40, 1  ;;  %v3353_v33 = vld [vmem:[#allocation2 + $0x110] sm:$0x1]  ;;  %v3356_v23 = vld [vmem:[#allocation2 + $0x128] sm:$0xfe] }
 0x1d8   : > { %v2326_v49 = vpop.f32.mrb[86].mxu0  ;;  %v3747_v48 = vrot.slane %v3351_v25, 1  ;;  %v3737_v28 = vsel %vm1241_vm0, %v3735_v35, %v3736_v13  ;;  %v3751_v40 = vrot.slane %v3353_v33, 1  ;;  %v8092_v25 = vld [vmem:[#allocation2 + $0x150] sm:$0xff] }
 0x1d9   : > { %v2327_v12 = vadd.f32 %v2326_v49, %v7732_v43  ;;  %v2551_v46 = vpop.f32.mrb[86].mxu1  ;;  %v2328_v51 = vpop.f32.mrb[87].mxu0  ;;  %4293 = vmatmul.mubr.f32.vlgmr.msra.gmra.mrb[192].mxu0 %v3717_v7  ;;  %v3740_v43 = vsel %vm1241_vm0, %v3738_v54, %v3739_v3  ;;  %v3358_v49 = vld [vmem:[#allocation2 + $0x138] sm:$0xfe] }
 0x1da   : > { %v2553_v1 = vpop.f32.mrb[87].mxu1  ;;  %4518 = vmatmul.mubr.f32.vlgmr.msra.gmra.mrb[192].mxu1 %v3723_v2  ;;  %4297 = vmatprep.mubr.f32.mxu0 %v3730_v39  ;;  %v3746_v2 = vsel %vm1241_vm0, %v3744_v15, %v3745_v22  ;;  %v3753_v39 = vrot.slane %v3354_v17, 1  ;;  %v3355_v15 = vld [vmem:[#allocation2 + $0x120] sm:$0xfe]  ;;  %v3759_v17 = vrot.slane %v8079_v26, 1  ;;  %v3764_v33 = vrot.slane %v3358_v49, 1 }
 0x1db   : > { %v8075_v42 = vadd.f32 %v2551_v46, %v2327_v12  ;;  %4522 = vmatprep.mubr.f32.mxu1 %v3734_v58  ;;  %v8082_v58 = vld [vmem:[#allocation2 + $0x158] sm:$0xff]  ;;  %v3758_v12 = vrot.slane %v3356_v23, 1  ;;  %v8085_v46 = vld [vmem:[#allocation2 + $0x140] sm:$0xff]  ;;  %v3357_v1 = vld [vmem:[#allocation2 + $0x130] sm:$0xfe] }
 0x1dc   : > { %v2331_v7 = vpop.f32.mrb[88].mxu0  ;;  %v3754_v35 = vsel %vm1241_vm0, %v3745_v22, %v3753_v39  ;;  %v3765_v23 = vrot.slane %v8082_v58, 1  ;;  %v3762_v22 = vrot.slane %v8092_v25, 1 }
 0x1dd   : > { %v2332_v5 = vadd.f32 %v2331_v7, %v7749_v10  ;;  %v2556_v6 = vpop.f32.mrb[88].mxu1  ;;  %v2333_v50 = vpop.f32.mrb[89].mxu0  ;;  %4298 = vmatmul.mubr.f32.gmra.mrb[194].mxu0 %v3728_v20  ;;  %v3743_v10 = vsel %vm1241_vm0, %v3741_v9, %v3742_v60  ;;  %v3750_v20 = vsel %vm1241_vm0, %v3739_v3, %v3749_v0  ;;  %v3748_v9 = vsel %vm1241_vm0, %v3736_v13, %v3747_v48  ;;  %v3366_v0 = vld [vmem:[#allocation2 + $0x178] sm:$0x1]  ;;  %v3365_v13 = vld [vmem:[#allocation2 + $0x170] sm:$0x1] }
 0x1de   : > { %v2558_v54 = vpop.f32.mrb[89].mxu1  ;;  %4523 = vmatmul.mubr.f32.gmra.mrb[194].mxu1 %v3732_v29  ;;  %4302 = vmatprep.mubr.f32.mxu0 %v3740_v43  ;;  %v3364_v29 = vld [vmem:[#allocation2 + $0x168] sm:$0x1]  ;;  %v3756_v3 = vrot.slane %v8085_v46, 1  ;;  %v3761_v50 = vrot.slane %v3357_v1, 1  ;;  %v3760_v58 = vsel %vm1241_vm0, %v3758_v12, %v3759_v17  ;;  %v3766_v46 = vsel %vm1241_vm0, %v3764_v33, %v3765_v23  ;;  %v8111_v33 = vld [vmem:[#allocation2 + $0x1a0] sm:$0xff] }
 0x1df   : > { %v8087_v51 = vadd.f32 %v2556_v6, %v2332_v5  ;;  %4527 = vmatprep.mubr.f32.mxu1 %v3746_v2  ;;  %v3755_v6 = vrot.slane %v3355_v15, 1  ;;  %v3769_v39 = vrot.slane %v3364_v29, 1  ;;  %v3363_v54 = vld [vmem:[#allocation2 + $0x160] sm:$0x1]  ;;  %v3368_v48 = vld [vmem:[#allocation2 + $0x188] sm:$0xfe] }
 0x1e0   : > { %v2336_v43 = vpop.f32.mrb[90].mxu0  ;;  %v3370_v29 = vld [vmem:[#allocation2 + $0x198] sm:$0xfe]  ;;  %v3767_v12 = vrot.slane %v3363_v54, 1 }
 0x1e1   : > { %v2337_v7 = vadd.f32 %v2336_v43, %v7768_v62  ;;  %v2561_v5 = vpop.f32.mrb[90].mxu1  ;;  %v2338_v2 = vpop.f32.mrb[91].mxu0  ;;  %4303 = vmatmul.mubr.f32.gmra.mrb[196].mxu0 %v3737_v28  ;;  %v3752_v62 = vsel %vm1241_vm0, %v3742_v60, %v3751_v40  ;;  %v8108_v43 = vld [vmem:[#allocation2 + $0x1b8] sm:$0xff]  ;;  %v3757_v40 = vsel %vm1241_vm0, %v3755_v6, %v3756_v3  ;;  %v3784_v54 = vrot.slane %v3370_v29, 1 }
 0x1e2   : > { %v2563_v26 = vpop.f32.mrb[91].mxu1  ;;  %4528 = vmatmul.mubr.f32.gmra.mrb[196].mxu1 %v3743_v10  ;;  %4307 = vmatprep.mubr.f32.mxu0 %v3750_v20  ;;  %v3773_v10 = vrot.slane %v3366_v0, 1  ;;  %v8105_v20 = vld [vmem:[#allocation2 + $0x1a8] sm:$0xff]  ;;  %v3770_v2 = vsel %vm1241_vm0, %v3759_v17, %v3769_v39  ;;  %v3367_v0 = vld [vmem:[#allocation2 + $0x180] sm:$0xfe]  ;;  %v3776_v17 = vrot.slane %v8111_v33, 1 }
 0x1e3   : > { %v8100_v49 = vadd.f32 %v2561_v5, %v2337_v7  ;;  %4532 = vmatprep.mubr.f32.mxu1 %v3754_v35  ;;  %v3771_v35 = vrot.slane %v3365_v13, 1  ;;  %v3778_v7 = vrot.slane %v3368_v48, 1  ;;  %v3369_v26 = vld [vmem:[#allocation2 + $0x190] sm:$0xfe]  ;;  %v3785_v13 = vrot.slane %v8108_v43, 1 }
 0x1e4   : > { %v2341_v28 = vpop.f32.mrb[92].mxu0  ;;  %v3774_v6 = vsel %vm1241_vm0, %v3765_v23, %v3773_v10  ;;  %v3376_v48 = vld [vmem:[#allocation2 + $0x1c8] sm:$0x1]  ;;  %v3375_v10 = vld [vmem:[#allocation2 + $0x1c0] sm:$0x1] }
 0x1e5   : > { %v2342_v15 = vadd.f32 %v2341_v28, %v7785_v47  ;;  %v2566_v1 = vpop.f32.mrb[92].mxu1  ;;  %v2343_v25 = vpop.f32.mrb[93].mxu0  ;;  %4308 = vmatmul.mubr.f32.gmra.mrb[198].mxu0 %v3748_v9  ;;  %v3763_v47 = vsel %vm1241_vm0, %v3761_v50, %v3762_v22  ;;  %v3779_v9 = vrot.slane %v8105_v20, 1  ;;  %v3378_v50 = vld [vmem:[#allocation2 + $0x1d8] sm:$0x1]  ;;  %v3768_v20 = vsel %vm1241_vm0, %v3756_v3, %v3767_v12  ;;  %v8131_v3 = vld [vmem:[#allocation2 + $0x208] sm:$0xff] }
 0x1e6   : > { %v2568_v60 = vpop.f32.mrb[93].mxu1  ;;  %4533 = vmatmul.mubr.f32.gmra.mrb[198].mxu1 %v3752_v62  ;;  %4312 = vmatprep.mubr.f32.mxu0 %v3760_v58  ;;  %v8118_v62 = vld [vmem:[#allocation2 + $0x1b0] sm:$0xff]  ;;  %v3781_v25 = vrot.slane %v3369_v26, 1  ;;  %v3380_v33 = vld [vmem:[#allocation2 + $0x1e8] sm:$0xfe] }
 0x1e7   : > { %v8113_v5 = vadd.f32 %v2566_v1, %v2342_v15  ;;  %4537 = vmatprep.mubr.f32.mxu1 %v3766_v46  ;;  %v3775_v1 = vrot.slane %v3367_v0, 1  ;;  %v3782_v23 = vrot.slane %v8118_v62, 1  ;;  %v3780_v43 = vsel %vm1241_vm0, %v3778_v7, %v3779_v9  ;;  %v3382_v12 = vld [vmem:[#allocation2 + $0x1f8] sm:$0xfe] }
 0x1e8   : > { %v2346_v58 = vpop.f32.mrb[94].mxu0  ;;  %v3789_v60 = vrot.slane %v3376_v48, 1  ;;  %v3798_v48 = vrot.slane %v3380_v33, 1 }
 0x1e9   : > { %v2347_v28 = vadd.f32 %v2346_v58, %v7804_v14  ;;  %v2571_v46 = vpop.f32.mrb[94].mxu1  ;;  %v2348_v15 = vpop.f32.mrb[95].mxu0  ;;  %4313 = vmatmul.mubr.f32.gmra.mrb[200].mxu0 %v3757_v40  ;;  %v3772_v14 = vsel %vm1241_vm0, %v3762_v22, %v3771_v35  ;;  %v3377_v40 = vld [vmem:[#allocation2 + $0x1d0] sm:$0x1]  ;;  %v3777_v35 = vsel %vm1241_vm0, %v3775_v1, %v3776_v17  ;;  %v3783_v7 = vsel %vm1241_vm0, %v3781_v25, %v3782_v23 }
 0x1ea   : > { %v2573_v39 = vpop.f32.mrb[95].mxu1  ;;  %4538 = vmatmul.mubr.f32.gmra.mrb[200].mxu1 %v3763_v47  ;;  %4317 = vmatprep.mubr.f32.mxu0 %v3770_v2  ;;  %v3786_v47 = vsel %vm1241_vm0, %v3784_v54, %v3785_v13  ;;  %v3793_v2 = vrot.slane %v3378_v50, 1  ;;  %v3791_v54 = vrot.slane %v3377_v40, 1  ;;  %v3799_v15 = vrot.slane %v8131_v3, 1  ;;  %v3388_v40 = vld [vmem:[#allocation2 + $0x228] sm:$0x1] }
 0x1eb   : > { %v8126_v29 = vadd.f32 %v2571_v46, %v2347_v28  ;;  %4542 = vmatprep.mubr.f32.mxu1 %v3774_v6  ;;  %v3787_v6 = vrot.slane %v3375_v10, 1  ;;  %v8134_v28 = vld [vmem:[#allocation2 + $0x218] sm:$0xff]  ;;  %v3804_v50 = vrot.slane %v3382_v12, 1  ;;  %v3379_v39 = vld [vmem:[#allocation2 + $0x1e0] sm:$0xfe]  ;;  %v8144_v10 = vld [vmem:[#allocation2 + $0x210] sm:$0xff] }
 0x1ec   : > { %v2351_v58 = vpop.f32.mrb[96].mxu0  ;;  %v3794_v1 = vsel %vm1241_vm0, %v3785_v13, %v3793_v2  ;;  %v3805_v25 = vrot.slane %v8134_v28, 1  ;;  %v3792_v12 = vsel %vm1241_vm0, %v3782_v23, %v3791_v54  ;;  %v3802_v2 = vrot.slane %v8144_v10, 1  ;;  %v8157_v23 = vld [vmem:[#allocation2 + $0x268] sm:$0xff] }
 0x1ed   : > { %v2352_v0 = vadd.f32 %v2351_v58, %v7821_v34  ;;  %v2576_v26 = vpop.f32.mrb[96].mxu1  ;;  %v2353_v62 = vpop.f32.mrb[97].mxu0  ;;  %4318 = vmatmul.mubr.f32.gmra.mrb[202].mxu0 %v3768_v20  ;;  %v3790_v34 = vsel %vm1241_vm0, %v3779_v9, %v3789_v60  ;;  %v8142_v20 = vld [vmem:[#allocation2 + $0x200] sm:$0xff]  ;;  %v3788_v9 = vsel %vm1241_vm0, %v3776_v17, %v3787_v6  ;;  %v3390_v60 = vld [vmem:[#allocation2 + $0x238] sm:$0x1] }
 0x1ee   : > { %v2578_v22 = vpop.f32.mrb[97].mxu1  ;;  %4543 = vmatmul.mubr.f32.gmra.mrb[202].mxu1 %v3772_v14  ;;  %4322 = vmatprep.mubr.f32.mxu0 %v3780_v43  ;;  %v3381_v43 = vld [vmem:[#allocation2 + $0x1f0] sm:$0xfe]  ;;  %v3796_v13 = vrot.slane %v8142_v20, 1  ;;  %v3389_v17 = vld [vmem:[#allocation2 + $0x230] sm:$0x1] }
 0x1ef   : > { %v8138_v46 = vadd.f32 %v2576_v26, %v2352_v0  ;;  %4547 = vmatprep.mubr.f32.mxu1 %v3786_v47  ;;  %v3795_v0 = vrot.slane %v3379_v39, 1  ;;  %v3387_v26 = vld [vmem:[#allocation2 + $0x220] sm:$0x1]  ;;  %v3801_v28 = vrot.slane %v3381_v43, 1  ;;  %v3809_v22 = vrot.slane %v3388_v40, 1 }
 0x1f0   : > { %v2356_v14 = vpop.f32.mrb[98].mxu0  ;;  %v3392_v6 = vld [vmem:[#allocation2 + $0x248] sm:$0xfe]  ;;  %v3807_v10 = vrot.slane %v3387_v26, 1  ;;  %v3811_v40 = vrot.slane %v3389_v17, 1  ;;  %v8170_v26 = vld [vmem:[#allocation2 + $0x270] sm:$0xff] }
 0x1f1   : > { %v2357_v33 = vadd.f32 %v2356_v14, %v7840_v11  ;;  %v2581_v58 = vpop.f32.mrb[98].mxu1  ;;  %v2358_v47 = vpop.f32.mrb[99].mxu0  ;;  %4323 = vmatmul.mubr.f32.gmra.mrb[204].mxu0 %v3777_v35  ;;  %v3800_v11 = vsel %vm1241_vm0, %v3798_v48, %v3799_v15  ;;  %v3394_v14 = vld [vmem:[#allocation2 + $0x258] sm:$0xfe]  ;;  %v3797_v43 = vsel %vm1241_vm0, %v3795_v0, %v3796_v13 }
 0x1f2   : > { %v2583_v3 = vpop.f32.mrb[99].mxu1  ;;  %4548 = vmatmul.mubr.f32.gmra.mrb[204].mxu1 %v3783_v7  ;;  %4327 = vmatprep.mubr.f32.mxu0 %v3790_v34  ;;  %v3806_v7 = vsel %vm1241_vm0, %v3804_v50, %v3805_v25  ;;  %v3813_v34 = vrot.slane %v3390_v60, 1  ;;  %v3391_v50 = vld [vmem:[#allocation2 + $0x240] sm:$0xfe]  ;;  %v3819_v60 = vrot.slane %v8157_v23, 1  ;;  %v3824_v17 = vrot.slane %v3394_v14, 1 }
 0x1f3   : > { %v8153_v62 = vadd.f32 %v2581_v58, %v2357_v33  ;;  %4552 = vmatprep.mubr.f32.mxu1 %v3794_v1  ;;  %v8160_v1 = vld [vmem:[#allocation2 + $0x278] sm:$0xff]  ;;  %v3818_v33 = vrot.slane %v3392_v6, 1  ;;  %v8163_v58 = vld [vmem:[#allocation2 + $0x260] sm:$0xff]  ;;  %v3393_v3 = vld [vmem:[#allocation2 + $0x250] sm:$0xfe] }
 0x1f4   : > { %v2361_v35 = vpop.f32.mrb[100].mxu0  ;;  %v3814_v0 = vsel %vm1241_vm0, %v3805_v25, %v3813_v34  ;;  %v3825_v6 = vrot.slane %v8160_v1, 1  ;;  %v3822_v25 = vrot.slane %v8170_v26, 1 }
 0x1f5   : > { %v2362_v54 = vadd.f32 %v2361_v35, %v7857_v4  ;;  %v2586_v39 = vpop.f32.mrb[100].mxu1  ;;  %v2363_v20 = vpop.f32.mrb[101].mxu0  ;;  %4328 = vmatmul.mubr.f32.gmra.mrb[206].mxu0 %v3788_v9  ;;  %v3803_v4 = vsel %vm1241_vm0, %v3801_v28, %v3802_v2  ;;  %v3810_v9 = vsel %vm1241_vm0, %v3799_v15, %v3809_v22  ;;  %v3808_v28 = vsel %vm1241_vm0, %v3796_v13, %v3807_v10  ;;  %v3402_v22 = vld [vmem:[#allocation2 + $0x298] sm:$0x1]  ;;  %v3401_v13 = vld [vmem:[#allocation2 + $0x290] sm:$0x1] }
 0x1f6   : > { %v2588_v48 = vpop.f32.mrb[101].mxu1  ;;  %4553 = vmatmul.mubr.f32.gmra.mrb[206].mxu1 %v3792_v12  ;;  %4332 = vmatprep.mubr.f32.mxu0 %v3800_v11  ;;  %v3400_v12 = vld [vmem:[#allocation2 + $0x288] sm:$0x1]  ;;  %v3816_v15 = vrot.slane %v8163_v58, 1  ;;  %v3821_v20 = vrot.slane %v3393_v3, 1  ;;  %v3820_v1 = vsel %vm1241_vm0, %v3818_v33, %v3819_v60  ;;  %v3826_v58 = vsel %vm1241_vm0, %v3824_v17, %v3825_v6  ;;  %v8189_v17 = vld [vmem:[#allocation2 + $0x2c0] sm:$0xff] }
 0x1f7   : > { %v8165_v47 = vadd.f32 %v2586_v39, %v2362_v54  ;;  %4557 = vmatprep.mubr.f32.mxu1 %v3806_v7  ;;  %v3815_v39 = vrot.slane %v3391_v50, 1  ;;  %v3829_v34 = vrot.slane %v3400_v12, 1  ;;  %v3399_v48 = vld [vmem:[#allocation2 + $0x280] sm:$0x1]  ;;  %v3404_v10 = vld [vmem:[#allocation2 + $0x2a8] sm:$0xfe] }
 0x1f8   : > { %v2366_v11 = vpop.f32.mrb[102].mxu0  ;;  %v3406_v12 = vld [vmem:[#allocation2 + $0x2b8] sm:$0xfe]  ;;  %v3827_v33 = vrot.slane %v3399_v48, 1 }
 0x1f9   : > { %v2367_v35 = vadd.f32 %v2366_v11, %v7876_v30  ;;  %v2591_v54 = vpop.f32.mrb[102].mxu1  ;;  %v2368_v7 = vpop.f32.mrb[103].mxu0  ;;  %4333 = vmatmul.mubr.f32.gmra.mrb[208].mxu0 %v3797_v43  ;;  %v3812_v30 = vsel %vm1241_vm0, %v3802_v2, %v3811_v40  ;;  %v8186_v11 = vld [vmem:[#allocation2 + $0x2d8] sm:$0xff]  ;;  %v3817_v40 = vsel %vm1241_vm0, %v3815_v39, %v3816_v15  ;;  %v3844_v48 = vrot.slane %v3406_v12, 1 }
 0x1fa   : > { %v2593_v23 = vpop.f32.mrb[103].mxu1  ;;  %4558 = vmatmul.mubr.f32.gmra.mrb[208].mxu1 %v3803_v4  ;;  %4337 = vmatprep.mubr.f32.mxu0 %v3810_v9  ;;  %v3833_v4 = vrot.slane %v3402_v22, 1  ;;  %v8183_v9 = vld [vmem:[#allocation2 + $0x2c8] sm:$0xff]  ;;  %v3830_v7 = vsel %vm1241_vm0, %v3819_v60, %v3829_v34  ;;  %v3403_v22 = vld [vmem:[#allocation2 + $0x2a0] sm:$0xfe]  ;;  %v3836_v60 = vrot.slane %v8189_v17, 1 }
 0x1fb   : > { %v8178_v14 = vadd.f32 %v2591_v54, %v2367_v35  ;;  %4562 = vmatprep.mubr.f32.mxu1 %v3814_v0  ;;  %v3831_v0 = vrot.slane %v3401_v13, 1  ;;  %v3838_v35 = vrot.slane %v3404_v10, 1  ;;  %v3405_v23 = vld [vmem:[#allocation2 + $0x2b0] sm:$0xfe]  ;;  %v3845_v13 = vrot.slane %v8186_v11, 1 }
 0x1fc   : > { %v2371_v43 = vpop.f32.mrb[104].mxu0  ;;  %v3834_v39 = vsel %vm1241_vm0, %v3825_v6, %v3833_v4  ;;  %v3412_v10 = vld [vmem:[#allocation2 + $0x2e8] sm:$0x1]  ;;  %v3411_v4 = vld [vmem:[#allocation2 + $0x2e0] sm:$0x1] }
 0x1fd   : > { %v2372_v50 = vadd.f32 %v2371_v43, %v7893_v18  ;;  %v2596_v3 = vpop.f32.mrb[104].mxu1  ;;  %v2373_v26 = vpop.f32.mrb[105].mxu0  ;;  %4338 = vmatmul.mubr.f32.gmra.mrb[210].mxu0 %v3808_v28  ;;  %v3823_v18 = vsel %vm1241_vm0, %v3821_v20, %v3822_v25  ;;  %v3839_v28 = vrot.slane %v8183_v9, 1  ;;  %v3414_v20 = vld [vmem:[#allocation2 + $0x2f8] sm:$0x1]  ;;  %v3828_v9 = vsel %vm1241_vm0, %v3816_v15, %v3827_v33  ;;  %v8209_v15 = vld [vmem:[#allocation2 + $0x328] sm:$0xff] }
 0x1fe   : > { %v2598_v2 = vpop.f32.mrb[105].mxu1  ;;  %4563 = vmatmul.mubr.f32.gmra.mrb[210].mxu1 %v3812_v30  ;;  %4342 = vmatprep.mubr.f32.mxu0 %v3820_v1  ;;  %v8196_v30 = vld [vmem:[#allocation2 + $0x2d0] sm:$0xff]  ;;  %v3841_v26 = vrot.slane %v3405_v23, 1  ;;  %v3416_v17 = vld [vmem:[#allocation2 + $0x308] sm:$0xfe] }
 0x1ff   : > { %v8191_v54 = vadd.f32 %v2596_v3, %v2372_v50  ;;  %4567 = vmatprep.mubr.f32.mxu1 %v3826_v58  ;;  %v3835_v3 = vrot.slane %v3403_v22, 1  ;;  %v3842_v6 = vrot.slane %v8196_v30, 1  ;;  %v3840_v11 = vsel %vm1241_vm0, %v3838_v35, %v3839_v28  ;;  %v3418_v33 = vld [vmem:[#allocation2 + $0x318] sm:$0xfe] }
 0x200   : > { %v2376_v1 = vpop.f32.mrb[106].mxu0  ;;  %v3849_v2 = vrot.slane %v3412_v10, 1  ;;  %v3858_v10 = vrot.slane %v3416_v17, 1 }
 0x201   : > { %v2377_v43 = vadd.f32 %v2376_v1, %v7912_v55  ;;  %v2601_v58 = vpop.f32.mrb[106].mxu1  ;;  %v2378_v50 = vpop.f32.mrb[107].mxu0  ;;  %4343 = vmatmul.mubr.f32.gmra.mrb[212].mxu0 %v3817_v40  ;;  %v3832_v55 = vsel %vm1241_vm0, %v3822_v25, %v3831_v0  ;;  %v3413_v40 = vld [vmem:[#allocation2 + $0x2f0] sm:$0x1]  ;;  %v3837_v0 = vsel %vm1241_vm0, %v3835_v3, %v3836_v60  ;;  %v3843_v35 = vsel %vm1241_vm0, %v3841_v26, %v3842_v6 }
 0x202   : > { %v2603_v34 = vpop.f32.mrb[107].mxu1  ;;  %4568 = vmatmul.mubr.f32.gmra.mrb[212].mxu1 %v3823_v18  ;;  %4347 = vmatprep.mubr.f32.mxu0 %v3830_v7  ;;  %v3846_v18 = vsel %vm1241_vm0, %v3844_v48, %v3845_v13  ;;  %v3853_v7 = vrot.slane %v3414_v20, 1  ;;  %v3851_v48 = vrot.slane %v3413_v40, 1  ;;  %v3859_v50 = vrot.slane %v8209_v15, 1  ;;  %v3424_v40 = vld [vmem:[#allocation2 + $0x348] sm:$0x1] }
 0x203   : > { %v8204_v12 = vadd.f32 %v2601_v58, %v2377_v43  ;;  %4572 = vmatprep.mubr.f32.mxu1 %v3834_v39  ;;  %v3847_v39 = vrot.slane %v3411_v4, 1  ;;  %v8212_v43 = vld [vmem:[#allocation2 + $0x338] sm:$0xff]  ;;  %v3864_v20 = vrot.slane %v3418_v33, 1  ;;  %v3415_v34 = vld [vmem:[#allocation2 + $0x300] sm:$0xfe]  ;;  %v8222_v4 = vld [vmem:[#allocation2 + $0x330] sm:$0xff] }
 0x204   : > { %v2381_v1 = vpop.f32.mrb[108].mxu0  ;;  %v3854_v3 = vsel %vm1241_vm0, %v3845_v13, %v3853_v7  ;;  %v3865_v26 = vrot.slane %v8212_v43, 1  ;;  %v3852_v33 = vsel %vm1241_vm0, %v3842_v6, %v3851_v48  ;;  %v3862_v7 = vrot.slane %v8222_v4, 1  ;;  %v8235_v6 = vld [vmem:[#allocation2 + $0x388] sm:$0xff] }
 0x205   : > { %v2382_v22 = vadd.f32 %v2381_v1, %v7929_v53  ;;  %v2606_v23 = vpop.f32.mrb[108].mxu1  ;;  %v2383_v30 = vpop.f32.mrb[109].mxu0  ;;  %4348 = vmatmul.mubr.f32.gmra.mrb[214].mxu0 %v3828_v9  ;;  %v3850_v53 = vsel %vm1241_vm0, %v3839_v28, %v3849_v2  ;;  %v8220_v9 = vld [vmem:[#allocation2 + $0x320] sm:$0xff]  ;;  %v3848_v28 = vsel %vm1241_vm0, %v3836_v60, %v3847_v39  ;;  %v3426_v2 = vld [vmem:[#allocation2 + $0x358] sm:$0x1] }
 0x206   : > { %v2608_v25 = vpop.f32.mrb[109].mxu1  ;;  %4573 = vmatmul.mubr.f32.gmra.mrb[214].mxu1 %v3832_v55  ;;  %4352 = vmatprep.mubr.f32.mxu0 %v3840_v11  ;;  %v3417_v11 = vld [vmem:[#allocation2 + $0x310] sm:$0xfe]  ;;  %v3856_v13 = vrot.slane %v8220_v9, 1  ;;  %v3425_v60 = vld [vmem:[#allocation2 + $0x350] sm:$0x1] }
 0x207   : > { %v8216_v58 = vadd.f32 %v2606_v23, %v2382_v22  ;;  %4577 = vmatprep.mubr.f32.mxu1 %v3846_v18  ;;  %v3855_v22 = vrot.slane %v3415_v34, 1  ;;  %v3423_v23 = vld [vmem:[#allocation2 + $0x340] sm:$0x1]  ;;  %v3861_v43 = vrot.slane %v3417_v11, 1  ;;  %v3869_v25 = vrot.slane %v3424_v40, 1 }
 0x208   : > { %v2386_v55 = vpop.f32.mrb[110].mxu0  ;;  %v3428_v39 = vld [vmem:[#allocation2 + $0x368] sm:$0xfe]  ;;  %v3867_v4 = vrot.slane %v3423_v23, 1  ;;  %v3871_v40 = vrot.slane %v3425_v60, 1  ;;  %v8248_v23 = vld [vmem:[#allocation2 + $0x390] sm:$0xff] }
 0x209   : > { %v2387_v17 = vadd.f32 %v2386_v55, %v7948_v45  ;;  %v2611_v1 = vpop.f32.mrb[110].mxu1  ;;  %v2388_v18 = vpop.f32.mrb[111].mxu0  ;;  %4353 = vmatmul.mubr.f32.gmra.mrb[216].mxu0 %v3837_v0  ;;  %v3860_v45 = vsel %vm1241_vm0, %v3858_v10, %v3859_v50  ;;  %v3430_v55 = vld [vmem:[#allocation2 + $0x378] sm:$0xfe]  ;;  %v3857_v11 = vsel %vm1241_vm0, %v3855_v22, %v3856_v13 }
 0x20a   : > { %v2613_v15 = vpop.f32.mrb[111].mxu1  ;;  %4578 = vmatmul.mubr.f32.gmra.mrb[216].mxu1 %v3843_v35  ;;  %4357 = vmatprep.mubr.f32.mxu0 %v3850_v53  ;;  %v3866_v35 = vsel %vm1241_vm0, %v3864_v20, %v3865_v26  ;;  %v3873_v53 = vrot.slane %v3426_v2, 1  ;;  %v3427_v20 = vld [vmem:[#allocation2 + $0x360] sm:$0xfe]  ;;  %v3879_v2 = vrot.slane %v8235_v6, 1  ;;  %v3884_v60 = vrot.slane %v3430_v55, 1 }
 0x20b   : > { %v8231_v30 = vadd.f32 %v2611_v1, %v2387_v17  ;;  %4582 = vmatprep.mubr.f32.mxu1 %v3854_v3  ;;  %v8238_v3 = vld [vmem:[#allocation2 + $0x398] sm:$0xff]  ;;  %v3878_v17 = vrot.slane %v3428_v39, 1  ;;  %v8241_v1 = vld [vmem:[#allocation2 + $0x380] sm:$0xff]  ;;  %v3429_v15 = vld [vmem:[#allocation2 + $0x370] sm:$0xfe] }
 0x20c   : > { %v2391_v0 = vpop.f32.mrb[112].mxu0  ;;  %v3874_v22 = vsel %vm1241_vm0, %v3865_v26, %v3873_v53  ;;  %v3885_v39 = vrot.slane %v8238_v3, 1  ;;  %v3882_v26 = vrot.slane %v8248_v23, 1 }
 0x20d   : > { %v2392_v48 = vadd.f32 %v2391_v0, %v7965_v21  ;;  %v2616_v34 = vpop.f32.mrb[112].mxu1  ;;  %v2393_v9 = vpop.f32.mrb[113].mxu0  ;;  %4358 = vmatmul.mubr.f32.gmra.mrb[218].mxu0 %v3848_v28  ;;  %v3863_v21 = vsel %vm1241_vm0, %v3861_v43, %v3862_v7  ;;  %v3870_v28 = vsel %vm1241_vm0, %v3859_v50, %v3869_v25  ;;  %v3868_v43 = vsel %vm1241_vm0, %v3856_v13, %v3867_v4  ;;  %v3438_v25 = vld [vmem:[#allocation2 + $0x3b8] sm:$0x1]  ;;  %v3437_v13 = vld [vmem:[#allocation2 + $0x3b0] sm:$0x1] }
 0x20e   : > { %v2618_v10 = vpop.f32.mrb[113].mxu1  ;;  %4583 = vmatmul.mubr.f32.gmra.mrb[218].mxu1 %v3852_v33  ;;  %4362 = vmatprep.mubr.f32.mxu0 %v3860_v45  ;;  %v3436_v33 = vld [vmem:[#allocation2 + $0x3a8] sm:$0x1]  ;;  %v3876_v50 = vrot.slane %v8241_v1, 1  ;;  %v3881_v9 = vrot.slane %v3429_v15, 1  ;;  %v3880_v3 = vsel %vm1241_vm0, %v3878_v17, %v3879_v2  ;;  %v3886_v1 = vsel %vm1241_vm0, %v3884_v60, %v3885_v39  ;;  %v8267_v60 = vld [vmem:[#allocation2 + $0x3e0] sm:$0xff] }
 0x20f   : > { %v8243_v18 = vadd.f32 %v2616_v34, %v2392_v48  ;;  %4587 = vmatprep.mubr.f32.mxu1 %v3866_v35  ;;  %v3875_v34 = vrot.slane %v3427_v20, 1  ;;  %v3889_v53 = vrot.slane %v3436_v33, 1  ;;  %v3435_v10 = vld [vmem:[#allocation2 + $0x3a0] sm:$0x1]  ;;  %v3440_v4 = vld [vmem:[#allocation2 + $0x3c8] sm:$0xfe] }
 0x210   : > { %v2396_v45 = vpop.f32.mrb[114].mxu0  ;;  %v3442_v33 = vld [vmem:[#allocation2 + $0x3d8] sm:$0xfe]  ;;  %v3887_v17 = vrot.slane %v3435_v10, 1 }
 0x211   : > { %v2397_v0 = vadd.f32 %v2396_v45, %v7984_v24  ;;  %v2621_v48 = vpop.f32.mrb[114].mxu1  ;;  %v2398_v35 = vpop.f32.mrb[115].mxu0  ;;  %4363 = vmatmul.mubr.f32.gmra.mrb[220].mxu0 %v3857_v11  ;;  %v3872_v24 = vsel %vm1241_vm0, %v3862_v7, %v3871_v40  ;;  %v8264_v45 = vld [vmem:[#allocation2 + $0x3f8] sm:$0xff]  ;;  %v3877_v40 = vsel %vm1241_vm0, %v3875_v34, %v3876_v50  ;;  %v3904_v10 = vrot.slane %v3442_v33, 1 }
 0x212   : > { %v2623_v6 = vpop.f32.mrb[115].mxu1  ;;  %4588 = vmatmul.mubr.f32.gmra.mrb[220].mxu1 %v3863_v21  ;;  %4367 = vmatprep.mubr.f32.mxu0 %v3870_v28  ;;  %v3893_v21 = vrot.slane %v3438_v25, 1  ;;  %v8261_v28 = vld [vmem:[#allocation2 + $0x3e8] sm:$0xff]  ;;  %v3890_v35 = vsel %vm1241_vm0, %v3879_v2, %v3889_v53  ;;  %v3439_v25 = vld [vmem:[#allocation2 + $0x3c0] sm:$0xfe]  ;;  %v3896_v2 = vrot.slane %v8267_v60, 1 }
 0x213   : > { %v8256_v55 = vadd.f32 %v2621_v48, %v2397_v0  ;;  %4592 = vmatprep.mubr.f32.mxu1 %v3874_v22  ;;  %v3891_v22 = vrot.slane %v3437_v13, 1  ;;  %v3898_v0 = vrot.slane %v3440_v4, 1  ;;  %v3441_v6 = vld [vmem:[#allocation2 + $0x3d0] sm:$0xfe]  ;;  %v3905_v13 = vrot.slane %v8264_v45, 1 }
 0x214   : > { %v2401_v11 = vpop.f32.mrb[116].mxu0  ;;  %v3894_v34 = vsel %vm1241_vm0, %v3885_v39, %v3893_v21  ;;  %v3448_v4 = vld [vmem:[#allocation2 + $0x408] sm:$0x1]  ;;  %v3447_v21 = vld [vmem:[#allocation2 + $0x400] sm:$0x1] }
 0x215   : > { %v2402_v20 = vadd.f32 %v2401_v11, %v7989_v41  ;;  %v2626_v15 = vpop.f32.mrb[116].mxu1  ;;  %v2403_v23 = vpop.f32.mrb[117].mxu0  ;;  %4368 = vmatmul.mubr.f32.gmra.mrb[222].mxu0 %v3868_v43  ;;  %v3883_v41 = vsel %vm1241_vm0, %v3881_v9, %v3882_v26  ;;  %v3899_v43 = vrot.slane %v8261_v28, 1  ;;  %v3450_v9 = vld [vmem:[#allocation2 + $0x418] sm:$0x1]  ;;  %v3888_v28 = vsel %vm1241_vm0, %v3876_v50, %v3887_v17  ;;  %v8287_v50 = vld [vmem:[#allocation2 + $0x448] sm:$0xff] }
 0x216   : > { %v2628_v7 = vpop.f32.mrb[117].mxu1  ;;  %4593 = vmatmul.mubr.f32.gmra.mrb[222].mxu1 %v3872_v24  ;;  %4372 = vmatprep.mubr.f32.mxu0 %v3880_v3  ;;  %v8274_v24 = vld [vmem:[#allocation2 + $0x3f0] sm:$0xff]  ;;  %v3901_v23 = vrot.slane %v3441_v6, 1  ;;  %v3452_v60 = vld [vmem:[#allocation2 + $0x428] sm:$0xfe] }
 0x217   : > { %v8269_v48 = vadd.f32 %v2626_v15, %v2402_v20  ;;  %4597 = vmatprep.mubr.f32.mxu1 %v3886_v1  ;;  %v3895_v15 = vrot.slane %v3439_v25, 1  ;;  %v3902_v39 = vrot.slane %v8274_v24, 1  ;;  %v3900_v45 = vsel %vm1241_vm0, %v3898_v0, %v3899_v43  ;;  %v3454_v17 = vld [vmem:[#allocation2 + $0x438] sm:$0xfe] }
 0x218   : > { %v2406_v3 = vpop.f32.mrb[118].mxu0  ;;  %v3909_v7 = vrot.slane %v3448_v4, 1  ;;  %v3918_v4 = vrot.slane %v3452_v60, 1 }
 0x219   : > { %v2407_v11 = vadd.f32 %v2406_v3, %v7994_v8  ;;  %v2631_v1 = vpop.f32.mrb[118].mxu1  ;;  %v2408_v20 = vpop.f32.mrb[119].mxu0  ;;  %4373 = vmatmul.mubr.f32.gmra.mrb[224].mxu0 %v3877_v40  ;;  %v3892_v8 = vsel %vm1241_vm0, %v3882_v26, %v3891_v22  ;;  %v3449_v40 = vld [vmem:[#allocation2 + $0x410] sm:$0x1]  ;;  %v3897_v22 = vsel %vm1241_vm0, %v3895_v15, %v3896_v2  ;;  %v3903_v0 = vsel %vm1241_vm0, %v3901_v23, %v3902_v39 }
 0x21a   : > { %v2633_v53 = vpop.f32.mrb[119].mxu1  ;;  %4598 = vmatmul.mubr.f32.gmra.mrb[224].mxu1 %v3883_v41  ;;  %4377 = vmatprep.mubr.f32.mxu0 %v3890_v35  ;;  %v3906_v41 = vsel %vm1241_vm0, %v3904_v10, %v3905_v13  ;;  %v3913_v35 = vrot.slane %v3450_v9, 1  ;;  %v3911_v10 = vrot.slane %v3449_v40, 1  ;;  %v3919_v20 = vrot.slane %v8287_v50, 1  ;;  %v3460_v40 = vld [vmem:[#allocation2 + $0x468] sm:$0x1] }
 0x21b   : > { %v8282_v33 = vadd.f32 %v2631_v1, %v2407_v11  ;;  %4602 = vmatprep.mubr.f32.mxu1 %v3894_v34  ;;  %v3907_v34 = vrot.slane %v3447_v21, 1  ;;  %v8290_v11 = vld [vmem:[#allocation2 + $0x458] sm:$0xff]  ;;  %v3924_v9 = vrot.slane %v3454_v17, 1  ;;  %v3451_v53 = vld [vmem:[#allocation2 + $0x420] sm:$0xfe]  ;;  %v8300_v21 = vld [vmem:[#allocation2 + $0x450] sm:$0xff] }
 0x21c   : > { %v2411_v3 = vpop.f32.mrb[120].mxu0  ;;  %v3914_v15 = vsel %vm1241_vm0, %v3905_v13, %v3913_v35  ;;  %v3925_v23 = vrot.slane %v8290_v11, 1  ;;  %v3912_v17 = vsel %vm1241_vm0, %v3902_v39, %v3911_v10  ;;  %v3922_v35 = vrot.slane %v8300_v21, 1  ;;  %v8313_v39 = vld [vmem:[#allocation2 + $0x4a8] sm:$0xff] }
 0x21d   : > { %v2412_v25 = vadd.f32 %v2411_v3, %v7997_v19  ;;  %v2636_v6 = vpop.f32.mrb[120].mxu1  ;;  %v2413_v24 = vpop.f32.mrb[121].mxu0  ;;  %4378 = vmatmul.mubr.f32.gmra.mrb[226].mxu0 %v3888_v28  ;;  %v3910_v19 = vsel %vm1241_vm0, %v3899_v43, %v3909_v7  ;;  %v8298_v28 = vld [vmem:[#allocation2 + $0x440] sm:$0xff]  ;;  %v3908_v43 = vsel %vm1241_vm0, %v3896_v2, %v3907_v34  ;;  %v3462_v7 = vld [vmem:[#allocation2 + $0x478] sm:$0x1] }
 0x21e   : > { %v2638_v26 = vpop.f32.mrb[121].mxu1  ;;  %4603 = vmatmul.mubr.f32.gmra.mrb[226].mxu1 %v3892_v8  ;;  %4382 = vmatprep.mubr.f32.mxu0 %v3900_v45  ;;  %v3453_v45 = vld [vmem:[#allocation2 + $0x430] sm:$0xfe]  ;;  %v3916_v13 = vrot.slane %v8298_v28, 1  ;;  %v3461_v2 = vld [vmem:[#allocation2 + $0x470] sm:$0x1] }
 0x21f   : > { %v8294_v1 = vadd.f32 %v2636_v6, %v2412_v25  ;;  %4607 = vmatprep.mubr.f32.mxu1 %v3906_v41  ;;  %v3915_v25 = vrot.slane %v3451_v53, 1  ;;  %v3459_v6 = vld [vmem:[#allocation2 + $0x460] sm:$0x1]  ;;  %v3921_v11 = vrot.slane %v3453_v45, 1  ;;  %v3929_v26 = vrot.slane %v3460_v40, 1 }
 0x220   : > { %v2416_v8 = vpop.f32.mrb[122].mxu0  ;;  %v3464_v34 = vld [vmem:[#allocation2 + $0x488] sm:$0xfe]  ;;  %v3927_v21 = vrot.slane %v3459_v6, 1  ;;  %v3931_v40 = vrot.slane %v3461_v2, 1  ;;  %v8328_v2 = vld [vmem:[#allocation2 + $0x4b0] sm:$0xff] }
 0x221   : > { %v2417_v60 = vadd.f32 %v2416_v8, %v7999_v31  ;;  %v2641_v3 = vpop.f32.mrb[122].mxu1  ;;  %v2418_v41 = vpop.f32.mrb[123].mxu0  ;;  %4383 = vmatmul.mubr.f32.gmra.mrb[228].mxu0 %v3897_v22  ;;  %v3920_v31 = vsel %vm1241_vm0, %v3918_v4, %v3919_v20  ;;  %v3466_v8 = vld [vmem:[#allocation2 + $0x498] sm:$0xfe]  ;;  %v3917_v45 = vsel %vm1241_vm0, %v3915_v25, %v3916_v13 }
 0x222   : > { %v2643_v50 = vpop.f32.mrb[123].mxu1  ;;  %4608 = vmatmul.mubr.f32.gmra.mrb[228].mxu1 %v3903_v0  ;;  %4387 = vmatprep.mubr.f32.mxu0 %v3910_v19  ;;  %v3926_v0 = vsel %vm1241_vm0, %v3924_v9, %v3925_v23  ;;  %v3933_v19 = vrot.slane %v3462_v7, 1  ;;  %v3939_v41 = vrot.slane %v8313_v39, 1  ;;  %v8324_v7 = vld [vmem:[#allocation2 + $0x4a0] sm:$0xff] }
 0x223   : > { %v8309_v24 = vadd.f32 %v2641_v3, %v2417_v60  ;;  %4612 = vmatprep.mubr.f32.mxu1 %v3914_v15  ;;  %v8316_v15 = vld [vmem:[#allocation2 + $0x4b8] sm:$0xff]  ;;  %v3938_v60 = vrot.slane %v3464_v34, 1  ;;  %v3923_v3 = vsel %vm1241_vm0, %v3921_v11, %v3922_v35  ;;  %v3465_v50 = vld [vmem:[#allocation2 + $0x490] sm:$0xfe]  ;;  %v3472_v34 = vld [vmem:[#allocation2 + $0x4c8] sm:$0x1] }
 0x224   : > { %v2421_v22 = vpop.f32.mrb[124].mxu0  ;;  %v3945_v25 = vrot.slane %v8316_v15, 1  ;;  %v3942_v15 = vrot.slane %v8328_v2, 1 }
 0x225   : > { %v2422_v10 = vadd.f32 %v2421_v22, %v8001_v63  ;;  %v2646_v53 = vpop.f32.mrb[124].mxu1  ;;  %v2423_v28 = vpop.f32.mrb[125].mxu0  ;;  %4388 = vmatmul.mubr.f32.gmra.mrb[230].mxu0 %v3908_v43  ;;  %v3930_v63 = vsel %vm1241_vm0, %v3919_v20, %v3929_v26  ;;  %v3463_v43 = vld [vmem:[#allocation2 + $0x480] sm:$0xfe]  ;;  %v3928_v20 = vsel %vm1241_vm0, %v3916_v13, %v3927_v21  ;;  %v3474_v26 = vld [vmem:[#allocation2 + $0x4d8] sm:$0x1] }
 0x226   : > { %v2648_v4 = vpop.f32.mrb[125].mxu1  ;;  %4613 = vmatmul.mubr.f32.gmra.mrb[230].mxu1 %v3912_v17  ;;  %4392 = vmatprep.mubr.f32.mxu0 %v3920_v31  ;;  %v3934_v17 = vsel %vm1241_vm0, %v3925_v23, %v3933_v19  ;;  %v3944_v31 = vrot.slane %v3466_v8, 1  ;;  %v3935_v23 = vrot.slane %v3463_v43, 1  ;;  %v3936_v19 = vrot.slane %v8324_v7, 1  ;;  %v3471_v28 = vld [vmem:[#allocation2 + $0x4c0] sm:$0x1] }
 0x227   : > { %v8319_v9 = vadd.f32 %v2646_v53, %v2422_v10  ;;  %4617 = vmatprep.mubr.f32.mxu1 %v3926_v0  ;;  %v3932_v10 = vsel %vm1241_vm0, %v3922_v35, %v3931_v40  ;;  %v3941_v53 = vrot.slane %v3465_v50, 1  ;;  %v3949_v4 = vrot.slane %v3472_v34, 1  ;;  %v3473_v13 = vld [vmem:[#allocation2 + $0x4d0] sm:$0x1]  ;;  %v3476_v21 = vld [vmem:[#allocation2 + $0x4e8] sm:$0xfe] }
 0x228   : > { %v2426_v6 = vpop.f32.mrb[126].mxu0  ;;  %v8339_v35 = vld [vmem:[#allocation2 + $0x508] sm:$0xff]  ;;  %v3947_v7 = vrot.slane %v3471_v28, 1  ;;  %v3478_v50 = vld [vmem:[#allocation2 + $0x4f8] sm:$0xfe]  ;;  %v3937_v2 = vsel %vm1241_vm0, %v3935_v23, %v3936_v19  ;;  %v3951_v34 = vrot.slane %v3473_v13, 1 }
 0x229   : > { %v2427_v22 = vadd.f32 %v2426_v6, %v8003_v59  ;;  %v2651_v11 = vpop.f32.mrb[126].mxu1  ;;  %v2428_v0 = vpop.f32.mrb[127].mxu0  ;;  %4393 = vmatmul.mubr.f32.gmra.mrb[232].mxu0 %v3917_v45  ;;  %v3940_v59 = vsel %vm1241_vm0, %v3938_v60, %v3939_v41  ;;  %v8341_v6 = vld [vmem:[#allocation2 + $0x518] sm:$0xff]  ;;  %v3964_v23 = vrot.slane %v3478_v50, 1 }
 0x22a   : > { %v2653_v39 = vpop.f32.mrb[127].mxu1  ;;  %4618 = vmatmul.mubr.f32.gmra.mrb[232].mxu1 %v3923_v3  ;;  %4397 = vmatprep.mubr.f32.mxu0 %v3930_v63  ;;  %v3946_v3 = vsel %vm1241_vm0, %v3944_v31, %v3945_v25  ;;  %v3953_v63 = vrot.slane %v3474_v26, 1  ;;  %v3943_v31 = vsel %vm1241_vm0, %v3941_v53, %v3942_v15  ;;  %v3959_v0 = vrot.slane %v8339_v35, 1  ;;  %v8347_v26 = vld [vmem:[#allocation2 + $0x500] sm:$0xff]  ;;  %v3484_v53 = vld [vmem:[#allocation2 + $0x528] sm:$0x1] }
 0x22b   : > { %v8334_v8 = vadd.f32 %v2651_v11, %v2427_v22  ;;  %4622 = vmatprep.mubr.f32.mxu1 %v3934_v17  ;;  %v3958_v22 = vrot.slane %v3476_v21, 1  ;;  %v3950_v11 = vsel %vm1241_vm0, %v3939_v41, %v3949_v4  ;;  %v3477_v39 = vld [vmem:[#allocation2 + $0x4f0] sm:$0xfe]  ;;  %v3965_v13 = vrot.slane %v8341_v6, 1 }
 0x22c   : > { %v2915_v45 = vpop.f32.mrb[128].mxu0  ;;  %v8354_v21 = vld [vmem:[#allocation2 + $0x510] sm:$0xff]  ;;  %v3948_v4 = vsel %vm1241_vm0, %v3936_v19, %v3947_v7  ;;  %v3952_v50 = vsel %vm1241_vm0, %v3942_v15, %v3951_v34  ;;  %v3488_v19 = vld [vmem:[#allocation2 + $0x548] sm:$0xfe] }
 0x22d   : > { %v3140_v40 = vpop.f32.mrb[128].mxu1  ;;  %v2917_v43 = vpop.f32.mrb[129].mxu0  ;;  %4398 = vmatmul.mubr.f32.gmra.mrb[234].mxu0 %v3928_v20  ;;  %v3475_v20 = vld [vmem:[#allocation2 + $0x4e0] sm:$0xfe]  ;;  %v3960_v6 = vsel %vm1241_vm0, %v3958_v22, %v3959_v0  ;;  %v3490_v22 = vld [vmem:[#allocation2 + $0x558] sm:$0xfe] }
 0x22e   : > { %v3141_v17 = vadd.f32 %v3140_v40, %v2915_v45  ;;  %v3142_v60 = vpop.f32.mrb[129].mxu1  ;;  %4623 = vmatmul.mubr.f32.gmra.mrb[234].mxu1 %v3932_v10  ;;  %4402 = vmatprep.mubr.f32.mxu0 %v3940_v59  ;;  %v3954_v59 = vsel %vm1241_vm0, %v3945_v25, %v3953_v63  ;;  %v3956_v43 = vrot.slane %v8347_v26, 1  ;;  %v3961_v25 = vrot.slane %v3477_v39, 1  ;;  %v3483_v63 = vld [vmem:[#allocation2 + $0x520] sm:$0x1]  ;;  %v8365_v26 = vld [vmem:[#allocation2 + $0x568] sm:$0xff] }
 0x22f   : > { %4627 = vmatprep.mubr.f32.mxu1 %v3946_v3  ;;  %v3486_v3 = vld [vmem:[#allocation2 + $0x538] sm:$0x1]  ;;  %v3969_v60 = vrot.slane %v3484_v53, 1  ;;  %v3967_v34 = vrot.slane %v3483_v63, 1  ;;  %v3489_v63 = vld [vmem:[#allocation2 + $0x550] sm:$0xfe] }
 0x230   : > { %v8350_v28 = vadd.f32 %v3141_v17, %v8006_v32  ;;  %v2920_v10 = vpop.f32.mrb[130].mxu0  ;;  %v3955_v32 = vrot.slane %v3475_v20, 1  ;;  %v3962_v17 = vrot.slane %v8354_v21, 1  ;;  %v3973_v20 = vrot.slane %v3486_v3, 1  ;;  %v8367_v39 = vld [vmem:[#allocation2 + $0x578] sm:$0xff] }
 0x231   : > { %v3145_v45 = vpop.f32.mrb[130].mxu1  ;;  %v2922_v41 = vpop.f32.mrb[131].mxu0  ;;  %4403 = vmatmul.mubr.f32.gmra.mrb[236].mxu0 %v3937_v2  ;;  %v3485_v2 = vld [vmem:[#allocation2 + $0x530] sm:$0x1]  ;;  %v3970_v3 = vsel %vm1241_vm0, %v3959_v0, %v3969_v60  ;;  %v3968_v60 = vsel %vm1241_vm0, %v3956_v43, %v3967_v34 }
 0x232   : > { %v3146_v35 = vadd.f32 %v3145_v45, %v2920_v10  ;;  %v3147_v40 = vpop.f32.mrb[131].mxu1  ;;  %4628 = vmatmul.mubr.f32.gmra.mrb[236].mxu1 %v3943_v31  ;;  %4407 = vmatprep.mubr.f32.mxu0 %v3950_v11  ;;  %v3966_v11 = vsel %vm1241_vm0, %v3964_v23, %v3965_v13  ;;  %v3971_v53 = vrot.slane %v3485_v2, 1  ;;  %v3978_v45 = vrot.slane %v3488_v19, 1  ;;  %v3487_v41 = vld [vmem:[#allocation2 + $0x540] sm:$0xfe] }
 0x233   : > { %4632 = vmatprep.mubr.f32.mxu1 %v3954_v59  ;;  %v3963_v23 = vsel %vm1241_vm0, %v3961_v25, %v3962_v17  ;;  %v8374_v40 = vld [vmem:[#allocation2 + $0x560] sm:$0xff]  ;;  %v3984_v2 = vrot.slane %v3490_v22, 1  ;;  %v3496_v19 = vld [vmem:[#allocation2 + $0x588] sm:$0x1]  ;;  %v3498_v25 = vld [vmem:[#allocation2 + $0x598] sm:$0x1] }
 0x234   : > { %v8362_v7 = vadd.f32 %v3146_v35, %v8009_v56  ;;  %v2925_v31 = vpop.f32.mrb[132].mxu0  ;;  %v3957_v56 = vsel %vm1241_vm0, %v3955_v32, %v3956_v43  ;;  %v3979_v35 = vrot.slane %v8365_v26, 1  ;;  %v3975_v26 = vrot.slane %v3487_v41, 1 }
 0x235   : > { %v3150_v10 = vpop.f32.mrb[132].mxu1  ;;  %v2927_v15 = vpop.f32.mrb[133].mxu0  ;;  %4408 = vmatmul.mubr.f32.gmra.mrb[238].mxu0 %v3948_v4  ;;  %v3985_v4 = vrot.slane %v8367_v39, 1  ;;  %v3989_v22 = vrot.slane %v3496_v19, 1 }
 0x236   : > { %v3151_v59 = vadd.f32 %v3150_v10, %v2925_v31  ;;  %v3152_v21 = vpop.f32.mrb[133].mxu1  ;;  %4633 = vmatmul.mubr.f32.gmra.mrb[238].mxu1 %v3952_v50  ;;  %4412 = vmatprep.mubr.f32.mxu0 %v3960_v6  ;;  %v8376_v31 = vld [vmem:[#allocation2 + $0x570] sm:$0xff]  ;;  %v3974_v6 = vsel %vm1241_vm0, %v3965_v13, %v3973_v20  ;;  %v3976_v15 = vrot.slane %v8374_v40, 1  ;;  %v3972_v13 = vsel %vm1241_vm0, %v3962_v17, %v3971_v53  ;;  %v8391_v40 = vld [vmem:[#allocation2 + $0x5c8] sm:$0xff]  ;;  %v8393_v17 = vld [vmem:[#allocation2 + $0x5d8] sm:$0xff] }
 0x237   : > { %4637 = vmatprep.mubr.f32.mxu1 %v3966_v11  ;;  %v3980_v20 = vsel %vm1241_vm0, %v3978_v45, %v3979_v35  ;;  %v3993_v21 = vrot.slane %v3498_v25, 1  ;;  %v3986_v41 = vsel %vm1241_vm0, %v3984_v2, %v3985_v4  ;;  %v3499_v2 = vld [vmem:[#allocation2 + $0x5a0] sm:$0xfe] }
 0x238   : > { %v8379_v50 = vadd.f32 %v3151_v59, %v8012_v44  ;;  %v2930_v32 = vpop.f32.mrb[134].mxu0  ;;  %v3981_v44 = vrot.slane %v3489_v63, 1  ;;  %v3982_v59 = vrot.slane %v8376_v31, 1  ;;  %v8397_v25 = vld [vmem:[#allocation2 + $0x5c0] sm:$0xff] }
 0x239   : > { %v3155_v11 = vpop.f32.mrb[134].mxu1  ;;  %v2932_v0 = vpop.f32.mrb[135].mxu0  ;;  %4413 = vmatmul.mubr.f32.gmra.mrb[240].mxu0 %v3957_v56  ;;  %v3495_v56 = vld [vmem:[#allocation2 + $0x580] sm:$0x1] }
 0x23a   : > { %v3156_v39 = vadd.f32 %v3155_v11, %v2930_v32  ;;  %v3157_v10 = vpop.f32.mrb[135].mxu1  ;;  %4638 = vmatmul.mubr.f32.gmra.mrb[240].mxu1 %v3963_v23  ;;  %4417 = vmatprep.mubr.f32.mxu0 %v3970_v3  ;;  %v3497_v23 = vld [vmem:[#allocation2 + $0x590] sm:$0x1]  ;;  %v3500_v3 = vld [vmem:[#allocation2 + $0x5a8] sm:$0xfe]  ;;  %v3987_v19 = vrot.slane %v3495_v56, 1  ;;  %v3990_v11 = vsel %vm1241_vm0, %v3979_v35, %v3989_v22 }
 0x23b   : > { %4642 = vmatprep.mubr.f32.mxu1 %v3974_v6  ;;  %v3502_v32 = vld [vmem:[#allocation2 + $0x5b8] sm:$0xfe]  ;;  %v3983_v6 = vsel %vm1241_vm0, %v3981_v44, %v3982_v59  ;;  %v3991_v0 = vrot.slane %v3497_v23, 1  ;;  %v3501_v10 = vld [vmem:[#allocation2 + $0x5b0] sm:$0xfe]  ;;  %v3994_v44 = vsel %vm1241_vm0, %v3985_v4, %v3993_v21  ;;  %v4005_v56 = vrot.slane %v8393_v17, 1 }
 0x23c   : > { %v8388_v43 = vadd.f32 %v3156_v39, %v8015_v36  ;;  %v2935_v34 = vpop.f32.mrb[136].mxu0  ;;  %v3977_v36 = vsel %vm1241_vm0, %v3975_v26, %v3976_v15  ;;  %v3999_v39 = vrot.slane %v8391_v40, 1  ;;  %v3995_v35 = vrot.slane %v3499_v2, 1  ;;  %v3510_v23 = vld [vmem:[#allocation2 + $0x5f8] sm:$0x1] }
 0x23d   : > { %v3160_v63 = vpop.f32.mrb[136].mxu1  ;;  %v2937_v31 = vpop.f32.mrb[137].mxu0  ;;  %4418 = vmatmul.mubr.f32.gmra.mrb[242].mxu0 %v3968_v60  ;;  %v3998_v60 = vrot.slane %v3500_v3, 1  ;;  %v3996_v22 = vrot.slane %v8397_v25, 1  ;;  %v3507_v21 = vld [vmem:[#allocation2 + $0x5e0] sm:$0x1] }
 0x23e   : > { %v3161_v53 = vadd.f32 %v3160_v63, %v2935_v34  ;;  %v3162_v45 = vpop.f32.mrb[137].mxu1  ;;  %4643 = vmatmul.mubr.f32.gmra.mrb[242].mxu1 %v3972_v13  ;;  %4422 = vmatprep.mubr.f32.mxu0 %v3980_v20  ;;  %v8401_v34 = vld [vmem:[#allocation2 + $0x5d0] sm:$0xff]  ;;  %v4004_v20 = vrot.slane %v3502_v32, 1  ;;  %v3508_v63 = vld [vmem:[#allocation2 + $0x5e8] sm:$0x1]  ;;  %v3992_v32 = vsel %vm1241_vm0, %v3982_v59, %v3991_v0  ;;  %v4007_v0 = vrot.slane %v3507_v21, 1 }
 0x23f   : > { %4647 = vmatprep.mubr.f32.mxu1 %v3986_v41  ;;  %v4002_v4 = vrot.slane %v8401_v34, 1  ;;  %v4000_v17 = vsel %vm1241_vm0, %v3998_v60, %v3999_v39  ;;  %v4009_v45 = vrot.slane %v3508_v63, 1  ;;  %v3512_v2 = vld [vmem:[#allocation2 + $0x608] sm:$0xfe]  ;;  %v3997_v59 = vsel %vm1241_vm0, %v3995_v35, %v3996_v22 }
 0x240   : > { %v8404_v13 = vadd.f32 %v3161_v53, %v8018_v61  ;;  %v2940_v26 = vpop.f32.mrb[138].mxu0  ;;  %v3988_v61 = vsel %vm1241_vm0, %v3976_v15, %v3987_v19  ;;  %v4001_v53 = vrot.slane %v3501_v10, 1  ;;  %v8417_v15 = vld [vmem:[#allocation2 + $0x628] sm:$0xff]  ;;  %v3514_v19 = vld [vmem:[#allocation2 + $0x618] sm:$0xfe] }
 0x241   : > { %v3165_v41 = vpop.f32.mrb[138].mxu1  ;;  %v2942_v31 = vpop.f32.mrb[139].mxu0  ;;  %4423 = vmatmul.mubr.f32.gmra.mrb[244].mxu0 %v3977_v36  ;;  %v3509_v36 = vld [vmem:[#allocation2 + $0x5f0] sm:$0x1]  ;;  %v8419_v10 = vld [vmem:[#allocation2 + $0x638] sm:$0xff] }
 0x242   : > { %v3166_v3 = vadd.f32 %v3165_v41, %v2940_v26  ;;  %v3167_v40 = vpop.f32.mrb[139].mxu1  ;;  %4648 = vmatmul.mubr.f32.gmra.mrb[244].mxu1 %v3983_v6  ;;  %4427 = vmatprep.mubr.f32.mxu0 %v3990_v11  ;;  %v4006_v6 = vsel %vm1241_vm0, %v4004_v20, %v4005_v56  ;;  %v4013_v11 = vrot.slane %v3510_v23, 1  ;;  %v4011_v41 = vrot.slane %v3509_v36, 1  ;;  %v3520_v36 = vld [vmem:[#allocation2 + $0x648] sm:$0x1] }
 0x243   : > { %4652 = vmatprep.mubr.f32.mxu1 %v3994_v44  ;;  %v4018_v20 = vrot.slane %v3512_v2, 1  ;;  %v4010_v31 = vsel %vm1241_vm0, %v3999_v39, %v4009_v45  ;;  %v4019_v23 = vrot.slane %v8417_v15, 1  ;;  %v4025_v40 = vrot.slane %v8419_v10, 1  ;;  %v3522_v45 = vld [vmem:[#allocation2 + $0x658] sm:$0x1] }
 0x244   : > { %v8414_v25 = vadd.f32 %v3166_v3, %v8021_v38  ;;  %v2945_v26 = vpop.f32.mrb[140].mxu0  ;;  %v4003_v38 = vsel %vm1241_vm0, %v4001_v53, %v4002_v4  ;;  %v4024_v3 = vrot.slane %v3514_v19, 1  ;;  %v3517_v53 = vld [vmem:[#allocation2 + $0x630] sm:$0xff]  ;;  %v4008_v39 = vsel %vm1241_vm0, %v3996_v22, %v4007_v0 }
 0x245   : > { %v3170_v34 = vpop.f32.mrb[140].mxu1  ;;  %v2947_v44 = vpop.f32.mrb[141].mxu0  ;;  %4428 = vmatmul.mubr.f32.gmra.mrb[246].mxu0 %v3988_v61  ;;  %v3511_v61 = vld [vmem:[#allocation2 + $0x600] sm:$0xfe]  ;;  %v4012_v19 = vsel %vm1241_vm0, %v4002_v4, %v4011_v41 }
 0x246   : > { %v3171_v60 = vadd.f32 %v3170_v34, %v2945_v26  ;;  %v3172_v63 = vpop.f32.mrb[141].mxu1  ;;  %4653 = vmatmul.mubr.f32.gmra.mrb[246].mxu1 %v3992_v32  ;;  %4432 = vmatprep.mubr.f32.mxu0 %v4000_v17  ;;  %v3515_v44 = vld [vmem:[#allocation2 + $0x620] sm:$0xff]  ;;  %v4014_v32 = vsel %vm1241_vm0, %v4005_v56, %v4013_v11  ;;  %v3513_v17 = vld [vmem:[#allocation2 + $0x610] sm:$0xfe]  ;;  %v4020_v56 = vsel %vm1241_vm0, %v4018_v20, %v4019_v23  ;;  %v4022_v34 = vrot.slane %v3517_v53, 1 }
 0x247   : > { %4657 = vmatprep.mubr.f32.mxu1 %v4006_v6  ;;  %v4016_v10 = vrot.slane %v3515_v44, 1  ;;  %v4021_v11 = vrot.slane %v3513_v17, 1  ;;  %v3519_v63 = vld [vmem:[#allocation2 + $0x640] sm:$0x1]  ;;  %v4026_v0 = vsel %vm1241_vm0, %v4024_v3, %v4025_v40 }
 0x248   : > { %v8427_v35 = vadd.f32 %v3171_v60, %v8024_v52  ;;  %v2950_v21 = vpop.f32.mrb[142].mxu0  ;;  %v4015_v52 = vrot.slane %v3511_v61, 1  ;;  %v4029_v60 = vrot.slane %v3520_v36, 1  ;;  %v4027_v61 = vrot.slane %v3519_v63, 1 }
 0x249   : > { %v3175_v2 = vpop.f32.mrb[142].mxu1  ;;  %v2952_v26 = vpop.f32.mrb[143].mxu0  ;;  %4433 = vmatmul.mubr.f32.gmra.mrb[248].mxu0 %v3997_v59  ;;  %v4023_v44 = vsel %vm1241_vm0, %v4021_v11, %v4022_v34 }
 0x24a   : > { %v3176_v6 = vadd.f32 %v3175_v2, %v2950_v21  ;;  %v3177_v15 = vpop.f32.mrb[143].mxu1  ;;  %4658 = vmatmul.mubr.f32.gmra.mrb[248].mxu1 %v4003_v38  ;;  %4437 = vmatprep.mubr.f32.mxu0 %v4010_v31  ;;  %v4033_v21 = vrot.slane %v3522_v45, 1  ;;  %v3521_v38 = vld [vmem:[#allocation2 + $0x650] sm:$0x1]  ;;  %v4017_v20 = vsel %vm1241_vm0, %v4015_v52, %v4016_v10 }
 0x24b   : > { %4662 = vmatprep.mubr.f32.mxu1 %v4014_v32  ;;  %v4031_v32 = vrot.slane %v3521_v38, 1 }
 0x24c   : > { %v8434_v59 = vadd.f32 %v3176_v6, %v8027_v16  ;;  %v2955_v22 = vpop.f32.mrb[144].mxu0  ;;  %v4030_v16 = vsel %vm1241_vm0, %v4019_v23, %v4029_v60  ;;  %v4034_v53 = vsel %vm1241_vm0, %v4025_v40, %v4033_v21  ;;  %v4028_v6 = vsel %vm1241_vm0, %v4016_v10, %v4027_v61 }
 0x24d   : > { %v3180_v31 = vpop.f32.mrb[144].mxu1  ;;  %v2957_v2 = vpop.f32.mrb[145].mxu0  ;;  %4438 = vmatmul.mubr.f32.gmra.mrb[250].mxu0 %v4008_v39  ;;  %v4032_v15 = vsel %vm1241_vm0, %v4022_v34, %v4031_v32 }
 0x24e   : > { %v3181_v4 = vadd.f32 %v3180_v31, %v2955_v22  ;;  %v3182_v41 = vpop.f32.mrb[145].mxu1  ;;  %4663 = vmatmul.mubr.f32.gmra.mrb[250].mxu1 %v4012_v19  ;;  %4442 = vmatprep.mubr.f32.mxu0 %v4020_v56 }
 0x24f   : > { %4667 = vmatprep.mubr.f32.mxu1 %v4026_v0 }
 0x250   : > { %v8441_v3 = vadd.f32 %v3181_v4, %v8037_v27  ;;  %v2960_v17 = vpop.f32.mrb[146].mxu0 }
 0x251   : > { %v3185_v36 = vpop.f32.mrb[146].mxu1  ;;  %v2962_v26 = vpop.f32.mrb[147].mxu0  ;;  %4443 = vmatmul.mubr.f32.gmra.mrb[252].mxu0 %v4017_v20 }
 0x252   : > { %v3186_v39 = vadd.f32 %v3185_v36, %v2960_v17  ;;  %v3187_v45 = vpop.f32.mrb[147].mxu1  ;;  %4668 = vmatmul.mubr.f32.gmra.mrb[252].mxu1 %v4023_v44  ;;  %4447 = vmatprep.mubr.f32.mxu0 %v4030_v16 }
 0x253   : > { %4672 = vmatprep.mubr.f32.mxu1 %v4034_v53 }
 0x254   : > { %v8447_v23 = vadd.f32 %v3186_v39, %v8049_v57  ;;  %v2965_v27 = vpop.f32.mrb[148].mxu0 }
 0x255   : > { %v3190_v19 = vpop.f32.mrb[148].mxu1  ;;  %v2967_v52 = vpop.f32.mrb[149].mxu0  ;;  %4448 = vmatmul.mubr.f32.gmra.mrb[254].mxu0 %v4028_v6 }
 0x256   : > { %v3191_v40 = vadd.f32 %v3190_v19, %v2965_v27  ;;  %v3192_v56 = vpop.f32.mrb[149].mxu1  ;;  %4673 = vmatmul.mubr.f32.gmra.mrb[254].mxu1 %v4032_v15 }
 0x258   : > { %v8450_v11 = vadd.f32 %v3191_v40, %v8060_v37  ;;  %v2970_v60 = vpop.f32.mrb[150].mxu0 }
 0x259   : > { %v3195_v63 = vpop.f32.mrb[150].mxu1  ;;  %v2972_v22 = vpop.f32.mrb[151].mxu0 }
 0x25a   : > { %v3196_v10 = vadd.f32 %v3195_v63, %v2970_v60  ;;  %v3197_v0 = vpop.f32.mrb[151].mxu1 }
 0x25c   : > { %v8453_v34 = vadd.f32 %v3196_v10, %v8075_v42  ;;  %v2975_v57 = vpop.f32.mrb[152].mxu0 }
 0x25d   : > { %v3200_v21 = vpop.f32.mrb[152].mxu1  ;;  %v2977_v38 = vpop.f32.mrb[153].mxu0 }
 0x25e   : > { %v3201_v31 = vadd.f32 %v3200_v21, %v2975_v57  ;;  %v3202_v2 = vpop.f32.mrb[153].mxu1 }
 0x260   : > { %v8456_v4 = vadd.f32 %v3201_v31, %v8087_v51  ;;  %v2980_v41 = vpop.f32.mrb[154].mxu0 }
 0x261   : > { %v3205_v20 = vpop.f32.mrb[154].mxu1  ;;  %v2982_v37 = vpop.f32.mrb[155].mxu0 }
 0x262   : > { %v3206_v61 = vadd.f32 %v3205_v20, %v2980_v41  ;;  %v3207_v44 = vpop.f32.mrb[155].mxu1 }
 0x264   : > { %v8459_v16 = vadd.f32 %v3206_v61, %v8100_v49  ;;  %v2985_v32 = vpop.f32.mrb[156].mxu0 }
 0x265   : > { %v3210_v17 = vpop.f32.mrb[156].mxu1  ;;  %v2987_v42 = vpop.f32.mrb[157].mxu0 }
 0x266   : > { %v3211_v53 = vadd.f32 %v3210_v17, %v2985_v32  ;;  %v3212_v36 = vpop.f32.mrb[157].mxu1 }
 0x268   : > { %v8462_v26 = vadd.f32 %v3211_v53, %v8113_v5  ;;  %v2990_v39 = vpop.f32.mrb[158].mxu0 }
 0x269   : > { %v3215_v45 = vpop.f32.mrb[158].mxu1  ;;  %v2992_v51 = vpop.f32.mrb[159].mxu0 }
 0x26a   : > { %v3216_v6 = vadd.f32 %v3215_v45, %v2990_v39  ;;  %v3217_v15 = vpop.f32.mrb[159].mxu1 }
 0x26c   : > { %v8465_v27 = vadd.f32 %v3216_v6, %v8126_v29  ;;  %v2995_v19 = vpop.f32.mrb[160].mxu0 }
 0x26d   : > { %v3220_v52 = vpop.f32.mrb[160].mxu1  ;;  %v2997_v49 = vpop.f32.mrb[161].mxu0 }
 0x26e   : > { %v3221_v40 = vadd.f32 %v3220_v52, %v2995_v19  ;;  %v3222_v56 = vpop.f32.mrb[161].mxu1 }
 0x270   : > { %v8468_v60 = vadd.f32 %v3221_v40, %v8138_v46  ;;  %v3000_v63 = vpop.f32.mrb[162].mxu0 }
 0x271   : > { %v3225_v22 = vpop.f32.mrb[162].mxu1  ;;  %v3002_v5 = vpop.f32.mrb[163].mxu0 }
 0x272   : > { %v3226_v10 = vadd.f32 %v3225_v22, %v3000_v63  ;;  %v3227_v0 = vpop.f32.mrb[163].mxu1 }
 0x274   : > { %v8471_v57 = vadd.f32 %v3226_v10, %v8153_v62  ;;  %v3005_v21 = vpop.f32.mrb[164].mxu0 }
 0x275   : > { %v3230_v38 = vpop.f32.mrb[164].mxu1  ;;  %v3007_v29 = vpop.f32.mrb[165].mxu0 }
 0x276   : > { %v3231_v31 = vadd.f32 %v3230_v38, %v3005_v21  ;;  %v3232_v2 = vpop.f32.mrb[165].mxu1 }
 0x278   : > { %v8474_v41 = vadd.f32 %v3231_v31, %v8165_v47  ;;  %v3010_v20 = vpop.f32.mrb[166].mxu0 }
 0x279   : > { %v3235_v37 = vpop.f32.mrb[166].mxu1  ;;  %v3012_v46 = vpop.f32.mrb[167].mxu0 }
 0x27a   : > { %v3236_v61 = vadd.f32 %v3235_v37, %v3010_v20  ;;  %v3237_v44 = vpop.f32.mrb[167].mxu1 }
 0x27c   : > { %v8477_v32 = vadd.f32 %v3236_v61, %v8178_v14  ;;  %v3015_v17 = vpop.f32.mrb[168].mxu0 }
 0x27d   : > { %v3240_v42 = vpop.f32.mrb[168].mxu1  ;;  %v3017_v62 = vpop.f32.mrb[169].mxu0 }
 0x27e   : > { %v3241_v53 = vadd.f32 %v3240_v42, %v3015_v17  ;;  %v3242_v36 = vpop.f32.mrb[169].mxu1 }
 0x280   : > { %v8480_v39 = vadd.f32 %v3241_v53, %v8191_v54  ;;  %v3020_v45 = vpop.f32.mrb[170].mxu0 }
 0x281   : > { %v3245_v51 = vpop.f32.mrb[170].mxu1  ;;  %v3022_v47 = vpop.f32.mrb[171].mxu0 }
 0x282   : > { %v3246_v6 = vadd.f32 %v3245_v51, %v3020_v45  ;;  %v3247_v15 = vpop.f32.mrb[171].mxu1 }
 0x284   : > { %v8483_v19 = vadd.f32 %v3246_v6, %v8204_v12  ;;  %v3025_v52 = vpop.f32.mrb[172].mxu0 }
 0x285   : > { %v3250_v49 = vpop.f32.mrb[172].mxu1  ;;  %v3027_v14 = vpop.f32.mrb[173].mxu0 }
 0x286   : > { %v3251_v40 = vadd.f32 %v3250_v49, %v3025_v52  ;;  %v3252_v56 = vpop.f32.mrb[173].mxu1 }
 0x288   : > { %v8486_v63 = vadd.f32 %v3251_v40, %v8216_v58  ;;  %v3030_v22 = vpop.f32.mrb[174].mxu0 }
 0x289   : > { %v3255_v5 = vpop.f32.mrb[174].mxu1  ;;  %v3032_v54 = vpop.f32.mrb[175].mxu0 }
 0x28a   : > { %v3256_v10 = vadd.f32 %v3255_v5, %v3030_v22  ;;  %v3257_v0 = vpop.f32.mrb[175].mxu1 }
 0x28c   : > { %v8489_v21 = vadd.f32 %v3256_v10, %v8231_v30  ;;  %v3035_v38 = vpop.f32.mrb[176].mxu0 }
 0x28d   : > { %v3260_v29 = vpop.f32.mrb[176].mxu1  ;;  %v3037_v12 = vpop.f32.mrb[177].mxu0 }
 0x28e   : > { %v3261_v31 = vadd.f32 %v3260_v29, %v3035_v38  ;;  %v3262_v2 = vpop.f32.mrb[177].mxu1 }
 0x290   : > { %v8492_v20 = vadd.f32 %v3261_v31, %v8243_v18  ;;  %v3040_v37 = vpop.f32.mrb[178].mxu0 }
 0x291   : > { %v3265_v46 = vpop.f32.mrb[178].mxu1  ;;  %v3042_v58 = vpop.f32.mrb[179].mxu0 }
 0x292   : > { %v3266_v61 = vadd.f32 %v3265_v46, %v3040_v37  ;;  %v3267_v44 = vpop.f32.mrb[179].mxu1 }
 0x294   : > { %v8495_v17 = vadd.f32 %v3266_v61, %v8256_v55  ;;  %v3045_v42 = vpop.f32.mrb[180].mxu0 }
 0x295   : > { %v3270_v62 = vpop.f32.mrb[180].mxu1  ;;  %v3047_v30 = vpop.f32.mrb[181].mxu0 }
 0x296   : > { %v3271_v53 = vadd.f32 %v3270_v62, %v3045_v42  ;;  %v3272_v36 = vpop.f32.mrb[181].mxu1 }
 0x298   : > { %v8498_v45 = vadd.f32 %v3271_v53, %v8269_v48  ;;  %v3050_v51 = vpop.f32.mrb[182].mxu0 }
 0x299   : > { %v3275_v47 = vpop.f32.mrb[182].mxu1  ;;  %v3052_v18 = vpop.f32.mrb[183].mxu0 }
 0x29a   : > { %v3276_v6 = vadd.f32 %v3275_v47, %v3050_v51  ;;  %v3277_v15 = vpop.f32.mrb[183].mxu1  ;;  %v8518_v51 = vld [vmem:[%s8634_s3] ss:$0 sm:$0xff] }
 0x29c   : > { %v8501_v52 = vadd.f32 %v3276_v6, %v8282_v33  ;;  %v3055_v49 = vpop.f32.mrb[184].mxu0 }
 0x29d   : > { %v3280_v14 = vpop.f32.mrb[184].mxu1  ;;  %v3057_v55 = vpop.f32.mrb[185].mxu0 }
 0x29e   : > { %v3281_v40 = vadd.f32 %v3280_v14, %v3055_v49  ;;  %v3282_v56 = vpop.f32.mrb[185].mxu1 }
 0x2a0   : > { %v8504_v22 = vadd.f32 %v3281_v40, %v8294_v1  ;;  %v3060_v5 = vpop.f32.mrb[186].mxu0 }
 0x2a1   : > { %v3285_v54 = vpop.f32.mrb[186].mxu1  ;;  %v3062_v48 = vpop.f32.mrb[187].mxu0 }
 0x2a2   : > { %v3286_v10 = vadd.f32 %v3285_v54, %v3060_v5  ;;  %v3287_v0 = vpop.f32.mrb[187].mxu1 }
 0x2a4   : > { %v8507_v38 = vadd.f32 %v3286_v10, %v8309_v24  ;;  %v3065_v29 = vpop.f32.mrb[188].mxu0 }
 0x2a5   : > { %v3290_v12 = vpop.f32.mrb[188].mxu1  ;;  %v3067_v33 = vpop.f32.mrb[189].mxu0 }
 0x2a6   : > { %v3291_v31 = vadd.f32 %v3290_v12, %v3065_v29  ;;  %v3292_v2 = vpop.f32.mrb[189].mxu1 }
 0x2a8   : > { %v8510_v37 = vadd.f32 %v3291_v31, %v8319_v9  ;;  %v3070_v46 = vpop.f32.mrb[190].mxu0 }
 0x2a9   : > { %v3295_v1 = vpop.f32.mrb[190].mxu1  ;;  %v3072_v58 = vpop.f32.mrb[191].mxu0 }
 0x2aa   : > { %v3296_v61 = vadd.f32 %v3295_v1, %v3070_v46  ;;  %v3297_v44 = vpop.f32.mrb[191].mxu1 }
 0x2ac   : > { %v8513_v42 = vadd.f32 %v3296_v61, %v8334_v8  ;;  %v4294_v62 = vpop.f32.mrb[192].mxu0 }
 0x2ad   : > { %v4519_v24 = vpop.f32.mrb[192].mxu1  ;;  %v4296_v30 = vpop.f32.mrb[193].mxu0 }
 0x2ae   : > { %v4520_v53 = vadd.f32 %v4519_v24, %v4294_v62  ;;  %v4521_v36 = vpop.f32.mrb[193].mxu1 }
 0x2b0   : > { %v4678_v9 = vadd.f32 %v4520_v53, %v8350_v28  ;;  %v4299_v47 = vpop.f32.mrb[194].mxu0 }
 0x2b1   : > { %v4524_v18 = vpop.f32.mrb[194].mxu1  ;;  %v4301_v6 = vpop.f32.mrb[195].mxu0 }
 0x2b2   : > { %v4717_v15 = vadd.f32 %v8518_v51, %v4678_v9  ;;  %v4525_v8 = vadd.f32 %v4524_v18, %v4299_v47  ;;  %v4526_v49 = vpop.f32.mrb[195].mxu1 }
 0x2b4   : > { %vm4749_vm1 = vcmp.ge.f32.partialorder %v4717_v15, 0.0  ;;  %v4781_v14 = vmul.f32 0.2, %v4717_v15  ;;  %v4679_v55 = vadd.f32 %v4525_v8, %v8362_v7  ;;  %v4304_v40 = vpop.f32.mrb[196].mxu0 }
 0x2b5   : > { %v4529_v28 = vpop.f32.mrb[196].mxu1  ;;  %v4306_v56 = vpop.f32.mrb[197].mxu0 }
 0x2b6   : > { %v4813_v5 = vsel %vm4749_vm1, %v4717_v15, %v4781_v14  ;;  %v4718_v54 = vadd.f32 %v8518_v51, %v4679_v55  ;;  %v4530_v48 = vadd.f32 %v4529_v28, %v4304_v40  ;;  %v4531_v10 = vpop.f32.mrb[197].mxu1 }
 0x2b7   : > { %4845 = vst [vmem:[%s8526_s24] sm:$0xff] %v4813_v5 }
 0x2b8   : > { %vm4750_vm2 = vcmp.ge.f32.partialorder %v4718_v54, 0.0  ;;  %v4782_v0 = vmul.f32 0.2, %v4718_v54  ;;  %v4680_v29 = vadd.f32 %v4530_v48, %v8379_v50  ;;  %v4309_v12 = vpop.f32.mrb[198].mxu0 }
 0x2b9   : > { %v4534_v33 = vpop.f32.mrb[198].mxu1  ;;  %v4311_v31 = vpop.f32.mrb[199].mxu0 }
 0x2ba   : > { %v4814_v2 = vsel %vm4750_vm2, %v4718_v54, %v4782_v0  ;;  %v4719_v7 = vadd.f32 %v8518_v51, %v4680_v29  ;;  %v4535_v46 = vadd.f32 %v4534_v33, %v4309_v12  ;;  %v4536_v1 = vpop.f32.mrb[199].mxu1 }
 0x2bb   : > { %4846 = vst [vmem:[%s8526_s24 + $0x8] sm:$0xff] %v4814_v2 }
 0x2bc   : > { %vm4751_vm3 = vcmp.ge.f32.partialorder %v4719_v7, 0.0  ;;  %v4783_v58 = vmul.f32 0.2, %v4719_v7  ;;  %v4681_v61 = vadd.f32 %v4535_v46, %v8388_v43  ;;  %v4314_v44 = vpop.f32.mrb[200].mxu0 }
 0x2bd   : > { %v4539_v62 = vpop.f32.mrb[200].mxu1  ;;  %v4316_v24 = vpop.f32.mrb[201].mxu0 }
 0x2be   : > { %v4815_v30 = vsel %vm4751_vm3, %v4719_v7, %v4783_v58  ;;  %v4720_v50 = vadd.f32 %v8518_v51, %v4681_v61  ;;  %v4540_v53 = vadd.f32 %v4539_v62, %v4314_v44  ;;  %v4541_v36 = vpop.f32.mrb[201].mxu1 }
 0x2bf   : > { %4847 = vst [vmem:[%s8526_s24 + $0x10] sm:$0xff] %v4815_v30 }
 0x2c0   : > { %vm4752_vm4 = vcmp.ge.f32.partialorder %v4720_v50, 0.0  ;;  %v4784_v9 = vmul.f32 0.2, %v4720_v50  ;;  %v4682_v47 = vadd.f32 %v4540_v53, %v8404_v13  ;;  %v4319_v18 = vpop.f32.mrb[202].mxu0 }
 0x2c1   : > { %v4544_v6 = vpop.f32.mrb[202].mxu1  ;;  %v4321_v15 = vpop.f32.mrb[203].mxu0 }
 0x2c2   : > { %v4816_v8 = vsel %vm4752_vm4, %v4720_v50, %v4784_v9  ;;  %v4721_v43 = vadd.f32 %v8518_v51, %v4682_v47  ;;  %v4545_v49 = vadd.f32 %v4544_v6, %v4319_v18  ;;  %v4546_v14 = vpop.f32.mrb[203].mxu1 }
 0x2c3   : > { %4848 = vst [vmem:[%s8526_s24 + $0x18] sm:$0xff] %v4816_v8 }
 0x2c4   : > { %vm4753_vm5 = vcmp.ge.f32.partialorder %v4721_v43, 0.0  ;;  %v4785_v55 = vmul.f32 0.2, %v4721_v43  ;;  %v4683_v40 = vadd.f32 %v4545_v49, %v8414_v25  ;;  %v4324_v28 = vpop.f32.mrb[204].mxu0 }
 0x2c5   : > { %v4549_v56 = vpop.f32.mrb[204].mxu1  ;;  %v4326_v5 = vpop.f32.mrb[205].mxu0 }
 0x2c6   : > { %v4817_v54 = vsel %vm4753_vm5, %v4721_v43, %v4785_v55  ;;  %v4722_v13 = vadd.f32 %v8518_v51, %v4683_v40  ;;  %v4550_v48 = vadd.f32 %v4549_v56, %v4324_v28  ;;  %v4551_v10 = vpop.f32.mrb[205].mxu1 }
 0x2c7   : > { %4849 = vst [vmem:[%s8526_s24 + $0x20] sm:$0xff] %v4817_v54 }
 0x2c8   : > { %vm4754_vm6 = vcmp.ge.f32.partialorder %v4722_v13, 0.0  ;;  %v4786_v0 = vmul.f32 0.2, %v4722_v13  ;;  %v4684_v29 = vadd.f32 %v4550_v48, %v8427_v35  ;;  %v4329_v12 = vpop.f32.mrb[206].mxu0 }
 0x2c9   : > { %v4554_v33 = vpop.f32.mrb[206].mxu1  ;;  %v4331_v31 = vpop.f32.mrb[207].mxu0 }
 0x2ca   : > { %v4818_v2 = vsel %vm4754_vm6, %v4722_v13, %v4786_v0  ;;  %v4723_v25 = vadd.f32 %v8518_v51, %v4684_v29  ;;  %v4555_v7 = vadd.f32 %v4554_v33, %v4329_v12  ;;  %v4556_v46 = vpop.f32.mrb[207].mxu1 }
 0x2cb   : > { %4850 = vst [vmem:[%s8526_s24 + $0x28] sm:$0xff] %v4818_v2 }
 0x2cc   : > { %vm4755_vm7 = vcmp.ge.f32.partialorder %v4723_v25, 0.0  ;;  %v4787_v1 = vmul.f32 0.2, %v4723_v25  ;;  %v4685_v58 = vadd.f32 %v4555_v7, %v8434_v59  ;;  %v4334_v61 = vpop.f32.mrb[208].mxu0 }
 0x2cd   : > { %v4559_v44 = vpop.f32.mrb[208].mxu1  ;;  %v4336_v62 = vpop.f32.mrb[209].mxu0 }
 0x2ce   : > { %v4819_v24 = vsel %vm4755_vm7, %v4723_v25, %v4787_v1  ;;  %v4724_v35 = vadd.f32 %v8518_v51, %v4685_v58  ;;  %v4560_v30 = vadd.f32 %v4559_v44, %v4334_v61  ;;  %v4561_v50 = vpop.f32.mrb[209].mxu1 }
 0x2cf   : > { %4851 = vst [vmem:[%s8526_s24 + $0x30] sm:$0xff] %v4819_v24 }
 0x2d0   : > { %vm4756_vm8 = vcmp.ge.f32.partialorder %v4724_v35, 0.0  ;;  %v4788_v53 = vmul.f32 0.2, %v4724_v35  ;;  %v4686_v36 = vadd.f32 %v4560_v30, %v8441_v3  ;;  %v4339_v9 = vpop.f32.mrb[210].mxu0 }
 0x2d1   : > { %v4564_v47 = vpop.f32.mrb[210].mxu1  ;;  %v4341_v18 = vpop.f32.mrb[211].mxu0 }
 0x2d2   : > { %v4820_v6 = vsel %vm4756_vm8, %v4724_v35, %v4788_v53  ;;  %v4725_v59 = vadd.f32 %v8518_v51, %v4686_v36  ;;  %v4565_v15 = vadd.f32 %v4564_v47, %v4339_v9  ;;  %v4566_v8 = vpop.f32.mrb[211].mxu1 }
 0x2d3   : > { %4852 = vst [vmem:[%s8526_s24 + $0x38] sm:$0xff] %v4820_v6 }
 0x2d4   : > { %vm4757_vm9 = vcmp.ge.f32.partialorder %v4725_v59, 0.0  ;;  %v4789_v43 = vmul.f32 0.2, %v4725_v59  ;;  %v4687_v49 = vadd.f32 %v4565_v15, %v8447_v23  ;;  %v4344_v14 = vpop.f32.mrb[212].mxu0 }
 0x2d5   : > { %v4569_v55 = vpop.f32.mrb[212].mxu1  ;;  %v4346_v40 = vpop.f32.mrb[213].mxu0 }
 0x2d6   : > { %v4821_v28 = vsel %vm4757_vm9, %v4725_v59, %v4789_v43  ;;  %v4726_v3 = vadd.f32 %v8518_v51, %v4687_v49  ;;  %v4570_v56 = vadd.f32 %v4569_v55, %v4344_v14  ;;  %v4571_v5 = vpop.f32.mrb[213].mxu1 }
 0x2d7   : > { %4853 = vst [vmem:[%s8526_s24 + $0x40] sm:$0xff] %v4821_v28 }
 0x2d8   : > { %vm4758_vm10 = vcmp.ge.f32.partialorder %v4726_v3, 0.0  ;;  %v4790_v54 = vmul.f32 0.2, %v4726_v3  ;;  %v4688_v13 = vadd.f32 %v4570_v56, %v8450_v11  ;;  %v4349_v48 = vpop.f32.mrb[214].mxu0 }
 0x2d9   : > { %v4574_v10 = vpop.f32.mrb[214].mxu1  ;;  %v4351_v0 = vpop.f32.mrb[215].mxu0 }
 0x2da   : > { %v4822_v29 = vsel %vm4758_vm10, %v4726_v3, %v4790_v54  ;;  %v4727_v23 = vadd.f32 %v8518_v51, %v4688_v13  ;;  %v4575_v12 = vadd.f32 %v4574_v10, %v4349_v48  ;;  %v4576_v33 = vpop.f32.mrb[215].mxu1 }
 0x2db   : > { %4854 = vst [vmem:[%s8526_s24 + $0x48] sm:$0xff] %v4822_v29 }
 0x2dc   : > { %vm4759_vm11 = vcmp.ge.f32.partialorder %v4727_v23, 0.0  ;;  %v4791_v31 = vmul.f32 0.2, %v4727_v23  ;;  %v4689_v2 = vadd.f32 %v4575_v12, %v8453_v34  ;;  %v4354_v25 = vpop.f32.mrb[216].mxu0 }
 0x2dd   : > { %v4579_v7 = vpop.f32.mrb[216].mxu1  ;;  %v4356_v46 = vpop.f32.mrb[217].mxu0 }
 0x2de   : > { %v4823_v1 = vsel %vm4759_vm11, %v4727_v23, %v4791_v31  ;;  %v4728_v11 = vadd.f32 %v8518_v51, %v4689_v2  ;;  %v4580_v58 = vadd.f32 %v4579_v7, %v4354_v25  ;;  %v4581_v61 = vpop.f32.mrb[217].mxu1 }
 0x2df   : > { %4855 = vst [vmem:[%s8526_s24 + $0x50] sm:$0xff] %v4823_v1 }
 0x2e0   : > { %vm4760_vm12 = vcmp.ge.f32.partialorder %v4728_v11, 0.0  ;;  %v4792_v44 = vmul.f32 0.2, %v4728_v11  ;;  %v4690_v62 = vadd.f32 %v4580_v58, %v8456_v4  ;;  %v4359_v24 = vpop.f32.mrb[218].mxu0 }
 0x2e1   : > { %v4584_v35 = vpop.f32.mrb[218].mxu1  ;;  %v4361_v30 = vpop.f32.mrb[219].mxu0 }
 0x2e2   : > { %v4824_v50 = vsel %vm4760_vm12, %v4728_v11, %v4792_v44  ;;  %v4729_v34 = vadd.f32 %v8518_v51, %v4690_v62  ;;  %v4585_v53 = vadd.f32 %v4584_v35, %v4359_v24  ;;  %v4586_v36 = vpop.f32.mrb[219].mxu1 }
 0x2e3   : > { %4856 = vst [vmem:[%s8526_s24 + $0x58] sm:$0xff] %v4824_v50 }
 0x2e4   : > { %vm4761_vm13 = vcmp.ge.f32.partialorder %v4729_v34, 0.0  ;;  %v4793_v9 = vmul.f32 0.2, %v4729_v34  ;;  %v4691_v47 = vadd.f32 %v4585_v53, %v8459_v16  ;;  %v4364_v18 = vpop.f32.mrb[220].mxu0 }
 0x2e5   : > { %v4589_v6 = vpop.f32.mrb[220].mxu1  ;;  %v4366_v59 = vpop.f32.mrb[221].mxu0 }
 0x2e6   : > { %v4825_v15 = vsel %vm4761_vm13, %v4729_v34, %v4793_v9  ;;  %v4730_v4 = vadd.f32 %v8518_v51, %v4691_v47  ;;  %v4590_v8 = vadd.f32 %v4589_v6, %v4364_v18  ;;  %v4591_v43 = vpop.f32.mrb[221].mxu1 }
 0x2e7   : > { %4857 = vst [vmem:[%s8526_s24 + $0x60] sm:$0xff] %v4825_v15 }
 0x2e8   : > { %vm4762_vm14 = vcmp.ge.f32.partialorder %v4730_v4, 0.0  ;;  %v4794_v49 = vmul.f32 0.2, %v4730_v4  ;;  %v4692_v14 = vadd.f32 %v4590_v8, %v8462_v26  ;;  %v4369_v55 = vpop.f32.mrb[222].mxu0 }
 0x2e9   : > { %v4594_v40 = vpop.f32.mrb[222].mxu1  ;;  %v4371_v28 = vpop.f32.mrb[223].mxu0 }
 0x2ea   : > { %v4826_v3 = vsel %vm4762_vm14, %v4730_v4, %v4794_v49  ;;  %v4731_v16 = vadd.f32 %v8518_v51, %v4692_v14  ;;  %v4595_v56 = vadd.f32 %v4594_v40, %v4369_v55  ;;  %v4596_v5 = vpop.f32.mrb[223].mxu1 }
 0x2eb   : > { %4858 = vst [vmem:[%s8526_s24 + $0x68] sm:$0xff] %v4826_v3 }
 0x2ec   : > { %vm4763_vm15 = vcmp.ge.f32.partialorder %v4731_v16, 0.0  ;;  %v4795_v54 = vmul.f32 0.2, %v4731_v16  ;;  %v4693_v13 = vadd.f32 %v4595_v56, %v8465_v27  ;;  %v4374_v48 = vpop.f32.mrb[224].mxu0 }
 0x2ed   : > { %v4599_v10 = vpop.f32.mrb[224].mxu1  ;;  %v4376_v0 = vpop.f32.mrb[225].mxu0 }
 0x2ee   : > { %v4827_v29 = vsel %vm4763_vm15, %v4731_v16, %v4795_v54  ;;  %v4732_v26 = vadd.f32 %v8518_v51, %v4693_v13  ;;  %v4600_v23 = vadd.f32 %v4599_v10, %v4374_v48  ;;  %v4601_v12 = vpop.f32.mrb[225].mxu1 }
 0x2ef   : > { %4859 = vst [vmem:[%s8526_s24 + $0x70] sm:$0xff] %v4827_v29 }
 0x2f0   : > { %vm4764_vm0 = vcmp.ge.f32.partialorder %v4732_v26, 0.0  ;;  %v4796_v33 = vmul.f32 0.2, %v4732_v26  ;;  %v4694_v31 = vadd.f32 %v4600_v23, %v8468_v60  ;;  %v4379_v2 = vpop.f32.mrb[226].mxu0 }
 0x2f1   : > { %v4604_v25 = vpop.f32.mrb[226].mxu1  ;;  %v4381_v7 = vpop.f32.mrb[227].mxu0 }
 0x2f2   : > { %v4828_v46 = vsel %vm4764_vm0, %v4732_v26, %v4796_v33  ;;  %v4733_v27 = vadd.f32 %v8518_v51, %v4694_v31  ;;  %v4605_v1 = vadd.f32 %v4604_v25, %v4379_v2  ;;  %v4606_v11 = vpop.f32.mrb[227].mxu1 }
 0x2f3   : > { %4860 = vst [vmem:[%s8526_s24 + $0x78] sm:$0xff] %v4828_v46 }
 0x2f4   : > { %vm4765_vm1 = vcmp.ge.f32.partialorder %v4733_v27, 0.0  ;;  %v4797_v58 = vmul.f32 0.2, %v4733_v27  ;;  %v4695_v61 = vadd.f32 %v4605_v1, %v8471_v57  ;;  %v4384_v44 = vpop.f32.mrb[228].mxu0 }
 0x2f5   : > { %v4609_v62 = vpop.f32.mrb[228].mxu1  ;;  %v4386_v24 = vpop.f32.mrb[229].mxu0 }
 0x2f6   : > { %v4829_v35 = vsel %vm4765_vm1, %v4733_v27, %v4797_v58  ;;  %v4734_v60 = vadd.f32 %v8518_v51, %v4695_v61  ;;  %v4610_v30 = vadd.f32 %v4609_v62, %v4384_v44  ;;  %v4611_v50 = vpop.f32.mrb[229].mxu1 }
 0x2f7   : > { %4861 = vst [vmem:[%s8526_s24 + $0x80] sm:$0xff] %v4829_v35 }
 0x2f8   : > { %vm4766_vm2 = vcmp.ge.f32.partialorder %v4734_v60, 0.0  ;;  %v4798_v34 = vmul.f32 0.2, %v4734_v60  ;;  %v4696_v53 = vadd.f32 %v4610_v30, %v8474_v41  ;;  %v4389_v36 = vpop.f32.mrb[230].mxu0 }
 0x2f9   : > { %v4614_v9 = vpop.f32.mrb[230].mxu1  ;;  %v4391_v47 = vpop.f32.mrb[231].mxu0 }
 0x2fa   : > { %v4830_v18 = vsel %vm4766_vm2, %v4734_v60, %v4798_v34  ;;  %v4735_v57 = vadd.f32 %v8518_v51, %v4696_v53  ;;  %v4615_v6 = vadd.f32 %v4614_v9, %v4389_v36  ;;  %v4616_v59 = vpop.f32.mrb[231].mxu1 }
 0x2fb   : > { %4862 = vst [vmem:[%s8526_s24 + $0x88] sm:$0xff] %v4830_v18 }
 0x2fc   : > { %vm4767_vm3 = vcmp.ge.f32.partialorder %v4735_v57, 0.0  ;;  %v4799_v15 = vmul.f32 0.2, %v4735_v57  ;;  %v4697_v4 = vadd.f32 %v4615_v6, %v8477_v32  ;;  %v4394_v8 = vpop.f32.mrb[232].mxu0 }
 0x2fd   : > { %v4619_v43 = vpop.f32.mrb[232].mxu1  ;;  %v4396_v49 = vpop.f32.mrb[233].mxu0 }
 0x2fe   : > { %v4831_v14 = vsel %vm4767_vm3, %v4735_v57, %v4799_v15  ;;  %v4736_v41 = vadd.f32 %v8518_v51, %v4697_v4  ;;  %v4620_v55 = vadd.f32 %v4619_v43, %v4394_v8  ;;  %v4621_v40 = vpop.f32.mrb[233].mxu1 }
 0x2ff   : > { %4863 = vst [vmem:[%s8526_s24 + $0x90] sm:$0xff] %v4831_v14 }
 0x300   : > { %vm4768_vm4 = vcmp.ge.f32.partialorder %v4736_v41, 0.0  ;;  %v4800_v28 = vmul.f32 0.2, %v4736_v41  ;;  %v4698_v3 = vadd.f32 %v4620_v55, %v8480_v39  ;;  %v4399_v16 = vpop.f32.mrb[234].mxu0 }
 0x301   : > { %v4624_v56 = vpop.f32.mrb[234].mxu1  ;;  %v4401_v5 = vpop.f32.mrb[235].mxu0 }
 0x302   : > { %v4832_v54 = vsel %vm4768_vm4, %v4736_v41, %v4800_v28  ;;  %v4737_v32 = vadd.f32 %v8518_v51, %v4698_v3  ;;  %v4625_v13 = vadd.f32 %v4624_v56, %v4399_v16  ;;  %v4626_v48 = vpop.f32.mrb[235].mxu1 }
 0x303   : > { %4864 = vst [vmem:[%s8526_s24 + $0x98] sm:$0xff] %v4832_v54 }
 0x304   : > { %vm4769_vm5 = vcmp.ge.f32.partialorder %v4737_v32, 0.0  ;;  %v4801_v10 = vmul.f32 0.2, %v4737_v32  ;;  %v4699_v0 = vadd.f32 %v4625_v13, %v8483_v19  ;;  %v4404_v29 = vpop.f32.mrb[236].mxu0 }
 0x305   : > { %v4629_v26 = vpop.f32.mrb[236].mxu1  ;;  %v4406_v23 = vpop.f32.mrb[237].mxu0 }
 0x306   : > { %v4833_v12 = vsel %vm4769_vm5, %v4737_v32, %v4801_v10  ;;  %v4738_v39 = vadd.f32 %v8518_v51, %v4699_v0  ;;  %v4630_v33 = vadd.f32 %v4629_v26, %v4404_v29  ;;  %v4631_v31 = vpop.f32.mrb[237].mxu1 }
 0x307   : > { %4865 = vst [vmem:[%s8526_s24 + $0xa0] sm:$0xff] %v4833_v12 }
 0x308   : > { %vm4770_vm6 = vcmp.ge.f32.partialorder %v4738_v39, 0.0  ;;  %v4802_v2 = vmul.f32 0.2, %v4738_v39  ;;  %v4700_v25 = vadd.f32 %v4630_v33, %v8486_v63  ;;  %v4409_v7 = vpop.f32.mrb[238].mxu0 }
 0x309   : > { %v4634_v46 = vpop.f32.mrb[238].mxu1  ;;  %v4411_v27 = vpop.f32.mrb[239].mxu0 }
 0x30a   : > { %v4834_v1 = vsel %vm4770_vm6, %v4738_v39, %v4802_v2  ;;  %v4739_v19 = vadd.f32 %v8518_v51, %v4700_v25  ;;  %v4635_v11 = vadd.f32 %v4634_v46, %v4409_v7  ;;  %v4636_v58 = vpop.f32.mrb[239].mxu1 }
 0x30b   : > { %4866 = vst [vmem:[%s8526_s24 + $0xa8] sm:$0xff] %v4834_v1 }
 0x30c   : > { %vm4771_vm7 = vcmp.ge.f32.partialorder %v4739_v19, 0.0  ;;  %v4803_v61 = vmul.f32 0.2, %v4739_v19  ;;  %v4701_v44 = vadd.f32 %v4635_v11, %v8489_v21  ;;  %v4414_v62 = vpop.f32.mrb[240].mxu0 }
 0x30d   : > { %v4639_v24 = vpop.f32.mrb[240].mxu1  ;;  %v4416_v35 = vpop.f32.mrb[241].mxu0 }
 0x30e   : > { %v4835_v60 = vsel %vm4771_vm7, %v4739_v19, %v4803_v61  ;;  %v4740_v63 = vadd.f32 %v8518_v51, %v4701_v44  ;;  %v4640_v30 = vadd.f32 %v4639_v24, %v4414_v62  ;;  %v4641_v50 = vpop.f32.mrb[241].mxu1 }
 0x30f   : > { %4867 = vst [vmem:[%s8526_s24 + $0xb0] sm:$0xff] %v4835_v60 }
 0x310   : > { %vm4772_vm8 = vcmp.ge.f32.partialorder %v4740_v63, 0.0  ;;  %v4804_v34 = vmul.f32 0.2, %v4740_v63  ;;  %v4702_v53 = vadd.f32 %v4640_v30, %v8492_v20  ;;  %v4419_v36 = vpop.f32.mrb[242].mxu0 }
 0x311   : > { %v4644_v9 = vpop.f32.mrb[242].mxu1  ;;  %v4421_v47 = vpop.f32.mrb[243].mxu0 }
 0x312   : > { %v4836_v18 = vsel %vm4772_vm8, %v4740_v63, %v4804_v34  ;;  %v4741_v21 = vadd.f32 %v8518_v51, %v4702_v53  ;;  %v4645_v57 = vadd.f32 %v4644_v9, %v4419_v36  ;;  %v4646_v6 = vpop.f32.mrb[243].mxu1 }
 0x313   : > { %4868 = vst [vmem:[%s8526_s24 + $0xb8] sm:$0xff] %v4836_v18 }
 0x314   : > { %vm4773_vm9 = vcmp.ge.f32.partialorder %v4741_v21, 0.0  ;;  %v4805_v59 = vmul.f32 0.2, %v4741_v21  ;;  %v4703_v15 = vadd.f32 %v4645_v57, %v8495_v17  ;;  %v4424_v4 = vpop.f32.mrb[244].mxu0 }
 0x315   : > { %v4649_v8 = vpop.f32.mrb[244].mxu1  ;;  %v4426_v43 = vpop.f32.mrb[245].mxu0 }
 0x316   : > { %v4837_v49 = vsel %vm4773_vm9, %v4741_v21, %v4805_v59  ;;  %v4742_v20 = vadd.f32 %v8518_v51, %v4703_v15  ;;  %v4650_v14 = vadd.f32 %v4649_v8, %v4424_v4  ;;  %v4651_v41 = vpop.f32.mrb[245].mxu1 }
 0x317   : > { %4869 = vst [vmem:[%s8526_s24 + $0xc0] sm:$0xff] %v4837_v49 }
 0x318   : > { %vm4774_vm10 = vcmp.ge.f32.partialorder %v4742_v20, 0.0  ;;  %v4806_v55 = vmul.f32 0.2, %v4742_v20  ;;  %v4704_v40 = vadd.f32 %v4650_v14, %v8498_v45  ;;  %v4429_v28 = vpop.f32.mrb[246].mxu0 }
 0x319   : > { %v4654_v3 = vpop.f32.mrb[246].mxu1  ;;  %v4431_v16 = vpop.f32.mrb[247].mxu0 }
 0x31a   : > { %v4838_v56 = vsel %vm4774_vm10, %v4742_v20, %v4806_v55  ;;  %v4743_v17 = vadd.f32 %v8518_v51, %v4704_v40  ;;  %v4655_v5 = vadd.f32 %v4654_v3, %v4429_v28  ;;  %v4656_v54 = vpop.f32.mrb[247].mxu1 }
 0x31b   : > { %4870 = vst [vmem:[%s8526_s24 + $0xc8] sm:$0xff] %v4838_v56 }
 0x31c   : > { %vm4775_vm11 = vcmp.ge.f32.partialorder %v4743_v17, 0.0  ;;  %v4807_v32 = vmul.f32 0.2, %v4743_v17  ;;  %v4705_v13 = vadd.f32 %v4655_v5, %v8501_v52  ;;  %v4434_v48 = vpop.f32.mrb[248].mxu0 }
 0x31d   : > { %v4659_v10 = vpop.f32.mrb[248].mxu1  ;;  %v4436_v0 = vpop.f32.mrb[249].mxu0 }
 0x31e   : > { %v4839_v29 = vsel %vm4775_vm11, %v4743_v17, %v4807_v32  ;;  %v4744_v45 = vadd.f32 %v8518_v51, %v4705_v13  ;;  %v4660_v26 = vadd.f32 %v4659_v10, %v4434_v48  ;;  %v4661_v23 = vpop.f32.mrb[249].mxu1 }
 0x31f   : > { %4871 = vst [vmem:[%s8526_s24 + $0xd0] sm:$0xff] %v4839_v29 }
 0x320   : > { %vm4776_vm12 = vcmp.ge.f32.partialorder %v4744_v45, 0.0  ;;  %v4808_v12 = vmul.f32 0.2, %v4744_v45  ;;  %v4706_v39 = vadd.f32 %v4660_v26, %v8504_v22  ;;  %v4439_v33 = vpop.f32.mrb[250].mxu0 }
 0x321   : > { %v4664_v31 = vpop.f32.mrb[250].mxu1  ;;  %v4441_v2 = vpop.f32.mrb[251].mxu0 }
 0x322   : > { %v4840_v25 = vsel %vm4776_vm12, %v4744_v45, %v4808_v12  ;;  %v4745_v52 = vadd.f32 %v8518_v51, %v4706_v39  ;;  %v4665_v7 = vadd.f32 %v4664_v31, %v4439_v33  ;;  %v4666_v46 = vpop.f32.mrb[251].mxu1 }
 0x323   : > { %4872 = vst [vmem:[%s8526_s24 + $0xd8] sm:$0xff] %v4840_v25 }
 0x324   : > { %vm4777_vm13 = vcmp.ge.f32.partialorder %v4745_v52, 0.0  ;;  %v4809_v27 = vmul.f32 0.2, %v4745_v52  ;;  %v4707_v1 = vadd.f32 %v4665_v7, %v8507_v38  ;;  %v4444_v19 = vpop.f32.mrb[252].mxu0 }
 0x325   : > { %v4669_v11 = vpop.f32.mrb[252].mxu1  ;;  %v4446_v58 = vpop.f32.mrb[253].mxu0 }
 0x326   : > { %v4841_v61 = vsel %vm4777_vm13, %v4745_v52, %v4809_v27  ;;  %v4746_v22 = vadd.f32 %v8518_v51, %v4707_v1  ;;  %v4670_v44 = vadd.f32 %v4669_v11, %v4444_v19  ;;  %v4671_v62 = vpop.f32.mrb[253].mxu1 }
 0x327   : > { %4873 = vst [vmem:[%s8526_s24 + $0xe0] sm:$0xff] %v4841_v61 }
 0x328   : > { %vm4778_vm14 = vcmp.ge.f32.partialorder %v4746_v22, 0.0  ;;  %v4810_v24 = vmul.f32 0.2, %v4746_v22  ;;  %v4708_v35 = vadd.f32 %v4670_v44, %v8510_v37  ;;  %v4449_v60 = vpop.f32.mrb[254].mxu0 }
 0x329   : > { %v4674_v63 = vpop.f32.mrb[254].mxu1  ;;  %v4451_v30 = vpop.f32.mrb[255].mxu0 }
 0x32a   : > { %v4842_v38 = vsel %vm4778_vm14, %v4746_v22, %v4810_v24  ;;  %v4747_v50 = vadd.f32 %v8518_v51, %v4708_v35  ;;  %v4675_v34 = vadd.f32 %v4674_v63, %v4449_v60  ;;  %v4676_v53 = vpop.f32.mrb[255].mxu1 }
 0x32b   : > { %4874 = vst [vmem:[%s8526_s24 + $0xe8] sm:$0xff] %v4842_v38 }
 0x32c   : > { %vm4779_vm15 = vcmp.ge.f32.partialorder %v4747_v50, 0.0  ;;  %v4811_v36 = vmul.f32 0.2, %v4747_v50  ;;  %v4709_v9 = vadd.f32 %v4675_v34, %v8513_v42 }
 0x32e   : > { %v4843_v47 = vsel %vm4779_vm15, %v4747_v50, %v4811_v36  ;;  %v4748_v18 = vadd.f32 %v8518_v51, %v4709_v9 }
 0x32f   : > { %4875 = vst [vmem:[%s8526_s24 + $0xf0] sm:$0xff] %v4843_v47 }
 0x330   : > { %vm4780_vm0 = vcmp.ge.f32.partialorder %v4748_v18, 0.0  ;;  %v4812_v37 = vmul.f32 0.2, %v4748_v18 }
 0x332   : > { %v4844_v21 = vsel %vm4780_vm0, %v4748_v18, %v4812_v37 }
 0x333   : > { %4876 = vst [vmem:[%s8526_s24 + $0xf8] sm:$0xff] %v4844_v21 }
 0x334 PF: > { %s14_s17 = sadd.s32 1, %s5716_s17   ;;  %s8639_s15 = smov %s5712_s16 }
 0x335   : > { %p11_p5 = scmp.ge.s32.totalorder %s14_s17, 4   ;;  %s8640_s16 = smov %s8642_s18 }
 0x337   :  { %13 = sbr.rel (!%p11_p5) target bundleno = 2 (0x2), region = 74 }

</bundles_post_ra>
